<compile_context>
chip_gen: v7x
topology: tpu7x:2x2x1
jax: 0.10.0
libtpu: 0.0.40
codegen_flags: <defaults>
</compile_context>

<pallas_src>
import jax
import jax.numpy as jnp
from jax import lax
from jax.experimental import pallas as pl
from jax.experimental.pallas import tpu as pltpu


N_TILE = 16      # batches per grid step (N=32 -> 2 batch tiles, one per v7x core)
LANE_CHUNK = 128  # spatial positions processed per inner step (lane-dense)
K_COMP = 20      # PCA components
K_PAD = 128      # lane-dense padding of the PCA projection output


def full_block(shape):
    """BlockSpec covering the whole array (grid=(1,))."""
    n = len(shape)
    return pl.BlockSpec(shape, lambda i, _n=n: (0,) * _n)


# ----------------------------------------------------------------------------
# Kernel 1 (fused): 1x1-conv backbone stand-in + ReLU + deep global max pool.
# TODO(synk): the full torchvision resnet18 backbone is an injected black-box
# dependency and is not reproducible in-script; replaced with a representative
# 1x1-conv + ReLU feature extractor.  For real resnet18 feature sizes
# (C~512, F~512, ragged 7x7 spatial) re-derive S_TILE/N_TILE against v7x's
# 64 MiB VMEM (32 MiB scoped default), set vmem_limit_bytes explicitly, and
# mask padded spatial positions to -inf before the max reduction.
# ----------------------------------------------------------------------------
def conv_relu_maxpool_kernel(x_ref, wt_ref, b_ref, o_ref):
    # x_ref : (N_TILE, C, S_TILE)  activations, spatial on the 128-lane axis
    # wt_ref: (F, C)               transposed 1x1-conv weights
    # b_ref : (1, F)               bias, lane-dense
    # o_ref : (1, N_TILE, F)       running spatial max (batch on sublanes,
    #                              features on lanes); bias + ReLU on last tile
    j = pl.program_id(1)
    n_tile, n_chan, s_tile = x_ref.shape

    @pl.when(j == 0)
    def _init():
        o_ref[...] = jnp.full(o_ref.shape, -jnp.inf, dtype=o_ref.dtype)

    # Hoist the per-channel weight-column slices (lane-splat broadcasts) out of
    # the batch/spatial loops: JAX does not CSE broadcast_in_dim.
    w_cols = [wt_ref[:, c:c + 1] for c in range(n_chan)]          # (F, 1) each

    # Build the whole tile-max in registers; ONE output RMW per grid step.
    cols = []
    for n in range(n_tile):                                       # static unroll
        col = None
        # 128-lane spatial sub-chunks keep each z at <= 8 live vregs (F=64).
        for s0 in range(0, s_tile, LANE_CHUNK):
            xs = x_ref[n, :, s0:s0 + LANE_CHUNK]                  # (C, 128)
            # VPU outer-product FMA over the tiny channel axis (K = C): avoids
            # a skinny-K MXU matmul, keeps every load/compute lane-dense.
            z = w_cols[0] * xs[0:1, :]                            # (F, 128)
            for c in range(1, n_chan):
                z = z + w_cols[c] * xs[c:c + 1, :]
            zmax = jnp.max(z, axis=1, keepdims=True)              # (F, 1) lane reduce
            col = zmax if col is None else jnp.maximum(col, zmax)
        cols.append(col)
    tile_cols = jnp.concatenate(cols, axis=1)                     # (F, N_TILE)
    tile_max = tile_cols.T                                        # (N_TILE, F) via XLU
    o_ref[0] = jnp.maximum(o_ref[0], tile_max)

    @pl.when(j == pl.num_programs(1) - 1)
    def _fin():
        # bias-add and ReLU are monotone: max_s relu(z+b) == relu(max_s z + b)
        o_ref[...] = jnp.maximum(o_ref[...] + b_ref[...][None], 0.0)


def backbone_and_dgmp(x_nchw, w, b):
    """Fused feature extractor (resnet18 stand-in) + deep global max pooling."""
    N, C, H, W = x_nchw.shape
    F_ = w.shape[1]
    S = H * W
    # One spatial tile covers the whole (tiny) feature map -> fewest grid steps
    # (per-step overhead ~0.35us dominates at this size).
    S_TILE = S
    assert N % N_TILE == 0 and S_TILE % LANE_CHUNK == 0

    x_ncs = x_nchw.reshape(N, C, S)          # NCHW read directly, spatial on lanes
    wt = w.T                                  # (F, C), tiny one-time transpose
    b_row = b.reshape(1, F_)                  # lane-dense bias
    n_tiles, s_tiles = N // N_TILE, S // S_TILE

    cost = pl.CostEstimate(
        flops=2 * N * S * C * F_,
        transcendentals=0,
        bytes_accessed=(N * C * S + N * F_ + F_ * C + F_) * 4)

    pooled = pl.pallas_call(
        conv_relu_maxpool_kernel,
        out_shape=jax.ShapeDtypeStruct((n_tiles, N_TILE, F_), jnp.float32),
        grid=(n_tiles, s_tiles),
        in_specs=[
            pl.BlockSpec((N_TILE, C, S_TILE), lambda i, j: (i, 0, j)),
            pl.BlockSpec((F_, C), lambda i, j: (0, 0)),
            pl.BlockSpec((1, F_), lambda i, j: (0, 0)),
        ],
        out_specs=pl.BlockSpec((1, N_TILE, F_), lambda i, j: (i, 0, 0)),
        compiler_params=pltpu.CompilerParams(
            dimension_semantics=("parallel", "arbitrary")),
        cost_estimate=cost,
    )(x_ncs, wt, b_row)

    # (n_tiles, N_TILE, F) -> (N, F): contiguous reshape, no transpose needed.
    return pooled.reshape(N, F_)


# ----------------------------------------------------------------------------
# Kernel 2: PCA centering + Gram matrix (Xc and Xc^T Xc) in one call.
# ----------------------------------------------------------------------------
def center_gram_kernel(p_ref, xc_ref, gram_ref):
    x = p_ref[...]
    mean = jnp.mean(x, axis=0, keepdims=True)
    xc = x - mean
    xc_ref[...] = xc
    # Xc^T @ Xc, contracting the row axis of both operands (no explicit transpose)
    gram_ref[...] = lax.dot_general(
        xc, xc, (((0,), (0,)), ((), ())), preferred_element_type=jnp.float32)


# ----------------------------------------------------------------------------
# Kernel 3: PCA projection Y = Xc @ Vpad with a lane-dense (N, 128) output.
# ----------------------------------------------------------------------------
def project_kernel(xc_ref, v_ref, o_ref):
    o_ref[...] = jnp.dot(xc_ref[...], v_ref[...],
                         preferred_element_type=jnp.float32)


def pca_fit_transform(x, n_components=K_COMP):
    # TODO(synk): Gram+eigh squares the condition number vs sklearn's SVD of Xc;
    # small/near-degenerate components may differ slightly in float32.
    N, F_ = x.shape
    xc, gram = pl.pallas_call(
        center_gram_kernel,
        out_shape=(jax.ShapeDtypeStruct((N, F_), jnp.float32),
                   jax.ShapeDtypeStruct((F_, F_), jnp.float32)),
        grid=(1,),
        in_specs=[full_block((N, F_))],
        out_specs=(full_block((N, F_)), full_block((F_, F_))),
    )(x)

    # TODO(synk): eigendecomposition has no Pallas equivalent; use jnp.linalg.eigh.
    evals, evecs = jnp.linalg.eigh(gram)
    order = jnp.argsort(evals)[::-1]
    V = evecs[:, order[:n_components]]                       # (F, k)
    V_pad = jnp.pad(V, ((0, 0), (0, K_PAD - n_components)))  # lane-dense rhs/out

    y_pad = pl.pallas_call(
        project_kernel,
        out_shape=jax.ShapeDtypeStruct((N, K_PAD), jnp.float32),
        grid=(1,),
        in_specs=[full_block((N, F_)), full_block((F_, K_PAD))],
        out_specs=full_block((N, K_PAD)),
    )(xc, V_pad)
    y = y_pad[:, :n_components]

    # sklearn-style svd_flip (u-based): largest-|value| entry per component > 0.
    # TODO(synk): ties / zero-max columns may flip differently than sklearn.
    idx = jnp.argmax(jnp.abs(y), axis=0)
    signs = jnp.sign(y[idx, jnp.arange(n_components)])
    signs = jnp.where(signs == 0, 1.0, signs)
    return y * signs[None, :]


# ----------------------------------------------------------------------------
# Model.forward equivalent
# ----------------------------------------------------------------------------
def model_forward(sample_nchw, params):
    pooled = backbone_and_dgmp(sample_nchw, params["w"], params["b"])  # model + dgmp (fused)
    out = pca_fit_transform(pooled, n_components=K_COMP)               # pca.fit_transform
    return out


if __name__ == "__main__":
    # Batch must be >= n_components (sklearn PCA requirement); NCHW like PyTorch.
    N, C, H, W = 32, 4, 16, 16
    F_ = 64  # feature channels produced by the stand-in backbone

    key = jax.random.PRNGKey(0)
    x = jax.random.normal(key, (N, C, H, W), dtype=jnp.float32)

    # Deterministic parameter init (synthetic, not a checkpoint load).
    kw, kb = jax.random.split(jax.random.PRNGKey(42))
    params = {
        "w": jax.random.normal(kw, (C, F_), dtype=jnp.float32) * 0.1,
        "b": jax.random.normal(kb, (F_,), dtype=jnp.float32) * 0.01,
    }

    fwd = jax.jit(model_forward)
    out = fwd(x, params)
    jax.block_until_ready(out)

    assert out.shape == (N, K_COMP), out.shape
    assert out.dtype == jnp.float32
    print("KERNEL_OK")
</pallas_src>

<mosaic_0001>
module attributes {stable_mosaic.version = 11 : i64} {
  func.func @center_gram_kernel(%arg0: i32, %arg1: memref<32x64xf32, #tpu.memory_space<vmem>>, %arg2: memref<32x64xf32, #tpu.memory_space<vmem>>, %arg3: memref<64x64xf32, #tpu.memory_space<vmem>>) attributes {dimension_semantics = [#tpu.dimension_semantics<arbitrary>], iteration_bounds = array<i64: 1>, scalar_prefetch = 0 : i64, scratch_operands = 0 : i64, tpu.core_type = #tpu.core_type<tc>, window_params = [{pipeline_mode = #tpu.pipeline_mode<synchronous>, transform_indices = @transform_0, window_bounds = array<i64: 32, 64>}, {pipeline_mode = #tpu.pipeline_mode<synchronous>, transform_indices = @transform_1, window_bounds = array<i64: 32, 64>}, {pipeline_mode = #tpu.pipeline_mode<synchronous>, transform_indices = @transform_2, window_bounds = array<i64: 64, 64>}]} {
    %c0 = arith.constant 0 : index
    %c0_0 = arith.constant 0 : index
    %0 = vector.load %arg1[%c0, %c0_0] : memref<32x64xf32, #tpu.memory_space<vmem>>, vector<32x64xf32>
    %cst = arith.constant dense<0.000000e+00> : vector<64xf32>
    %1 = vector.multi_reduction <add>, %0, %cst [0] : vector<32x64xf32> to vector<64xf32>
    %2 = vector.shape_cast %1 : vector<64xf32> to vector<1x64xf32>
    %cst_1 = arith.constant 3.200000e+01 : f32
    %3 = vector.broadcast %cst_1 : f32 to vector<1x64xf32>
    %4 = arith.divf %2, %3 : vector<1x64xf32>
    %5 = vector.broadcast %4 : vector<1x64xf32> to vector<32x64xf32>
    %6 = arith.subf %0, %5 : vector<32x64xf32>
    %c0_2 = arith.constant 0 : index
    %c0_3 = arith.constant 0 : index
    %7 = vector.load %arg2[%c0_2, %c0_3] : memref<32x64xf32, #tpu.memory_space<vmem>>, vector<32x64xf32>
    tpu.vector_store %arg2[%c0_2, %c0_3], %6 {strides = array<i32>} : memref<32x64xf32, #tpu.memory_space<vmem>>, vector<32x64xf32>,
    %cst_4 = arith.constant dense<0.000000e+00> : vector<64x64xf32>
    %8 = tpu.matmul %6, %6, %cst_4 {dimension_numbers = #tpu.dot_dimension_numbers<[0], [0], [1], [1], [0, 1, 1, 1], [], []>} : vector<32x64xf32>, vector<32x64xf32>, vector<64x64xf32> -> vector<64x64xf32>
    %c0_5 = arith.constant 0 : index
    %c0_6 = arith.constant 0 : index
    %9 = vector.load %arg3[%c0_5, %c0_6] : memref<64x64xf32, #tpu.memory_space<vmem>>, vector<64x64xf32>
    tpu.vector_store %arg3[%c0_5, %c0_6], %8 {strides = array<i32>} : memref<64x64xf32, #tpu.memory_space<vmem>>, vector<64x64xf32>,
    return
  }
  func.func @transform_0(%arg0: i32) -> (i32, i32) {
    %c0_i32 = arith.constant 0 : i32
    %c0_i32_0 = arith.constant 0 : i32
    %c0_i32_1 = arith.constant 0 : i32
    return %c0_i32, %c0_i32_0 : i32, i32
  }
  func.func @transform_1(%arg0: i32) -> (i32, i32) {
    %c0_i32 = arith.constant 0 : i32
    %c0_i32_0 = arith.constant 0 : i32
    %c0_i32_1 = arith.constant 0 : i32
    return %c0_i32, %c0_i32_0 : i32, i32
  }
  func.func @transform_2(%arg0: i32) -> (i32, i32) {
    %c0_i32 = arith.constant 0 : i32
    %c0_i32_0 = arith.constant 0 : i32
    %c0_i32_1 = arith.constant 0 : i32
    return %c0_i32, %c0_i32_0 : i32, i32
  }
}

module attributes {stable_mosaic.version = 11 : i64} {
  func.func @conv_relu_maxpool_kernel(%arg0: i32, %arg1: i32, %arg2: memref<16x4x256xf32, #tpu.memory_space<vmem>>, %arg3: memref<64x4xf32, #tpu.memory_space<vmem>>, %arg4: memref<1x64xf32, #tpu.memory_space<vmem>>, %arg5: memref<1x16x64xf32, #tpu.memory_space<vmem>>) attributes {dimension_semantics = [#tpu.dimension_semantics<parallel>, #tpu.dimension_semantics<arbitrary>], iteration_bounds = array<i64: 2, 1>, scalar_prefetch = 0 : i64, scratch_operands = 0 : i64, tpu.core_type = #tpu.core_type<tc>, window_params = [{transform_indices = @transform_0, window_bounds = array<i64: 16, 4, 256>}, {pipeline_mode = #tpu.pipeline_mode<synchronous>, transform_indices = @transform_1, window_bounds = array<i64: 64, 4>}, {pipeline_mode = #tpu.pipeline_mode<synchronous>, transform_indices = @transform_2, window_bounds = array<i64: 1, 64>}, {transform_indices = @transform_3, window_bounds = array<i64: 1, 16, 64>}]} {
    %c0_i32 = arith.constant 0 : i32
    %0 = arith.cmpi eq, %arg1, %c0_i32 : i32
    %1 = arith.extui %0 : i1 to i32
    %c0_i32_0 = arith.constant 0 : i32
    %2 = arith.cmpi ne, %1, %c0_i32_0 : i32
    scf.if %2 {
      %cst_127 = arith.constant 0xFF800000 : f32
      %770 = vector.broadcast %cst_127 : f32 to vector<1x16x64xf32>
      %c0_128 = arith.constant 0 : index
      %c0_129 = arith.constant 0 : index
      %c0_130 = arith.constant 0 : index
      %771 = vector.load %arg5[%c0_128, %c0_129, %c0_130] : memref<1x16x64xf32, #tpu.memory_space<vmem>>, vector<1x16x64xf32>
      tpu.vector_store %arg5[%c0_128, %c0_129, %c0_130], %770 {strides = array<i32>} : memref<1x16x64xf32, #tpu.memory_space<vmem>>, vector<1x16x64xf32>,
    } else {
    }
    %c0 = arith.constant 0 : index
    %c0_1 = arith.constant 0 : index
    %3 = vector.load %arg3[%c0, %c0_1] : memref<64x4xf32, #tpu.memory_space<vmem>>, vector<64x1xf32>
    %c0_2 = arith.constant 0 : index
    %c1 = arith.constant 1 : index
    %4 = vector.load %arg3[%c0_2, %c1] : memref<64x4xf32, #tpu.memory_space<vmem>>, vector<64x1xf32>
    %c0_3 = arith.constant 0 : index
    %c2 = arith.constant 2 : index
    %5 = vector.load %arg3[%c0_3, %c2] : memref<64x4xf32, #tpu.memory_space<vmem>>, vector<64x1xf32>
    %c0_4 = arith.constant 0 : index
    %c3 = arith.constant 3 : index
    %6 = vector.load %arg3[%c0_4, %c3] : memref<64x4xf32, #tpu.memory_space<vmem>>, vector<64x1xf32>
    %c0_5 = arith.constant 0 : index
    %c0_6 = arith.constant 0 : index
    %c0_7 = arith.constant 0 : index
    %7 = vector.load %arg2[%c0_5, %c0_6, %c0_7] : memref<16x4x256xf32, #tpu.memory_space<vmem>>, vector<1x4x128xf32>
    %8 = vector.shape_cast %7 : vector<1x4x128xf32> to vector<4x128xf32>
    %9 = vector.extract_strided_slice %8 {offsets = [0, 0], sizes = [1, 128], strides = [1, 1]} : vector<4x128xf32> to vector<1x128xf32>
    %10 = vector.broadcast %3 : vector<64x1xf32> to vector<64x128xf32>
    %11 = vector.broadcast %9 : vector<1x128xf32> to vector<64x128xf32>
    %12 = arith.mulf %10, %11 : vector<64x128xf32>
    %13 = vector.extract_strided_slice %8 {offsets = [1, 0], sizes = [1, 128], strides = [1, 1]} : vector<4x128xf32> to vector<1x128xf32>
    %14 = vector.broadcast %4 : vector<64x1xf32> to vector<64x128xf32>
    %15 = vector.broadcast %13 : vector<1x128xf32> to vector<64x128xf32>
    %16 = arith.mulf %14, %15 : vector<64x128xf32>
    %17 = arith.addf %12, %16 : vector<64x128xf32>
    %18 = vector.extract_strided_slice %8 {offsets = [2, 0], sizes = [1, 128], strides = [1, 1]} : vector<4x128xf32> to vector<1x128xf32>
    %19 = vector.broadcast %5 : vector<64x1xf32> to vector<64x128xf32>
    %20 = vector.broadcast %18 : vector<1x128xf32> to vector<64x128xf32>
    %21 = arith.mulf %19, %20 : vector<64x128xf32>
    %22 = arith.addf %17, %21 : vector<64x128xf32>
    %23 = vector.extract_strided_slice %8 {offsets = [3, 0], sizes = [1, 128], strides = [1, 1]} : vector<4x128xf32> to vector<1x128xf32>
    %24 = vector.broadcast %6 : vector<64x1xf32> to vector<64x128xf32>
    %25 = vector.broadcast %23 : vector<1x128xf32> to vector<64x128xf32>
    %26 = arith.mulf %24, %25 : vector<64x128xf32>
    %27 = arith.addf %22, %26 : vector<64x128xf32>
    %cst = arith.constant dense<0xFF800000> : vector<64xf32>
    %28 = vector.multi_reduction <maximumf>, %27, %cst [1] : vector<64x128xf32> to vector<64xf32>
    %29 = vector.shape_cast %28 : vector<64xf32> to vector<64x1xf32>
    %c0_8 = arith.constant 0 : index
    %c0_9 = arith.constant 0 : index
    %c128 = arith.constant 128 : index
    %30 = vector.load %arg2[%c0_8, %c0_9, %c128] : memref<16x4x256xf32, #tpu.memory_space<vmem>>, vector<1x4x128xf32>
    %31 = vector.shape_cast %30 : vector<1x4x128xf32> to vector<4x128xf32>
    %32 = vector.extract_strided_slice %31 {offsets = [0, 0], sizes = [1, 128], strides = [1, 1]} : vector<4x128xf32> to vector<1x128xf32>
    %33 = vector.broadcast %3 : vector<64x1xf32> to vector<64x128xf32>
    %34 = vector.broadcast %32 : vector<1x128xf32> to vector<64x128xf32>
    %35 = arith.mulf %33, %34 : vector<64x128xf32>
    %36 = vector.extract_strided_slice %31 {offsets = [1, 0], sizes = [1, 128], strides = [1, 1]} : vector<4x128xf32> to vector<1x128xf32>
    %37 = vector.broadcast %4 : vector<64x1xf32> to vector<64x128xf32>
    %38 = vector.broadcast %36 : vector<1x128xf32> to vector<64x128xf32>
    %39 = arith.mulf %37, %38 : vector<64x128xf32>
    %40 = arith.addf %35, %39 : vector<64x128xf32>
    %41 = vector.extract_strided_slice %31 {offsets = [2, 0], sizes = [1, 128], strides = [1, 1]} : vector<4x128xf32> to vector<1x128xf32>
    %42 = vector.broadcast %5 : vector<64x1xf32> to vector<64x128xf32>
    %43 = vector.broadcast %41 : vector<1x128xf32> to vector<64x128xf32>
    %44 = arith.mulf %42, %43 : vector<64x128xf32>
    %45 = arith.addf %40, %44 : vector<64x128xf32>
    %46 = vector.extract_strided_slice %31 {offsets = [3, 0], sizes = [1, 128], strides = [1, 1]} : vector<4x128xf32> to vector<1x128xf32>
    %47 = vector.broadcast %6 : vector<64x1xf32> to vector<64x128xf32>
    %48 = vector.broadcast %46 : vector<1x128xf32> to vector<64x128xf32>
    %49 = arith.mulf %47, %48 : vector<64x128xf32>
    %50 = arith.addf %45, %49 : vector<64x128xf32>
    %cst_10 = arith.constant dense<0xFF800000> : vector<64xf32>
    %51 = vector.multi_reduction <maximumf>, %50, %cst_10 [1] : vector<64x128xf32> to vector<64xf32>
    %52 = vector.shape_cast %51 : vector<64xf32> to vector<64x1xf32>
    %53 = arith.maximumf %29, %52 : vector<64x1xf32>
    %c1_11 = arith.constant 1 : index
    %c0_12 = arith.constant 0 : index
    %c0_13 = arith.constant 0 : index
    %54 = vector.load %arg2[%c1_11, %c0_12, %c0_13] : memref<16x4x256xf32, #tpu.memory_space<vmem>>, vector<1x4x128xf32>
    %55 = vector.shape_cast %54 : vector<1x4x128xf32> to vector<4x128xf32>
    %56 = vector.extract_strided_slice %55 {offsets = [0, 0], sizes = [1, 128], strides = [1, 1]} : vector<4x128xf32> to vector<1x128xf32>
    %57 = vector.broadcast %3 : vector<64x1xf32> to vector<64x128xf32>
    %58 = vector.broadcast %56 : vector<1x128xf32> to vector<64x128xf32>
    %59 = arith.mulf %57, %58 : vector<64x128xf32>
    %60 = vector.extract_strided_slice %55 {offsets = [1, 0], sizes = [1, 128], strides = [1, 1]} : vector<4x128xf32> to vector<1x128xf32>
    %61 = vector.broadcast %4 : vector<64x1xf32> to vector<64x128xf32>
    %62 = vector.broadcast %60 : vector<1x128xf32> to vector<64x128xf32>
    %63 = arith.mulf %61, %62 : vector<64x128xf32>
    %64 = arith.addf %59, %63 : vector<64x128xf32>
    %65 = vector.extract_strided_slice %55 {offsets = [2, 0], sizes = [1, 128], strides = [1, 1]} : vector<4x128xf32> to vector<1x128xf32>
    %66 = vector.broadcast %5 : vector<64x1xf32> to vector<64x128xf32>
    %67 = vector.broadcast %65 : vector<1x128xf32> to vector<64x128xf32>
    %68 = arith.mulf %66, %67 : vector<64x128xf32>
    %69 = arith.addf %64, %68 : vector<64x128xf32>
    %70 = vector.extract_strided_slice %55 {offsets = [3, 0], sizes = [1, 128], strides = [1, 1]} : vector<4x128xf32> to vector<1x128xf32>
    %71 = vector.broadcast %6 : vector<64x1xf32> to vector<64x128xf32>
    %72 = vector.broadcast %70 : vector<1x128xf32> to vector<64x128xf32>
    %73 = arith.mulf %71, %72 : vector<64x128xf32>
    %74 = arith.addf %69, %73 : vector<64x128xf32>
    %cst_14 = arith.constant dense<0xFF800000> : vector<64xf32>
    %75 = vector.multi_reduction <maximumf>, %74, %cst_14 [1] : vector<64x128xf32> to vector<64xf32>
    %76 = vector.shape_cast %75 : vector<64xf32> to vector<64x1xf32>
    %c1_15 = arith.constant 1 : index
    %c0_16 = arith.constant 0 : index
    %c128_17 = arith.constant 128 : index
    %77 = vector.load %arg2[%c1_15, %c0_16, %c128_17] : memref<16x4x256xf32, #tpu.memory_space<vmem>>, vector<1x4x128xf32>
    %78 = vector.shape_cast %77 : vector<1x4x128xf32> to vector<4x128xf32>
    %79 = vector.extract_strided_slice %78 {offsets = [0, 0], sizes = [1, 128], strides = [1, 1]} : vector<4x128xf32> to vector<1x128xf32>
    %80 = vector.broadcast %3 : vector<64x1xf32> to vector<64x128xf32>
    %81 = vector.broadcast %79 : vector<1x128xf32> to vector<64x128xf32>
    %82 = arith.mulf %80, %81 : vector<64x128xf32>
    %83 = vector.extract_strided_slice %78 {offsets = [1, 0], sizes = [1, 128], strides = [1, 1]} : vector<4x128xf32> to vector<1x128xf32>
    %84 = vector.broadcast %4 : vector<64x1xf32> to vector<64x128xf32>
    %85 = vector.broadcast %83 : vector<1x128xf32> to vector<64x128xf32>
    %86 = arith.mulf %84, %85 : vector<64x128xf32>
    %87 = arith.addf %82, %86 : vector<64x128xf32>
    %88 = vector.extract_strided_slice %78 {offsets = [2, 0], sizes = [1, 128], strides = [1, 1]} : vector<4x128xf32> to vector<1x128xf32>
    %89 = vector.broadcast %5 : vector<64x1xf32> to vector<64x128xf32>
    %90 = vector.broadcast %88 : vector<1x128xf32> to vector<64x128xf32>
    %91 = arith.mulf %89, %90 : vector<64x128xf32>
    %92 = arith.addf %87, %91 : vector<64x128xf32>
    %93 = vector.extract_strided_slice %78 {offsets = [3, 0], sizes = [1, 128], strides = [1, 1]} : vector<4x128xf32> to vector<1x128xf32>
    %94 = vector.broadcast %6 : vector<64x1xf32> to vector<64x128xf32>
    %95 = vector.broadcast %93 : vector<1x128xf32> to vector<64x128xf32>
    %96 = arith.mulf %94, %95 : vector<64x128xf32>
    %97 = arith.addf %92, %96 : vector<64x128xf32>
    %cst_18 = arith.constant dense<0xFF800000> : vector<64xf32>
    %98 = vector.multi_reduction <maximumf>, %97, %cst_18 [1] : vector<64x128xf32> to vector<64xf32>
    %99 = vector.shape_cast %98 : vector<64xf32> to vector<64x1xf32>
    %100 = arith.maximumf %76, %99 : vector<64x1xf32>
    %c2_19 = arith.constant 2 : index
    %c0_20 = arith.constant 0 : index
    %c0_21 = arith.constant 0 : index
    %101 = vector.load %arg2[%c2_19, %c0_20, %c0_21] : memref<16x4x256xf32, #tpu.memory_space<vmem>>, vector<1x4x128xf32>
    %102 = vector.shape_cast %101 : vector<1x4x128xf32> to vector<4x128xf32>
    %103 = vector.extract_strided_slice %102 {offsets = [0, 0], sizes = [1, 128], strides = [1, 1]} : vector<4x128xf32> to vector<1x128xf32>
    %104 = vector.broadcast %3 : vector<64x1xf32> to vector<64x128xf32>
    %105 = vector.broadcast %103 : vector<1x128xf32> to vector<64x128xf32>
    %106 = arith.mulf %104, %105 : vector<64x128xf32>
    %107 = vector.extract_strided_slice %102 {offsets = [1, 0], sizes = [1, 128], strides = [1, 1]} : vector<4x128xf32> to vector<1x128xf32>
    %108 = vector.broadcast %4 : vector<64x1xf32> to vector<64x128xf32>
    %109 = vector.broadcast %107 : vector<1x128xf32> to vector<64x128xf32>
    %110 = arith.mulf %108, %109 : vector<64x128xf32>
    %111 = arith.addf %106, %110 : vector<64x128xf32>
    %112 = vector.extract_strided_slice %102 {offsets = [2, 0], sizes = [1, 128], strides = [1, 1]} : vector<4x128xf32> to vector<1x128xf32>
    %113 = vector.broadcast %5 : vector<64x1xf32> to vector<64x128xf32>
    %114 = vector.broadcast %112 : vector<1x128xf32> to vector<64x128xf32>
    %115 = arith.mulf %113, %114 : vector<64x128xf32>
    %116 = arith.addf %111, %115 : vector<64x128xf32>
    %117 = vector.extract_strided_slice %102 {offsets = [3, 0], sizes = [1, 128], strides = [1, 1]} : vector<4x128xf32> to vector<1x128xf32>
    %118 = vector.broadcast %6 : vector<64x1xf32> to vector<64x128xf32>
    %119 = vector.broadcast %117 : vector<1x128xf32> to vector<64x128xf32>
    %120 = arith.mulf %118, %119 : vector<64x128xf32>
    %121 = arith.addf %116, %120 : vector<64x128xf32>
    %cst_22 = arith.constant dense<0xFF800000> : vector<64xf32>
    %122 = vector.multi_reduction <maximumf>, %121, %cst_22 [1] : vector<64x128xf32> to vector<64xf32>
    %123 = vector.shape_cast %122 : vector<64xf32> to vector<64x1xf32>
    %c2_23 = arith.constant 2 : index
    %c0_24 = arith.constant 0 : index
    %c128_25 = arith.constant 128 : index
    %124 = vector.load %arg2[%c2_23, %c0_24, %c128_25] : memref<16x4x256xf32, #tpu.memory_space<vmem>>, vector<1x4x128xf32>
    %125 = vector.shape_cast %124 : vector<1x4x128xf32> to vector<4x128xf32>
    %126 = vector.extract_strided_slice %125 {offsets = [0, 0], sizes = [1, 128], strides = [1, 1]} : vector<4x128xf32> to vector<1x128xf32>
    %127 = vector.broadcast %3 : vector<64x1xf32> to vector<64x128xf32>
    %128 = vector.broadcast %126 : vector<1x128xf32> to vector<64x128xf32>
    %129 = arith.mulf %127, %128 : vector<64x128xf32>
    %130 = vector.extract_strided_slice %125 {offsets = [1, 0], sizes = [1, 128], strides = [1, 1]} : vector<4x128xf32> to vector<1x128xf32>
    %131 = vector.broadcast %4 : vector<64x1xf32> to vector<64x128xf32>
    %132 = vector.broadcast %130 : vector<1x128xf32> to vector<64x128xf32>
    %133 = arith.mulf %131, %132 : vector<64x128xf32>
    %134 = arith.addf %129, %133 : vector<64x128xf32>
    %135 = vector.extract_strided_slice %125 {offsets = [2, 0], sizes = [1, 128], strides = [1, 1]} : vector<4x128xf32> to vector<1x128xf32>
    %136 = vector.broadcast %5 : vector<64x1xf32> to vector<64x128xf32>
    %137 = vector.broadcast %135 : vector<1x128xf32> to vector<64x128xf32>
    %138 = arith.mulf %136, %137 : vector<64x128xf32>
    %139 = arith.addf %134, %138 : vector<64x128xf32>
    %140 = vector.extract_strided_slice %125 {offsets = [3, 0], sizes = [1, 128], strides = [1, 1]} : vector<4x128xf32> to vector<1x128xf32>
    %141 = vector.broadcast %6 : vector<64x1xf32> to vector<64x128xf32>
    %142 = vector.broadcast %140 : vector<1x128xf32> to vector<64x128xf32>
    %143 = arith.mulf %141, %142 : vector<64x128xf32>
    %144 = arith.addf %139, %143 : vector<64x128xf32>
    %cst_26 = arith.constant dense<0xFF800000> : vector<64xf32>
    %145 = vector.multi_reduction <maximumf>, %144, %cst_26 [1] : vector<64x128xf32> to vector<64xf32>
    %146 = vector.shape_cast %145 : vector<64xf32> to vector<64x1xf32>
    %147 = arith.maximumf %123, %146 : vector<64x1xf32>
    %c3_27 = arith.constant 3 : index
    %c0_28 = arith.constant 0 : index
    %c0_29 = arith.constant 0 : index
    %148 = vector.load %arg2[%c3_27, %c0_28, %c0_29] : memref<16x4x256xf32, #tpu.memory_space<vmem>>, vector<1x4x128xf32>
    %149 = vector.shape_cast %148 : vector<1x4x128xf32> to vector<4x128xf32>
    %150 = vector.extract_strided_slice %149 {offsets = [0, 0], sizes = [1, 128], strides = [1, 1]} : vector<4x128xf32> to vector<1x128xf32>
    %151 = vector.broadcast %3 : vector<64x1xf32> to vector<64x128xf32>
    %152 = vector.broadcast %150 : vector<1x128xf32> to vector<64x128xf32>
    %153 = arith.mulf %151, %152 : vector<64x128xf32>
    %154 = vector.extract_strided_slice %149 {offsets = [1, 0], sizes = [1, 128], strides = [1, 1]} : vector<4x128xf32> to vector<1x128xf32>
    %155 = vector.broadcast %4 : vector<64x1xf32> to vector<64x128xf32>
    %156 = vector.broadcast %154 : vector<1x128xf32> to vector<64x128xf32>
    %157 = arith.mulf %155, %156 : vector<64x128xf32>
    %158 = arith.addf %153, %157 : vector<64x128xf32>
    %159 = vector.extract_strided_slice %149 {offsets = [2, 0], sizes = [1, 128], strides = [1, 1]} : vector<4x128xf32> to vector<1x128xf32>
    %160 = vector.broadcast %5 : vector<64x1xf32> to vector<64x128xf32>
    %161 = vector.broadcast %159 : vector<1x128xf32> to vector<64x128xf32>
    %162 = arith.mulf %160, %161 : vector<64x128xf32>
    %163 = arith.addf %158, %162 : vector<64x128xf32>
    %164 = vector.extract_strided_slice %149 {offsets = [3, 0], sizes = [1, 128], strides = [1, 1]} : vector<4x128xf32> to vector<1x128xf32>
    %165 = vector.broadcast %6 : vector<64x1xf32> to vector<64x128xf32>
    %166 = vector.broadcast %164 : vector<1x128xf32> to vector<64x128xf32>
    %167 = arith.mulf %165, %166 : vector<64x128xf32>
    %168 = arith.addf %163, %167 : vector<64x128xf32>
    %cst_30 = arith.constant dense<0xFF800000> : vector<64xf32>
    %169 = vector.multi_reduction <maximumf>, %168, %cst_30 [1] : vector<64x128xf32> to vector<64xf32>
    %170 = vector.shape_cast %169 : vector<64xf32> to vector<64x1xf32>
    %c3_31 = arith.constant 3 : index
    %c0_32 = arith.constant 0 : index
    %c128_33 = arith.constant 128 : index
    %171 = vector.load %arg2[%c3_31, %c0_32, %c128_33] : memref<16x4x256xf32, #tpu.memory_space<vmem>>, vector<1x4x128xf32>
    %172 = vector.shape_cast %171 : vector<1x4x128xf32> to vector<4x128xf32>
    %173 = vector.extract_strided_slice %172 {offsets = [0, 0], sizes = [1, 128], strides = [1, 1]} : vector<4x128xf32> to vector<1x128xf32>
    %174 = vector.broadcast %3 : vector<64x1xf32> to vector<64x128xf32>
    %175 = vector.broadcast %173 : vector<1x128xf32> to vector<64x128xf32>
    %176 = arith.mulf %174, %175 : vector<64x128xf32>
    %177 = vector.extract_strided_slice %172 {offsets = [1, 0], sizes = [1, 128], strides = [1, 1]} : vector<4x128xf32> to vector<1x128xf32>
    %178 = vector.broadcast %4 : vector<64x1xf32> to vector<64x128xf32>
    %179 = vector.broadcast %177 : vector<1x128xf32> to vector<64x128xf32>
    %180 = arith.mulf %178, %179 : vector<64x128xf32>
    %181 = arith.addf %176, %180 : vector<64x128xf32>
    %182 = vector.extract_strided_slice %172 {offsets = [2, 0], sizes = [1, 128], strides = [1, 1]} : vector<4x128xf32> to vector<1x128xf32>
    %183 = vector.broadcast %5 : vector<64x1xf32> to vector<64x128xf32>
    %184 = vector.broadcast %182 : vector<1x128xf32> to vector<64x128xf32>
    %185 = arith.mulf %183, %184 : vector<64x128xf32>
    %186 = arith.addf %181, %185 : vector<64x128xf32>
    %187 = vector.extract_strided_slice %172 {offsets = [3, 0], sizes = [1, 128], strides = [1, 1]} : vector<4x128xf32> to vector<1x128xf32>
    %188 = vector.broadcast %6 : vector<64x1xf32> to vector<64x128xf32>
    %189 = vector.broadcast %187 : vector<1x128xf32> to vector<64x128xf32>
    %190 = arith.mulf %188, %189 : vector<64x128xf32>
    %191 = arith.addf %186, %190 : vector<64x128xf32>
    %cst_34 = arith.constant dense<0xFF800000> : vector<64xf32>
    %192 = vector.multi_reduction <maximumf>, %191, %cst_34 [1] : vector<64x128xf32> to vector<64xf32>
    %193 = vector.shape_cast %192 : vector<64xf32> to vector<64x1xf32>
    %194 = arith.maximumf %170, %193 : vector<64x1xf32>
    %c4 = arith.constant 4 : index
    %c0_35 = arith.constant 0 : index
    %c0_36 = arith.constant 0 : index
    %195 = vector.load %arg2[%c4, %c0_35, %c0_36] : memref<16x4x256xf32, #tpu.memory_space<vmem>>, vector<1x4x128xf32>
    %196 = vector.shape_cast %195 : vector<1x4x128xf32> to vector<4x128xf32>
    %197 = vector.extract_strided_slice %196 {offsets = [0, 0], sizes = [1, 128], strides = [1, 1]} : vector<4x128xf32> to vector<1x128xf32>
    %198 = vector.broadcast %3 : vector<64x1xf32> to vector<64x128xf32>
    %199 = vector.broadcast %197 : vector<1x128xf32> to vector<64x128xf32>
    %200 = arith.mulf %198, %199 : vector<64x128xf32>
    %201 = vector.extract_strided_slice %196 {offsets = [1, 0], sizes = [1, 128], strides = [1, 1]} : vector<4x128xf32> to vector<1x128xf32>
    %202 = vector.broadcast %4 : vector<64x1xf32> to vector<64x128xf32>
    %203 = vector.broadcast %201 : vector<1x128xf32> to vector<64x128xf32>
    %204 = arith.mulf %202, %203 : vector<64x128xf32>
    %205 = arith.addf %200, %204 : vector<64x128xf32>
    %206 = vector.extract_strided_slice %196 {offsets = [2, 0], sizes = [1, 128], strides = [1, 1]} : vector<4x128xf32> to vector<1x128xf32>
    %207 = vector.broadcast %5 : vector<64x1xf32> to vector<64x128xf32>
    %208 = vector.broadcast %206 : vector<1x128xf32> to vector<64x128xf32>
    %209 = arith.mulf %207, %208 : vector<64x128xf32>
    %210 = arith.addf %205, %209 : vector<64x128xf32>
    %211 = vector.extract_strided_slice %196 {offsets = [3, 0], sizes = [1, 128], strides = [1, 1]} : vector<4x128xf32> to vector<1x128xf32>
    %212 = vector.broadcast %6 : vector<64x1xf32> to vector<64x128xf32>
    %213 = vector.broadcast %211 : vector<1x128xf32> to vector<64x128xf32>
    %214 = arith.mulf %212, %213 : vector<64x128xf32>
    %215 = arith.addf %210, %214 : vector<64x128xf32>
    %cst_37 = arith.constant dense<0xFF800000> : vector<64xf32>
    %216 = vector.multi_reduction <maximumf>, %215, %cst_37 [1] : vector<64x128xf32> to vector<64xf32>
    %217 = vector.shape_cast %216 : vector<64xf32> to vector<64x1xf32>
    %c4_38 = arith.constant 4 : index
    %c0_39 = arith.constant 0 : index
    %c128_40 = arith.constant 128 : index
    %218 = vector.load %arg2[%c4_38, %c0_39, %c128_40] : memref<16x4x256xf32, #tpu.memory_space<vmem>>, vector<1x4x128xf32>
    %219 = vector.shape_cast %218 : vector<1x4x128xf32> to vector<4x128xf32>
    %220 = vector.extract_strided_slice %219 {offsets = [0, 0], sizes = [1, 128], strides = [1, 1]} : vector<4x128xf32> to vector<1x128xf32>
    %221 = vector.broadcast %3 : vector<64x1xf32> to vector<64x128xf32>
    %222 = vector.broadcast %220 : vector<1x128xf32> to vector<64x128xf32>
    %223 = arith.mulf %221, %222 : vector<64x128xf32>
    %224 = vector.extract_strided_slice %219 {offsets = [1, 0], sizes = [1, 128], strides = [1, 1]} : vector<4x128xf32> to vector<1x128xf32>
    %225 = vector.broadcast %4 : vector<64x1xf32> to vector<64x128xf32>
    %226 = vector.broadcast %224 : vector<1x128xf32> to vector<64x128xf32>
    %227 = arith.mulf %225, %226 : vector<64x128xf32>
    %228 = arith.addf %223, %227 : vector<64x128xf32>
    %229 = vector.extract_strided_slice %219 {offsets = [2, 0], sizes = [1, 128], strides = [1, 1]} : vector<4x128xf32> to vector<1x128xf32>
    %230 = vector.broadcast %5 : vector<64x1xf32> to vector<64x128xf32>
    %231 = vector.broadcast %229 : vector<1x128xf32> to vector<64x128xf32>
    %232 = arith.mulf %230, %231 : vector<64x128xf32>
    %233 = arith.addf %228, %232 : vector<64x128xf32>
    %234 = vector.extract_strided_slice %219 {offsets = [3, 0], sizes = [1, 128], strides = [1, 1]} : vector<4x128xf32> to vector<1x128xf32>
    %235 = vector.broadcast %6 : vector<64x1xf32> to vector<64x128xf32>
    %236 = vector.broadcast %234 : vector<1x128xf32> to vector<64x128xf32>
    %237 = arith.mulf %235, %236 : vector<64x128xf32>
    %238 = arith.addf %233, %237 : vector<64x128xf32>
    %cst_41 = arith.constant dense<0xFF800000> : vector<64xf32>
    %239 = vector.multi_reduction <maximumf>, %238, %cst_41 [1] : vector<64x128xf32> to vector<64xf32>
    %240 = vector.shape_cast %239 : vector<64xf32> to vector<64x1xf32>
    %241 = arith.maximumf %217, %240 : vector<64x1xf32>
    %c5 = arith.constant 5 : index
    %c0_42 = arith.constant 0 : index
    %c0_43 = arith.constant 0 : index
    %242 = vector.load %arg2[%c5, %c0_42, %c0_43] : memref<16x4x256xf32, #tpu.memory_space<vmem>>, vector<1x4x128xf32>
    %243 = vector.shape_cast %242 : vector<1x4x128xf32> to vector<4x128xf32>
    %244 = vector.extract_strided_slice %243 {offsets = [0, 0], sizes = [1, 128], strides = [1, 1]} : vector<4x128xf32> to vector<1x128xf32>
    %245 = vector.broadcast %3 : vector<64x1xf32> to vector<64x128xf32>
    %246 = vector.broadcast %244 : vector<1x128xf32> to vector<64x128xf32>
    %247 = arith.mulf %245, %246 : vector<64x128xf32>
    %248 = vector.extract_strided_slice %243 {offsets = [1, 0], sizes = [1, 128], strides = [1, 1]} : vector<4x128xf32> to vector<1x128xf32>
    %249 = vector.broadcast %4 : vector<64x1xf32> to vector<64x128xf32>
    %250 = vector.broadcast %248 : vector<1x128xf32> to vector<64x128xf32>
    %251 = arith.mulf %249, %250 : vector<64x128xf32>
    %252 = arith.addf %247, %251 : vector<64x128xf32>
    %253 = vector.extract_strided_slice %243 {offsets = [2, 0], sizes = [1, 128], strides = [1, 1]} : vector<4x128xf32> to vector<1x128xf32>
    %254 = vector.broadcast %5 : vector<64x1xf32> to vector<64x128xf32>
    %255 = vector.broadcast %253 : vector<1x128xf32> to vector<64x128xf32>
    %256 = arith.mulf %254, %255 : vector<64x128xf32>
    %257 = arith.addf %252, %256 : vector<64x128xf32>
    %258 = vector.extract_strided_slice %243 {offsets = [3, 0], sizes = [1, 128], strides = [1, 1]} : vector<4x128xf32> to vector<1x128xf32>
    %259 = vector.broadcast %6 : vector<64x1xf32> to vector<64x128xf32>
    %260 = vector.broadcast %258 : vector<1x128xf32> to vector<64x128xf32>
    %261 = arith.mulf %259, %260 : vector<64x128xf32>
    %262 = arith.addf %257, %261 : vector<64x128xf32>
    %cst_44 = arith.constant dense<0xFF800000> : vector<64xf32>
    %263 = vector.multi_reduction <maximumf>, %262, %cst_44 [1] : vector<64x128xf32> to vector<64xf32>
    %264 = vector.shape_cast %263 : vector<64xf32> to vector<64x1xf32>
    %c5_45 = arith.constant 5 : index
    %c0_46 = arith.constant 0 : index
    %c128_47 = arith.constant 128 : index
    %265 = vector.load %arg2[%c5_45, %c0_46, %c128_47] : memref<16x4x256xf32, #tpu.memory_space<vmem>>, vector<1x4x128xf32>
    %266 = vector.shape_cast %265 : vector<1x4x128xf32> to vector<4x128xf32>
    %267 = vector.extract_strided_slice %266 {offsets = [0, 0], sizes = [1, 128], strides = [1, 1]} : vector<4x128xf32> to vector<1x128xf32>
    %268 = vector.broadcast %3 : vector<64x1xf32> to vector<64x128xf32>
    %269 = vector.broadcast %267 : vector<1x128xf32> to vector<64x128xf32>
    %270 = arith.mulf %268, %269 : vector<64x128xf32>
    %271 = vector.extract_strided_slice %266 {offsets = [1, 0], sizes = [1, 128], strides = [1, 1]} : vector<4x128xf32> to vector<1x128xf32>
    %272 = vector.broadcast %4 : vector<64x1xf32> to vector<64x128xf32>
    %273 = vector.broadcast %271 : vector<1x128xf32> to vector<64x128xf32>
    %274 = arith.mulf %272, %273 : vector<64x128xf32>
    %275 = arith.addf %270, %274 : vector<64x128xf32>
    %276 = vector.extract_strided_slice %266 {offsets = [2, 0], sizes = [1, 128], strides = [1, 1]} : vector<4x128xf32> to vector<1x128xf32>
    %277 = vector.broadcast %5 : vector<64x1xf32> to vector<64x128xf32>
    %278 = vector.broadcast %276 : vector<1x128xf32> to vector<64x128xf32>
    %279 = arith.mulf %277, %278 : vector<64x128xf32>
    %280 = arith.addf %275, %279 : vector<64x128xf32>
    %281 = vector.extract_strided_slice %266 {offsets = [3, 0], sizes = [1, 128], strides = [1, 1]} : vector<4x128xf32> to vector<1x128xf32>
    %282 = vector.broadcast %6 : vector<64x1xf32> to vector<64x128xf32>
    %283 = vector.broadcast %281 : vector<1x128xf32> to vector<64x128xf32>
    %284 = arith.mulf %282, %283 : vector<64x128xf32>
    %285 = arith.addf %280, %284 : vector<64x128xf32>
    %cst_48 = arith.constant dense<0xFF800000> : vector<64xf32>
    %286 = vector.multi_reduction <maximumf>, %285, %cst_48 [1] : vector<64x128xf32> to vector<64xf32>
    %287 = vector.shape_cast %286 : vector<64xf32> to vector<64x1xf32>
    %288 = arith.maximumf %264, %287 : vector<64x1xf32>
    %c6 = arith.constant 6 : index
    %c0_49 = arith.constant 0 : index
    %c0_50 = arith.constant 0 : index
    %289 = vector.load %arg2[%c6, %c0_49, %c0_50] : memref<16x4x256xf32, #tpu.memory_space<vmem>>, vector<1x4x128xf32>
    %290 = vector.shape_cast %289 : vector<1x4x128xf32> to vector<4x128xf32>
    %291 = vector.extract_strided_slice %290 {offsets = [0, 0], sizes = [1, 128], strides = [1, 1]} : vector<4x128xf32> to vector<1x128xf32>
    %292 = vector.broadcast %3 : vector<64x1xf32> to vector<64x128xf32>
    %293 = vector.broadcast %291 : vector<1x128xf32> to vector<64x128xf32>
    %294 = arith.mulf %292, %293 : vector<64x128xf32>
    %295 = vector.extract_strided_slice %290 {offsets = [1, 0], sizes = [1, 128], strides = [1, 1]} : vector<4x128xf32> to vector<1x128xf32>
    %296 = vector.broadcast %4 : vector<64x1xf32> to vector<64x128xf32>
    %297 = vector.broadcast %295 : vector<1x128xf32> to vector<64x128xf32>
    %298 = arith.mulf %296, %297 : vector<64x128xf32>
    %299 = arith.addf %294, %298 : vector<64x128xf32>
    %300 = vector.extract_strided_slice %290 {offsets = [2, 0], sizes = [1, 128], strides = [1, 1]} : vector<4x128xf32> to vector<1x128xf32>
    %301 = vector.broadcast %5 : vector<64x1xf32> to vector<64x128xf32>
    %302 = vector.broadcast %300 : vector<1x128xf32> to vector<64x128xf32>
    %303 = arith.mulf %301, %302 : vector<64x128xf32>
    %304 = arith.addf %299, %303 : vector<64x128xf32>
    %305 = vector.extract_strided_slice %290 {offsets = [3, 0], sizes = [1, 128], strides = [1, 1]} : vector<4x128xf32> to vector<1x128xf32>
    %306 = vector.broadcast %6 : vector<64x1xf32> to vector<64x128xf32>
    %307 = vector.broadcast %305 : vector<1x128xf32> to vector<64x128xf32>
    %308 = arith.mulf %306, %307 : vector<64x128xf32>
    %309 = arith.addf %304, %308 : vector<64x128xf32>
    %cst_51 = arith.constant dense<0xFF800000> : vector<64xf32>
    %310 = vector.multi_reduction <maximumf>, %309, %cst_51 [1] : vector<64x128xf32> to vector<64xf32>
    %311 = vector.shape_cast %310 : vector<64xf32> to vector<64x1xf32>
    %c6_52 = arith.constant 6 : index
    %c0_53 = arith.constant 0 : index
    %c128_54 = arith.constant 128 : index
    %312 = vector.load %arg2[%c6_52, %c0_53, %c128_54] : memref<16x4x256xf32, #tpu.memory_space<vmem>>, vector<1x4x128xf32>
    %313 = vector.shape_cast %312 : vector<1x4x128xf32> to vector<4x128xf32>
    %314 = vector.extract_strided_slice %313 {offsets = [0, 0], sizes = [1, 128], strides = [1, 1]} : vector<4x128xf32> to vector<1x128xf32>
    %315 = vector.broadcast %3 : vector<64x1xf32> to vector<64x128xf32>
    %316 = vector.broadcast %314 : vector<1x128xf32> to vector<64x128xf32>
    %317 = arith.mulf %315, %316 : vector<64x128xf32>
    %318 = vector.extract_strided_slice %313 {offsets = [1, 0], sizes = [1, 128], strides = [1, 1]} : vector<4x128xf32> to vector<1x128xf32>
    %319 = vector.broadcast %4 : vector<64x1xf32> to vector<64x128xf32>
    %320 = vector.broadcast %318 : vector<1x128xf32> to vector<64x128xf32>
    %321 = arith.mulf %319, %320 : vector<64x128xf32>
    %322 = arith.addf %317, %321 : vector<64x128xf32>
    %323 = vector.extract_strided_slice %313 {offsets = [2, 0], sizes = [1, 128], strides = [1, 1]} : vector<4x128xf32> to vector<1x128xf32>
    %324 = vector.broadcast %5 : vector<64x1xf32> to vector<64x128xf32>
    %325 = vector.broadcast %323 : vector<1x128xf32> to vector<64x128xf32>
    %326 = arith.mulf %324, %325 : vector<64x128xf32>
    %327 = arith.addf %322, %326 : vector<64x128xf32>
    %328 = vector.extract_strided_slice %313 {offsets = [3, 0], sizes = [1, 128], strides = [1, 1]} : vector<4x128xf32> to vector<1x128xf32>
    %329 = vector.broadcast %6 : vector<64x1xf32> to vector<64x128xf32>
    %330 = vector.broadcast %328 : vector<1x128xf32> to vector<64x128xf32>
    %331 = arith.mulf %329, %330 : vector<64x128xf32>
    %332 = arith.addf %327, %331 : vector<64x128xf32>
    %cst_55 = arith.constant dense<0xFF800000> : vector<64xf32>
    %333 = vector.multi_reduction <maximumf>, %332, %cst_55 [1] : vector<64x128xf32> to vector<64xf32>
    %334 = vector.shape_cast %333 : vector<64xf32> to vector<64x1xf32>
    %335 = arith.maximumf %311, %334 : vector<64x1xf32>
    %c7 = arith.constant 7 : index
    %c0_56 = arith.constant 0 : index
    %c0_57 = arith.constant 0 : index
    %336 = vector.load %arg2[%c7, %c0_56, %c0_57] : memref<16x4x256xf32, #tpu.memory_space<vmem>>, vector<1x4x128xf32>
    %337 = vector.shape_cast %336 : vector<1x4x128xf32> to vector<4x128xf32>
    %338 = vector.extract_strided_slice %337 {offsets = [0, 0], sizes = [1, 128], strides = [1, 1]} : vector<4x128xf32> to vector<1x128xf32>
    %339 = vector.broadcast %3 : vector<64x1xf32> to vector<64x128xf32>
    %340 = vector.broadcast %338 : vector<1x128xf32> to vector<64x128xf32>
    %341 = arith.mulf %339, %340 : vector<64x128xf32>
    %342 = vector.extract_strided_slice %337 {offsets = [1, 0], sizes = [1, 128], strides = [1, 1]} : vector<4x128xf32> to vector<1x128xf32>
    %343 = vector.broadcast %4 : vector<64x1xf32> to vector<64x128xf32>
    %344 = vector.broadcast %342 : vector<1x128xf32> to vector<64x128xf32>
    %345 = arith.mulf %343, %344 : vector<64x128xf32>
    %346 = arith.addf %341, %345 : vector<64x128xf32>
    %347 = vector.extract_strided_slice %337 {offsets = [2, 0], sizes = [1, 128], strides = [1, 1]} : vector<4x128xf32> to vector<1x128xf32>
    %348 = vector.broadcast %5 : vector<64x1xf32> to vector<64x128xf32>
    %349 = vector.broadcast %347 : vector<1x128xf32> to vector<64x128xf32>
    %350 = arith.mulf %348, %349 : vector<64x128xf32>
    %351 = arith.addf %346, %350 : vector<64x128xf32>
    %352 = vector.extract_strided_slice %337 {offsets = [3, 0], sizes = [1, 128], strides = [1, 1]} : vector<4x128xf32> to vector<1x128xf32>
    %353 = vector.broadcast %6 : vector<64x1xf32> to vector<64x128xf32>
    %354 = vector.broadcast %352 : vector<1x128xf32> to vector<64x128xf32>
    %355 = arith.mulf %353, %354 : vector<64x128xf32>
    %356 = arith.addf %351, %355 : vector<64x128xf32>
    %cst_58 = arith.constant dense<0xFF800000> : vector<64xf32>
    %357 = vector.multi_reduction <maximumf>, %356, %cst_58 [1] : vector<64x128xf32> to vector<64xf32>
    %358 = vector.shape_cast %357 : vector<64xf32> to vector<64x1xf32>
    %c7_59 = arith.constant 7 : index
    %c0_60 = arith.constant 0 : index
    %c128_61 = arith.constant 128 : index
    %359 = vector.load %arg2[%c7_59, %c0_60, %c128_61] : memref<16x4x256xf32, #tpu.memory_space<vmem>>, vector<1x4x128xf32>
    %360 = vector.shape_cast %359 : vector<1x4x128xf32> to vector<4x128xf32>
    %361 = vector.extract_strided_slice %360 {offsets = [0, 0], sizes = [1, 128], strides = [1, 1]} : vector<4x128xf32> to vector<1x128xf32>
    %362 = vector.broadcast %3 : vector<64x1xf32> to vector<64x128xf32>
    %363 = vector.broadcast %361 : vector<1x128xf32> to vector<64x128xf32>
    %364 = arith.mulf %362, %363 : vector<64x128xf32>
    %365 = vector.extract_strided_slice %360 {offsets = [1, 0], sizes = [1, 128], strides = [1, 1]} : vector<4x128xf32> to vector<1x128xf32>
    %366 = vector.broadcast %4 : vector<64x1xf32> to vector<64x128xf32>
    %367 = vector.broadcast %365 : vector<1x128xf32> to vector<64x128xf32>
    %368 = arith.mulf %366, %367 : vector<64x128xf32>
    %369 = arith.addf %364, %368 : vector<64x128xf32>
    %370 = vector.extract_strided_slice %360 {offsets = [2, 0], sizes = [1, 128], strides = [1, 1]} : vector<4x128xf32> to vector<1x128xf32>
    %371 = vector.broadcast %5 : vector<64x1xf32> to vector<64x128xf32>
    %372 = vector.broadcast %370 : vector<1x128xf32> to vector<64x128xf32>
    %373 = arith.mulf %371, %372 : vector<64x128xf32>
    %374 = arith.addf %369, %373 : vector<64x128xf32>
    %375 = vector.extract_strided_slice %360 {offsets = [3, 0], sizes = [1, 128], strides = [1, 1]} : vector<4x128xf32> to vector<1x128xf32>
    %376 = vector.broadcast %6 : vector<64x1xf32> to vector<64x128xf32>
    %377 = vector.broadcast %375 : vector<1x128xf32> to vector<64x128xf32>
    %378 = arith.mulf %376, %377 : vector<64x128xf32>
    %379 = arith.addf %374, %378 : vector<64x128xf32>
    %cst_62 = arith.constant dense<0xFF800000> : vector<64xf32>
    %380 = vector.multi_reduction <maximumf>, %379, %cst_62 [1] : vector<64x128xf32> to vector<64xf32>
    %381 = vector.shape_cast %380 : vector<64xf32> to vector<64x1xf32>
    %382 = arith.maximumf %358, %381 : vector<64x1xf32>
    %c8 = arith.constant 8 : index
    %c0_63 = arith.constant 0 : index
    %c0_64 = arith.constant 0 : index
    %383 = vector.load %arg2[%c8, %c0_63, %c0_64] : memref<16x4x256xf32, #tpu.memory_space<vmem>>, vector<1x4x128xf32>
    %384 = vector.shape_cast %383 : vector<1x4x128xf32> to vector<4x128xf32>
    %385 = vector.extract_strided_slice %384 {offsets = [0, 0], sizes = [1, 128], strides = [1, 1]} : vector<4x128xf32> to vector<1x128xf32>
    %386 = vector.broadcast %3 : vector<64x1xf32> to vector<64x128xf32>
    %387 = vector.broadcast %385 : vector<1x128xf32> to vector<64x128xf32>
    %388 = arith.mulf %386, %387 : vector<64x128xf32>
    %389 = vector.extract_strided_slice %384 {offsets = [1, 0], sizes = [1, 128], strides = [1, 1]} : vector<4x128xf32> to vector<1x128xf32>
    %390 = vector.broadcast %4 : vector<64x1xf32> to vector<64x128xf32>
    %391 = vector.broadcast %389 : vector<1x128xf32> to vector<64x128xf32>
    %392 = arith.mulf %390, %391 : vector<64x128xf32>
    %393 = arith.addf %388, %392 : vector<64x128xf32>
    %394 = vector.extract_strided_slice %384 {offsets = [2, 0], sizes = [1, 128], strides = [1, 1]} : vector<4x128xf32> to vector<1x128xf32>
    %395 = vector.broadcast %5 : vector<64x1xf32> to vector<64x128xf32>
    %396 = vector.broadcast %394 : vector<1x128xf32> to vector<64x128xf32>
    %397 = arith.mulf %395, %396 : vector<64x128xf32>
    %398 = arith.addf %393, %397 : vector<64x128xf32>
    %399 = vector.extract_strided_slice %384 {offsets = [3, 0], sizes = [1, 128], strides = [1, 1]} : vector<4x128xf32> to vector<1x128xf32>
    %400 = vector.broadcast %6 : vector<64x1xf32> to vector<64x128xf32>
    %401 = vector.broadcast %399 : vector<1x128xf32> to vector<64x128xf32>
    %402 = arith.mulf %400, %401 : vector<64x128xf32>
    %403 = arith.addf %398, %402 : vector<64x128xf32>
    %cst_65 = arith.constant dense<0xFF800000> : vector<64xf32>
    %404 = vector.multi_reduction <maximumf>, %403, %cst_65 [1] : vector<64x128xf32> to vector<64xf32>
    %405 = vector.shape_cast %404 : vector<64xf32> to vector<64x1xf32>
    %c8_66 = arith.constant 8 : index
    %c0_67 = arith.constant 0 : index
    %c128_68 = arith.constant 128 : index
    %406 = vector.load %arg2[%c8_66, %c0_67, %c128_68] : memref<16x4x256xf32, #tpu.memory_space<vmem>>, vector<1x4x128xf32>
    %407 = vector.shape_cast %406 : vector<1x4x128xf32> to vector<4x128xf32>
    %408 = vector.extract_strided_slice %407 {offsets = [0, 0], sizes = [1, 128], strides = [1, 1]} : vector<4x128xf32> to vector<1x128xf32>
    %409 = vector.broadcast %3 : vector<64x1xf32> to vector<64x128xf32>
    %410 = vector.broadcast %408 : vector<1x128xf32> to vector<64x128xf32>
    %411 = arith.mulf %409, %410 : vector<64x128xf32>
    %412 = vector.extract_strided_slice %407 {offsets = [1, 0], sizes = [1, 128], strides = [1, 1]} : vector<4x128xf32> to vector<1x128xf32>
    %413 = vector.broadcast %4 : vector<64x1xf32> to vector<64x128xf32>
    %414 = vector.broadcast %412 : vector<1x128xf32> to vector<64x128xf32>
    %415 = arith.mulf %413, %414 : vector<64x128xf32>
    %416 = arith.addf %411, %415 : vector<64x128xf32>
    %417 = vector.extract_strided_slice %407 {offsets = [2, 0], sizes = [1, 128], strides = [1, 1]} : vector<4x128xf32> to vector<1x128xf32>
    %418 = vector.broadcast %5 : vector<64x1xf32> to vector<64x128xf32>
    %419 = vector.broadcast %417 : vector<1x128xf32> to vector<64x128xf32>
    %420 = arith.mulf %418, %419 : vector<64x128xf32>
    %421 = arith.addf %416, %420 : vector<64x128xf32>
    %422 = vector.extract_strided_slice %407 {offsets = [3, 0], sizes = [1, 128], strides = [1, 1]} : vector<4x128xf32> to vector<1x128xf32>
    %423 = vector.broadcast %6 : vector<64x1xf32> to vector<64x128xf32>
    %424 = vector.broadcast %422 : vector<1x128xf32> to vector<64x128xf32>
    %425 = arith.mulf %423, %424 : vector<64x128xf32>
    %426 = arith.addf %421, %425 : vector<64x128xf32>
    %cst_69 = arith.constant dense<0xFF800000> : vector<64xf32>
    %427 = vector.multi_reduction <maximumf>, %426, %cst_69 [1] : vector<64x128xf32> to vector<64xf32>
    %428 = vector.shape_cast %427 : vector<64xf32> to vector<64x1xf32>
    %429 = arith.maximumf %405, %428 : vector<64x1xf32>
    %c9 = arith.constant 9 : index
    %c0_70 = arith.constant 0 : index
    %c0_71 = arith.constant 0 : index
    %430 = vector.load %arg2[%c9, %c0_70, %c0_71] : memref<16x4x256xf32, #tpu.memory_space<vmem>>, vector<1x4x128xf32>
    %431 = vector.shape_cast %430 : vector<1x4x128xf32> to vector<4x128xf32>
    %432 = vector.extract_strided_slice %431 {offsets = [0, 0], sizes = [1, 128], strides = [1, 1]} : vector<4x128xf32> to vector<1x128xf32>
    %433 = vector.broadcast %3 : vector<64x1xf32> to vector<64x128xf32>
    %434 = vector.broadcast %432 : vector<1x128xf32> to vector<64x128xf32>
    %435 = arith.mulf %433, %434 : vector<64x128xf32>
    %436 = vector.extract_strided_slice %431 {offsets = [1, 0], sizes = [1, 128], strides = [1, 1]} : vector<4x128xf32> to vector<1x128xf32>
    %437 = vector.broadcast %4 : vector<64x1xf32> to vector<64x128xf32>
    %438 = vector.broadcast %436 : vector<1x128xf32> to vector<64x128xf32>
    %439 = arith.mulf %437, %438 : vector<64x128xf32>
    %440 = arith.addf %435, %439 : vector<64x128xf32>
    %441 = vector.extract_strided_slice %431 {offsets = [2, 0], sizes = [1, 128], strides = [1, 1]} : vector<4x128xf32> to vector<1x128xf32>
    %442 = vector.broadcast %5 : vector<64x1xf32> to vector<64x128xf32>
    %443 = vector.broadcast %441 : vector<1x128xf32> to vector<64x128xf32>
    %444 = arith.mulf %442, %443 : vector<64x128xf32>
    %445 = arith.addf %440, %444 : vector<64x128xf32>
    %446 = vector.extract_strided_slice %431 {offsets = [3, 0], sizes = [1, 128], strides = [1, 1]} : vector<4x128xf32> to vector<1x128xf32>
    %447 = vector.broadcast %6 : vector<64x1xf32> to vector<64x128xf32>
    %448 = vector.broadcast %446 : vector<1x128xf32> to vector<64x128xf32>
    %449 = arith.mulf %447, %448 : vector<64x128xf32>
    %450 = arith.addf %445, %449 : vector<64x128xf32>
    %cst_72 = arith.constant dense<0xFF800000> : vector<64xf32>
    %451 = vector.multi_reduction <maximumf>, %450, %cst_72 [1] : vector<64x128xf32> to vector<64xf32>
    %452 = vector.shape_cast %451 : vector<64xf32> to vector<64x1xf32>
    %c9_73 = arith.constant 9 : index
    %c0_74 = arith.constant 0 : index
    %c128_75 = arith.constant 128 : index
    %453 = vector.load %arg2[%c9_73, %c0_74, %c128_75] : memref<16x4x256xf32, #tpu.memory_space<vmem>>, vector<1x4x128xf32>
    %454 = vector.shape_cast %453 : vector<1x4x128xf32> to vector<4x128xf32>
    %455 = vector.extract_strided_slice %454 {offsets = [0, 0], sizes = [1, 128], strides = [1, 1]} : vector<4x128xf32> to vector<1x128xf32>
    %456 = vector.broadcast %3 : vector<64x1xf32> to vector<64x128xf32>
    %457 = vector.broadcast %455 : vector<1x128xf32> to vector<64x128xf32>
    %458 = arith.mulf %456, %457 : vector<64x128xf32>
    %459 = vector.extract_strided_slice %454 {offsets = [1, 0], sizes = [1, 128], strides = [1, 1]} : vector<4x128xf32> to vector<1x128xf32>
    %460 = vector.broadcast %4 : vector<64x1xf32> to vector<64x128xf32>
    %461 = vector.broadcast %459 : vector<1x128xf32> to vector<64x128xf32>
    %462 = arith.mulf %460, %461 : vector<64x128xf32>
    %463 = arith.addf %458, %462 : vector<64x128xf32>
    %464 = vector.extract_strided_slice %454 {offsets = [2, 0], sizes = [1, 128], strides = [1, 1]} : vector<4x128xf32> to vector<1x128xf32>
    %465 = vector.broadcast %5 : vector<64x1xf32> to vector<64x128xf32>
    %466 = vector.broadcast %464 : vector<1x128xf32> to vector<64x128xf32>
    %467 = arith.mulf %465, %466 : vector<64x128xf32>
    %468 = arith.addf %463, %467 : vector<64x128xf32>
    %469 = vector.extract_strided_slice %454 {offsets = [3, 0], sizes = [1, 128], strides = [1, 1]} : vector<4x128xf32> to vector<1x128xf32>
    %470 = vector.broadcast %6 : vector<64x1xf32> to vector<64x128xf32>
    %471 = vector.broadcast %469 : vector<1x128xf32> to vector<64x128xf32>
    %472 = arith.mulf %470, %471 : vector<64x128xf32>
    %473 = arith.addf %468, %472 : vector<64x128xf32>
    %cst_76 = arith.constant dense<0xFF800000> : vector<64xf32>
    %474 = vector.multi_reduction <maximumf>, %473, %cst_76 [1] : vector<64x128xf32> to vector<64xf32>
    %475 = vector.shape_cast %474 : vector<64xf32> to vector<64x1xf32>
    %476 = arith.maximumf %452, %475 : vector<64x1xf32>
    %c10 = arith.constant 10 : index
    %c0_77 = arith.constant 0 : index
    %c0_78 = arith.constant 0 : index
    %477 = vector.load %arg2[%c10, %c0_77, %c0_78] : memref<16x4x256xf32, #tpu.memory_space<vmem>>, vector<1x4x128xf32>
    %478 = vector.shape_cast %477 : vector<1x4x128xf32> to vector<4x128xf32>
    %479 = vector.extract_strided_slice %478 {offsets = [0, 0], sizes = [1, 128], strides = [1, 1]} : vector<4x128xf32> to vector<1x128xf32>
    %480 = vector.broadcast %3 : vector<64x1xf32> to vector<64x128xf32>
    %481 = vector.broadcast %479 : vector<1x128xf32> to vector<64x128xf32>
    %482 = arith.mulf %480, %481 : vector<64x128xf32>
    %483 = vector.extract_strided_slice %478 {offsets = [1, 0], sizes = [1, 128], strides = [1, 1]} : vector<4x128xf32> to vector<1x128xf32>
    %484 = vector.broadcast %4 : vector<64x1xf32> to vector<64x128xf32>
    %485 = vector.broadcast %483 : vector<1x128xf32> to vector<64x128xf32>
    %486 = arith.mulf %484, %485 : vector<64x128xf32>
    %487 = arith.addf %482, %486 : vector<64x128xf32>
    %488 = vector.extract_strided_slice %478 {offsets = [2, 0], sizes = [1, 128], strides = [1, 1]} : vector<4x128xf32> to vector<1x128xf32>
    %489 = vector.broadcast %5 : vector<64x1xf32> to vector<64x128xf32>
    %490 = vector.broadcast %488 : vector<1x128xf32> to vector<64x128xf32>
    %491 = arith.mulf %489, %490 : vector<64x128xf32>
    %492 = arith.addf %487, %491 : vector<64x128xf32>
    %493 = vector.extract_strided_slice %478 {offsets = [3, 0], sizes = [1, 128], strides = [1, 1]} : vector<4x128xf32> to vector<1x128xf32>
    %494 = vector.broadcast %6 : vector<64x1xf32> to vector<64x128xf32>
    %495 = vector.broadcast %493 : vector<1x128xf32> to vector<64x128xf32>
    %496 = arith.mulf %494, %495 : vector<64x128xf32>
    %497 = arith.addf %492, %496 : vector<64x128xf32>
    %cst_79 = arith.constant dense<0xFF800000> : vector<64xf32>
    %498 = vector.multi_reduction <maximumf>, %497, %cst_79 [1] : vector<64x128xf32> to vector<64xf32>
    %499 = vector.shape_cast %498 : vector<64xf32> to vector<64x1xf32>
    %c10_80 = arith.constant 10 : index
    %c0_81 = arith.constant 0 : index
    %c128_82 = arith.constant 128 : index
    %500 = vector.load %arg2[%c10_80, %c0_81, %c128_82] : memref<16x4x256xf32, #tpu.memory_space<vmem>>, vector<1x4x128xf32>
    %501 = vector.shape_cast %500 : vector<1x4x128xf32> to vector<4x128xf32>
    %502 = vector.extract_strided_slice %501 {offsets = [0, 0], sizes = [1, 128], strides = [1, 1]} : vector<4x128xf32> to vector<1x128xf32>
    %503 = vector.broadcast %3 : vector<64x1xf32> to vector<64x128xf32>
    %504 = vector.broadcast %502 : vector<1x128xf32> to vector<64x128xf32>
    %505 = arith.mulf %503, %504 : vector<64x128xf32>
    %506 = vector.extract_strided_slice %501 {offsets = [1, 0], sizes = [1, 128], strides = [1, 1]} : vector<4x128xf32> to vector<1x128xf32>
    %507 = vector.broadcast %4 : vector<64x1xf32> to vector<64x128xf32>
    %508 = vector.broadcast %506 : vector<1x128xf32> to vector<64x128xf32>
    %509 = arith.mulf %507, %508 : vector<64x128xf32>
    %510 = arith.addf %505, %509 : vector<64x128xf32>
    %511 = vector.extract_strided_slice %501 {offsets = [2, 0], sizes = [1, 128], strides = [1, 1]} : vector<4x128xf32> to vector<1x128xf32>
    %512 = vector.broadcast %5 : vector<64x1xf32> to vector<64x128xf32>
    %513 = vector.broadcast %511 : vector<1x128xf32> to vector<64x128xf32>
    %514 = arith.mulf %512, %513 : vector<64x128xf32>
    %515 = arith.addf %510, %514 : vector<64x128xf32>
    %516 = vector.extract_strided_slice %501 {offsets = [3, 0], sizes = [1, 128], strides = [1, 1]} : vector<4x128xf32> to vector<1x128xf32>
    %517 = vector.broadcast %6 : vector<64x1xf32> to vector<64x128xf32>
    %518 = vector.broadcast %516 : vector<1x128xf32> to vector<64x128xf32>
    %519 = arith.mulf %517, %518 : vector<64x128xf32>
    %520 = arith.addf %515, %519 : vector<64x128xf32>
    %cst_83 = arith.constant dense<0xFF800000> : vector<64xf32>
    %521 = vector.multi_reduction <maximumf>, %520, %cst_83 [1] : vector<64x128xf32> to vector<64xf32>
    %522 = vector.shape_cast %521 : vector<64xf32> to vector<64x1xf32>
    %523 = arith.maximumf %499, %522 : vector<64x1xf32>
    %c11 = arith.constant 11 : index
    %c0_84 = arith.constant 0 : index
    %c0_85 = arith.constant 0 : index
    %524 = vector.load %arg2[%c11, %c0_84, %c0_85] : memref<16x4x256xf32, #tpu.memory_space<vmem>>, vector<1x4x128xf32>
    %525 = vector.shape_cast %524 : vector<1x4x128xf32> to vector<4x128xf32>
    %526 = vector.extract_strided_slice %525 {offsets = [0, 0], sizes = [1, 128], strides = [1, 1]} : vector<4x128xf32> to vector<1x128xf32>
    %527 = vector.broadcast %3 : vector<64x1xf32> to vector<64x128xf32>
    %528 = vector.broadcast %526 : vector<1x128xf32> to vector<64x128xf32>
    %529 = arith.mulf %527, %528 : vector<64x128xf32>
    %530 = vector.extract_strided_slice %525 {offsets = [1, 0], sizes = [1, 128], strides = [1, 1]} : vector<4x128xf32> to vector<1x128xf32>
    %531 = vector.broadcast %4 : vector<64x1xf32> to vector<64x128xf32>
    %532 = vector.broadcast %530 : vector<1x128xf32> to vector<64x128xf32>
    %533 = arith.mulf %531, %532 : vector<64x128xf32>
    %534 = arith.addf %529, %533 : vector<64x128xf32>
    %535 = vector.extract_strided_slice %525 {offsets = [2, 0], sizes = [1, 128], strides = [1, 1]} : vector<4x128xf32> to vector<1x128xf32>
    %536 = vector.broadcast %5 : vector<64x1xf32> to vector<64x128xf32>
    %537 = vector.broadcast %535 : vector<1x128xf32> to vector<64x128xf32>
    %538 = arith.mulf %536, %537 : vector<64x128xf32>
    %539 = arith.addf %534, %538 : vector<64x128xf32>
    %540 = vector.extract_strided_slice %525 {offsets = [3, 0], sizes = [1, 128], strides = [1, 1]} : vector<4x128xf32> to vector<1x128xf32>
    %541 = vector.broadcast %6 : vector<64x1xf32> to vector<64x128xf32>
    %542 = vector.broadcast %540 : vector<1x128xf32> to vector<64x128xf32>
    %543 = arith.mulf %541, %542 : vector<64x128xf32>
    %544 = arith.addf %539, %543 : vector<64x128xf32>
    %cst_86 = arith.constant dense<0xFF800000> : vector<64xf32>
    %545 = vector.multi_reduction <maximumf>, %544, %cst_86 [1] : vector<64x128xf32> to vector<64xf32>
    %546 = vector.shape_cast %545 : vector<64xf32> to vector<64x1xf32>
    %c11_87 = arith.constant 11 : index
    %c0_88 = arith.constant 0 : index
    %c128_89 = arith.constant 128 : index
    %547 = vector.load %arg2[%c11_87, %c0_88, %c128_89] : memref<16x4x256xf32, #tpu.memory_space<vmem>>, vector<1x4x128xf32>
    %548 = vector.shape_cast %547 : vector<1x4x128xf32> to vector<4x128xf32>
    %549 = vector.extract_strided_slice %548 {offsets = [0, 0], sizes = [1, 128], strides = [1, 1]} : vector<4x128xf32> to vector<1x128xf32>
    %550 = vector.broadcast %3 : vector<64x1xf32> to vector<64x128xf32>
    %551 = vector.broadcast %549 : vector<1x128xf32> to vector<64x128xf32>
    %552 = arith.mulf %550, %551 : vector<64x128xf32>
    %553 = vector.extract_strided_slice %548 {offsets = [1, 0], sizes = [1, 128], strides = [1, 1]} : vector<4x128xf32> to vector<1x128xf32>
    %554 = vector.broadcast %4 : vector<64x1xf32> to vector<64x128xf32>
    %555 = vector.broadcast %553 : vector<1x128xf32> to vector<64x128xf32>
    %556 = arith.mulf %554, %555 : vector<64x128xf32>
    %557 = arith.addf %552, %556 : vector<64x128xf32>
    %558 = vector.extract_strided_slice %548 {offsets = [2, 0], sizes = [1, 128], strides = [1, 1]} : vector<4x128xf32> to vector<1x128xf32>
    %559 = vector.broadcast %5 : vector<64x1xf32> to vector<64x128xf32>
    %560 = vector.broadcast %558 : vector<1x128xf32> to vector<64x128xf32>
    %561 = arith.mulf %559, %560 : vector<64x128xf32>
    %562 = arith.addf %557, %561 : vector<64x128xf32>
    %563 = vector.extract_strided_slice %548 {offsets = [3, 0], sizes = [1, 128], strides = [1, 1]} : vector<4x128xf32> to vector<1x128xf32>
    %564 = vector.broadcast %6 : vector<64x1xf32> to vector<64x128xf32>
    %565 = vector.broadcast %563 : vector<1x128xf32> to vector<64x128xf32>
    %566 = arith.mulf %564, %565 : vector<64x128xf32>
    %567 = arith.addf %562, %566 : vector<64x128xf32>
    %cst_90 = arith.constant dense<0xFF800000> : vector<64xf32>
    %568 = vector.multi_reduction <maximumf>, %567, %cst_90 [1] : vector<64x128xf32> to vector<64xf32>
    %569 = vector.shape_cast %568 : vector<64xf32> to vector<64x1xf32>
    %570 = arith.maximumf %546, %569 : vector<64x1xf32>
    %c12 = arith.constant 12 : index
    %c0_91 = arith.constant 0 : index
    %c0_92 = arith.constant 0 : index
    %571 = vector.load %arg2[%c12, %c0_91, %c0_92] : memref<16x4x256xf32, #tpu.memory_space<vmem>>, vector<1x4x128xf32>
    %572 = vector.shape_cast %571 : vector<1x4x128xf32> to vector<4x128xf32>
    %573 = vector.extract_strided_slice %572 {offsets = [0, 0], sizes = [1, 128], strides = [1, 1]} : vector<4x128xf32> to vector<1x128xf32>
    %574 = vector.broadcast %3 : vector<64x1xf32> to vector<64x128xf32>
    %575 = vector.broadcast %573 : vector<1x128xf32> to vector<64x128xf32>
    %576 = arith.mulf %574, %575 : vector<64x128xf32>
    %577 = vector.extract_strided_slice %572 {offsets = [1, 0], sizes = [1, 128], strides = [1, 1]} : vector<4x128xf32> to vector<1x128xf32>
    %578 = vector.broadcast %4 : vector<64x1xf32> to vector<64x128xf32>
    %579 = vector.broadcast %577 : vector<1x128xf32> to vector<64x128xf32>
    %580 = arith.mulf %578, %579 : vector<64x128xf32>
    %581 = arith.addf %576, %580 : vector<64x128xf32>
    %582 = vector.extract_strided_slice %572 {offsets = [2, 0], sizes = [1, 128], strides = [1, 1]} : vector<4x128xf32> to vector<1x128xf32>
    %583 = vector.broadcast %5 : vector<64x1xf32> to vector<64x128xf32>
    %584 = vector.broadcast %582 : vector<1x128xf32> to vector<64x128xf32>
    %585 = arith.mulf %583, %584 : vector<64x128xf32>
    %586 = arith.addf %581, %585 : vector<64x128xf32>
    %587 = vector.extract_strided_slice %572 {offsets = [3, 0], sizes = [1, 128], strides = [1, 1]} : vector<4x128xf32> to vector<1x128xf32>
    %588 = vector.broadcast %6 : vector<64x1xf32> to vector<64x128xf32>
    %589 = vector.broadcast %587 : vector<1x128xf32> to vector<64x128xf32>
    %590 = arith.mulf %588, %589 : vector<64x128xf32>
    %591 = arith.addf %586, %590 : vector<64x128xf32>
    %cst_93 = arith.constant dense<0xFF800000> : vector<64xf32>
    %592 = vector.multi_reduction <maximumf>, %591, %cst_93 [1] : vector<64x128xf32> to vector<64xf32>
    %593 = vector.shape_cast %592 : vector<64xf32> to vector<64x1xf32>
    %c12_94 = arith.constant 12 : index
    %c0_95 = arith.constant 0 : index
    %c128_96 = arith.constant 128 : index
    %594 = vector.load %arg2[%c12_94, %c0_95, %c128_96] : memref<16x4x256xf32, #tpu.memory_space<vmem>>, vector<1x4x128xf32>
    %595 = vector.shape_cast %594 : vector<1x4x128xf32> to vector<4x128xf32>
    %596 = vector.extract_strided_slice %595 {offsets = [0, 0], sizes = [1, 128], strides = [1, 1]} : vector<4x128xf32> to vector<1x128xf32>
    %597 = vector.broadcast %3 : vector<64x1xf32> to vector<64x128xf32>
    %598 = vector.broadcast %596 : vector<1x128xf32> to vector<64x128xf32>
    %599 = arith.mulf %597, %598 : vector<64x128xf32>
    %600 = vector.extract_strided_slice %595 {offsets = [1, 0], sizes = [1, 128], strides = [1, 1]} : vector<4x128xf32> to vector<1x128xf32>
    %601 = vector.broadcast %4 : vector<64x1xf32> to vector<64x128xf32>
    %602 = vector.broadcast %600 : vector<1x128xf32> to vector<64x128xf32>
    %603 = arith.mulf %601, %602 : vector<64x128xf32>
    %604 = arith.addf %599, %603 : vector<64x128xf32>
    %605 = vector.extract_strided_slice %595 {offsets = [2, 0], sizes = [1, 128], strides = [1, 1]} : vector<4x128xf32> to vector<1x128xf32>
    %606 = vector.broadcast %5 : vector<64x1xf32> to vector<64x128xf32>
    %607 = vector.broadcast %605 : vector<1x128xf32> to vector<64x128xf32>
    %608 = arith.mulf %606, %607 : vector<64x128xf32>
    %609 = arith.addf %604, %608 : vector<64x128xf32>
    %610 = vector.extract_strided_slice %595 {offsets = [3, 0], sizes = [1, 128], strides = [1, 1]} : vector<4x128xf32> to vector<1x128xf32>
    %611 = vector.broadcast %6 : vector<64x1xf32> to vector<64x128xf32>
    %612 = vector.broadcast %610 : vector<1x128xf32> to vector<64x128xf32>
    %613 = arith.mulf %611, %612 : vector<64x128xf32>
    %614 = arith.addf %609, %613 : vector<64x128xf32>
    %cst_97 = arith.constant dense<0xFF800000> : vector<64xf32>
    %615 = vector.multi_reduction <maximumf>, %614, %cst_97 [1] : vector<64x128xf32> to vector<64xf32>
    %616 = vector.shape_cast %615 : vector<64xf32> to vector<64x1xf32>
    %617 = arith.maximumf %593, %616 : vector<64x1xf32>
    %c13 = arith.constant 13 : index
    %c0_98 = arith.constant 0 : index
    %c0_99 = arith.constant 0 : index
    %618 = vector.load %arg2[%c13, %c0_98, %c0_99] : memref<16x4x256xf32, #tpu.memory_space<vmem>>, vector<1x4x128xf32>
    %619 = vector.shape_cast %618 : vector<1x4x128xf32> to vector<4x128xf32>
    %620 = vector.extract_strided_slice %619 {offsets = [0, 0], sizes = [1, 128], strides = [1, 1]} : vector<4x128xf32> to vector<1x128xf32>
    %621 = vector.broadcast %3 : vector<64x1xf32> to vector<64x128xf32>
    %622 = vector.broadcast %620 : vector<1x128xf32> to vector<64x128xf32>
    %623 = arith.mulf %621, %622 : vector<64x128xf32>
    %624 = vector.extract_strided_slice %619 {offsets = [1, 0], sizes = [1, 128], strides = [1, 1]} : vector<4x128xf32> to vector<1x128xf32>
    %625 = vector.broadcast %4 : vector<64x1xf32> to vector<64x128xf32>
    %626 = vector.broadcast %624 : vector<1x128xf32> to vector<64x128xf32>
    %627 = arith.mulf %625, %626 : vector<64x128xf32>
    %628 = arith.addf %623, %627 : vector<64x128xf32>
    %629 = vector.extract_strided_slice %619 {offsets = [2, 0], sizes = [1, 128], strides = [1, 1]} : vector<4x128xf32> to vector<1x128xf32>
    %630 = vector.broadcast %5 : vector<64x1xf32> to vector<64x128xf32>
    %631 = vector.broadcast %629 : vector<1x128xf32> to vector<64x128xf32>
    %632 = arith.mulf %630, %631 : vector<64x128xf32>
    %633 = arith.addf %628, %632 : vector<64x128xf32>
    %634 = vector.extract_strided_slice %619 {offsets = [3, 0], sizes = [1, 128], strides = [1, 1]} : vector<4x128xf32> to vector<1x128xf32>
    %635 = vector.broadcast %6 : vector<64x1xf32> to vector<64x128xf32>
    %636 = vector.broadcast %634 : vector<1x128xf32> to vector<64x128xf32>
    %637 = arith.mulf %635, %636 : vector<64x128xf32>
    %638 = arith.addf %633, %637 : vector<64x128xf32>
    %cst_100 = arith.constant dense<0xFF800000> : vector<64xf32>
    %639 = vector.multi_reduction <maximumf>, %638, %cst_100 [1] : vector<64x128xf32> to vector<64xf32>
    %640 = vector.shape_cast %639 : vector<64xf32> to vector<64x1xf32>
    %c13_101 = arith.constant 13 : index
    %c0_102 = arith.constant 0 : index
    %c128_103 = arith.constant 128 : index
    %641 = vector.load %arg2[%c13_101, %c0_102, %c128_103] : memref<16x4x256xf32, #tpu.memory_space<vmem>>, vector<1x4x128xf32>
    %642 = vector.shape_cast %641 : vector<1x4x128xf32> to vector<4x128xf32>
    %643 = vector.extract_strided_slice %642 {offsets = [0, 0], sizes = [1, 128], strides = [1, 1]} : vector<4x128xf32> to vector<1x128xf32>
    %644 = vector.broadcast %3 : vector<64x1xf32> to vector<64x128xf32>
    %645 = vector.broadcast %643 : vector<1x128xf32> to vector<64x128xf32>
    %646 = arith.mulf %644, %645 : vector<64x128xf32>
    %647 = vector.extract_strided_slice %642 {offsets = [1, 0], sizes = [1, 128], strides = [1, 1]} : vector<4x128xf32> to vector<1x128xf32>
    %648 = vector.broadcast %4 : vector<64x1xf32> to vector<64x128xf32>
    %649 = vector.broadcast %647 : vector<1x128xf32> to vector<64x128xf32>
    %650 = arith.mulf %648, %649 : vector<64x128xf32>
    %651 = arith.addf %646, %650 : vector<64x128xf32>
    %652 = vector.extract_strided_slice %642 {offsets = [2, 0], sizes = [1, 128], strides = [1, 1]} : vector<4x128xf32> to vector<1x128xf32>
    %653 = vector.broadcast %5 : vector<64x1xf32> to vector<64x128xf32>
    %654 = vector.broadcast %652 : vector<1x128xf32> to vector<64x128xf32>
    %655 = arith.mulf %653, %654 : vector<64x128xf32>
    %656 = arith.addf %651, %655 : vector<64x128xf32>
    %657 = vector.extract_strided_slice %642 {offsets = [3, 0], sizes = [1, 128], strides = [1, 1]} : vector<4x128xf32> to vector<1x128xf32>
    %658 = vector.broadcast %6 : vector<64x1xf32> to vector<64x128xf32>
    %659 = vector.broadcast %657 : vector<1x128xf32> to vector<64x128xf32>
    %660 = arith.mulf %658, %659 : vector<64x128xf32>
    %661 = arith.addf %656, %660 : vector<64x128xf32>
    %cst_104 = arith.constant dense<0xFF800000> : vector<64xf32>
    %662 = vector.multi_reduction <maximumf>, %661, %cst_104 [1] : vector<64x128xf32> to vector<64xf32>
    %663 = vector.shape_cast %662 : vector<64xf32> to vector<64x1xf32>
    %664 = arith.maximumf %640, %663 : vector<64x1xf32>
    %c14 = arith.constant 14 : index
    %c0_105 = arith.constant 0 : index
    %c0_106 = arith.constant 0 : index
    %665 = vector.load %arg2[%c14, %c0_105, %c0_106] : memref<16x4x256xf32, #tpu.memory_space<vmem>>, vector<1x4x128xf32>
    %666 = vector.shape_cast %665 : vector<1x4x128xf32> to vector<4x128xf32>
    %667 = vector.extract_strided_slice %666 {offsets = [0, 0], sizes = [1, 128], strides = [1, 1]} : vector<4x128xf32> to vector<1x128xf32>
    %668 = vector.broadcast %3 : vector<64x1xf32> to vector<64x128xf32>
    %669 = vector.broadcast %667 : vector<1x128xf32> to vector<64x128xf32>
    %670 = arith.mulf %668, %669 : vector<64x128xf32>
    %671 = vector.extract_strided_slice %666 {offsets = [1, 0], sizes = [1, 128], strides = [1, 1]} : vector<4x128xf32> to vector<1x128xf32>
    %672 = vector.broadcast %4 : vector<64x1xf32> to vector<64x128xf32>
    %673 = vector.broadcast %671 : vector<1x128xf32> to vector<64x128xf32>
    %674 = arith.mulf %672, %673 : vector<64x128xf32>
    %675 = arith.addf %670, %674 : vector<64x128xf32>
    %676 = vector.extract_strided_slice %666 {offsets = [2, 0], sizes = [1, 128], strides = [1, 1]} : vector<4x128xf32> to vector<1x128xf32>
    %677 = vector.broadcast %5 : vector<64x1xf32> to vector<64x128xf32>
    %678 = vector.broadcast %676 : vector<1x128xf32> to vector<64x128xf32>
    %679 = arith.mulf %677, %678 : vector<64x128xf32>
    %680 = arith.addf %675, %679 : vector<64x128xf32>
    %681 = vector.extract_strided_slice %666 {offsets = [3, 0], sizes = [1, 128], strides = [1, 1]} : vector<4x128xf32> to vector<1x128xf32>
    %682 = vector.broadcast %6 : vector<64x1xf32> to vector<64x128xf32>
    %683 = vector.broadcast %681 : vector<1x128xf32> to vector<64x128xf32>
    %684 = arith.mulf %682, %683 : vector<64x128xf32>
    %685 = arith.addf %680, %684 : vector<64x128xf32>
    %cst_107 = arith.constant dense<0xFF800000> : vector<64xf32>
    %686 = vector.multi_reduction <maximumf>, %685, %cst_107 [1] : vector<64x128xf32> to vector<64xf32>
    %687 = vector.shape_cast %686 : vector<64xf32> to vector<64x1xf32>
    %c14_108 = arith.constant 14 : index
    %c0_109 = arith.constant 0 : index
    %c128_110 = arith.constant 128 : index
    %688 = vector.load %arg2[%c14_108, %c0_109, %c128_110] : memref<16x4x256xf32, #tpu.memory_space<vmem>>, vector<1x4x128xf32>
    %689 = vector.shape_cast %688 : vector<1x4x128xf32> to vector<4x128xf32>
    %690 = vector.extract_strided_slice %689 {offsets = [0, 0], sizes = [1, 128], strides = [1, 1]} : vector<4x128xf32> to vector<1x128xf32>
    %691 = vector.broadcast %3 : vector<64x1xf32> to vector<64x128xf32>
    %692 = vector.broadcast %690 : vector<1x128xf32> to vector<64x128xf32>
    %693 = arith.mulf %691, %692 : vector<64x128xf32>
    %694 = vector.extract_strided_slice %689 {offsets = [1, 0], sizes = [1, 128], strides = [1, 1]} : vector<4x128xf32> to vector<1x128xf32>
    %695 = vector.broadcast %4 : vector<64x1xf32> to vector<64x128xf32>
    %696 = vector.broadcast %694 : vector<1x128xf32> to vector<64x128xf32>
    %697 = arith.mulf %695, %696 : vector<64x128xf32>
    %698 = arith.addf %693, %697 : vector<64x128xf32>
    %699 = vector.extract_strided_slice %689 {offsets = [2, 0], sizes = [1, 128], strides = [1, 1]} : vector<4x128xf32> to vector<1x128xf32>
    %700 = vector.broadcast %5 : vector<64x1xf32> to vector<64x128xf32>
    %701 = vector.broadcast %699 : vector<1x128xf32> to vector<64x128xf32>
    %702 = arith.mulf %700, %701 : vector<64x128xf32>
    %703 = arith.addf %698, %702 : vector<64x128xf32>
    %704 = vector.extract_strided_slice %689 {offsets = [3, 0], sizes = [1, 128], strides = [1, 1]} : vector<4x128xf32> to vector<1x128xf32>
    %705 = vector.broadcast %6 : vector<64x1xf32> to vector<64x128xf32>
    %706 = vector.broadcast %704 : vector<1x128xf32> to vector<64x128xf32>
    %707 = arith.mulf %705, %706 : vector<64x128xf32>
    %708 = arith.addf %703, %707 : vector<64x128xf32>
    %cst_111 = arith.constant dense<0xFF800000> : vector<64xf32>
    %709 = vector.multi_reduction <maximumf>, %708, %cst_111 [1] : vector<64x128xf32> to vector<64xf32>
    %710 = vector.shape_cast %709 : vector<64xf32> to vector<64x1xf32>
    %711 = arith.maximumf %687, %710 : vector<64x1xf32>
    %c15 = arith.constant 15 : index
    %c0_112 = arith.constant 0 : index
    %c0_113 = arith.constant 0 : index
    %712 = vector.load %arg2[%c15, %c0_112, %c0_113] : memref<16x4x256xf32, #tpu.memory_space<vmem>>, vector<1x4x128xf32>
    %713 = vector.shape_cast %712 : vector<1x4x128xf32> to vector<4x128xf32>
    %714 = vector.extract_strided_slice %713 {offsets = [0, 0], sizes = [1, 128], strides = [1, 1]} : vector<4x128xf32> to vector<1x128xf32>
    %715 = vector.broadcast %3 : vector<64x1xf32> to vector<64x128xf32>
    %716 = vector.broadcast %714 : vector<1x128xf32> to vector<64x128xf32>
    %717 = arith.mulf %715, %716 : vector<64x128xf32>
    %718 = vector.extract_strided_slice %713 {offsets = [1, 0], sizes = [1, 128], strides = [1, 1]} : vector<4x128xf32> to vector<1x128xf32>
    %719 = vector.broadcast %4 : vector<64x1xf32> to vector<64x128xf32>
    %720 = vector.broadcast %718 : vector<1x128xf32> to vector<64x128xf32>
    %721 = arith.mulf %719, %720 : vector<64x128xf32>
    %722 = arith.addf %717, %721 : vector<64x128xf32>
    %723 = vector.extract_strided_slice %713 {offsets = [2, 0], sizes = [1, 128], strides = [1, 1]} : vector<4x128xf32> to vector<1x128xf32>
    %724 = vector.broadcast %5 : vector<64x1xf32> to vector<64x128xf32>
    %725 = vector.broadcast %723 : vector<1x128xf32> to vector<64x128xf32>
    %726 = arith.mulf %724, %725 : vector<64x128xf32>
    %727 = arith.addf %722, %726 : vector<64x128xf32>
    %728 = vector.extract_strided_slice %713 {offsets = [3, 0], sizes = [1, 128], strides = [1, 1]} : vector<4x128xf32> to vector<1x128xf32>
    %729 = vector.broadcast %6 : vector<64x1xf32> to vector<64x128xf32>
    %730 = vector.broadcast %728 : vector<1x128xf32> to vector<64x128xf32>
    %731 = arith.mulf %729, %730 : vector<64x128xf32>
    %732 = arith.addf %727, %731 : vector<64x128xf32>
    %cst_114 = arith.constant dense<0xFF800000> : vector<64xf32>
    %733 = vector.multi_reduction <maximumf>, %732, %cst_114 [1] : vector<64x128xf32> to vector<64xf32>
    %734 = vector.shape_cast %733 : vector<64xf32> to vector<64x1xf32>
    %c15_115 = arith.constant 15 : index
    %c0_116 = arith.constant 0 : index
    %c128_117 = arith.constant 128 : index
    %735 = vector.load %arg2[%c15_115, %c0_116, %c128_117] : memref<16x4x256xf32, #tpu.memory_space<vmem>>, vector<1x4x128xf32>
    %736 = vector.shape_cast %735 : vector<1x4x128xf32> to vector<4x128xf32>
    %737 = vector.extract_strided_slice %736 {offsets = [0, 0], sizes = [1, 128], strides = [1, 1]} : vector<4x128xf32> to vector<1x128xf32>
    %738 = vector.broadcast %3 : vector<64x1xf32> to vector<64x128xf32>
    %739 = vector.broadcast %737 : vector<1x128xf32> to vector<64x128xf32>
    %740 = arith.mulf %738, %739 : vector<64x128xf32>
    %741 = vector.extract_strided_slice %736 {offsets = [1, 0], sizes = [1, 128], strides = [1, 1]} : vector<4x128xf32> to vector<1x128xf32>
    %742 = vector.broadcast %4 : vector<64x1xf32> to vector<64x128xf32>
    %743 = vector.broadcast %741 : vector<1x128xf32> to vector<64x128xf32>
    %744 = arith.mulf %742, %743 : vector<64x128xf32>
    %745 = arith.addf %740, %744 : vector<64x128xf32>
    %746 = vector.extract_strided_slice %736 {offsets = [2, 0], sizes = [1, 128], strides = [1, 1]} : vector<4x128xf32> to vector<1x128xf32>
    %747 = vector.broadcast %5 : vector<64x1xf32> to vector<64x128xf32>
    %748 = vector.broadcast %746 : vector<1x128xf32> to vector<64x128xf32>
    %749 = arith.mulf %747, %748 : vector<64x128xf32>
    %750 = arith.addf %745, %749 : vector<64x128xf32>
    %751 = vector.extract_strided_slice %736 {offsets = [3, 0], sizes = [1, 128], strides = [1, 1]} : vector<4x128xf32> to vector<1x128xf32>
    %752 = vector.broadcast %6 : vector<64x1xf32> to vector<64x128xf32>
    %753 = vector.broadcast %751 : vector<1x128xf32> to vector<64x128xf32>
    %754 = arith.mulf %752, %753 : vector<64x128xf32>
    %755 = arith.addf %750, %754 : vector<64x128xf32>
    %cst_118 = arith.constant dense<0xFF800000> : vector<64xf32>
    %756 = vector.multi_reduction <maximumf>, %755, %cst_118 [1] : vector<64x128xf32> to vector<64xf32>
    %757 = vector.shape_cast %756 : vector<64xf32> to vector<64x1xf32>
    %758 = arith.maximumf %734, %757 : vector<64x1xf32>
    %759 = tpu.concatenate %53, %100, %147, %194, %241, %288, %335, %382, %429, %476, %523, %570, %617, %664, %711, %758 in 1 : vector<64x1xf32>, vector<64x1xf32>, vector<64x1xf32>, vector<64x1xf32>, vector<64x1xf32>, vector<64x1xf32>, vector<64x1xf32>, vector<64x1xf32>, vector<64x1xf32>, vector<64x1xf32>, vector<64x1xf32>, vector<64x1xf32>, vector<64x1xf32>, vector<64x1xf32>, vector<64x1xf32>, vector<64x1xf32> -> vector<64x16xf32>
    %760 = tpu.transpose %759, [1, 0] : vector<64x16xf32> -> vector<16x64xf32>
    %c0_119 = arith.constant 0 : index
    %c0_120 = arith.constant 0 : index
    %c0_121 = arith.constant 0 : index
    %761 = vector.load %arg5[%c0_119, %c0_120, %c0_121] : memref<1x16x64xf32, #tpu.memory_space<vmem>>, vector<1x16x64xf32>
    %762 = vector.shape_cast %761 : vector<1x16x64xf32> to vector<16x64xf32>
    %763 = arith.maximumf %762, %760 : vector<16x64xf32>
    %c0_122 = arith.constant 0 : index
    %c0_123 = arith.constant 0 : index
    %c0_124 = arith.constant 0 : index
    %764 = vector.load %arg5[%c0_122, %c0_123, %c0_124] : memref<1x16x64xf32, #tpu.memory_space<vmem>>, vector<1x16x64xf32>
    %765 = vector.shape_cast %764 : vector<1x16x64xf32> to vector<16x64xf32>
    %766 = vector.shape_cast %763 : vector<16x64xf32> to vector<1x16x64xf32>
    tpu.vector_store %arg5[%c0_122, %c0_123, %c0_124], %766 {strides = array<i32>} : memref<1x16x64xf32, #tpu.memory_space<vmem>>, vector<1x16x64xf32>,
    %c0_i32_125 = arith.constant 0 : i32
    %767 = arith.cmpi eq, %arg1, %c0_i32_125 : i32
    %768 = arith.extui %767 : i1 to i32
    %c0_i32_126 = arith.constant 0 : i32
    %769 = arith.cmpi ne, %768, %c0_i32_126 : i32
    scf.if %769 {
      %c0_127 = arith.constant 0 : index
      %c0_128 = arith.constant 0 : index
      %c0_129 = arith.constant 0 : index
      %770 = vector.load %arg5[%c0_127, %c0_128, %c0_129] : memref<1x16x64xf32, #tpu.memory_space<vmem>>, vector<1x16x64xf32>
      %c0_130 = arith.constant 0 : index
      %c0_131 = arith.constant 0 : index
      %771 = vector.load %arg4[%c0_130, %c0_131] : memref<1x64xf32, #tpu.memory_space<vmem>>, vector<1x64xf32>
      %772 = vector.shape_cast %771 : vector<1x64xf32> to vector<1x1x64xf32>
      %773 = vector.broadcast %772 : vector<1x1x64xf32> to vector<1x16x64xf32>
      %774 = arith.addf %770, %773 : vector<1x16x64xf32>
      %cst_132 = arith.constant 0.000000e+00 : f32
      %775 = vector.broadcast %cst_132 : f32 to vector<1x16x64xf32>
      %776 = arith.maximumf %774, %775 : vector<1x16x64xf32>
      %c0_133 = arith.constant 0 : index
      %c0_134 = arith.constant 0 : index
      %c0_135 = arith.constant 0 : index
      %777 = vector.load %arg5[%c0_133, %c0_134, %c0_135] : memref<1x16x64xf32, #tpu.memory_space<vmem>>, vector<1x16x64xf32>
      tpu.vector_store %arg5[%c0_133, %c0_134, %c0_135], %776 {strides = array<i32>} : memref<1x16x64xf32, #tpu.memory_space<vmem>>, vector<1x16x64xf32>,
    } else {
    }
    return
  }
  func.func @transform_0(%arg0: i32, %arg1: i32) -> (i32, i32, i32) {
    %c0_i32 = arith.constant 0 : i32
    %c0_i32_0 = arith.constant 0 : i32
    return %arg0, %c0_i32, %arg1 : i32, i32, i32
  }
  func.func @transform_1(%arg0: i32, %arg1: i32) -> (i32, i32) {
    %c0_i32 = arith.constant 0 : i32
    %c0_i32_0 = arith.constant 0 : i32
    %c0_i32_1 = arith.constant 0 : i32
    return %c0_i32, %c0_i32_0 : i32, i32
  }
  func.func @transform_2(%arg0: i32, %arg1: i32) -> (i32, i32) {
    %c0_i32 = arith.constant 0 : i32
    %c0_i32_0 = arith.constant 0 : i32
    %c0_i32_1 = arith.constant 0 : i32
    return %c0_i32, %c0_i32_0 : i32, i32
  }
  func.func @transform_3(%arg0: i32, %arg1: i32) -> (i32, i32, i32) {
    %c0_i32 = arith.constant 0 : i32
    %c0_i32_0 = arith.constant 0 : i32
    %c0_i32_1 = arith.constant 0 : i32
    return %arg0, %c0_i32, %c0_i32_0 : i32, i32, i32
  }
}

module attributes {stable_mosaic.version = 11 : i64} {
  func.func @project_kernel(%arg0: i32, %arg1: memref<32x64xf32, #tpu.memory_space<vmem>>, %arg2: memref<64x128xf32, #tpu.memory_space<vmem>>, %arg3: memref<32x128xf32, #tpu.memory_space<vmem>>) attributes {dimension_semantics = [#tpu.dimension_semantics<arbitrary>], iteration_bounds = array<i64: 1>, scalar_prefetch = 0 : i64, scratch_operands = 0 : i64, tpu.core_type = #tpu.core_type<tc>, window_params = [{pipeline_mode = #tpu.pipeline_mode<synchronous>, transform_indices = @transform_0, window_bounds = array<i64: 32, 64>}, {pipeline_mode = #tpu.pipeline_mode<synchronous>, transform_indices = @transform_1, window_bounds = array<i64: 64, 128>}, {pipeline_mode = #tpu.pipeline_mode<synchronous>, transform_indices = @transform_2, window_bounds = array<i64: 32, 128>}]} {
    %c0 = arith.constant 0 : index
    %c0_0 = arith.constant 0 : index
    %0 = vector.load %arg1[%c0, %c0_0] : memref<32x64xf32, #tpu.memory_space<vmem>>, vector<32x64xf32>
    %c0_1 = arith.constant 0 : index
    %c0_2 = arith.constant 0 : index
    %1 = vector.load %arg2[%c0_1, %c0_2] : memref<64x128xf32, #tpu.memory_space<vmem>>, vector<64x128xf32>
    %cst = arith.constant dense<0.000000e+00> : vector<32x128xf32>
    %2 = tpu.matmul %0, %1, %cst {dimension_numbers = #tpu.dot_dimension_numbers<[1], [0], [0], [1], [0, 0, 1, 1], [], []>} : vector<32x64xf32>, vector<64x128xf32>, vector<32x128xf32> -> vector<32x128xf32>
    %c0_3 = arith.constant 0 : index
    %c0_4 = arith.constant 0 : index
    %3 = vector.load %arg3[%c0_3, %c0_4] : memref<32x128xf32, #tpu.memory_space<vmem>>, vector<32x128xf32>
    tpu.vector_store %arg3[%c0_3, %c0_4], %2 {strides = array<i32>} : memref<32x128xf32, #tpu.memory_space<vmem>>, vector<32x128xf32>,
    return
  }
  func.func @transform_0(%arg0: i32) -> (i32, i32) {
    %c0_i32 = arith.constant 0 : i32
    %c0_i32_0 = arith.constant 0 : i32
    %c0_i32_1 = arith.constant 0 : i32
    return %c0_i32, %c0_i32_0 : i32, i32
  }
  func.func @transform_1(%arg0: i32) -> (i32, i32) {
    %c0_i32 = arith.constant 0 : i32
    %c0_i32_0 = arith.constant 0 : i32
    %c0_i32_1 = arith.constant 0 : i32
    return %c0_i32, %c0_i32_0 : i32, i32
  }
  func.func @transform_2(%arg0: i32) -> (i32, i32) {
    %c0_i32 = arith.constant 0 : i32
    %c0_i32_0 = arith.constant 0 : i32
    %c0_i32_1 = arith.constant 0 : i32
    return %c0_i32, %c0_i32_0 : i32, i32
  }
}

</mosaic_0001>

<bundles_post_ra>
// kernel: custom-call.2
= control target key start
LH: loop header
LB: loop body
LE: loop exit
PB: predicated region body
PF: predicated region fallthrough
CT: control target
= control target key end

     0   :  { %s5040_s0 = inlined_call_operand.vmem [shape: f32[32,32], index: 0, kind: input, shape index: {}]   ;;  %s5041_s1 = inlined_call_operand.vmem [shape: f32[32,32], index: 1, kind: input, shape index: {}]   ;;  %s5042_s2 = inlined_call_operand.vmem [shape: f32[32,32], index: 2, kind: input, shape index: {}]   ;;  %s5043_s3 = inlined_call_operand.vmem [shape: f32[32,32], index: 3, kind: input, shape index: {}]   ;;  %s5044_s4 = inlined_call_operand.vmem [shape: f32[32], index: 4, kind: output, shape index: {0}]   ;;  %s5045_s5 = inlined_call_operand.vmem [shape: f32[32], index: 5, kind: output, shape index: {1}]   ;;  %s5046_s6 = inlined_call_operand.vmem [shape: f32[32,32], index: 6, kind: output, shape index: {2}]   ;;  %s5047_s7 = inlined_call_operand.vmem [shape: f32[32,32], index: 7, kind: output, shape index: {3}]   ;;  %s5048_s8 = inlined_call_operand.vmem [shape: f32[32,32], index: 8, kind: output, shape index: {4}]   ;;  %s5049_s9 = inlined_call_operand.vmem [shape: f32[32,32], index: 9, kind: output, shape index: {5}]  }
   0x1   :  { %s24_s11 = scalar_lea.vmem %s5040_s0, 24 }
   0x2   :  { %p2577_p0 = scmp.gt.s32.totalorder %s5040_s0, %s24_s11 }
   0x3   :  { %s4004_s14 = smov (!%p2577_p0), [#allocation0]   ;;  %s4008_s17 = smov (!%p2577_p0), %s5040_s0  }
   0x4   :  { %2578 = sbr.rel (%p2577_p0) target bundleno = 21 (0x15), region = 559 }
   0xb LB: > { %v58_v0 = vld [vmem:[%s4010_s17] sm:$0xff]  ;;  %s60_s17 = scalar_lea.vmem %s4010_s17, 8   ;;  %s4010_s17 = sphi %s4008_s17, %s60_s17   ;;  %s4006_s14 = sphi %s4004_s14, %s61_s14  }
   0xc   : > { %59 = vst [vmem:[%s4006_s14] sm:$0xff] %v58_v0  ;;  %s61_s14 = scalar_lea.vmem %s4006_s14, 8   ;;  %p55_p1 = scmp.gt.s32.totalorder %s60_s17, %s24_s11 }
   0xe   :  { %57 = sbr.rel (!%p55_p1) target bundleno = 11 (0xb), region = 565 }
  0x15 PF:  { %s86_s20 = scalar_lea.vmem %s5041_s1, 24 }
  0x16   :  { %p2597_p2 = scmp.gt.s32.totalorder %s5041_s1, %s86_s20 }
  0x17   :  { %s4012_s0 = smov (!%p2597_p2), [#allocation1]   ;;  %s4016_s25 = smov (!%p2597_p2), %s5041_s1  }
  0x18   :  { %2598 = sbr.rel (%p2597_p2) target bundleno = 41 (0x29), region = 581 }
  0x1f LB: > { %v120_v1 = vld [vmem:[%s4018_s25] sm:$0xff]  ;;  %s122_s25 = scalar_lea.vmem %s4018_s25, 8   ;;  %s4018_s25 = sphi %s4016_s25, %s122_s25   ;;  %s4014_s0 = sphi %s4012_s0, %s123_s0  }
  0x20   : > { %121 = vst [vmem:[%s4014_s0] sm:$0xff] %v120_v1  ;;  %s123_s0 = scalar_lea.vmem %s4014_s0, 8   ;;  %p117_p3 = scmp.gt.s32.totalorder %s122_s25, %s86_s20 }
  0x22   :  { %119 = sbr.rel (!%p117_p3) target bundleno = 31 (0x1f), region = 587 }
  0x29 PF:  { %s148_s28 = scalar_lea.vmem %s5042_s2, 24 }
  0x2a   :  { %p2617_p4 = scmp.gt.s32.totalorder %s5042_s2, %s148_s28 }
  0x2b   :  { %s4020_s1 = smov (!%p2617_p4), [#allocation2]   ;;  %s4024_s12 = smov (!%p2617_p4), %s5042_s2  }
  0x2c   :  { %2618 = sbr.rel (%p2617_p4) target bundleno = 61 (0x3d), region = 603 }
  0x33 LB: > { %v182_v2 = vld [vmem:[%s4026_s12] sm:$0xff]  ;;  %s184_s12 = scalar_lea.vmem %s4026_s12, 8   ;;  %s4026_s12 = sphi %s4024_s12, %s184_s12   ;;  %s4022_s1 = sphi %s4020_s1, %s185_s1  }
  0x34   : > { %183 = vst [vmem:[%s4022_s1] sm:$0xff] %v182_v2  ;;  %s185_s1 = scalar_lea.vmem %s4022_s1, 8   ;;  %p179_p5 = scmp.gt.s32.totalorder %s184_s12, %s148_s28 }
  0x36   :  { %181 = sbr.rel (!%p179_p5) target bundleno = 51 (0x33), region = 609 }
  0x3d PF:  { %s210_s15 = scalar_lea.vmem %s5043_s3, 24 }
  0x3e   :  { %p2637_p6 = scmp.gt.s32.totalorder %s5043_s3, %s210_s15 }
  0x3f   :  { %s4028_s2 = smov (!%p2637_p6), [#allocation3]   ;;  %s4032_s20 = smov (!%p2637_p6), %s5043_s3  }
  0x40   :  { %2638 = sbr.rel (%p2637_p6) target bundleno = 81 (0x51), region = 625 }
  0x47 LB: > { %v244_v3 = vld [vmem:[%s4034_s20] sm:$0xff]  ;;  %s246_s20 = scalar_lea.vmem %s4034_s20, 8   ;;  %s4034_s20 = sphi %s4032_s20, %s246_s20   ;;  %s4030_s2 = sphi %s4028_s2, %s247_s2  }
  0x48   : > { %245 = vst [vmem:[%s4030_s2] sm:$0xff] %v244_v3  ;;  %s247_s2 = scalar_lea.vmem %s4030_s2, 8   ;;  %p241_p7 = scmp.gt.s32.totalorder %s246_s20, %s210_s15 }
  0x4a   :  { %243 = sbr.rel (!%p241_p7) target bundleno = 71 (0x47), region = 631 }
  0x51 PF:  { %s259_s21 = smov [#allocation12]  ;;  %v260_v4 = vld [vmem:[#allocation0] sm:$0xff]  ;;  %v264_v5 = vld [vmem:[#allocation0 + $0x8] sm:$0xff]  ;;  %v268_v6 = vld [vmem:[#allocation0 + $0x10] sm:$0xff]  ;;  %s4165_s22 = smov [#allocation13]  ;;  %v348_v7 = vlaneseq  ;;  %v4076_v11 = vmov 0.0  }
  0x52   :  { %261 = vst [vmem:[%s259_s21] sm:$0xff] %v260_v4  ;;  %2962 = vst [vmem:[%s259_s21 + $0x8] sm:$0xff] %v264_v5  ;;  %v272_v8 = vld [vmem:[#allocation0 + $0x18] sm:$0xff]  ;;  %v275_v9 = vld [vmem:[#allocation1] sm:$0xff]  ;;  %s4167_s3 = smov [#allocation14]  ;;  %s304_s0 = smov [#allocation15] }
  0x53   :  { %2963 = vst [vmem:[%s259_s21 + $0x10] sm:$0xff] %v268_v6  ;;  %v279_v10 = vld [vmem:[#allocation1 + $0x8] sm:$0xff]  ;;  %319 = vst [vmem:[#allocation8] sm:$0xff] %v4076_v11  ;;  %v283_v12 = vld [vmem:[#allocation1 + $0x10] sm:$0xff]  ;;  %v4171_v15 = vand.u32 127, %v348_v7  ;;  %v4173_v16 = vshrl.u32 %v348_v7, 7 }
  0x54   :  { %321 = vst [vmem:[#allocation8 + $0x8] sm:$0xff] %v4076_v11  ;;  %323 = vst [vmem:[#allocation8 + $0x10] sm:$0xff] %v4076_v11  ;;  %v287_v13 = vld [vmem:[#allocation1 + $0x18] sm:$0xff]  ;;  %v290_v14 = vld [vmem:[#allocation2] sm:$0xff]  ;;  %s4185_s23 = smov [#allocation8]  ;;  %s4187_s24 = smov [#allocation11] }
  0x55   :  { %325 = vst [vmem:[#allocation8 + $0x18] sm:$0xff] %v4076_v11  ;;  %326 = vst [vmem:[#allocation9] sm:$0xff] %v4076_v11  ;;  %v294_v17 = vld [vmem:[#allocation2 + $0x8] sm:$0xff]  ;;  %v298_v18 = vld [vmem:[#allocation2 + $0x10] sm:$0xff]  ;;  %v350_v15 = vmov %v4171_v15  ;;  %v353_v16 = vmov %v4173_v16  ;;  %s2655_s25 = smov [#allocation12]  ;;  %vm2659_vm8 = vcmp.lt.s32.totalorder %v4171_v15, 32 }
  0x56   :  { %328 = vst [vmem:[#allocation9 + $0x8] sm:$0xff] %v4076_v11  ;;  %330 = vst [vmem:[#allocation9 + $0x10] sm:$0xff] %v4076_v11  ;;  %v302_v19 = vld [vmem:[#allocation2 + $0x18] sm:$0xff]  ;;  %v305_v20 = vld [vmem:[#allocation3] sm:$0xff]  ;;  %v384_v15 = vmov %v4171_v15  ;;  %v387_v16 = vmov %v4173_v16  ;;  %v363_v24 = vadd.s32 8, %v353_v16  ;;  %v370_v25 = vadd.s32 16, %v353_v16 }
  0x57   :  { %332 = vst [vmem:[#allocation9 + $0x18] sm:$0xff] %v4076_v11  ;;  %333 = vst [vmem:[#allocation10] sm:$0xff] %v4076_v11  ;;  %v309_v21 = vld [vmem:[#allocation3 + $0x8] sm:$0xff]  ;;  %v313_v22 = vld [vmem:[#allocation3 + $0x10] sm:$0xff]  ;;  %v377_v26 = vadd.s32 24, %v353_v16  ;;  %vm357_vm0 = vcmp.eq.s32.totalorder %v353_v16, %v350_v15  ;;  %v397_v27 = vadd.s32 8, %v387_v16  ;;  %vm391_vm4 = vcmp.eq.s32.totalorder %v387_v16, %v384_v15 }
  0x58   :  { %335 = vst [vmem:[#allocation10 + $0x8] sm:$0xff] %v4076_v11  ;;  %337 = vst [vmem:[#allocation10 + $0x10] sm:$0xff] %v4076_v11  ;;  %v317_v23 = vld [vmem:[#allocation3 + $0x18] sm:$0xff]  ;;  %v404_v28 = vadd.s32 16, %v387_v16  ;;  %v411_v29 = vadd.s32 24, %v387_v16  ;;  %vm364_vm1 = vcmp.eq.s32.totalorder %v363_v24, %v350_v15  ;;  %vm371_vm2 = vcmp.eq.s32.totalorder %v370_v25, %v350_v15  ;;  %s2699_s26 = smov [#allocation13] }
  0x59   :  { %339 = vst [vmem:[#allocation10 + $0x18] sm:$0xff] %v4076_v11  ;;  %340 = vst [vmem:[#allocation11] sm:$0xff] %v4076_v11  ;;  %vm378_vm3 = vcmp.eq.s32.totalorder %v377_v26, %v350_v15  ;;  %vm398_vm5 = vcmp.eq.s32.totalorder %v397_v27, %v384_v15  ;;  %v2654_v16 = vmov %v4173_v16  ;;  %s4225_s27 = smov [#allocation14]  ;;  %s2769_s28 = smov [#allocation15] }
  0x5a   :  { %342 = vst [vmem:[#allocation11 + $0x8] sm:$0xff] %v4076_v11  ;;  %344 = vst [vmem:[#allocation11 + $0x10] sm:$0xff] %v4076_v11  ;;  %vm405_vm6 = vcmp.eq.s32.totalorder %v404_v28, %v384_v15  ;;  %vm412_vm7 = vcmp.eq.s32.totalorder %v411_v29, %v384_v15  ;;  %v2695_v15 = vmov %v4171_v15  ;;  %v2670_v0 = vadd.s32 8, %v2654_v16 }
  0x5b   :  { %346 = vst [vmem:[#allocation11 + $0x18] sm:$0xff] %v4076_v11  ;;  %2964 = vst [vmem:[%s259_s21 + $0x18] sm:$0xff] %v272_v8  ;;  %v2651_v15 = vmov %v4171_v15 }
  0x5c   :  { %276 = vst [vmem:[%s4165_s22] sm:$0xff] %v275_v9  ;;  %2965 = vst [vmem:[%s4165_s22 + $0x8] sm:$0xff] %v279_v10  ;;  %v354_v30 = vld [vmem:[%s4185_s23] sm:$0xff]  ;;  %v2974_v31 = vld [vmem:[%s4185_s23 + $0x8] sm:$0xff]  ;;  %vm2664_vm9 = vcmp.eq.s32.totalorder %v2654_v16, %v2651_v15  ;;  %vm2671_vm10 = vcmp.eq.s32.totalorder %v2670_v0, %v2651_v15 }
  0x5d   :  { %2966 = vst [vmem:[%s4165_s22 + $0x10] sm:$0xff] %v283_v12  ;;  %2967 = vst [vmem:[%s4165_s22 + $0x18] sm:$0xff] %v287_v13  ;;  %v2976_v32 = vld [vmem:[%s4185_s23 + $0x10] sm:$0xff]  ;;  %v358_v33 = vsel %vm357_vm0, 1.0, %v354_v30  ;;  %v365_v34 = vsel %vm364_vm1, 1.0, %v2974_v31  ;;  %v2978_v36 = vld [vmem:[%s4185_s23 + $0x18] sm:$0xff] }
  0x5e   :  { %291 = vst [vmem:[%s4167_s3] sm:$0xff] %v290_v14  ;;  %2968 = vst [vmem:[%s4167_s3 + $0x8] sm:$0xff] %v294_v17  ;;  %v372_v35 = vsel %vm371_vm2, 1.0, %v2976_v32  ;;  %v379_v39 = vsel %vm378_vm3, 1.0, %v2978_v36 }
  0x5f   :  { %2969 = vst [vmem:[%s4167_s3 + $0x10] sm:$0xff] %v298_v18  ;;  %2970 = vst [vmem:[%s4167_s3 + $0x18] sm:$0xff] %v302_v19  ;;  %v2679_v18 = vadd.s32 16, %v2654_v16  ;;  %v2688_v19 = vadd.s32 24, %v2654_v16  ;;  %v2698_v16 = vmov %v4173_v16 }
  0x60   :  { %306 = vst [vmem:[%s304_s0] sm:$0xff] %v305_v20  ;;  %2971 = vst [vmem:[%s304_s0 + $0x8] sm:$0xff] %v309_v21  ;;  %v2733_v16 = vmov %v4173_v16 }
  0x61   :  { %2972 = vst [vmem:[%s304_s0 + $0x10] sm:$0xff] %v313_v22  ;;  %2973 = vst [vmem:[%s304_s0 + $0x18] sm:$0xff] %v317_v23  ;;  %vm2680_vm11 = vcmp.eq.s32.totalorder %v2679_v18, %v2651_v15  ;;  %vm2689_vm12 = vcmp.eq.s32.totalorder %v2688_v19, %v2651_v15  ;;  %v2730_v15 = vmov %v4171_v15  ;;  %v2768_v16 = vmov %v4173_v16 }
  0x62   :  { %v388_v37 = vld [vmem:[%s4187_s24] sm:$0xff]  ;;  %v2980_v38 = vld [vmem:[%s4187_s24 + $0x8] sm:$0xff]  ;;  %359 = vst [vmem:[%s4185_s23] sm:$0xff] %v358_v33  ;;  %2975 = vst [vmem:[%s4185_s23 + $0x8] sm:$0xff] %v365_v34  ;;  %v2765_v15 = vmov %v4171_v15 }
  0x63   :  { %2977 = vst [vmem:[%s4185_s23 + $0x10] sm:$0xff] %v372_v35  ;;  %v392_v40 = vsel %vm391_vm4, 1.0, %v388_v37  ;;  %v399_v41 = vsel %vm398_vm5, 1.0, %v2980_v38  ;;  %v2982_v42 = vld [vmem:[%s4187_s24 + $0x10] sm:$0xff]  ;;  %v2984_v43 = vld [vmem:[%s4187_s24 + $0x18] sm:$0xff]  ;;  %2979 = vst [vmem:[%s4185_s23 + $0x18] sm:$0xff] %v379_v39  ;;  %vm2778_vm13 = vcmp.eq.s32.totalorder %v2768_v16, %v2765_v15 }
  0x64   :  { %393 = vst [vmem:[%s4187_s24] sm:$0xff] %v392_v40  ;;  %2981 = vst [vmem:[%s4187_s24 + $0x8] sm:$0xff] %v399_v41  ;;  %v406_v44 = vsel %vm405_vm6, 1.0, %v2982_v42  ;;  %v413_v45 = vsel %vm412_vm7, 1.0, %v2984_v43  ;;  %v2661_v46 = vld [vmem:[%s2655_s25] sm:$0xff]  ;;  %v2986_v47 = vld [vmem:[%s2655_s25 + $0x8] sm:$0xff] }
  0x65   :  { %2983 = vst [vmem:[%s4187_s24 + $0x10] sm:$0xff] %v406_v44  ;;  %2985 = vst [vmem:[%s4187_s24 + $0x18] sm:$0xff] %v413_v45  ;;  %v2987_v48 = vld [vmem:[%s2655_s25 + $0x10] sm:$0xff]  ;;  %v2662_v49 = vsel %vm2659_vm8, %v2661_v46, 0.0  ;;  %v2668_v50 = vsel %vm2659_vm8, %v2986_v47, 0.0  ;;  %v2988_v52 = vld [vmem:[%s2655_s25 + $0x18] sm:$0xff] }
  0x66   :  { %v2677_v51 = vsel %vm2659_vm8, %v2987_v48, 0.0  ;;  %v2705_v53 = vld [vmem:[%s2699_s26] sm:$0xff]  ;;  %v2663_v54 = vmul.f32 %v2662_v49, %v2662_v49  ;;  %v2669_v55 = vmul.f32 %v2668_v50, %v2668_v50  ;;  %v2686_v57 = vsel %vm2659_vm8, %v2988_v52, 0.0  ;;  %v2989_v58 = vld [vmem:[%s2699_s26 + $0x8] sm:$0xff]  ;;  %v2990_v62 = vld [vmem:[%s2699_s26 + $0x10] sm:$0xff] }
  0x67   :  { %v2678_v56 = vmul.f32 %v2677_v51, %v2677_v51  ;;  %v2706_v59 = vsel %vm2659_vm8, %v2705_v53, 0.0  ;;  %v2687_v61 = vmul.f32 %v2686_v57, %v2686_v57  ;;  %v2712_v63 = vsel %vm2659_vm8, %v2989_v58, 0.0  ;;  %v2991_v3 = vld [vmem:[%s2699_s26 + $0x18] sm:$0xff]  ;;  %v2740_v7 = vld [vmem:[%s4225_s27] sm:$0xff]  ;;  %v2992_v9 = vld [vmem:[%s4225_s27 + $0x8] sm:$0xff] }
  0x68   :  { %v2674_v60 = vadd.f32 %v2669_v55, %v2663_v54  ;;  %v2707_v2 = vmul.f32 %v2706_v59, %v2706_v59  ;;  %v2718_v4 = vsel %vm2659_vm8, %v2990_v62, 0.0  ;;  %v2713_v6 = vmul.f32 %v2712_v63, %v2712_v63  ;;  %v2993_v23 = vld [vmem:[%s4225_s27 + $0x10] sm:$0xff]  ;;  %v2994_v26 = vld [vmem:[%s4225_s27 + $0x18] sm:$0xff]  ;;  %v2775_v33 = vld [vmem:[%s2769_s28] sm:$0xff] }
  0x69   :  { %v2724_v8 = vsel %vm2659_vm8, %v2991_v3, 0.0  ;;  %v2665_v10 = vsel %vm2664_vm9, 0.0, %v2663_v54  ;;  %v2719_v12 = vmul.f32 %v2718_v4, %v2718_v4  ;;  %v2672_v13 = vsel %vm2671_vm10, 0.0, %v2669_v55  ;;  %v2995_v38 = vld [vmem:[%s2769_s28 + $0x8] sm:$0xff]  ;;  %v2996_v43 = vld [vmem:[%s2769_s28 + $0x10] sm:$0xff]  ;;  %v2997_v48 = vld [vmem:[%s2769_s28 + $0x18] sm:$0xff] }
  0x6a   :  { %v2683_v1 = vadd.f32 %v2678_v56, %v2674_v60  ;;  %v2741_v14 = vsel %vm2659_vm8, %v2740_v7, 0.0  ;;  %v2673_v17 = vadd.f32 %v2672_v13, %v2665_v10  ;;  %v2725_v21 = vmul.f32 %v2724_v8, %v2724_v8 }
  0x6b   :  { %v2747_v22 = vsel %vm2659_vm8, %v2992_v9, 0.0  ;;  %v2742_v25 = vmul.f32 %v2741_v14, %v2741_v14  ;;  %v2681_v27 = vsel %vm2680_vm11, 0.0, %v2678_v56  ;;  %v2690_v28 = vsel %vm2689_vm12, 0.0, %v2687_v61 }
  0x6c   :  { %v2692_v5 = vadd.f32 %v2687_v61, %v2683_v1  ;;  %v2753_v29 = vsel %vm2659_vm8, %v2993_v23, 0.0  ;;  %v2682_v30 = vadd.f32 %v2681_v27, %v2673_v17  ;;  %v2748_v32 = vmul.f32 %v2747_v22, %v2747_v22 }
  0x6d   :  { %v2759_v34 = vsel %vm2659_vm8, %v2994_v26, 0.0  ;;  %v2754_v37 = vmul.f32 %v2753_v29, %v2753_v29  ;;  %v2776_v39 = vsel %vm2659_vm8, %v2775_v33, 0.0  ;;  %v2784_v44 = vsel %vm2659_vm8, %v2995_v38, 0.0 }
  0x6e   :  { %v2709_v11 = vadd.f32 %v2707_v2, %v2692_v5  ;;  %v2691_v35 = vadd.f32 %v2690_v28, %v2682_v30  ;;  %v2760_v42 = vmul.f32 %v2759_v34, %v2759_v34  ;;  %v2777_v47 = vmul.f32 %v2776_v39, %v2776_v39 }
  0x6f   :  { %v2793_v49 = vsel %vm2659_vm8, %v2996_v43, 0.0  ;;  %v2785_v52 = vmul.f32 %v2784_v44, %v2784_v44  ;;  %v2802_v53 = vsel %vm2659_vm8, %v2997_v48, 0.0  ;;  %v2786_v58 = vadd.s32 8, %v2768_v16 }
  0x70   :  { %v2715_v20 = vadd.f32 %v2713_v6, %v2709_v11  ;;  %v2708_v40 = vadd.f32 %v2707_v2, %v2691_v35  ;;  %v2794_v56 = vmul.f32 %v2793_v49, %v2793_v49  ;;  %v2803_v60 = vmul.f32 %v2802_v53, %v2802_v53 }
  0x71   :  { %v2795_v62 = vadd.s32 16, %v2768_v16  ;;  %vm2787_vm14 = vcmp.eq.s32.totalorder %v2786_v58, %v2765_v15  ;;  %v2804_v1 = vadd.s32 24, %v2768_v16  ;;  %v2779_v3 = vsel %vm2778_vm13, 0.0, %v2777_v47 }
  0x72   :  { %v2721_v24 = vadd.f32 %v2719_v12, %v2715_v20  ;;  %v2714_v45 = vadd.f32 %v2713_v6, %v2708_v40  ;;  %v2788_v5 = vsel %vm2787_vm14, 0.0, %v2785_v52 }
  0x73   :  { %vm2796_vm15 = vcmp.eq.s32.totalorder %v2795_v62, %v2765_v15  ;;  %vm2805_vm0 = vcmp.eq.s32.totalorder %v2804_v1, %v2765_v15 }
  0x74   :  { %v2727_v31 = vadd.f32 %v2725_v21, %v2721_v24  ;;  %v2720_v50 = vadd.f32 %v2719_v12, %v2714_v45  ;;  %v2797_v7 = vsel %vm2796_vm15, 0.0, %v2794_v56  ;;  %v2806_v9 = vsel %vm2805_vm0, 0.0, %v2803_v60 }
  0x76   :  { %v2744_v36 = vadd.f32 %v2742_v25, %v2727_v31  ;;  %v2726_v54 = vadd.f32 %v2725_v21, %v2720_v50 }
  0x78   :  { %v2750_v41 = vadd.f32 %v2748_v32, %v2744_v36  ;;  %v2743_v57 = vadd.f32 %v2742_v25, %v2726_v54 }
  0x7a   :  { %v2756_v46 = vadd.f32 %v2754_v37, %v2750_v41  ;;  %v2749_v61 = vadd.f32 %v2748_v32, %v2743_v57 }
  0x7c   :  { %v2762_v51 = vadd.f32 %v2760_v42, %v2756_v46  ;;  %v2755_v0 = vadd.f32 %v2754_v37, %v2749_v61 }
  0x7e   :  { %v2781_v55 = vadd.f32 %v2777_v47, %v2762_v51  ;;  %v2761_v4 = vadd.f32 %v2760_v42, %v2755_v0 }
  0x80   :  { %v2790_v59 = vadd.f32 %v2785_v52, %v2781_v55  ;;  %v2780_v6 = vadd.f32 %v2779_v3, %v2761_v4 }
  0x82   :  { %v2799_v63 = vadd.f32 %v2794_v56, %v2790_v59  ;;  %v2789_v8 = vadd.f32 %v2788_v5, %v2780_v6 }
  0x84   :  { %v2808_v2 = vadd.f32 %v2803_v60, %v2799_v63  ;;  %v2798_v10 = vadd.f32 %v2797_v7, %v2789_v8 }
  0x86   :  { %2809 = vadd.xlane.f32.xlu0 %v2808_v2  ;;  %v2807_v11 = vadd.f32 %v2806_v9, %v2798_v10 }
  0x8a   :  { %2817 = vadd.xlane.f32.xlu0 %v2807_v11 }
 0x113   :  { %v2810_v12 = vpop.xlane.xlu0 %2809 }
 0x114   :  { %v2811_v13 = vrot.slane %v2810_v12, 4 }
 0x116   :  { %v2812_v14 = vadd.f32 %v2811_v13, %v2810_v12 }
 0x117   :  { %v2818_v18 = vpop.xlane.xlu0 %2817 }
 0x118   :  { %v2813_v17 = vrot.slane %v2812_v14, 2  ;;  %v2819_v19 = vrot.slane %v2818_v18, 4 }
 0x11a   :  { %v2820_v20 = vadd.f32 %v2819_v19, %v2818_v18  ;;  %v2814_v21 = vadd.f32 %v2813_v17, %v2812_v14 }
 0x11c   :  { %v2821_v22 = vrot.slane %v2820_v20, 2  ;;  %v2815_v24 = vrot.slane %v2814_v21, 1 }
 0x11e   :  { %v2822_v23 = vadd.f32 %v2821_v22, %v2820_v20  ;;  %v2816_v27 = vadd.f32 %v2815_v24, %v2814_v21 }
 0x120   :  { %v2823_v25 = vrot.slane %v2822_v23, 1 }
 0x122   :  { %v2824_v26 = vadd.f32 %v2823_v25, %v2822_v23 }
 0x124   :  { %3285 = vpush %v2824_v26 }
 0x125   :  { %3287 = vpush %v2816_v27 }
 0x155   :  { %s3286_s29 = spop %3285 }
 0x156   :  { %s3288_s30 = spop %3287 }
 0x157   :  { %s2827_s1 = smul.f32 1e-10, %s3288_s30 }
 0x159   :  { %p2828_p8 = scmp.le.f32.partialorder %s3286_s29, %s2827_s1 }
 0x15a   :  { %s4256_s10 = smov (!%p2828_p8), 0  }
 0x15b   :  { %2831 = sbr.rel (%p2828_p8) target bundleno = 1177 (0x499), region = 647 }
 0x162 LB: > { %s4261_s11 = smov 0   ;;  %s4038_s10 = sphi %s4256_s10, %s5059_s10  }
 0x163 LB: >> { %s615_s12 = smov [#allocation12]  ;;  %v619_v15 = vmov %v4171_v15  ;;  %v622_v16 = vmov %v4173_v16  ;;  %s653_s13 = smov [#allocation13]  ;;  %s4042_s11 = sphi %s4261_s11, %s614_s11  }
 0x164   : >> { %v657_v15 = vmov %v4171_v15  ;;  %v660_v16 = vmov %v4173_v16  ;;  %v623_v28 = vld [vmem:[%s615_s12] sm:$0xff]  ;;  %vm626_vm1 = vcmp.eq.s32.totalorder %v622_v16, %v619_v15  ;;  %v2998_v29 = vld [vmem:[%s615_s12 + $0x8] sm:$0xff]  ;;  %v631_v30 = vadd.s32 8, %v622_v16  ;;  %v2999_v34 = vld [vmem:[%s615_s12 + $0x10] sm:$0xff]  ;;  %s691_s14 = smov [#allocation15]  ;;  %s616_s15 = smov [#allocation16] }
 0x165   : >> { %v637_v31 = vadd.s32 16, %v622_v16  ;;  %v643_v32 = vadd.s32 24, %v622_v16  ;;  %v627_v33 = vsel %vm626_vm1, %v623_v28, 0.0  ;;  %v3000_v35 = vld [vmem:[%s615_s12 + $0x18] sm:$0xff]  ;;  %vm664_vm2 = vcmp.eq.s32.totalorder %v660_v16, %v657_v15  ;;  %v661_v38 = vld [vmem:[%s653_s13] sm:$0xff]  ;;  %v3001_v39 = vld [vmem:[%s653_s13 + $0x8] sm:$0xff] }
 0x166   : >> { %v669_v36 = vadd.s32 8, %v660_v16  ;;  %v675_v37 = vadd.s32 16, %v660_v16  ;;  %vm632_vm3 = vcmp.eq.s32.totalorder %v631_v30, %v619_v15  ;;  %v3002_v40 = vld [vmem:[%s653_s13 + $0x10] sm:$0xff]  ;;  %v681_v41 = vadd.s32 24, %v660_v16  ;;  %v3003_v44 = vld [vmem:[%s653_s13 + $0x18] sm:$0xff]  ;;  %v699_v47 = vld [vmem:[%s691_s14] sm:$0xff] }
 0x167   : >> { %vm638_vm4 = vcmp.eq.s32.totalorder %v637_v31, %v619_v15  ;;  %vm644_vm5 = vcmp.eq.s32.totalorder %v643_v32, %v619_v15  ;;  %v633_v42 = vsel %vm632_vm3, %v2998_v29, %v627_v33  ;;  %v665_v43 = vsel %vm664_vm2, %v661_v38, 0.0  ;;  %v3004_v52 = vld [vmem:[%s691_s14 + $0x8] sm:$0xff]  ;;  %v3005_v56 = vld [vmem:[%s691_s14 + $0x10] sm:$0xff]  ;;  %v3006_v60 = vld [vmem:[%s691_s14 + $0x18] sm:$0xff]  ;;  %s654_s16 = smov [#allocation17]  ;;  %s692_s17 = smov [#allocation18] }
 0x168   : >> { %vm670_vm6 = vcmp.eq.s32.totalorder %v669_v36, %v657_v15  ;;  %vm676_vm7 = vcmp.eq.s32.totalorder %v675_v37, %v657_v15  ;;  %v639_v45 = vsel %vm638_vm4, %v2999_v34, %v633_v42  ;;  %vm682_vm9 = vcmp.eq.s32.totalorder %v681_v41, %v657_v15  ;;  %s733_s2 = smov [#allocation17]  ;;  %s731_s18 = smov [#allocation16] }
 0x169   : >> { %v671_v46 = vsel %vm670_vm6, %v3001_v39, %v665_v43  ;;  %v695_v15 = vmov %v4171_v15  ;;  %v645_v48 = vsel %vm644_vm5, %v3000_v35, %v639_v45  ;;  %v698_v16 = vmov %v4173_v16  ;;  %s735_s19 = smov [#allocation18]  ;;  %s770_s20 = smov [#allocation19] }
 0x16a   : >> { %v677_v49 = vsel %vm676_vm7, %v3002_v40, %v671_v46  ;;  %v646_v50 = vrot.slane %v645_v48, 4  ;;  %vm702_vm10 = vcmp.eq.s32.totalorder %v698_v16, %v695_v15  ;;  %v707_v53 = vadd.s32 8, %v698_v16  ;;  %s772_s21 = smov [#allocation20]  ;;  %s729_s22 = smov [#allocation21] }
 0x16b   : >> { %v683_v51 = vsel %vm682_vm9, %v3003_v44, %v677_v49  ;;  %v703_v55 = vsel %vm702_vm10, %v699_v47, 0.0  ;;  %v713_v57 = vadd.s32 16, %v698_v16  ;;  %v719_v58 = vadd.s32 24, %v698_v16  ;;  %s730_s3 = smov [#allocation22]  ;;  %s774_s22 = smov %s729_s22 }
 0x16c   : >> { %v684_v54 = vrot.slane %v683_v51, 4  ;;  %v647_v59 = vadd.f32 %v646_v50, %v645_v48  ;;  %vm708_vm11 = vcmp.eq.s32.totalorder %v707_v53, %v695_v15  ;;  %v800_v16 = vmov %v4173_v16  ;;  %s776_s3 = smov %s730_s3  ;;  %s793_s0 = smov [#allocation21] }
 0x16d   : >> { %v709_v62 = vsel %vm708_vm11, %v3004_v52, %v703_v55  ;;  %vm714_vm12 = vcmp.eq.s32.totalorder %v713_v57, %v695_v15  ;;  %vm720_vm13 = vcmp.eq.s32.totalorder %v719_v58, %v695_v15  ;;  %v816_v16 = vmov %v4173_v16  ;;  %s778_s23 = smov [#allocation21]  ;;  %s809_s24 = smov [#allocation21] }
 0x16e   : >> { %v685_v61 = vadd.f32 %v684_v54, %v683_v51  ;;  %v648_v63 = vrot.slane %v647_v59, 2  ;;  %v715_v0 = vsel %vm714_vm12, %v3005_v56, %v709_v62  ;;  %v863_v16 = vmov %v4173_v16  ;;  %s856_s25 = smov [#allocation22]  ;;  %s872_s26 = smov [#allocation22] }
 0x16f   : >> { %v721_v2 = vsel %vm720_vm13, %v3006_v60, %v715_v0  ;;  %v801_v48 = vadd.s32 8, %v800_v16  ;;  %v797_v15 = vmov %v4171_v15  ;;  %v785_v16 = vmov %v4173_v16  ;;  %s841_s27 = smov [#allocation22]  ;;  %s888_s28 = smov [#allocation22] }
 0x170   : >> { %v686_v1 = vrot.slane %v685_v61, 2  ;;  %v649_v3 = vadd.f32 %v648_v63, %v647_v59  ;;  %v722_v4 = vrot.slane %v721_v2, 4  ;;  %v782_v15 = vmov %v4171_v15  ;;  %s825_s29 = smov [#allocation21]  ;;  %s791_s30 = smov [#allocation23] }
 0x171   : >> { %v817_v49 = vadd.s32 16, %v816_v16  ;;  %v813_v15 = vmov %v4171_v15  ;;  %v864_v50 = vadd.s32 8, %v863_v16  ;;  %v879_v16 = vmov %v4173_v16  ;;  %s806_s1 = smov [#allocation23]  ;;  %s822_s12 = smov [#allocation23] }
 0x172   : >> { %v687_v5 = vadd.f32 %v686_v1, %v685_v61  ;;  %v650_v6 = vrot.slane %v649_v3, 1  ;;  %v723_v7 = vadd.f32 %v722_v4, %v721_v2  ;;  %v860_v15 = vmov %v4171_v15  ;;  %s854_s13 = smov [#allocation24]  ;;  %s869_s14 = smov [#allocation24] }
 0x173   : >> { %vm802_vm2 = vcmp.eq.s32.totalorder %v801_v48, %v797_v15  ;;  %vm787_vm3 = vcmp.eq.s32.totalorder %v785_v16, %v782_v15  ;;  %vm818_vm4 = vcmp.eq.s32.totalorder %v817_v49, %v813_v15  ;;  %v876_v15 = vmov %v4171_v15  ;;  %s614_s11 = sadd.s32 1, %s4042_s11  }
 0x174   : >> { %v688_v8 = vrot.slane %v687_v5, 1  ;;  %v651_v9 = vadd.f32 %v650_v6, %v649_v3  ;;  %v724_v10 = vrot.slane %v723_v7, 2  ;;  %vm865_vm5 = vcmp.eq.s32.totalorder %v864_v50, %v860_v15  ;;  %p611_p9 = scmp.ge.s32.totalorder %s614_s11, 63  }
 0x175   : >> { %v880_v53 = vadd.s32 16, %v879_v16  ;;  %v845_v15 = vmov %v4171_v15  ;;  %v848_v16 = vmov %v4173_v16  ;;  %vm1568_vm11 = vcmp.eq.s32.totalorder %v4173_v16, 0  ;;  %s4982_s11 = smov (%p611_p9), [#allocation14] }
 0x176   : >> { %v689_v11 = vadd.f32 %v688_v8, %v687_v5  ;;  %652 = vst [vmem:[%s616_s15] sm:$0x1] %v651_v9  ;;  %v725_v12 = vadd.f32 %v724_v10, %v723_v7  ;;  %v895_v16 = vmov %v4173_v16  ;;  %vm850_vm7 = vcmp.eq.s32.totalorder %v848_v16, %v845_v15  ;;  %s885_s15 = smov [#allocation24] }
 0x177   : >> { %v832_v16 = vmov %v4173_v16  ;;  %vm881_vm6 = vcmp.eq.s32.totalorder %v880_v53, %v876_v15  ;;  %v896_v62 = vadd.s32 24, %v895_v16  ;;  %v892_v15 = vmov %v4171_v15 }
 0x178   : >> { %690 = vst [vmem:[%s654_s16] sm:$0x1] %v689_v11  ;;  %v726_v13 = vrot.slane %v725_v12, 1  ;;  %v833_v63 = vadd.s32 24, %v832_v16  ;;  %v829_v15 = vmov %v4171_v15  ;;  %s901_s16 = smov [#allocation24]  ;;  %vm5050_vm12 = vcmp.eq.s32.totalorder %v4173_v16, 7 }
 0x179   : >> { %vm897_vm9 = vcmp.eq.s32.totalorder %v896_v62, %v892_v15  ;;  %v4573_v16 = vmov %v4173_v16 }
 0x17a   : >> { %v727_v14 = vadd.f32 %v726_v13, %v725_v12  ;;  %vm834_vm10 = vcmp.eq.s32.totalorder %v833_v63, %v829_v15  ;;  %v1153_v16 = vmov %v4173_v16  ;;  %v1188_v15 = vmov %v4171_v15 }
 0x17b   : >> { %vm1195_vm13 = vcmp.eq.s32.totalorder %v4573_v16, %v1188_v15  ;;  %v1150_v15 = vmov %v4171_v15 }
 0x17c   : >> { %728 = vst [vmem:[%s692_s17] sm:$0x1] %v727_v14  ;;  %s838_s17 = smov [#allocation23]  ;;  %v4597_v15 = vmov %v4171_v15 }
 0x17d   : >> { %v732_v19 = vld [vmem:[%s731_s18] sm:$0xff]  ;;  %s4292_s18 = smov [#allocation13] }
 0x17e   : >> { %v755_v32 = vand.u32 2147483647, %v732_v19 }
 0x17f   : >> { %v734_v17 = vld [vmem:[%s733_s2] sm:$0xff]  ;;  %s4290_s2 = smov [#allocation12] }
 0x180   : >> { %v738_v18 = vmul.f32 2.0, %v734_v17  ;;  %v756_v37 = vand.u32 2147483647, %v734_v17  ;;  %v912_v14 = vld [vmem:[%s4290_s2] sm:$0xff] }
 0x182   : >> { %3764 = vrcp.f32 %v738_v18 }
 0x183   : >> { %v736_v20 = vld [vmem:[%s735_s19] sm:$0xff]  ;;  %s4294_s19 = smov [#allocation14] }
 0x184   : >> { %v737_v21 = vsub.f32 %v736_v20, %v732_v19  ;;  %v757_v33 = vand.u32 2147483647, %v736_v20  ;;  %v914_v18 = vld [vmem:[%s4294_s19] sm:$0xff] }
 0x186   : >> { %v758_v36 = vmin.f32 %v755_v32, %v757_v33 }
 0x188   : >> { %v759_v38 = vmul.f32 1.1920929e-08, %v758_v36 }
 0x18a   : >> { %vm760_vm1 = vcmp.le.f32.partialorder %v756_v37, %v759_v38 }
 0x18c   : >> { %v3765_v22 = vpop.eup %3764 }
 0x18d   : >> { %v740_v23 = vmul.f32 %v3765_v22, %v737_v21 }
 0x18f   : >> { %v742_v24 = vmul.f32 %v740_v23, %v740_v23  ;;  %vm741_vm0 = vcmp.ge.f32.partialorder %v740_v23, 0.0 }
 0x191   : >> { %v743_v25 = vadd.f32 1.0, %v742_v24 }
 0x193   : >> { %3766 = vrsqrt.f32 %v743_v25  ;;  %vm746_vm14 = vcmp.eq.f32.partialorder %v743_v25, inf  ;;  %v749_v27 = vand.u32 2147483648, %v743_v25  ;;  %vm748_vm15 = vcmp.eq.f32.partialorder %v743_v25, 0.0 }
 0x19d   : >> { %v3767_v26 = vpop.eup %3766 }
 0x19e   : >> { %v745_v28 = vmul.f32 %v3767_v26, %v743_v25 }
 0x1a0   : >> { %v747_v29 = vsel %vm746_vm14, %v743_v25, %v745_v28 }
 0x1a1   : >> { %v750_v30 = vsel %vm748_vm15, %v749_v27, %v747_v29 }
 0x1a2   : >> { %v751_v31 = vxor.u32 2147483648, %v750_v30 }
 0x1a4   : >> { %v752_v34 = vsel %vm741_vm0, %v750_v30, %v751_v31 }
 0x1a5   : >> { %v753_v35 = vadd.f32 %v752_v34, %v740_v23 }
 0x1a7   : >> { %3768 = vrcp.f32 %v753_v35 }
 0x1b1   : >> { %v3769_v39 = vpop.eup %3768 }
 0x1b2   : >> { %v761_v40 = vsel %vm760_vm1, 0.0, %v3769_v39  ;;  %vm1158_vm1 = vcmp.eq.s32.totalorder %v1153_v16, %v1150_v15 }
 0x1b3   : >> { %v762_v41 = vmul.f32 %v761_v40, %v761_v40  ;;  %v766_v42 = vmul.f32 %v761_v40, %v734_v17  ;;  %v913_v17 = vld [vmem:[%s4292_s18] sm:$0xff] }
 0x1b5   : >> { %v763_v43 = vadd.f32 1.0, %v762_v41  ;;  %v767_v44 = vsub.f32 %v732_v19, %v766_v42  ;;  %v769_v45 = vadd.f32 %v766_v42, %v736_v20 }
 0x1b7   : >> { %3770 = vrsqrt.f32 %v763_v43  ;;  %771 = vst [vmem:[%s770_s20] sm:$0xff] %v767_v44  ;;  %773 = vst [vmem:[%s772_s21] sm:$0xff] %v769_v45  ;;  %s4296_s20 = smov [#allocation15]  ;;  %s906_s21 = smov [#allocation24] }
 0x1b8   : >> { %v915_v19 = vld [vmem:[%s4296_s20] sm:$0xff] }
 0x1c1   : >> { %v3771_v46 = vpop.eup %3770 }
 0x1c2   : >> { %775 = vst [vmem:[%s774_s22] sm:$0xff] %v3771_v46  ;;  %v765_v47 = vmul.f32 %v3771_v46, %v761_v40  ;;  %s1730_s22 = smov [#allocation24] }
 0x1c4   : >> { %777 = vst [vmem:[%s776_s3] sm:$0xff] %v765_v47  ;;  %s4299_s3 = smov [#allocation8] }
 0x1c5   : >> { %v1736_v20 = vld [vmem:[%s4299_s3] sm:$0xff] }
 0x1c9   : >> { %v794_v51 = vld [vmem:[%s793_s0] ss:$0 sm:$0xff]  ;;  %s4301_s0 = smov [#allocation9] }
 0x1ca   : >> { %v779_v52 = vld [vmem:[%s778_s23] ss:$0 sm:$0xff]  ;;  %v803_v54 = vsel %vm802_vm2, %v794_v51, 0.0  ;;  %s4306_s23 = smov [#allocation10] }
 0x1cb   : >> { %v788_v55 = vsel %vm787_vm3, %v779_v52, 0.0  ;;  %v810_v56 = vld [vmem:[%s809_s24] ss:$0 sm:$0xff]  ;;  %804 = vadd.xlane.f32.xlu1 %v803_v54  ;;  %s4308_s24 = smov [#allocation11] }
 0x1cc   : >> { %789 = vadd.xlane.f32.xlu0 %v788_v55  ;;  %v857_v57 = vld [vmem:[%s856_s25] ss:$0 sm:$0xff]  ;;  %v819_v58 = vsel %vm818_vm4, %v810_v56, 0.0  ;;  %s904_s25 = smov [#allocation23] }
 0x1cd   : >> { %v866_v59 = vsel %vm865_vm5, %v857_v57, 0.0  ;;  %v873_v60 = vld [vmem:[%s872_s26] ss:$0 sm:$0xff]  ;;  %s1728_s26 = smov [#allocation23] }
 0x1ce   : >> { %v842_v61 = vld [vmem:[%s841_s27] ss:$0 sm:$0xff]  ;;  %v882_v0 = vsel %vm881_vm6, %v873_v60, 0.0  ;;  %s935_s27 = smov [#allocation24] }
 0x1cf   : >> { %867 = vadd.xlane.f32.xlu1 %v866_v59  ;;  %v851_v1 = vsel %vm850_vm7, %v842_v61, 0.0  ;;  %v889_v2 = vld [vmem:[%s888_s28] ss:$0 sm:$0xff]  ;;  %s932_s28 = smov [#allocation23] }
 0x1d0   : >> { %820 = vadd.xlane.f32.xlu0 %v819_v58  ;;  %v826_v3 = vld [vmem:[%s825_s29] ss:$0 sm:$0xff]  ;;  %v898_v4 = vsel %vm897_vm9, %v889_v2, 0.0  ;;  %s4318_s29 = smov [#allocation12] }
 0x1d1   : >> { %v835_v5 = vsel %vm834_vm10, %v826_v3, 0.0  ;;  %v1737_v21 = vld [vmem:[%s4301_s0] sm:$0xff] }
 0x1d2   : >> { %v1738_v23 = vld [vmem:[%s4306_s23] sm:$0xff] }
 0x1d3   : >> { %883 = vadd.xlane.f32.xlu1 %v882_v0  ;;  %v1739_v24 = vld [vmem:[%s4308_s24] sm:$0xff] }
 0x1d4   : >> { %852 = vadd.xlane.f32.xlu0 %v851_v1 }
 0x1d7   : >> { %899 = vadd.xlane.f32.xlu1 %v898_v4 }
 0x1d8   : >> { %836 = vadd.xlane.f32.xlu0 %v835_v5 }
 0x258   : >> { %v805_v6 = vpop.xlane.xlu1 %804 }
 0x259   : >> { %v790_v7 = vpop.xlane.xlu0 %789 }
 0x25a   : >> { %792 = vst [vmem:[%s791_s30] sm:$0xff] %v790_v7  ;;  %s4324_s30 = smov [#allocation13] }
 0x25b   : >> { %3007 = vst [vmem:[%s806_s1 + $0x8] sm:$0xff] %v805_v6  ;;  %s4326_s1 = smov [#allocation14] }
 0x25c   : >> { %v868_v9 = vpop.xlane.xlu1 %867 }
 0x25d   : >> { %v821_v8 = vpop.xlane.xlu0 %820 }
 0x25e   : >> { %3008 = vst [vmem:[%s822_s12 + $0x10] sm:$0xff] %v821_v8  ;;  %s4328_s12 = smov [#allocation15] }
 0x260   : >> { %v884_v10 = vpop.xlane.xlu1 %883 }
 0x261   : >> { %v853_v11 = vpop.xlane.xlu0 %852 }
 0x262   : >> { %855 = vst [vmem:[%s854_s13] sm:$0xff] %v853_v11  ;;  %s1756_s13 = smov [#allocation23] }
 0x263   : >> { %3010 = vst [vmem:[%s869_s14 + $0x8] sm:$0xff] %v868_v9  ;;  %s4330_s14 = smov [#allocation8] }
 0x264   : >> { %3011 = vst [vmem:[%s885_s15 + $0x10] sm:$0xff] %v884_v10  ;;  %v900_v12 = vpop.xlane.xlu1 %899  ;;  %s4332_s15 = smov [#allocation9] }
 0x265   : >> { %v837_v13 = vpop.xlane.xlu0 %836  ;;  %3012 = vst [vmem:[%s901_s16 + $0x18] sm:$0xff] %v900_v12  ;;  %s4334_s16 = smov [#allocation10] }
 0x266   : >> { %3009 = vst [vmem:[%s838_s17 + $0x18] sm:$0xff] %v837_v13  ;;  %s1759_s17 = smov [#allocation24] }
 0x26c   : >> { %v907_v22 = vld [vmem:[%s906_s21] sm:$0xff]  ;;  %v3014_v52 = vld [vmem:[%s935_s27 + $0x8] sm:$0xff]  ;;  %s4352_s21 = smov [#allocation13]  ;;  %s4372_s27 = smov [#allocation11] }
 0x26d   : >> { %v917_v25 = vmul.f32 %v914_v18, %v907_v22  ;;  %v920_v26 = vmul.f32 %v915_v19, %v907_v22  ;;  %v922_v27 = vmul.f32 %v912_v14, %v907_v22  ;;  %v925_v28 = vmul.f32 %v913_v17, %v907_v22  ;;  %v1731_v29 = vld [vmem:[%s1730_s22] sm:$0xff]  ;;  %v3013_v53 = vld [vmem:[%s932_s28 + $0x8] sm:$0xff]  ;;  %s4356_s22 = smov [#allocation14]  ;;  %s1003_s28 = smov [#allocation24] }
 0x26e   : >> { %v905_v30 = vld [vmem:[%s904_s25] sm:$0xff]  ;;  %v1741_v35 = vmul.f32 %v1738_v23, %v1731_v29  ;;  %v1744_v36 = vmul.f32 %v1739_v24, %v1731_v29  ;;  %v1746_v37 = vmul.f32 %v1736_v20, %v1731_v29  ;;  %v1749_v38 = vmul.f32 %v1737_v21, %v1731_v29  ;;  %v3171_v2 = vld [vmem:[%s1756_s13 + $0x8] sm:$0xff]  ;;  %s4365_s25 = smov [#allocation9]  ;;  %s4391_s13 = smov [#allocation15] }
 0x26f   : >> { %v916_v31 = vmul.f32 %v912_v14, %v905_v30  ;;  %v919_v32 = vmul.f32 %v913_v17, %v905_v30  ;;  %v923_v33 = vmul.f32 %v914_v18, %v905_v30  ;;  %v926_v34 = vmul.f32 %v915_v19, %v905_v30  ;;  %v1729_v39 = vld [vmem:[%s1728_s26] sm:$0xff]  ;;  %v3172_v7 = vld [vmem:[%s1759_s17 + $0x8] sm:$0xff]  ;;  %s4370_s26 = smov [#allocation10]  ;;  %s4399_s17 = smov [#allocation9] }
 0x270   : >> { %v1740_v44 = vmul.f32 %v1736_v20, %v1729_v39  ;;  %v1743_v45 = vmul.f32 %v1737_v21, %v1729_v39  ;;  %v1747_v46 = vmul.f32 %v1738_v23, %v1729_v39  ;;  %v1750_v47 = vmul.f32 %v1739_v24, %v1729_v39 }
 0x271   : >> { %v918_v40 = vsub.f32 %v916_v31, %v917_v25  ;;  %v921_v41 = vsub.f32 %v919_v32, %v920_v26  ;;  %v924_v42 = vadd.f32 %v923_v33, %v922_v27  ;;  %v927_v43 = vadd.f32 %v926_v34, %v925_v28 }
 0x272   : >> { %v1742_v48 = vsub.f32 %v1740_v44, %v1741_v35  ;;  %v1745_v49 = vsub.f32 %v1743_v45, %v1744_v36  ;;  %v1748_v50 = vadd.f32 %v1747_v46, %v1746_v37  ;;  %v1751_v51 = vadd.f32 %v1750_v47, %v1749_v38 }
 0x273   : >> { %928 = vst [vmem:[%s4290_s2] sm:$0xff] %v918_v40  ;;  %929 = vst [vmem:[%s4292_s18] sm:$0xff] %v921_v41  ;;  %s4339_s2 = smov [#allocation11]  ;;  %s969_s18 = smov [#allocation24] }
 0x274   : >> { %930 = vst [vmem:[%s4294_s19] sm:$0xff] %v924_v42  ;;  %931 = vst [vmem:[%s4296_s20] sm:$0xff] %v927_v43  ;;  %s966_s19 = smov [#allocation23]  ;;  %s4350_s20 = smov [#allocation12]  ;;  %v3024_v26 = vld [vmem:[%s969_s18 + $0x10] sm:$0xff] }
 0x275   : >> { %1752 = vst [vmem:[%s4299_s3] sm:$0xff] %v1742_v48  ;;  %1753 = vst [vmem:[%s4301_s0] sm:$0xff] %v1745_v49  ;;  %s4358_s3 = smov [#allocation15]  ;;  %s1793_s0 = smov [#allocation24]  ;;  %v3023_v27 = vld [vmem:[%s966_s19 + $0x10] sm:$0xff] }
 0x276   : >> { %1754 = vst [vmem:[%s4306_s23] sm:$0xff] %v1748_v50  ;;  %1755 = vst [vmem:[%s4308_s24] sm:$0xff] %v1751_v51  ;;  %s1790_s23 = smov [#allocation23]  ;;  %s4363_s24 = smov [#allocation8]  ;;  %v3182_v38 = vld [vmem:[%s1793_s0 + $0x10] sm:$0xff] }
 0x277   : >> { %v3181_v44 = vld [vmem:[%s1790_s23 + $0x10] sm:$0xff]  ;;  %s4404_s18 = smov [#allocation11]  ;;  %s1034_s19 = smov [#allocation21] }
 0x278   : >> { %s4428_s0 = smov [#allocation15]  ;;  %s4431_s23 = smov [#allocation8] }
 0x27a   : >> { %v3015_v54 = vld [vmem:[%s4318_s29 + $0x8] sm:$0xff] }
 0x27b   : >> { %v3016_v55 = vld [vmem:[%s4324_s30 + $0x8] sm:$0xff]  ;;  %v950_v58 = vmul.f32 %v3015_v54, %v3013_v53  ;;  %v956_v61 = vmul.f32 %v3015_v54, %v3014_v52 }
 0x27c   : >> { %v3017_v56 = vld [vmem:[%s4326_s1 + $0x8] sm:$0xff]  ;;  %v953_v60 = vmul.f32 %v3016_v55, %v3013_v53  ;;  %v959_v0 = vmul.f32 %v3016_v55, %v3014_v52 }
 0x27d   : >> { %v3018_v57 = vld [vmem:[%s4328_s12 + $0x8] sm:$0xff]  ;;  %v951_v59 = vmul.f32 %v3017_v56, %v3014_v52  ;;  %v957_v63 = vmul.f32 %v3017_v56, %v3013_v53 }
 0x27e   : >> { %v954_v62 = vmul.f32 %v3018_v57, %v3014_v52  ;;  %v960_v1 = vmul.f32 %v3018_v57, %v3013_v53  ;;  %v3173_v4 = vld [vmem:[%s4330_s14 + $0x8] sm:$0xff] }
 0x27f   : >> { %v952_v3 = vsub.f32 %v950_v58, %v951_v59  ;;  %v3174_v5 = vld [vmem:[%s4332_s15 + $0x8] sm:$0xff]  ;;  %v958_v9 = vadd.f32 %v957_v63, %v956_v61  ;;  %v1774_v12 = vmul.f32 %v3173_v4, %v3171_v2  ;;  %v1780_v18 = vmul.f32 %v3173_v4, %v3172_v7 }
 0x280   : >> { %v3175_v6 = vld [vmem:[%s4334_s16 + $0x8] sm:$0xff]  ;;  %v955_v8 = vsub.f32 %v953_v60, %v954_v62  ;;  %v961_v10 = vadd.f32 %v960_v1, %v959_v0  ;;  %v1777_v14 = vmul.f32 %v3174_v5, %v3171_v2  ;;  %v1783_v20 = vmul.f32 %v3174_v5, %v3172_v7  ;;  %v3034_v62 = vld [vmem:[%s1003_s28 + $0x18] sm:$0xff]  ;;  %s4451_s28 = smov [#allocation13] }
 0x281   : >> { %v3176_v11 = vld [vmem:[%s4339_s2 + $0x8] sm:$0xff]  ;;  %3019 = vst [vmem:[%s4318_s29 + $0x8] sm:$0xff] %v952_v3  ;;  %v1775_v13 = vmul.f32 %v3175_v6, %v3172_v7  ;;  %3021 = vst [vmem:[%s4326_s1 + $0x8] sm:$0xff] %v958_v9  ;;  %v1781_v19 = vmul.f32 %v3175_v6, %v3171_v2  ;;  %s1000_s29 = smov [#allocation23]  ;;  %s4384_s1 = smov [#allocation14] }
 0x282   : >> { %v1778_v17 = vmul.f32 %v3176_v11, %v3172_v7  ;;  %3020 = vst [vmem:[%s4324_s30 + $0x8] sm:$0xff] %v955_v8  ;;  %3022 = vst [vmem:[%s4328_s12 + $0x8] sm:$0xff] %v961_v10  ;;  %v1784_v21 = vmul.f32 %v3176_v11, %v3171_v2  ;;  %s4382_s30 = smov [#allocation12]  ;;  %s4389_s12 = smov [#allocation13]  ;;  %v3033_v63 = vld [vmem:[%s1000_s29 + $0x18] sm:$0xff] }
 0x283   : >> { %v1776_v22 = vsub.f32 %v1774_v12, %v1775_v13  ;;  %v1782_v24 = vadd.f32 %v1781_v19, %v1780_v18  ;;  %s4456_s29 = smov [#allocation14] }
 0x284   : >> { %v1779_v23 = vsub.f32 %v1777_v14, %v1778_v17  ;;  %v1785_v25 = vadd.f32 %v1784_v21, %v1783_v20 }
 0x285   : >> { %3177 = vst [vmem:[%s4330_s14 + $0x8] sm:$0xff] %v1776_v22  ;;  %3179 = vst [vmem:[%s4334_s16 + $0x8] sm:$0xff] %v1782_v24  ;;  %s1827_s14 = smov [#allocation24]  ;;  %s4394_s16 = smov [#allocation8] }
 0x286   : >> { %3178 = vst [vmem:[%s4332_s15 + $0x8] sm:$0xff] %v1779_v23  ;;  %3180 = vst [vmem:[%s4339_s2 + $0x8] sm:$0xff] %v1785_v25  ;;  %s1824_s15 = smov [#allocation23]  ;;  %s4401_s2 = smov [#allocation10]  ;;  %v3192_v12 = vld [vmem:[%s1827_s14 + $0x18] sm:$0xff] }
 0x287   : >> { %v3191_v17 = vld [vmem:[%s1824_s15 + $0x18] sm:$0xff]  ;;  %s1096_s14 = smov [#allocation15]  ;;  %s1118_s15 = smov [#allocation12] }
 0x288   : >> { %v3025_v28 = vld [vmem:[%s4350_s20 + $0x10] sm:$0xff] }
 0x289   : >> { %v3026_v29 = vld [vmem:[%s4352_s21 + $0x10] sm:$0xff]  ;;  %v984_v32 = vmul.f32 %v3025_v28, %v3023_v27  ;;  %v990_v33 = vmul.f32 %v3025_v28, %v3024_v26 }
 0x28a   : >> { %v3027_v30 = vld [vmem:[%s4356_s22 + $0x10] sm:$0xff]  ;;  %v987_v35 = vmul.f32 %v3026_v29, %v3023_v27  ;;  %v993_v39 = vmul.f32 %v3026_v29, %v3024_v26 }
 0x28b   : >> { %v3028_v31 = vld [vmem:[%s4358_s3 + $0x10] sm:$0xff]  ;;  %v985_v34 = vmul.f32 %v3027_v30, %v3024_v26  ;;  %v991_v37 = vmul.f32 %v3027_v30, %v3023_v27 }
 0x28c   : >> { %v988_v36 = vmul.f32 %v3028_v31, %v3024_v26  ;;  %v994_v40 = vmul.f32 %v3028_v31, %v3023_v27  ;;  %v3183_v45 = vld [vmem:[%s4363_s24 + $0x10] sm:$0xff] }
 0x28d   : >> { %v986_v41 = vsub.f32 %v984_v32, %v985_v34  ;;  %v992_v43 = vadd.f32 %v991_v37, %v990_v33  ;;  %v3184_v46 = vld [vmem:[%s4365_s25 + $0x10] sm:$0xff]  ;;  %v1808_v50 = vmul.f32 %v3183_v45, %v3181_v44  ;;  %v1814_v52 = vmul.f32 %v3183_v45, %v3182_v38 }
 0x28e   : >> { %v989_v42 = vsub.f32 %v987_v35, %v988_v36  ;;  %v995_v47 = vadd.f32 %v994_v40, %v993_v39  ;;  %v3185_v48 = vld [vmem:[%s4370_s26 + $0x10] sm:$0xff]  ;;  %v1811_v51 = vmul.f32 %v3184_v46, %v3181_v44  ;;  %v1817_v56 = vmul.f32 %v3184_v46, %v3182_v38  ;;  %v4419_v36 = vld [vmem:[%s1034_s19] ss:$0 sm:$0xff]  ;;  %s4602_s19 = smov [#allocation13] }
 0x28f   : >> { %v3186_v49 = vld [vmem:[%s4372_s27 + $0x10] sm:$0xff]  ;;  %3029 = vst [vmem:[%s4350_s20 + $0x10] sm:$0xff] %v986_v41  ;;  %3031 = vst [vmem:[%s4356_s22 + $0x10] sm:$0xff] %v992_v43  ;;  %v1809_v53 = vmul.f32 %v3185_v48, %v3182_v38  ;;  %v1815_v55 = vmul.f32 %v3185_v48, %v3181_v44  ;;  %s1036_s20 = smov [#allocation22]  ;;  %s4417_s22 = smov [#allocation14] }
 0x290   : >> { %v1812_v54 = vmul.f32 %v3186_v49, %v3182_v38  ;;  %3030 = vst [vmem:[%s4352_s21 + $0x10] sm:$0xff] %v989_v42  ;;  %3032 = vst [vmem:[%s4358_s3 + $0x10] sm:$0xff] %v995_v47  ;;  %v1818_v57 = vmul.f32 %v3186_v49, %v3181_v44  ;;  %s4415_s21 = smov [#allocation12]  ;;  %v4421_v37 = vld [vmem:[%s1036_s20] ss:$0 sm:$0xff]  ;;  %s4426_s3 = smov [#allocation13] }
 0x291   : >> { %v1810_v58 = vsub.f32 %v1808_v50, %v1809_v53  ;;  %v1816_v60 = vadd.f32 %v1815_v55, %v1814_v52  ;;  %s1254_s20 = smov [#allocation20] }
 0x292   : >> { %v1813_v59 = vsub.f32 %v1811_v51, %v1812_v54  ;;  %v1819_v61 = vadd.f32 %v1818_v57, %v1817_v56 }
 0x293   : >> { %3187 = vst [vmem:[%s4363_s24 + $0x10] sm:$0xff] %v1810_v58  ;;  %3189 = vst [vmem:[%s4370_s26 + $0x10] sm:$0xff] %v1816_v60  ;;  %s4433_s24 = smov [#allocation10]  ;;  %s4439_s26 = smov [#allocation11] }
 0x294   : >> { %3188 = vst [vmem:[%s4365_s25 + $0x10] sm:$0xff] %v1813_v59  ;;  %3190 = vst [vmem:[%s4372_s27 + $0x10] sm:$0xff] %v1819_v61  ;;  %s4437_s25 = smov [#allocation9]  ;;  %s4449_s27 = smov [#allocation12] }
 0x296   : >> { %v3035_v0 = vld [vmem:[%s4382_s30 + $0x18] sm:$0xff] }
 0x297   : >> { %v3037_v1 = vld [vmem:[%s4384_s1 + $0x18] sm:$0xff]  ;;  %v1018_v4 = vmul.f32 %v3035_v0, %v3033_v63  ;;  %v1024_v6 = vmul.f32 %v3035_v0, %v3034_v62 }
 0x298   : >> { %v3036_v2 = vld [vmem:[%s4389_s12 + $0x18] sm:$0xff]  ;;  %v1019_v5 = vmul.f32 %v3037_v1, %v3034_v62  ;;  %v1025_v7 = vmul.f32 %v3037_v1, %v3033_v63 }
 0x299   : >> { %v3038_v3 = vld [vmem:[%s4391_s13 + $0x18] sm:$0xff]  ;;  %v1021_v10 = vmul.f32 %v3036_v2, %v3033_v63  ;;  %v1027_v11 = vmul.f32 %v3036_v2, %v3034_v62 }
 0x29a   : >> { %v1022_v8 = vmul.f32 %v3038_v3, %v3034_v62  ;;  %v1028_v9 = vmul.f32 %v3038_v3, %v3033_v63  ;;  %v1020_v13 = vsub.f32 %v1018_v4, %v1019_v5  ;;  %v1026_v14 = vadd.f32 %v1025_v7, %v1024_v6  ;;  %v3193_v18 = vld [vmem:[%s4394_s16 + $0x18] sm:$0xff] }
 0x29b   : >> { %v3194_v19 = vld [vmem:[%s4399_s17 + $0x18] sm:$0xff]  ;;  %v1842_v24 = vmul.f32 %v3193_v18, %v3191_v17  ;;  %v1848_v27 = vmul.f32 %v3193_v18, %v3192_v12 }
 0x29c   : >> { %v3195_v20 = vld [vmem:[%s4401_s2 + $0x18] sm:$0xff]  ;;  %v1023_v21 = vsub.f32 %v1021_v10, %v1022_v8  ;;  %v1029_v22 = vadd.f32 %v1028_v9, %v1027_v11  ;;  %3039 = vst [vmem:[%s4382_s30 + $0x18] sm:$0xff] %v1020_v13  ;;  %v1845_v26 = vmul.f32 %v3194_v19, %v3191_v17  ;;  %3041 = vst [vmem:[%s4384_s1 + $0x18] sm:$0xff] %v1026_v14  ;;  %s4458_s30 = smov [#allocation15]  ;;  %s1090_s1 = smov [#allocation12] }
 0x29d   : >> { %v3196_v23 = vld [vmem:[%s4404_s18 + $0x18] sm:$0xff]  ;;  %v1843_v25 = vmul.f32 %v3195_v20, %v3192_v12  ;;  %v1849_v29 = vmul.f32 %v3195_v20, %v3191_v17  ;;  %v1851_v30 = vmul.f32 %v3194_v19, %v3192_v12 }
 0x29e   : >> { %v1846_v28 = vmul.f32 %v3196_v23, %v3192_v12  ;;  %v1852_v31 = vmul.f32 %v3196_v23, %v3191_v17  ;;  %3040 = vst [vmem:[%s4389_s12 + $0x18] sm:$0xff] %v1023_v21  ;;  %3042 = vst [vmem:[%s4391_s13 + $0x18] sm:$0xff] %v1029_v22  ;;  %s1092_s12 = smov [#allocation13]  ;;  %s1094_s13 = smov [#allocation14] }
 0x29f   : >> { %v1844_v32 = vsub.f32 %v1842_v24, %v1843_v25  ;;  %v1850_v34 = vadd.f32 %v1849_v29, %v1848_v27 }
 0x2a0   : >> { %v1847_v33 = vsub.f32 %v1845_v26, %v1846_v28  ;;  %v1853_v35 = vadd.f32 %v1852_v31, %v1851_v30 }
 0x2a1   : >> { %3197 = vst [vmem:[%s4394_s16 + $0x18] sm:$0xff] %v1844_v32  ;;  %3199 = vst [vmem:[%s4401_s2 + $0x18] sm:$0xff] %v1850_v34  ;;  %s1120_s16 = smov [#allocation13]  ;;  %s1124_s2 = smov [#allocation15] }
 0x2a2   : >> { %3198 = vst [vmem:[%s4399_s17 + $0x18] sm:$0xff] %v1847_v33  ;;  %3200 = vst [vmem:[%s4404_s18 + $0x18] sm:$0xff] %v1853_v35  ;;  %s1122_s17 = smov [#allocation14]  ;;  %s1147_s18 = smov [#allocation19] }
 0x2a3   : >> { %v1042_v38 = vld [vmem:[%s4415_s21] sm:$0xff] }
 0x2a4   : >> { %v1044_v39 = vld [vmem:[%s4417_s22] sm:$0xff]  ;;  %v1046_v41 = vmul.f32 %v1042_v38, %v4419_v36  ;;  %v1049_v42 = vmul.f32 %v1042_v38, %v4421_v37 }
 0x2a5   : >> { %v1043_v40 = vld [vmem:[%s4426_s3] sm:$0xff]  ;;  %v1052_v44 = vmul.f32 %v1044_v39, %v4419_v36  ;;  %v1055_v45 = vmul.f32 %v1044_v39, %v4421_v37 }
 0x2a6   : >> { %v1045_v43 = vld [vmem:[%s4428_s0] sm:$0xff]  ;;  %v1047_v46 = vmul.f32 %v1043_v40, %v4421_v37  ;;  %v1050_v47 = vmul.f32 %v1043_v40, %v4419_v36 }
 0x2a7   : >> { %v1053_v48 = vmul.f32 %v1045_v43, %v4421_v37  ;;  %v1056_v49 = vmul.f32 %v1045_v43, %v4419_v36 }
 0x2a8   : >> { %v1860_v50 = vld [vmem:[%s4431_s23] ss:$0 sm:$0xff]  ;;  %v3202_v52 = vld [vmem:[%s4431_s23 + $0x7] ss:$0 sm:$0xff]  ;;  %v1048_v53 = vsub.f32 %v1046_v41, %v1047_v46  ;;  %v1051_v54 = vadd.f32 %v1050_v47, %v1049_v42  ;;  %v3203_v58 = vld [vmem:[%s4431_s23 + $0x7] sm:$0xfe] }
 0x2a9   : >> { %v3201_v51 = vld [vmem:[%s4431_s23 - $0x1] sm:$0xfe]  ;;  %v1054_v55 = vsub.f32 %v1052_v44, %v1053_v48  ;;  %v1057_v56 = vadd.f32 %v1056_v49, %v1055_v45  ;;  %v3204_v59 = vld [vmem:[%s4431_s23 + $0xf] ss:$0 sm:$0xff]  ;;  %v3206_v60 = vld [vmem:[%s4431_s23 + $0xf] sm:$0xfe]  ;;  %v1878_v61 = vsel %vm1568_vm11, %v3202_v52, %v3203_v58 }
 0x2aa   : >> { %v1867_v57 = vsel %vm1568_vm11, %v1860_v50, %v3201_v51  ;;  %v1889_v62 = vsel %vm1568_vm11, %v3204_v59, %v3206_v60  ;;  %v3207_v63 = vld [vmem:[%s4431_s23 + $0x17] ss:$0 sm:$0xff]  ;;  %v3209_v0 = vld [vmem:[%s4431_s23 + $0x17] sm:$0xfe]  ;;  %v3210_v1 = vld [vmem:[%s4431_s23 + $0x1f] ss:$0 sm:$0xff]  ;;  %1058 = vst [vmem:[%s4415_s21] sm:$0xff] %v1048_v53 }
 0x2ab   : >> { %1870 = vst [vmem:[%s4431_s23] sm:$0xff] %v1867_v57  ;;  %1059 = vst [vmem:[%s4426_s3] sm:$0xff] %v1051_v54  ;;  %v1900_v2 = vsel %vm1568_vm11, %v3207_v63, %v3209_v0  ;;  %v1904_v3 = vld [vmem:[%s4433_s24] ss:$0 sm:$0xff]  ;;  %v3213_v4 = vld [vmem:[%s4433_s24 + $0x19] sm:$0x7f]  ;;  %s4610_s21 = smov [#allocation12]  ;;  %s4624_s3 = smov [#allocation15] }
 0x2ac   : >> { %1060 = vst [vmem:[%s4417_s22] sm:$0xff] %v1054_v55  ;;  %1061 = vst [vmem:[%s4428_s0] sm:$0xff] %v1057_v56  ;;  %v3214_v5 = vld [vmem:[%s4433_s24 + $0x18] ss:$0 sm:$0xff]  ;;  %v1913_v6 = vsel %vm5050_vm12, %v3210_v1, %v3213_v4  ;;  %v3216_v7 = vld [vmem:[%s4433_s24 + $0x11] sm:$0x7f]  ;;  %s4613_s22 = smov [#allocation14]  ;;  %s4688_s0 = smov [#allocation13] }
 0x2ad   : >> { %3205 = vst [vmem:[%s4431_s23 + $0x8] sm:$0xff] %v1878_v61  ;;  %3208 = vst [vmem:[%s4431_s23 + $0x10] sm:$0xff] %v1889_v62  ;;  %v3217_v8 = vld [vmem:[%s4433_s24 + $0x10] ss:$0 sm:$0xff]  ;;  %v3219_v9 = vld [vmem:[%s4433_s24 + $0x9] sm:$0x7f]  ;;  %v1922_v10 = vsel %vm5050_vm12, %v3214_v5, %v3216_v7 }
 0x2ae   : >> { %3211 = vst [vmem:[%s4431_s23 + $0x18] sm:$0xff] %v1900_v2  ;;  %3212 = vst [vmem:[%s4431_s23 + $0x1] sm:$0x1] %v1904_v3  ;;  %v1931_v11 = vsel %vm5050_vm12, %v3217_v8, %v3219_v9  ;;  %v3220_v12 = vld [vmem:[%s4433_s24 + $0x8] ss:$0 sm:$0xff]  ;;  %s4691_s23 = smov [#allocation12] }
 0x2af   : >> { %3215 = vst [vmem:[%s4433_s24 + $0x18] sm:$0xff] %v1913_v6  ;;  %v3222_v13 = vld [vmem:[%s4433_s24 + $0x1] sm:$0x7f]  ;;  %v1944_v14 = vld [vmem:[%s4437_s25] ss:$0 sm:$0xff]  ;;  %3218 = vst [vmem:[%s4433_s24 + $0x10] sm:$0xff] %v1922_v10 }
 0x2b0   : >> { %3221 = vst [vmem:[%s4433_s24 + $0x8] sm:$0xff] %v1931_v11  ;;  %v1939_v17 = vsel %vm5050_vm12, %v3220_v12, %v3222_v13  ;;  %v3223_v18 = vld [vmem:[%s4437_s25 - $0x1] sm:$0xfe]  ;;  %v3224_v19 = vld [vmem:[%s4437_s25 + $0x7] ss:$0 sm:$0xff] }
 0x2b1   : >> { %v3225_v20 = vld [vmem:[%s4437_s25 + $0x7] sm:$0xfe]  ;;  %1941 = vst [vmem:[%s4433_s24] sm:$0xff] %v1939_v17  ;;  %v1951_v21 = vsel %vm1568_vm11, %v1944_v14, %v3223_v18  ;;  %v3226_v23 = vld [vmem:[%s4437_s25 + $0xf] ss:$0 sm:$0xff]  ;;  %v3228_v24 = vld [vmem:[%s4437_s25 + $0xf] sm:$0xfe] }
 0x2b2   : >> { %v1962_v22 = vsel %vm1568_vm11, %v3224_v19, %v3225_v20  ;;  %v3229_v25 = vld [vmem:[%s4437_s25 + $0x17] ss:$0 sm:$0xff]  ;;  %1954 = vst [vmem:[%s4437_s25] sm:$0xff] %v1951_v21  ;;  %v1973_v26 = vsel %vm1568_vm11, %v3226_v23, %v3228_v24  ;;  %v3231_v27 = vld [vmem:[%s4437_s25 + $0x17] sm:$0xfe]  ;;  %v3232_v28 = vld [vmem:[%s4437_s25 + $0x1f] ss:$0 sm:$0xff] }
 0x2b3   : >> { %3227 = vst [vmem:[%s4437_s25 + $0x8] sm:$0xff] %v1962_v22  ;;  %v1988_v29 = vld [vmem:[%s4439_s26] ss:$0 sm:$0xff]  ;;  %3230 = vst [vmem:[%s4437_s25 + $0x10] sm:$0xff] %v1973_v26  ;;  %v1984_v30 = vsel %vm1568_vm11, %v3229_v25, %v3231_v27  ;;  %v3235_v31 = vld [vmem:[%s4439_s26 + $0x19] sm:$0x7f] }
 0x2b4   : >> { %3234 = vst [vmem:[%s4437_s25 + $0x1] sm:$0x1] %v1988_v29  ;;  %v3236_v32 = vld [vmem:[%s4439_s26 + $0x18] ss:$0 sm:$0xff]  ;;  %v3238_v33 = vld [vmem:[%s4439_s26 + $0x11] sm:$0x7f]  ;;  %v1997_v34 = vsel %vm5050_vm12, %v3232_v28, %v3235_v31 }
 0x2b5   : >> { %3233 = vst [vmem:[%s4437_s25 + $0x18] sm:$0xff] %v1984_v30  ;;  %v2006_v35 = vsel %vm5050_vm12, %v3236_v32, %v3238_v33  ;;  %v3239_v38 = vld [vmem:[%s4439_s26 + $0x10] ss:$0 sm:$0xff]  ;;  %v3241_v39 = vld [vmem:[%s4439_s26 + $0x9] sm:$0x7f]  ;;  %3237 = vst [vmem:[%s4439_s26 + $0x18] sm:$0xff] %v1997_v34 }
 0x2b6   : >> { %v3242_v40 = vld [vmem:[%s4439_s26 + $0x8] ss:$0 sm:$0xff]  ;;  %3240 = vst [vmem:[%s4439_s26 + $0x10] sm:$0xff] %v2006_v35  ;;  %v2015_v41 = vsel %vm5050_vm12, %v3239_v38, %v3241_v39  ;;  %v3244_v42 = vld [vmem:[%s4439_s26 + $0x1] sm:$0x7f]  ;;  %v1201_v30 = vadd.s32 8, %v4573_v16 }
 0x2b7   : >> { %v3043_v43 = vld [vmem:[%s4449_s27 + $0x8] sm:$0xff]  ;;  %3243 = vst [vmem:[%s4439_s26 + $0x8] sm:$0xff] %v2015_v41  ;;  %v2023_v45 = vsel %vm5050_vm12, %v3242_v40, %v3244_v42  ;;  %v1208_v31 = vadd.s32 16, %v4573_v16  ;;  %v4588_v16 = vmov %v4173_v16  ;;  %v1173_v32 = vadd.s32 16, %v1153_v16  ;;  %v1154_v41 = vld [vmem:[%s1147_s18] ss:$0 sm:$0xff] }
 0x2b8   : >> { %v3044_v44 = vld [vmem:[%s4451_s28 + $0x8] sm:$0xff]  ;;  %v1074_v46 = vmul.f32 %v3043_v43, %v4419_v36  ;;  %v1077_v48 = vmul.f32 %v3043_v43, %v4421_v37  ;;  %2025 = vst [vmem:[%s4439_s26] sm:$0xff] %v2023_v45  ;;  %v1181_v33 = vadd.s32 24, %v1153_v16  ;;  %v1235_v34 = vadd.s32 8, %v4588_v16  ;;  %s4077_s24 = smov 1   ;;  %s4698_s25 = smov [#allocation12] }
 0x2b9   : >> { %v1075_v47 = vmul.f32 %v3044_v44, %v4421_v37  ;;  %v3045_v49 = vld [vmem:[%s4456_s29 + $0x8] sm:$0xff]  ;;  %v1078_v51 = vmul.f32 %v3044_v44, %v4419_v36  ;;  %v1242_v35 = vadd.s32 16, %v4588_v16  ;;  %v1249_v38 = vadd.s32 24, %v4588_v16  ;;  %s4707_s26 = smov [#allocation14]  ;;  %s4774_s18 = smov [#allocation15] }
 0x2ba   : >> { %v3046_v50 = vld [vmem:[%s4458_s30 + $0x8] sm:$0xff]  ;;  %v1080_v52 = vmul.f32 %v3045_v49, %v4419_v36  ;;  %v1083_v54 = vmul.f32 %v3045_v49, %v4421_v37  ;;  %vm1202_vm14 = vcmp.eq.s32.totalorder %v1201_v30, %v1188_v15  ;;  %vm1209_vm15 = vcmp.eq.s32.totalorder %v1208_v31, %v1188_v15 }
 0x2bb   : >> { %v1081_v53 = vmul.f32 %v3046_v50, %v4421_v37  ;;  %v1076_v55 = vsub.f32 %v1074_v46, %v1075_v47  ;;  %v1084_v56 = vmul.f32 %v3046_v50, %v4419_v36  ;;  %v1079_v57 = vadd.f32 %v1078_v51, %v1077_v48  ;;  %v1261_v46 = vld [vmem:[%s1254_s20] ss:$0 sm:$0xff]  ;;  %s4895_s20 = smov [#allocation13] }
 0x2bc   : >> { %v4605_v15 = vmov %v4171_v15  ;;  %vm1174_vm3 = vcmp.eq.s32.totalorder %v1173_v32, %v1150_v15  ;;  %vm1182_vm4 = vcmp.eq.s32.totalorder %v1181_v33, %v1150_v15  ;;  %vm1229_vm5 = vcmp.eq.s32.totalorder %v4588_v16, %v4597_v15 }
 0x2bd   : >> { %v1082_v58 = vsub.f32 %v1080_v52, %v1081_v53  ;;  %3047 = vst [vmem:[%s4449_s27 + $0x8] sm:$0xff] %v1076_v55  ;;  %v1085_v59 = vadd.f32 %v1084_v56, %v1083_v54  ;;  %3048 = vst [vmem:[%s4451_s28 + $0x8] sm:$0xff] %v1079_v57  ;;  %vm1236_vm6 = vcmp.eq.s32.totalorder %v1235_v34, %v4597_v15  ;;  %s4078_s27 = smov 127   ;;  %s4710_s28 = smov [#allocation12] }
 0x2be   : >> { %vm1243_vm7 = vcmp.eq.s32.totalorder %v1242_v35, %v4597_v15  ;;  %vm1250_vm9 = vcmp.eq.s32.totalorder %v1249_v38, %v4597_v15 }
 0x2bf   : >> { %3049 = vst [vmem:[%s4456_s29 + $0x8] sm:$0xff] %v1082_v58  ;;  %3050 = vst [vmem:[%s4458_s30 + $0x8] sm:$0xff] %v1085_v59  ;;  %s4720_s29 = smov [#allocation13]  ;;  %s4724_s30 = smov [#allocation14] }
 0x2c4   : >> { %v3051_v60 = vld [vmem:[%s1090_s1 + $0x10] sm:$0xff] }
 0x2c5   : >> { %v3052_v61 = vld [vmem:[%s1092_s12 + $0x10] sm:$0xff]  ;;  %v1102_v62 = vmul.f32 %v3051_v60, %v4419_v36  ;;  %v1105_v63 = vmul.f32 %v3051_v60, %v4421_v37 }
 0x2c6   : >> { %v3053_v0 = vld [vmem:[%s1094_s13 + $0x10] sm:$0xff]  ;;  %v1103_v1 = vmul.f32 %v3052_v61, %v4421_v37  ;;  %v1106_v2 = vmul.f32 %v3052_v61, %v4419_v36 }
 0x2c7   : >> { %v3054_v3 = vld [vmem:[%s1096_s14 + $0x10] sm:$0xff]  ;;  %v1108_v4 = vmul.f32 %v3053_v0, %v4419_v36  ;;  %v1111_v5 = vmul.f32 %v3053_v0, %v4421_v37 }
 0x2c8   : >> { %v1109_v6 = vmul.f32 %v3054_v3, %v4421_v37  ;;  %v1112_v7 = vmul.f32 %v3054_v3, %v4419_v36  ;;  %v1104_v8 = vsub.f32 %v1102_v62, %v1103_v1  ;;  %v1107_v9 = vadd.f32 %v1106_v2, %v1105_v63 }
 0x2ca   : >> { %v1110_v10 = vsub.f32 %v1108_v4, %v1109_v6  ;;  %v1113_v11 = vadd.f32 %v1112_v7, %v1111_v5  ;;  %3055 = vst [vmem:[%s1090_s1 + $0x10] sm:$0xff] %v1104_v8  ;;  %3056 = vst [vmem:[%s1092_s12 + $0x10] sm:$0xff] %v1107_v9  ;;  %s4731_s1 = smov [#allocation15]  ;;  %s4735_s12 = smov [#allocation13] }
 0x2cc   : >> { %3057 = vst [vmem:[%s1094_s13 + $0x10] sm:$0xff] %v1110_v10  ;;  %3058 = vst [vmem:[%s1096_s14 + $0x10] sm:$0xff] %v1113_v11  ;;  %s4742_s13 = smov [#allocation12]  ;;  %s4745_s14 = smov [#allocation14] }
 0x2d1   : >> { %v3059_v12 = vld [vmem:[%s1118_s15 + $0x18] sm:$0xff] }
 0x2d2   : >> { %v3060_v13 = vld [vmem:[%s1120_s16 + $0x18] sm:$0xff]  ;;  %v1133_v17 = vmul.f32 %v3059_v12, %v4421_v37  ;;  %v1130_v19 = vmul.f32 %v3059_v12, %v4419_v36 }
 0x2d3   : >> { %v1131_v14 = vmul.f32 %v3060_v13, %v4421_v37  ;;  %v1134_v18 = vmul.f32 %v3060_v13, %v4419_v36  ;;  %v3061_v20 = vld [vmem:[%s1122_s17 + $0x18] sm:$0xff] }
 0x2d4   : >> { %v3062_v21 = vld [vmem:[%s1124_s2 + $0x18] sm:$0xff]  ;;  %v1136_v22 = vmul.f32 %v3061_v20, %v4419_v36  ;;  %v1139_v24 = vmul.f32 %v3061_v20, %v4421_v37 }
 0x2d5   : >> { %v1137_v23 = vmul.f32 %v3062_v21, %v4421_v37  ;;  %v1140_v25 = vmul.f32 %v3062_v21, %v4419_v36  ;;  %v1135_v26 = vadd.f32 %v1134_v18, %v1133_v17  ;;  %v1132_v27 = vsub.f32 %v1130_v19, %v1131_v14 }
 0x2d6   : >> { %v1215_v37 = vadd.s32 24, %v4573_v16  ;;  %v1165_v36 = vadd.s32 8, %v1153_v16  ;;  %v4592_v16 = vmov %v4173_v16 }
 0x2d7   : >> { %v1138_v28 = vsub.f32 %v1136_v22, %v1137_v23  ;;  %v1141_v29 = vadd.f32 %v1140_v25, %v1139_v24  ;;  %3064 = vst [vmem:[%s1120_s16 + $0x18] sm:$0xff] %v1135_v26  ;;  %3063 = vst [vmem:[%s1118_s15 + $0x18] sm:$0xff] %v1132_v27  ;;  %v4608_v39 = vadd.s32 8, %v4592_v16  ;;  %v1280_v40 = vadd.s32 16, %v4592_v16  ;;  %s4755_s15 = smov [#allocation15]  ;;  %s4759_s16 = smov [#allocation13] }
 0x2d8   : >> { %vm1216_vm0 = vcmp.eq.s32.totalorder %v1215_v37, %v1188_v15  ;;  %vm1166_vm2 = vcmp.eq.s32.totalorder %v1165_v36, %v1150_v15  ;;  %v1288_v42 = vadd.s32 24, %v4592_v16  ;;  %vm1265_vm10 = vcmp.eq.s32.totalorder %v4592_v16, %v4605_v15 }
 0x2d9   : >> { %3065 = vst [vmem:[%s1122_s17 + $0x18] sm:$0xff] %v1138_v28  ;;  %3066 = vst [vmem:[%s1124_s2 + $0x18] sm:$0xff] %v1141_v29  ;;  %vm1273_vm12 = vcmp.eq.s32.totalorder %v4608_v39, %v4605_v15  ;;  %s4765_s17 = smov [#allocation15]  ;;  %s4771_s2 = smov [#allocation14] }
 0x2de   : >> { %v1192_v43 = vld [vmem:[%s4602_s19] sm:$0xff]  ;;  %v3073_v44 = vld [vmem:[%s4602_s19 + $0x8] sm:$0xff]  ;;  %v3075_v45 = vld [vmem:[%s4602_s19 + $0x10] sm:$0xff] }
 0x2df   : >> { %v1196_v47 = vsel %vm1195_vm13, 0.0, %v1192_v43  ;;  %v1203_v48 = vsel %vm1202_vm14, 0.0, %v3073_v44  ;;  %v1210_v49 = vsel %vm1209_vm15, 0.0, %v3075_v45  ;;  %v3077_v50 = vld [vmem:[%s4602_s19 + $0x18] sm:$0xff]  ;;  %v1155_v51 = vld [vmem:[%s4610_s21] sm:$0xff]  ;;  %v3067_v52 = vld [vmem:[%s4610_s21 + $0x8] sm:$0xff]  ;;  %vm1281_vm13 = vcmp.eq.s32.totalorder %v1280_v40, %v4605_v15 }
 0x2e0   : >> { %1197 = vst [vmem:[%s4602_s19] sm:$0xff] %v1196_v47  ;;  %3074 = vst [vmem:[%s4602_s19 + $0x8] sm:$0xff] %v1203_v48  ;;  %v1217_v53 = vsel %vm1216_vm0, 0.0, %v3077_v50  ;;  %v1159_v54 = vsel %vm1158_vm1, %v1154_v41, %v1155_v51  ;;  %v1167_v55 = vsel %vm1166_vm2, %v1154_v41, %v3067_v52  ;;  %v3069_v56 = vld [vmem:[%s4610_s21 + $0x10] sm:$0xff]  ;;  %v3071_v57 = vld [vmem:[%s4610_s21 + $0x18] sm:$0xff]  ;;  %vm1289_vm14 = vcmp.eq.s32.totalorder %v1288_v42, %v4605_v15 }
 0x2e1   : >> { %3076 = vst [vmem:[%s4602_s19 + $0x10] sm:$0xff] %v1210_v49  ;;  %v1226_v58 = vld [vmem:[%s4613_s22] sm:$0xff]  ;;  %3078 = vst [vmem:[%s4602_s19 + $0x18] sm:$0xff] %v1217_v53  ;;  %v1175_v59 = vsel %vm1174_vm3, %v1154_v41, %v3069_v56  ;;  %v1183_v60 = vsel %vm1182_vm4, %v1154_v41, %v3071_v57  ;;  %v3079_v62 = vld [vmem:[%s4613_s22 + $0x8] sm:$0xff]  ;;  %vm1307_vm15 = vcmp.eq.s32.totalorder %v4171_v15, 1  ;;  %vm1320_vm0 = vcmp.eq.s32.totalorder %v4171_v15, 31 }
 0x2e2   : >> { %1160 = vst [vmem:[%s4610_s21] sm:$0xff] %v1159_v54  ;;  %3068 = vst [vmem:[%s4610_s21 + $0x8] sm:$0xff] %v1167_v55  ;;  %v1230_v61 = vsel %vm1229_vm5, 0.0, %v1226_v58  ;;  %v3081_v63 = vld [vmem:[%s4613_s22 + $0x10] sm:$0xff]  ;;  %v3083_v0 = vld [vmem:[%s4613_s22 + $0x18] sm:$0xff]  ;;  %v1237_v1 = vsel %vm1236_vm6, 0.0, %v3079_v62  ;;  %s4859_s19 = smov [#allocation12] }
 0x2e3   : >> { %3070 = vst [vmem:[%s4610_s21 + $0x10] sm:$0xff] %v1175_v59  ;;  %3072 = vst [vmem:[%s4610_s21 + $0x18] sm:$0xff] %v1183_v60  ;;  %v1244_v2 = vsel %vm1243_vm7, 0.0, %v3081_v63  ;;  %v1251_v3 = vsel %vm1250_vm9, 0.0, %v3083_v0  ;;  %v1262_v4 = vld [vmem:[%s4624_s3] sm:$0xff]  ;;  %v3085_v5 = vld [vmem:[%s4624_s3 + $0x8] sm:$0xff] }
 0x2e4   : >> { %1231 = vst [vmem:[%s4613_s22] sm:$0xff] %v1230_v61  ;;  %v3087_v6 = vld [vmem:[%s4624_s3 + $0x10] sm:$0xff]  ;;  %3080 = vst [vmem:[%s4613_s22 + $0x8] sm:$0xff] %v1237_v1  ;;  %v1266_v7 = vsel %vm1265_vm10, %v1261_v46, %v1262_v4  ;;  %v1274_v8 = vsel %vm1273_vm12, %v1261_v46, %v3085_v5  ;;  %v3089_v10 = vld [vmem:[%s4624_s3 + $0x18] sm:$0xff]  ;;  %vm1303_vm12 = vcmp.eq.s32.totalorder %v4171_v15, 0  ;;  %s4904_s21 = smov [#allocation14]  ;;  %vm5051_vm1 = vcmp.eq.s32.totalorder %v4173_v16, 7 }
 0x2e5   : >> { %3082 = vst [vmem:[%s4613_s22 + $0x10] sm:$0xff] %v1244_v2  ;;  %3084 = vst [vmem:[%s4613_s22 + $0x18] sm:$0xff] %v1251_v3  ;;  %v1282_v9 = vsel %vm1281_vm13, %v1261_v46, %v3087_v6  ;;  %v1290_v11 = vsel %vm1289_vm14, %v1261_v46, %v3089_v10  ;;  %s1645_s22 = smov [#allocation15]  ;;  %v422_v16 = vmov (%p611_p9), %v4173_v16  ;;  %v468_v15 = vmov (%p611_p9), %v4171_v15 }
 0x2e6   : >> { %1267 = vst [vmem:[%s4624_s3] sm:$0xff] %v1266_v7  ;;  %3086 = vst [vmem:[%s4624_s3 + $0x8] sm:$0xff] %v1274_v8  ;;  %v471_v16 = vmov (%p611_p9), %v4173_v16  ;;  %v419_v15 = vmov (%p611_p9), %v4171_v15 }
 0x2e7   : >> { %3088 = vst [vmem:[%s4624_s3 + $0x10] sm:$0xff] %v1282_v9  ;;  %3090 = vst [vmem:[%s4624_s3 + $0x18] sm:$0xff] %v1290_v11  ;;  %s2026_s3 = sadd.s32 (%p611_p9), 1, %s4038_s10   ;;  %vm434_vm9 = vcmp.eq.s32.totalorder (%p611_p9), %v422_v16, %v419_v15 }
 0x2e8   : >> { %v1294_v12 = vld [vmem:[%s4688_s0] sm:$0xff]  ;;  %v3091_v19 = vld [vmem:[%s4720_s29 + $0x8] sm:$0xff]  ;;  %v3095_v22 = vld [vmem:[%s4735_s12 + $0x10] sm:$0xff]  ;;  %p607_p10 = scmp.ge.s32.totalorder (%p611_p9), %s2026_s3, 15  ;;  %s5059_s10 = smov (%p611_p9), %s2026_s3 }
 0x2e9   : >> { %1295 = vrot.lane.b32.xlu1 %v1294_v12, %s4077_s24  ;;  %v3099_v26 = vld [vmem:[%s4759_s16 + $0x18] sm:$0xff]  ;;  %vm5053_vm2 = vmmov %vm5051_vm1 }
 0x2ea   : >> { %v4696_v13 = vld [vmem:[%s4691_s23] sm:$0xff]  ;;  %v4703_v14 = vld [vmem:[%s4698_s25 + $0x8] sm:$0xff]  ;;  %v4718_v18 = vld [vmem:[%s4710_s28 + $0x10] sm:$0xff] }
 0x2eb   : >> { %1299 = vrot.lane.b32.xlu0 %v4696_v13, %s4077_s24  ;;  %v4748_v23 = vld [vmem:[%s4742_s13 + $0x18] sm:$0xff]  ;;  %vm5054_vm3 = vmmov %vm5051_vm1 }
 0x2ec   : >> { %v4713_v17 = vld [vmem:[%s4707_s26] sm:$0xff]  ;;  %v4729_v20 = vld [vmem:[%s4724_s30 + $0x8] sm:$0xff]  ;;  %v4753_v24 = vld [vmem:[%s4745_s14 + $0x10] sm:$0xff] }
 0x2ed   : >> { %1331 = vrot.lane.b32.xlu1 %v4703_v14, %s4077_s24  ;;  %v4777_v28 = vld [vmem:[%s4771_s2 + $0x18] sm:$0xff]  ;;  %vm5055_vm4 = vmmov %vm5051_vm1 }
 0x2ee   : >> { %v1428_v21 = vld [vmem:[%s4731_s1] sm:$0xff]  ;;  %v3109_v25 = vld [vmem:[%s4755_s15 + $0x8] sm:$0xff]  ;;  %v3113_v27 = vld [vmem:[%s4765_s17 + $0x10] sm:$0xff] }
 0x2ef   : >> { %1316 = vrot.lane.b32.xlu0 %v1294_v12, %s4078_s27  ;;  %v3117_v29 = vld [vmem:[%s4774_s18 + $0x18] sm:$0xff]  ;;  %vm5056_vm5 = vmmov %vm5051_vm1 }
 0x2f0   : >> { %vm5057_vm6 = vmmov %vm5051_vm1 }
 0x2f1   : >> { %1433 = vrot.lane.b32.xlu1 %v4713_v17, %s4077_s24  ;;  %vm5058_vm7 = vmmov %vm5051_vm1 }
 0x2f3   : >> { %1363 = vrot.lane.b32.xlu0 %v4718_v18, %s4077_s24 }
 0x2f5   : >> { %1327 = vrot.lane.b32.xlu1 %v3091_v19, %s4077_s24 }
 0x2f7   : >> { %1465 = vrot.lane.b32.xlu0 %v4729_v20, %s4077_s24 }
 0x2f9   : >> { %1429 = vrot.lane.b32.xlu1 %v1428_v21, %s4077_s24 }
 0x2fb   : >> { %1359 = vrot.lane.b32.xlu0 %v3095_v22, %s4077_s24 }
 0x2fd   : >> { %1348 = vrot.lane.b32.xlu1 %v3091_v19, %s4078_s27 }
 0x2ff   : >> { %1450 = vrot.lane.b32.xlu0 %v1428_v21, %s4078_s27 }
 0x301   : >> { %1395 = vrot.lane.b32.xlu1 %v4748_v23, %s4077_s24 }
 0x303   : >> { %1497 = vrot.lane.b32.xlu0 %v4753_v24, %s4077_s24 }
 0x305   : >> { %1461 = vrot.lane.b32.xlu1 %v3109_v25, %s4077_s24 }
 0x307   : >> { %1391 = vrot.lane.b32.xlu0 %v3099_v26, %s4077_s24 }
 0x309   : >> { %1380 = vrot.lane.b32.xlu1 %v3095_v22, %s4078_s27 }
 0x30b   : >> { %1493 = vrot.lane.b32.xlu0 %v3113_v27, %s4077_s24 }
 0x30d   : >> { %1482 = vrot.lane.b32.xlu1 %v3109_v25, %s4078_s27 }
 0x30f   : >> { %1412 = vrot.lane.b32.xlu0 %v3099_v26, %s4078_s27 }
 0x311   : >> { %1529 = vrot.lane.b32.xlu1 %v4777_v28, %s4077_s24 }
 0x313   : >> { %1525 = vrot.lane.b32.xlu0 %v3117_v29, %s4077_s24  ;;  %s542_s24 = smov (%p611_p9), [#allocation15] }
 0x315   : >> { %1514 = vrot.lane.b32.xlu1 %v3113_v27, %s4078_s27 }
 0x319   : >> { %1546 = vrot.lane.b32.xlu1 %v3117_v29, %s4078_s27 }
 0x35b   : >> { %v1296_v30 = vpop.permute.xlu1 %1295 }
 0x35d   : >> { %v1300_v31 = vpop.permute.xlu0 %1299 }
 0x35e   : >> { %v1304_v37 = vsel %vm1303_vm12, %v4696_v13, %v1300_v31 }
 0x35f   : >> { %v1308_v36 = vsel %vm1307_vm15, %v1296_v30, %v1304_v37  ;;  %v1332_v33 = vpop.permute.xlu1 %1331 }
 0x360   : >> { %v1314_v32 = vsel %vm2659_vm8, %v1308_v36, 0.0  ;;  %v1336_v40 = vsel %vm1303_vm12, %v4703_v14, %v1332_v33 }
 0x361   : >> { %v1317_v34 = vpop.permute.xlu0 %1316  ;;  %1418 = vst [vmem:[%s4691_s23] sm:$0xff] %v1314_v32  ;;  %s472_s23 = smov (%p611_p9), [#allocation13] }
 0x362   : >> { %v1321_v35 = vsel %vm1320_vm0, %v4696_v13, %v1317_v34 }
 0x363   : >> { %1419 = vst [vmem:[%s4688_s0] sm:$0xff] %v1321_v35  ;;  %v1434_v38 = vpop.permute.xlu1 %1433  ;;  %s423_s0 = smov (%p611_p9), [#allocation12] }
 0x364   : >> { %v1438_v45 = vsel %vm1303_vm12, %v4713_v17, %v1434_v38 }
 0x365   : >> { %v1364_v39 = vpop.permute.xlu0 %1363 }
 0x366   : >> { %v1368_v47 = vsel %vm1303_vm12, %v4718_v18, %v1364_v39 }
 0x367   : >> { %v1328_v41 = vpop.permute.xlu1 %1327 }
 0x368   : >> { %v1340_v42 = vsel %vm1307_vm15, %v1328_v41, %v1336_v40 }
 0x369   : >> { %v1466_v43 = vpop.permute.xlu0 %1465  ;;  %v1346_v44 = vsel %vm2659_vm8, %v1340_v42, 0.0 }
 0x36a   : >> { %3103 = vst [vmem:[%s4698_s25 + $0x8] sm:$0xff] %v1346_v44  ;;  %v1470_v59 = vsel %vm1303_vm12, %v4729_v20, %v1466_v43 }
 0x36b   : >> { %v1430_v46 = vpop.permute.xlu1 %1429 }
 0x36c   : >> { %v1442_v48 = vsel %vm1307_vm15, %v1430_v46, %v1438_v45 }
 0x36d   : >> { %v1360_v49 = vpop.permute.xlu0 %1359  ;;  %v1448_v50 = vsel %vm2659_vm8, %v1442_v48, 0.0 }
 0x36e   : >> { %v1372_v51 = vsel %vm1307_vm15, %v1360_v49, %v1368_v47  ;;  %1552 = vst [vmem:[%s4707_s26] sm:$0xff] %v1448_v50 }
 0x36f   : >> { %v1378_v52 = vsel %vm2659_vm8, %v1372_v51, 0.0  ;;  %v1349_v53 = vpop.permute.xlu1 %1348 }
 0x370   : >> { %3105 = vst [vmem:[%s4710_s28 + $0x10] sm:$0xff] %v1378_v52  ;;  %v1353_v54 = vsel %vm1320_vm0, %v4703_v14, %v1349_v53 }
 0x371   : >> { %v1451_v55 = vpop.permute.xlu0 %1450  ;;  %3104 = vst [vmem:[%s4720_s29 + $0x8] sm:$0xff] %v1353_v54 }
 0x372   : >> { %v1455_v56 = vsel %vm1320_vm0, %v4713_v17, %v1451_v55 }
 0x373   : >> { %1553 = vst [vmem:[%s4731_s1] sm:$0xff] %v1455_v56  ;;  %v1396_v57 = vpop.permute.xlu1 %1395 }
 0x374   : >> { %v1400_v61 = vsel %vm1303_vm12, %v4748_v23, %v1396_v57 }
 0x375   : >> { %v1498_v58 = vpop.permute.xlu0 %1497 }
 0x376   : >> { %v1502_v4 = vsel %vm1303_vm12, %v4753_v24, %v1498_v58 }
 0x377   : >> { %v1462_v60 = vpop.permute.xlu1 %1461 }
 0x378   : >> { %v1474_v62 = vsel %vm1307_vm15, %v1462_v60, %v1470_v59 }
 0x379   : >> { %v1392_v63 = vpop.permute.xlu0 %1391  ;;  %v1480_v0 = vsel %vm2659_vm8, %v1474_v62, 0.0 }
 0x37a   : >> { %v1404_v1 = vsel %vm1307_vm15, %v1392_v63, %v1400_v61  ;;  %3121 = vst [vmem:[%s4724_s30 + $0x8] sm:$0xff] %v1480_v0 }
 0x37b   : >> { %v1410_v2 = vsel %vm2659_vm8, %v1404_v1, 0.0  ;;  %v1381_v3 = vpop.permute.xlu1 %1380 }
 0x37c   : >> { %3107 = vst [vmem:[%s4742_s13 + $0x18] sm:$0xff] %v1410_v2  ;;  %v1385_v5 = vsel %vm1320_vm0, %v4718_v18, %v1381_v3 }
 0x37d   : >> { %v1494_v6 = vpop.permute.xlu0 %1493  ;;  %3106 = vst [vmem:[%s4735_s12 + $0x10] sm:$0xff] %v1385_v5 }
 0x37e   : >> { %v1506_v7 = vsel %vm1307_vm15, %v1494_v6, %v1502_v4 }
 0x37f   : >> { %v1512_v8 = vsel %vm2659_vm8, %v1506_v7, 0.0  ;;  %v1483_v9 = vpop.permute.xlu1 %1482 }
 0x380   : >> { %3123 = vst [vmem:[%s4745_s14 + $0x10] sm:$0xff] %v1512_v8  ;;  %v1487_v10 = vsel %vm1320_vm0, %v4729_v20, %v1483_v9 }
 0x381   : >> { %v1413_v11 = vpop.permute.xlu0 %1412  ;;  %3122 = vst [vmem:[%s4755_s15 + $0x8] sm:$0xff] %v1487_v10 }
 0x382   : >> { %v1417_v12 = vsel %vm1320_vm0, %v4748_v23, %v1413_v11 }
 0x383   : >> { %3108 = vst [vmem:[%s4759_s16 + $0x18] sm:$0xff] %v1417_v12  ;;  %v1562_v13 = vld [vmem:[%s4859_s19] ss:$0 sm:$0xff]  ;;  %v3128_v17 = vld [vmem:[%s4859_s19 + $0x7] ss:$0 sm:$0xff]  ;;  %v1530_v22 = vpop.permute.xlu1 %1529 }
 0x384   : >> { %v3127_v14 = vld [vmem:[%s4859_s19 - $0x1] sm:$0xfe]  ;;  %v3129_v19 = vld [vmem:[%s4859_s19 + $0x7] sm:$0xfe]  ;;  %v3130_v20 = vld [vmem:[%s4859_s19 + $0xf] ss:$0 sm:$0xff]  ;;  %v1534_v30 = vsel %vm1303_vm12, %v4777_v28, %v1530_v22 }
 0x385   : >> { %v1569_v18 = vsel %vm1568_vm11, %v1562_v13, %v3127_v14  ;;  %v3132_v21 = vld [vmem:[%s4859_s19 + $0xf] sm:$0xfe]  ;;  %v1580_v25 = vsel %vm1568_vm11, %v3128_v17, %v3129_v19  ;;  %v3133_v26 = vld [vmem:[%s4859_s19 + $0x17] ss:$0 sm:$0xff]  ;;  %v3135_v27 = vld [vmem:[%s4859_s19 + $0x17] sm:$0xfe]  ;;  %v1526_v31 = vpop.permute.xlu0 %1525 }
 0x386   : >> { %1572 = vst [vmem:[%s4859_s19] sm:$0xff] %v1569_v18  ;;  %v1591_v23 = vsel %vm1568_vm11, %v3130_v20, %v3132_v21  ;;  %v3136_v29 = vld [vmem:[%s4859_s19 + $0x1f] ss:$0 sm:$0xff]  ;;  %3131 = vst [vmem:[%s4859_s19 + $0x8] sm:$0xff] %v1580_v25  ;;  %v1602_v37 = vsel %vm1568_vm11, %v3133_v26, %v3135_v27  ;;  %v1538_v36 = vsel %vm1307_vm15, %v1526_v31, %v1534_v30 }
 0x387   : >> { %3134 = vst [vmem:[%s4859_s19 + $0x10] sm:$0xff] %v1591_v23  ;;  %3137 = vst [vmem:[%s4859_s19 + $0x18] sm:$0xff] %v1602_v37  ;;  %v1544_v32 = vsel %vm2659_vm8, %v1538_v36, 0.0  ;;  %v1515_v33 = vpop.permute.xlu1 %1514  ;;  %v441_v37 = vadd.s32 (%p611_p9), 8, %v422_v16 }
 0x388   : >> { %3125 = vst [vmem:[%s4771_s2 + $0x18] sm:$0xff] %v1544_v32  ;;  %v1519_v34 = vsel %vm1320_vm0, %v4753_v24, %v1515_v33 }
 0x389   : >> { %3124 = vst [vmem:[%s4765_s17 + $0x10] sm:$0xff] %v1519_v34  ;;  %vm442_vm10 = vcmp.eq.s32.totalorder (%p611_p9), %v441_v37, %v419_v15 }
 0x38a   : >> { %v1646_v35 = vld [vmem:[%s4895_s20] ss:$0 sm:$0xff]  ;;  %v3150_v39 = vld [vmem:[%s4895_s20 + $0x7] ss:$0 sm:$0xff]  ;;  %v3151_v41 = vld [vmem:[%s4895_s20 + $0x7] sm:$0xfe] }
 0x38b   : >> { %v3149_v38 = vld [vmem:[%s4895_s20 - $0x1] sm:$0xfe]  ;;  %v3152_v42 = vld [vmem:[%s4895_s20 + $0xf] ss:$0 sm:$0xff]  ;;  %v3154_v43 = vld [vmem:[%s4895_s20 + $0xf] sm:$0xfe]  ;;  %v1664_v24 = vsel %vm1568_vm11, %v3150_v39, %v3151_v41  ;;  %v1547_v48 = vpop.permute.xlu1 %1546 }
 0x38c   : >> { %v1653_v40 = vsel %vm1568_vm11, %v1646_v35, %v3149_v38  ;;  %v1675_v44 = vsel %vm1568_vm11, %v3152_v42, %v3154_v43  ;;  %v3155_v45 = vld [vmem:[%s4895_s20 + $0x17] ss:$0 sm:$0xff]  ;;  %v3157_v46 = vld [vmem:[%s4895_s20 + $0x17] sm:$0xfe]  ;;  %v3158_v47 = vld [vmem:[%s4895_s20 + $0x1f] ss:$0 sm:$0xff]  ;;  %v1551_v50 = vsel %vm1320_vm0, %v4777_v28, %v1547_v48 }
 0x38d   : >> { %1656 = vst [vmem:[%s4895_s20] sm:$0xff] %v1653_v40  ;;  %3153 = vst [vmem:[%s4895_s20 + $0x8] sm:$0xff] %v1664_v24  ;;  %v1686_v49 = vsel %vm1568_vm11, %v3155_v45, %v3157_v46  ;;  %v461_v48 = vadd.s32 (%p611_p9), 24, %v422_v16 }
 0x38e   : >> { %3156 = vst [vmem:[%s4895_s20 + $0x10] sm:$0xff] %v1675_v44  ;;  %3159 = vst [vmem:[%s4895_s20 + $0x18] sm:$0xff] %v1686_v49 }
 0x38f   : >> { %3126 = vst [vmem:[%s4774_s18 + $0x18] sm:$0xff] %v1551_v50  ;;  %v1606_v51 = vld [vmem:[%s4904_s21] ss:$0 sm:$0xff]  ;;  %v3139_v52 = vld [vmem:[%s4904_s21 + $0x19] sm:$0x7f]  ;;  %vm5052_vm11 = vmmov %vm5051_vm1  ;;  %vm462_vm14 = vcmp.eq.s32.totalorder (%p611_p9), %v461_v48, %v419_v15 }
 0x390   : >> { %v3140_v53 = vld [vmem:[%s4904_s21 + $0x18] ss:$0 sm:$0xff]  ;;  %3138 = vst [vmem:[%s4859_s19 + $0x1] sm:$0x1] %v1606_v51  ;;  %v1615_v54 = vsel %vm5051_vm1, %v3136_v29, %v3139_v52  ;;  %v3142_v55 = vld [vmem:[%s4904_s21 + $0x11] sm:$0x7f] }
 0x391   : >> { %v3143_v56 = vld [vmem:[%s4904_s21 + $0x10] ss:$0 sm:$0xff]  ;;  %v3145_v57 = vld [vmem:[%s4904_s21 + $0x9] sm:$0x7f]  ;;  %3141 = vst [vmem:[%s4904_s21 + $0x18] sm:$0xff] %v1615_v54  ;;  %v1624_v28 = vsel %vm5052_vm11, %v3140_v53, %v3142_v55 }
 0x392   : >> { %v1633_v58 = vsel %vm5053_vm2, %v3143_v56, %v3145_v57  ;;  %v3146_v59 = vld [vmem:[%s4904_s21 + $0x8] ss:$0 sm:$0xff]  ;;  %v3148_v60 = vld [vmem:[%s4904_s21 + $0x1] sm:$0x7f]  ;;  %3144 = vst [vmem:[%s4904_s21 + $0x10] sm:$0xff] %v1624_v28 }
 0x393   : >> { %3147 = vst [vmem:[%s4904_s21 + $0x8] sm:$0xff] %v1633_v58  ;;  %v1641_v61 = vsel %vm5054_vm3, %v3146_v59, %v3148_v60 }
 0x394   : >> { %1643 = vst [vmem:[%s4904_s21] sm:$0xff] %v1641_v61 }
 0x395   : > { %613 = sbr.rel (!%p611_p9) target bundleno = 355 (0x163), region = 642 }
 0x396   : >> { %v1690_v62 = vld [vmem:[%s1645_s22] ss:$0 sm:$0xff]  ;;  %v3161_v63 = vld [vmem:[%s1645_s22 + $0x19] sm:$0x7f]  ;;  %v3162_v0 = vld [vmem:[%s1645_s22 + $0x18] ss:$0 sm:$0xff] }
 0x397   : >> { %3160 = vst [vmem:[%s4895_s20 + $0x1] sm:$0x1] %v1690_v62  ;;  %v1699_v1 = vsel %vm5055_vm4, %v3158_v47, %v3161_v63  ;;  %v3164_v2 = vld [vmem:[%s1645_s22 + $0x11] sm:$0x7f]  ;;  %v3165_v3 = vld [vmem:[%s1645_s22 + $0x10] ss:$0 sm:$0xff] }
 0x398   : >> { %v3167_v4 = vld [vmem:[%s1645_s22 + $0x9] sm:$0x7f]  ;;  %3163 = vst [vmem:[%s1645_s22 + $0x18] sm:$0xff] %v1699_v1  ;;  %v1708_v5 = vsel %vm5056_vm5, %v3162_v0, %v3164_v2  ;;  %v3168_v7 = vld [vmem:[%s1645_s22 + $0x8] ss:$0 sm:$0xff]  ;;  %v429_v10 = vld [vmem:[%s423_s0] sm:$0xff] (%p611_p9) }
 0x399   : >> { %v1717_v6 = vsel %vm5057_vm6, %v3165_v3, %v3167_v4  ;;  %v3170_v8 = vld [vmem:[%s1645_s22 + $0x1] sm:$0x7f]  ;;  %3166 = vst [vmem:[%s1645_s22 + $0x10] sm:$0xff] %v1708_v5  ;;  %v3245_v11 = vld [vmem:[%s423_s0 + $0x8] sm:$0xff] (%p611_p9)  ;;  %v3246_v12 = vld [vmem:[%s423_s0 + $0x10] sm:$0xff] (%p611_p9)  ;;  %v430_v13 = vsel (%p611_p9), %vm2659_vm8, %v429_v10, 0.0 }
 0x39a   : >> { %3169 = vst [vmem:[%s1645_s22 + $0x8] sm:$0xff] %v1717_v6  ;;  %v1725_v9 = vsel %vm5058_vm7, %v3168_v7, %v3170_v8  ;;  %v438_v14 = vsel (%p611_p9), %vm2659_vm8, %v3245_v11, 0.0  ;;  %v448_v17 = vsel (%p611_p9), %vm2659_vm8, %v3246_v12, 0.0  ;;  %v3247_v18 = vld [vmem:[%s423_s0 + $0x18] sm:$0xff] (%p611_p9)  ;;  %v431_v20 = vmul.f32 (%p611_p9), %v430_v13, %v430_v13 }
 0x39b   : >> { %1727 = vst [vmem:[%s1645_s22] sm:$0xff] %v1725_v9  ;;  %v439_v21 = vmul.f32 (%p611_p9), %v438_v14, %v438_v14  ;;  %v449_v22 = vmul.f32 (%p611_p9), %v448_v17, %v448_v17  ;;  %v458_v25 = vsel (%p611_p9), %vm2659_vm8, %v3247_v18, 0.0  ;;  %v513_v39 = vld [vmem:[%s4982_s11] sm:$0xff] (%p611_p9)  ;;  %v3251_v41 = vld [vmem:[%s4982_s11 + $0x8] sm:$0xff] (%p611_p9)  ;;  %v451_v47 = vadd.s32 (%p611_p9), 16, %v422_v16  ;;  %v3252_v52 = vld [vmem:[%s4982_s11 + $0x10] sm:$0xff] (%p611_p9) }
 0x39c   : > { %v459_v29 = vmul.f32 %v458_v25, %v458_v25  ;;  %v435_v42 = vsel %vm434_vm9, 0.0, %v431_v20  ;;  %v514_v45 = vsel %vm2659_vm8, %v513_v39, 0.0  ;;  %v520_v51 = vsel %vm2659_vm8, %v3251_v41, 0.0  ;;  %v3253_v55 = vld [vmem:[%s4982_s11 + $0x18] sm:$0xff] }
 0x39d   : > { %v445_v27 = vadd.f32 %v439_v21, %v431_v20  ;;  %v443_v44 = vsel %vm442_vm10, 0.0, %v439_v21  ;;  %vm452_vm13 = vcmp.eq.s32.totalorder %v451_v47, %v419_v15  ;;  %v503_v15 = vmov %v4171_v15 }
 0x39e   : > { %v478_v19 = vld [vmem:[%s472_s23] sm:$0xff]  ;;  %v3248_v23 = vld [vmem:[%s472_s23 + $0x8] sm:$0xff]  ;;  %v3249_v30 = vld [vmem:[%s472_s23 + $0x10] sm:$0xff]  ;;  %v444_v46 = vadd.f32 %v443_v44, %v435_v42  ;;  %v506_v16 = vmov %v4173_v16  ;;  %v515_v54 = vmul.f32 %v514_v45, %v514_v45  ;;  %v453_v56 = vsel %vm452_vm13, 0.0, %v449_v22 }
 0x39f   : > { %v479_v26 = vsel %vm2659_vm8, %v478_v19, 0.0  ;;  %v485_v31 = vsel %vm2659_vm8, %v3248_v23, 0.0  ;;  %v455_v36 = vadd.f32 %v449_v22, %v445_v27  ;;  %v3250_v33 = vld [vmem:[%s472_s23 + $0x18] sm:$0xff]  ;;  %v491_v34 = vsel %vm2659_vm8, %v3249_v30, 0.0 }
 0x3a0   : > { %v480_v32 = vmul.f32 %v479_v26, %v479_v26  ;;  %v486_v38 = vmul.f32 %v485_v31, %v485_v31  ;;  %v497_v40 = vsel %vm2659_vm8, %v3250_v33, 0.0  ;;  %v492_v24 = vmul.f32 %v491_v34, %v491_v34 }
 0x3a1   : > { %v465_v35 = vadd.f32 %v459_v29, %v455_v36  ;;  %v498_v50 = vmul.f32 %v497_v40, %v497_v40  ;;  %v463_v57 = vsel %vm462_vm14, 0.0, %v459_v29  ;;  %v526_v28 = vsel %vm2659_vm8, %v3252_v52, 0.0 }
 0x3a2   : > { %v454_v58 = vadd.f32 %v453_v56, %v444_v46  ;;  %v521_v60 = vmul.f32 %v520_v51, %v520_v51  ;;  %v548_v61 = vld [vmem:[%s542_s24] sm:$0xff]  ;;  %v532_v62 = vsel %vm2659_vm8, %v3253_v55, 0.0  ;;  %v527_v1 = vmul.f32 %v526_v28, %v526_v28  ;;  %v3254_v2 = vld [vmem:[%s542_s24 + $0x8] sm:$0xff]  ;;  %v3255_v7 = vld [vmem:[%s542_s24 + $0x10] sm:$0xff] }
 0x3a3   : > { %v482_v43 = vadd.f32 %v480_v32, %v465_v35  ;;  %v549_v3 = vsel %vm2659_vm8, %v548_v61, 0.0  ;;  %v533_v6 = vmul.f32 %v532_v62, %v532_v62  ;;  %v559_v8 = vsel %vm2659_vm8, %v3254_v2, 0.0  ;;  %v3256_v12 = vld [vmem:[%s542_s24 + $0x18] sm:$0xff] }
 0x3a4   : > { %v464_v63 = vadd.f32 %v463_v57, %v454_v58  ;;  %v550_v11 = vmul.f32 %v549_v3, %v549_v3  ;;  %v569_v13 = vsel %vm2659_vm8, %v3255_v7, 0.0  ;;  %v560_v18 = vmul.f32 %v559_v8, %v559_v8 }
 0x3a5   : > { %v488_v49 = vadd.f32 %v486_v38, %v482_v43  ;;  %v541_v16 = vmov %v4173_v16  ;;  %v579_v19 = vsel %vm2659_vm8, %v3256_v12, 0.0  ;;  %v570_v22 = vmul.f32 %v569_v13, %v569_v13 }
 0x3a6   : > { %v481_v4 = vadd.f32 %v480_v32, %v464_v63  ;;  %v538_v15 = vmov %v4171_v15  ;;  %v562_v23 = vadd.s32 8, %v541_v16  ;;  %v580_v27 = vmul.f32 %v579_v19, %v579_v19 }
 0x3a7   : > { %v494_v53 = vadd.f32 %v492_v24, %v488_v49  ;;  %vm553_vm12 = vcmp.eq.s32.totalorder %v541_v16, %v538_v15  ;;  %v572_v30 = vadd.s32 16, %v541_v16  ;;  %v582_v36 = vadd.s32 24, %v541_v16 }
 0x3a8   : > { %v487_v9 = vadd.f32 %v486_v38, %v481_v4  ;;  %vm563_vm15 = vcmp.eq.s32.totalorder %v562_v23, %v538_v15  ;;  %v554_v33 = vsel %vm553_vm12, 0.0, %v550_v11 }
 0x3a9   : > { %v500_v59 = vadd.f32 %v498_v50, %v494_v53  ;;  %vm573_vm0 = vcmp.eq.s32.totalorder %v572_v30, %v538_v15  ;;  %v564_v35 = vsel %vm563_vm15, 0.0, %v560_v18  ;;  %vm583_vm1 = vcmp.eq.s32.totalorder %v582_v36, %v538_v15 }
 0x3aa   : > { %v493_v14 = vadd.f32 %v492_v24, %v487_v9  ;;  %v574_v39 = vsel %vm573_vm0, 0.0, %v570_v22  ;;  %v584_v41 = vsel %vm583_vm1, 0.0, %v580_v27 }
 0x3ab   : > { %v517_v0 = vadd.f32 %v515_v54, %v500_v59 }
 0x3ac   : > { %v499_v20 = vadd.f32 %v498_v50, %v493_v14 }
 0x3ad   : > { %v523_v5 = vadd.f32 %v521_v60, %v517_v0 }
 0x3ae   : > { %v516_v25 = vadd.f32 %v515_v54, %v499_v20 }
 0x3af   : > { %v529_v10 = vadd.f32 %v527_v1, %v523_v5 }
 0x3b0   : > { %v522_v29 = vadd.f32 %v521_v60, %v516_v25 }
 0x3b1   : > { %v535_v17 = vadd.f32 %v533_v6, %v529_v10 }
 0x3b2   : > { %v528_v37 = vadd.f32 %v527_v1, %v522_v29 }
 0x3b3   : > { %v556_v21 = vadd.f32 %v550_v11, %v535_v17 }
 0x3b4   : > { %v534_v34 = vadd.f32 %v533_v6, %v528_v37 }
 0x3b5   : > { %v566_v26 = vadd.f32 %v560_v18, %v556_v21 }
 0x3b6   : > { %v555_v38 = vadd.f32 %v554_v33, %v534_v34 }
 0x3b7   : > { %v576_v31 = vadd.f32 %v570_v22, %v566_v26 }
 0x3b8   : > { %v565_v40 = vadd.f32 %v564_v35, %v555_v38 }
 0x3b9   : > { %v586_v32 = vadd.f32 %v580_v27, %v576_v31 }
 0x3ba   : > { %v575_v42 = vadd.f32 %v574_v39, %v565_v40 }
 0x3bb   : > { %587 = vadd.xlane.f32.xlu0 %v586_v32 }
 0x3bc   : > { %v585_v43 = vadd.f32 %v584_v41, %v575_v42 }
 0x3bf   : > { %595 = vadd.xlane.f32.xlu0 %v585_v43 }
 0x448   : > { %v588_v24 = vpop.xlane.xlu0 %587 }
 0x449   : > { %v589_v44 = vrot.slane %v588_v24, 4 }
 0x44b   : > { %v590_v45 = vadd.f32 %v589_v44, %v588_v24 }
 0x44c   : > { %v596_v47 = vpop.xlane.xlu0 %595 }
 0x44d   : > { %v591_v46 = vrot.slane %v590_v45, 2  ;;  %v597_v48 = vrot.slane %v596_v47, 4 }
 0x44f   : > { %v598_v49 = vadd.f32 %v597_v48, %v596_v47  ;;  %v592_v50 = vadd.f32 %v591_v46, %v590_v45 }
 0x451   : > { %v599_v51 = vrot.slane %v598_v49, 2  ;;  %v593_v53 = vrot.slane %v592_v50, 1 }
 0x453   : > { %v600_v52 = vadd.f32 %v599_v51, %v598_v49  ;;  %v594_v56 = vadd.f32 %v593_v53, %v592_v50 }
 0x455   : > { %v601_v54 = vrot.slane %v600_v52, 1 }
 0x457   : > { %v602_v55 = vadd.f32 %v601_v54, %v600_v52 }
 0x459   : > { %3289 = vpush %v602_v55 }
 0x45a   : > { %3291 = vpush %v594_v56 }
 0x48a   : > { %s3290_s25 = spop %3289 }
 0x48b   : > { %s3292_s26 = spop %3291 }
 0x48c   : > { %s605_s27 = smul.f32 1e-10, %s3292_s26 }
 0x48e   : > { %p606_p11 = scmp.le.f32.partialorder %s3290_s25, %s605_s27 }
 0x490   : > { %p608_p12 = por %p607_p10, %p606_p11 }
 0x492   :  { %2028 = sbr.rel (!%p608_p12) target bundleno = 354 (0x162), region = 653 }
 0x499 PF:  { %s2029_s28 = smov [#allocation12]  ;;  %v2033_v15 = vmov %v4171_v15  ;;  %v2036_v16 = vmov %v4173_v16  ;;  %s2067_s10 = smov [#allocation15] }
 0x49a   :  { %v2071_v15 = vmov %v4171_v15  ;;  %v2074_v16 = vmov %v4173_v16  ;;  %v2037_v57 = vld [vmem:[%s2029_s28] sm:$0xff]  ;;  %vm2040_vm11 = vcmp.eq.s32.totalorder %v2036_v16, %v2033_v15  ;;  %v3257_v28 = vld [vmem:[%s2029_s28 + $0x8] sm:$0xff]  ;;  %v2045_v58 = vadd.s32 8, %v2036_v16  ;;  %v3258_v62 = vld [vmem:[%s2029_s28 + $0x10] sm:$0xff]  ;;  %s2030_s29 = smov [#allocation4]  ;;  %s2068_s30 = smov [#allocation6] }
 0x49b   :  { %v2051_v59 = vadd.s32 16, %v2036_v16  ;;  %v2057_v60 = vadd.s32 24, %v2036_v16  ;;  %v2041_v61 = vsel %vm2040_vm11, %v2037_v57, 0.0  ;;  %v3259_v63 = vld [vmem:[%s2029_s28 + $0x18] sm:$0xff]  ;;  %vm2078_vm8 = vcmp.eq.s32.totalorder %v2074_v16, %v2071_v15  ;;  %v2075_v2 = vld [vmem:[%s2067_s10] sm:$0xff]  ;;  %v3260_v3 = vld [vmem:[%s2067_s10 + $0x8] sm:$0xff]  ;;  %s4044_s17 = smov %s5046_s6  }
 0x49c   :  { %v2083_v0 = vadd.s32 8, %v2074_v16  ;;  %v2089_v1 = vadd.s32 16, %v2074_v16  ;;  %vm2046_vm2 = vcmp.eq.s32.totalorder %v2045_v58, %v2033_v15  ;;  %v3261_v4 = vld [vmem:[%s2067_s10 + $0x10] sm:$0xff]  ;;  %v2095_v5 = vadd.s32 24, %v2074_v16  ;;  %v3262_v8 = vld [vmem:[%s2067_s10 + $0x18] sm:$0xff]  ;;  %s4048_s2 = smov [#allocation8]  }
 0x49d   :  { %vm2052_vm3 = vcmp.eq.s32.totalorder %v2051_v59, %v2033_v15  ;;  %vm2058_vm4 = vcmp.eq.s32.totalorder %v2057_v60, %v2033_v15  ;;  %v2047_v6 = vsel %vm2046_vm2, %v3257_v28, %v2041_v61  ;;  %v2079_v7 = vsel %vm2078_vm8, %v2075_v2, 0.0 }
 0x49e   :  { %vm2084_vm5 = vcmp.eq.s32.totalorder %v2083_v0, %v2071_v15  ;;  %vm2090_vm6 = vcmp.eq.s32.totalorder %v2089_v1, %v2071_v15  ;;  %v2053_v9 = vsel %vm2052_vm3, %v3258_v62, %v2047_v6  ;;  %vm2096_vm7 = vcmp.eq.s32.totalorder %v2095_v5, %v2071_v15 }
 0x49f   :  { %v2085_v10 = vsel %vm2084_vm5, %v3260_v3, %v2079_v7  ;;  %v2059_v11 = vsel %vm2058_vm4, %v3259_v63, %v2053_v9 }
 0x4a0   :  { %v2091_v12 = vsel %vm2090_vm6, %v3261_v4, %v2085_v10  ;;  %v2060_v13 = vrot.slane %v2059_v11, 4 }
 0x4a1   :  { %v2097_v14 = vsel %vm2096_vm7, %v3262_v8, %v2091_v12 }
 0x4a2   :  { %v2098_v17 = vrot.slane %v2097_v14, 4  ;;  %v2061_v18 = vadd.f32 %v2060_v13, %v2059_v11 }
 0x4a4   :  { %v2099_v19 = vadd.f32 %v2098_v17, %v2097_v14  ;;  %v2062_v20 = vrot.slane %v2061_v18, 2 }
 0x4a6   :  { %v2100_v21 = vrot.slane %v2099_v19, 2  ;;  %v2063_v22 = vadd.f32 %v2062_v20, %v2061_v18 }
 0x4a8   :  { %v2101_v25 = vadd.f32 %v2100_v21, %v2099_v19  ;;  %v2064_v16 = vrot.slane %v2063_v22, 1 }
 0x4aa   :  { %v2102_v23 = vrot.slane %v2101_v25, 1  ;;  %v2065_v26 = vadd.f32 %v2064_v16, %v2063_v22 }
 0x4ac   :  { %v2103_v27 = vadd.f32 %v2102_v23, %v2101_v25  ;;  %2066 = vst [vmem:[%s2030_s29] sm:$0x1] %v2065_v26 }
 0x4ae   :  { %2104 = vst [vmem:[%s2068_s30] sm:$0x1] %v2103_v27 }
 0x4b3   :  { %v2108_v15 = vld [vmem:[#allocation4] sm:$0x1] }
 0x4b4   :  { %2110 = vst [vmem:[#allocation5] sm:$0x1] %v2108_v15 }
 0x4b5   :  { %v2114_v29 = vld [vmem:[#allocation6] sm:$0x1] }
 0x4b6   :  { %2116 = vst [vmem:[#allocation7] sm:$0x1] %v2114_v29 }
 0x4bb   :  { %v2179_v30 = vld [vmem:[#allocation5] sm:$0x1] }
 0x4bc   :  { %2180 = vst [vmem:[%s5044_s4] sm:$0x1] %v2179_v30 }
 0x4bd   :  { %v2243_v31 = vld [vmem:[#allocation7] sm:$0x1] }
 0x4be   :  { %2244 = vst [vmem:[%s5045_s5] sm:$0x1] %v2243_v31 }
 0x4bf LB: > { %v2292_v37 = vld [vmem:[%s4050_s2] sm:$0xff]  ;;  %s2294_s2 = scalar_lea.vmem %s4050_s2, 8   ;;  %s4050_s2 = sphi %s4048_s2, %s2294_s2   ;;  %s4046_s17 = sphi %s4044_s17, %s2295_s17  }
 0x4c0   : > { %2293 = vst [vmem:[%s4046_s17] sm:$0xff] %v2292_v37  ;;  %s2295_s17 = scalar_lea.vmem %s4046_s17, 8   ;;  %p2289_p13 = scmp.gt.s32.totalorder %s2294_s2, [#allocation8 + $0x18] }
 0x4c1   :  { %s4052_s5 = smov (%p2289_p13), %s5047_s7   ;;  %s4056_s19 = smov (%p2289_p13), [#allocation9]  }
 0x4c2   :  { %2291 = sbr.rel (!%p2289_p13) target bundleno = 1215 (0x4bf), region = 719 }
 0x4c9 LB: > { %v2354_v36 = vld [vmem:[%s4058_s19] sm:$0xff]  ;;  %s2356_s19 = scalar_lea.vmem %s4058_s19, 8   ;;  %s4058_s19 = sphi %s4056_s19, %s2356_s19   ;;  %s4054_s5 = sphi %s4052_s5, %s2357_s5  }
 0x4ca   : > { %2355 = vst [vmem:[%s4054_s5] sm:$0xff] %v2354_v36  ;;  %s2357_s5 = scalar_lea.vmem %s4054_s5, 8   ;;  %p2351_p0 = scmp.gt.s32.totalorder %s2356_s19, [#allocation9 + $0x18] }
 0x4cb   :  { %s4060_s21 = smov (%p2351_p0), %s5048_s8   ;;  %s4064_s22 = smov (%p2351_p0), [#allocation10]  }
 0x4cc   :  { %2353 = sbr.rel (!%p2351_p0) target bundleno = 1225 (0x4c9), region = 741 }
 0x4d3 LB: > { %v2416_v32 = vld [vmem:[%s4066_s22] sm:$0xff]  ;;  %s2418_s22 = scalar_lea.vmem %s4066_s22, 8   ;;  %s4066_s22 = sphi %s4064_s22, %s2418_s22   ;;  %s4062_s21 = sphi %s4060_s21, %s2419_s21  }
 0x4d4   : > { %2417 = vst [vmem:[%s4062_s21] sm:$0xff] %v2416_v32  ;;  %s2419_s21 = scalar_lea.vmem %s4062_s21, 8   ;;  %p2413_p1 = scmp.gt.s32.totalorder %s2418_s22, [#allocation10 + $0x18] }
 0x4d5   :  { %s4068_s0 = smov (%p2413_p1), %s5049_s9   ;;  %s4072_s23 = smov (%p2413_p1), [#allocation11]  }
 0x4d6   :  { %2415 = sbr.rel (!%p2413_p1) target bundleno = 1235 (0x4d3), region = 763 }
 0x4dd LB: > { %v2478_v33 = vld [vmem:[%s4074_s23] sm:$0xff]  ;;  %s2480_s23 = scalar_lea.vmem %s4074_s23, 8   ;;  %s4074_s23 = sphi %s4072_s23, %s2480_s23   ;;  %s4070_s0 = sphi %s4068_s0, %s2481_s0  }
 0x4de   : > { %2479 = vst [vmem:[%s4070_s0] sm:$0xff] %v2478_v33  ;;  %s2481_s0 = scalar_lea.vmem %s4070_s0, 8   ;;  %p2475_p2 = scmp.gt.s32.totalorder %s2480_s23, [#allocation11 + $0x18] }
 0x4e0   :  { %2477 = sbr.rel (!%p2475_p2) target bundleno = 1245 (0x4dd), region = 785 }

// kernel: model_forward.4
= control target key start
LH: loop header
LB: loop body
LE: loop exit
PB: predicated region body
PF: predicated region fallthrough
CT: control target
= control target key end

     0   :  { %vm14_vm0 = vcmask 523264   ;;  %vm70_vm1 = vcmask 261120   ;;  %s356_s0 = inlined_call_operand.vmem [shape: f32[32,64], index: 0, kind: input, shape index: {}]   ;;  %s357_s1 = inlined_call_operand.vmem [shape: f32[32,64], index: 1, kind: output, shape index: {0}]   ;;  %s358_s2 = inlined_call_operand.vmem [shape: f32[64,64], index: 2, kind: output, shape index: {1}]  }
   0x1   :  { %v10_v0 = vld [vmem:[%s356_s0] sm:$0xff]  ;;  %v11_v1 = vld [vmem:[%s356_s0 + $0x8] sm:$0xff]  ;;  %v12_v2 = vld [vmem:[%s356_s0 + $0x10] sm:$0xff] }
   0x2   :  { %v13_v3 = vld [vmem:[%s356_s0 + $0x18] sm:$0xff]  ;;  %v15_v4 = vsel %vm14_vm0, %v10_v0, 0.0  ;;  %v16_v5 = vsel %vm14_vm0, %v11_v1, 0.0  ;;  %v18_v6 = vsel %vm14_vm0, %v12_v2, 0.0 }
   0x3   :  { %v17_v7 = vadd.f32 %v16_v5, %v15_v4  ;;  %v20_v8 = vsel %vm14_vm0, %v13_v3, 0.0 }
   0x5   :  { %v19_v9 = vadd.f32 %v18_v6, %v17_v7 }
   0x7   :  { %v21_v10 = vadd.f32 %v20_v8, %v19_v9 }
   0x9   :  { %v22_v11 = vrot.slane %v21_v10, 4 }
   0xb   :  { %v23_v12 = vadd.f32 %v22_v11, %v21_v10 }
   0xd   :  { %v24_v13 = vrot.slane %v23_v12, 2 }
   0xf   :  { %v25_v14 = vadd.f32 %v24_v13, %v23_v12 }
  0x11   :  { %v26_v15 = vrot.slane %v25_v14, 1 }
  0x13   :  { %v27_v16 = vadd.f32 %v26_v15, %v25_v14 }
  0x15   :  { %v29_v17 = vmul.f32 0.03125, %v27_v16 }
  0x17   :  { %v30_v18 = vsub.f32 %v10_v0, %v29_v17  ;;  %v31_v19 = vsub.f32 %v11_v1, %v29_v17  ;;  %v32_v20 = vsub.f32 %v12_v2, %v29_v17  ;;  %v33_v21 = vsub.f32 %v13_v3, %v29_v17 }
  0x19   :  { %38 = vxpose.xlu0.b32.start [1/4] (short) (narrow) %v30_v18, 64  ;;  %34 = vst.msk [vmem:[%s357_s1] sm:$0xff] %vm14_vm0, %v30_v18  ;;  %35 = vst.msk [vmem:[%s357_s1 + $0x8] sm:$0xff] %vm14_vm0, %v31_v19  ;;  %v256_v22 = vpack.c.bf16 %v31_v19, %v30_v18  ;;  %v260_v23 = vpack.c.bf16 %v33_v21, %v32_v20 }
  0x1a   :  { %36 = vst.msk [vmem:[%s357_s1 + $0x10] sm:$0xff] %vm14_vm0, %v32_v20  ;;  %37 = vst.msk [vmem:[%s357_s1 + $0x18] sm:$0xff] %vm14_vm0, %v33_v21 }
  0x1b   :  { %257 = vmatprep.subr.bf16.mxu0 %v256_v22  ;;  %264 = vmatprep.subr.bf16.mxu1 %v256_v22 }
  0x1c   :  { %259 = vmatpush3.bf16.msra.mxu0 %v256_v22  ;;  %266 = vmatpush3.bf16.msra.mxu1 %v256_v22 }
  0x1d   :  { %39 = vxpose.xlu0.b32.cont [2/4] (short) (narrow) %v31_v19, 64  ;;  %261 = vmatprep.subr.bf16.mxu0 %v260_v23 }
  0x1e   :  { %265 = vmatprep.subr.bf16.mxu1 %v260_v23 }
  0x20   :  { %263 = vmatpush3.bf16.msra.mxu0 %v260_v23  ;;  %267 = vmatpush3.bf16.msra.mxu1 %v260_v23 }
  0x21   :  { %40 = vxpose.xlu0.b32.cont [3/4] (short) (narrow) %v32_v20, 64 }
  0x25   :  { %41 = vxpose.xlu0.b32.end [4/4] (short) (narrow) %v33_v21, 64 }
  0x99   :  { %v54_v24 = vpop.trf.xlu0 }
  0x9a   :  { %244 = vmatprep.mubr.msk.f32.mxu0 %vm70_vm1, %v54_v24 }
  0x9d   :  { %v55_v25 = vpop.trf.xlu0 }
  0x9e   :  { %245 = vmatmul.mubr.msk.f32.vlgmr.msra.gmra.mrb[0].mxu0 %vm70_vm1, %v55_v25 }
  0xa1   :  { %v56_v26 = vpop.trf.xlu0 }
  0xa2   :  { %247 = vmatprep.mubr.msk.f32.mxu0 %vm70_vm1, %v56_v26 }
  0xa5   :  { %v57_v27 = vpop.trf.xlu0 }
  0xa6   :  { %248 = vmatmul.mubr.msk.f32.gmra.mrb[2].mxu0 %vm70_vm1, %v57_v27 }
  0xa9   :  { %v58_v28 = vpop.trf.xlu0 }
  0xaa   :  { %250 = vmatprep.mubr.msk.f32.mxu1 %vm70_vm1, %v58_v28 }
  0xad   :  { %v59_v29 = vpop.trf.xlu0 }
  0xae   :  { %251 = vmatmul.mubr.msk.f32.vlgmr.msra.gmra.mrb[0].mxu1 %vm70_vm1, %v59_v29 }
  0xb1   :  { %v60_v30 = vpop.trf.xlu0 }
  0xb2   :  { %253 = vmatprep.mubr.msk.f32.mxu1 %vm70_vm1, %v60_v30 }
  0xb5   :  { %v61_v31 = vpop.trf.xlu0 }
  0xb6   :  { %254 = vmatmul.mubr.msk.f32.gmra.mrb[2].mxu1 %vm70_vm1, %v61_v31 }
 0x171   :  { %v246_v32 = vpop.f32.mrb[0].mxu0 }
 0x172   :  { %201 = vst.msk [vmem:[%s358_s2 + $0x8] sm:$0xff] %vm14_vm0, %v246_v32  ;;  %v161_v33 = vpop.f32.mrb[1].mxu0 }
 0x173   :  { %200 = vst.msk [vmem:[%s358_s2] sm:$0xff] %vm14_vm0, %v161_v33 }
 0x179   :  { %v249_v34 = vpop.f32.mrb[2].mxu0 }
 0x17a   :  { %203 = vst.msk [vmem:[%s358_s2 + $0x18] sm:$0xff] %vm14_vm0, %v249_v34  ;;  %v171_v35 = vpop.f32.mrb[3].mxu0 }
 0x17b   :  { %202 = vst.msk [vmem:[%s358_s2 + $0x10] sm:$0xff] %vm14_vm0, %v171_v35 }
 0x181   :  { %v252_v36 = vpop.f32.mrb[0].mxu1 }
 0x182   :  { %205 = vst.msk [vmem:[%s358_s2 + $0x28] sm:$0xff] %vm14_vm0, %v252_v36  ;;  %v181_v37 = vpop.f32.mrb[1].mxu1 }
 0x183   :  { %204 = vst.msk [vmem:[%s358_s2 + $0x20] sm:$0xff] %vm14_vm0, %v181_v37 }
 0x189   :  { %v255_v38 = vpop.f32.mrb[2].mxu1 }
 0x18a   :  { %207 = vst.msk [vmem:[%s358_s2 + $0x38] sm:$0xff] %vm14_vm0, %v255_v38  ;;  %v191_v39 = vpop.f32.mrb[3].mxu1 }
 0x18b   :  { %206 = vst.msk [vmem:[%s358_s2 + $0x30] sm:$0xff] %vm14_vm0, %v191_v39 }

// kernel: reverse
= control target key start
LH: loop header
LB: loop body
LE: loop exit
PB: predicated region body
PF: predicated region fallthrough
CT: control target
= control target key end

     0   :  { %v2_v0 = vlaneseq  ;;  %s123_s0 = inlined_call_operand.vmem [shape: s32[20], index: 0, kind: input, shape index: {}]   ;;  %s124_s1 = inlined_call_operand.vmem [shape: s32[20], index: 1, kind: output, shape index: {}]  }
   0x2   :  { %v3_v1 = vsub.s32 19, %v2_v0 }
   0x4   :  { %4 = vset.pattern.permute.xlu0 %v3_v1 }
   0x5   :  { %v43_v2 = vld [vmem:[#allocation1] sm:$0x1]  ;;  %v21_v3 = vld [vmem:[%s123_s0] sm:$0x1]  ;;  %v58_v10 = vshrl.u32 %v2_v0, 7 }
   0x6   :  { %44 = vst [vmem:[#allocation0] sm:$0x1] %v43_v2  ;;  %22 = vst [vmem:[#allocation1 + $0x1] sm:$0x1] %v21_v3 }
   0x7   :  { %vm59_vm0 = vcmp.lt.s32.totalorder %v58_v10, 1 }
   0xd   :  { %v46_v4 = vld [vmem:[#allocation0 + $0x7] ss:$-1 sm:$0xff]  ;;  %v40_v5 = vld [vmem:[#allocation1 + $0x1] sm:$0x1] }
   0xe   :  { %v47_v6 = vrot.slane %v46_v4, 7  ;;  %42 = vst [vmem:[#allocation0 + $0x8] sm:$0x1] %v40_v5 }
  0x10   :  { %48 = vperm.xlu0 %4, %v47_v6  }
  0x15   :  { %v53_v7 = vld [vmem:[#allocation0 + $0xf] ss:$-1 sm:$0xff] }
  0x16   :  { %v54_v8 = vrot.slane %v53_v7, 7 }
  0x18   :  { %55 = vperm.xlu0 %4, %v54_v8  }
  0x8f   :  { %v49_v9 = vpop.permute.xlu0 %48 }
  0x90   :  { %50 = vst [vmem:[#allocation2] sm:$0xff] %v49_v9 }
  0x97   :  { %v56_v11 = vpop.permute.xlu0 %55 }
  0x98   :  { %60 = vst.msk [vmem:[#allocation2] sm:$0xff] %vm59_vm0, %v56_v11 }
  0x9f   :  { %v64_v12 = vld [vmem:[#allocation2] sm:$0x1] }
  0xa0   :  { %66 = vst [vmem:[#allocation3] sm:$0x1] %v64_v12 }
  0xa7   :  { %v82_v13 = vld [vmem:[#allocation3] sm:$0x1] }
  0xa8   :  { %83 = vst [vmem:[%s124_s1] sm:$0x1] %v82_v13 }

// kernel: model_forward.3
= control target key start
LH: loop header
LB: loop body
LE: loop exit
PB: predicated region body
PF: predicated region fallthrough
CT: control target
= control target key end

     0   :  { %s3740_s12 = smov 0   ;;  %s3742_s13 = smov 0   ;;  %s7988_s0 = inlined_call_operand.vmem [shape: f32[32,4,256], index: 0, kind: input, shape index: {}]   ;;  %s7989_s1 = inlined_call_operand.vmem [shape: f32[64,4], index: 1, kind: input, shape index: {}]   ;;  %s7990_s2 = inlined_call_operand.vmem [shape: f32[1,64], index: 2, kind: input, shape index: {}]   ;;  %s7991_s3 = inlined_call_operand.vmem [shape: f32[2,16,64], index: 3, kind: output, shape index: {}]  }
   0x1   :  { %s3744_s14 = smov 0  }
   0x2 LB: > { %s25_s15 = sadd.s32 1, %s3709_s13  ;;  %p3611_p0 = scmp.ge.s32.totalorder %s3713_s14, 1  ;;  %s3713_s14 = sphi %s3744_s14, %s13_s14   ;;  %s3709_s13 = sphi %s3742_s13, %s8959_s13   ;;  %s3705_s12 = sphi %s3740_s12, %s8958_s12  }
   0x3   : > { %p27_p1 = scmp.ge.s32.totalorder %s25_s15, 2  ;;  %p158_p2 = scmp.lt.s32.totalorder %s3713_s14, 3 }
   0x5   : > { %s8961_s15 = smov (%p27_p1, %s25_s15), 0  ;;  %p159_p3 = pnand %p3611_p0, %p158_p2 }
   0x7   : > { %162 = sbr.rel (%p159_p3) target bundleno = 982 (0x3d6), region = 32 }
   0xe   : > { %v213_v0 = vld [vmem:[%s7989_s1 + $0x10] sm:$0xff]  ;;  %v211_v1 = vld [vmem:[%s7989_s1] sm:$0xff]  ;;  %v3715_v2 = vmov 0   ;;  %v214_v3 = vld [vmem:[%s7989_s1 + $0x18] sm:$0xff]  ;;  %v3716_v9 = vmov 1   ;;  %v3717_v10 = vmov 2   ;;  %v260_v12 = vlaneseq }
   0xf   : > { %3683 = vset.pattern.permute.xlu1 %v3715_v2  ;;  %3682 = vset.pattern.permute.xlu0 %v3715_v2  ;;  %v212_v4 = vld [vmem:[%s7989_s1 + $0x8] sm:$0xff]  ;;  %v215_v6 = vld [vmem:[%s7989_s1 + $0x20] sm:$0xff]  ;;  %v218_v7 = vld [vmem:[%s7989_s1 + $0x38] sm:$0xff]  ;;  %v3718_v11 = vmov 3   ;;  %s3612_s5 = sshll.u32 %s3705_s12, 4  ;;  %vm3346_vm0 = vcmask 7168  }
  0x10   : > { %232 = vperm.xlu1 %3683, %v213_v0   ;;  %222 = vperm.xlu0 %3682, %v211_v1   ;;  %v216_v5 = vld [vmem:[%s7989_s1 + $0x28] sm:$0xff]  ;;  %v217_v8 = vld [vmem:[%s7989_s1 + $0x30] sm:$0xff]  ;;  %p189_p4 = scmp.lt.s32.totalorder %s3612_s5, 31  ;;  %v261_v13 = vshrl.u32 %v260_v12, 7  ;;  %vm3355_vm1 = vcmask 15360   ;;  %vm3364_vm2 = vcmask 23552  }
  0x11   : > { %vm3373_vm3 = vcmask 31744   ;;  %vm3382_vm4 = vcmask 39936   ;;  %vm3391_vm5 = vcmask 48128   ;;  %vm3400_vm6 = vcmask 56320   ;;  %p199_p5 = scmp.lt.s32.totalorder %s3705_s12, 1 }
  0x12   : > { %s8963_s5 = smov (!%p189_p4, %s3612_s5), 31  ;;  %v3794_v16 = vsub.s32 0, %v261_v13  ;;  %v3799_v20 = vsub.s32 1, %v261_v13  ;;  %v3807_v25 = vsub.s32 2, %v261_v13  ;;  %v3812_v27 = vsub.s32 3, %v261_v13 }
  0x13   : > { %s3650_s6 = sshll.u32 %s8963_s5, 3  ;;  %vm3409_vm7 = vcmask 64512   ;;  %vm3418_vm8 = vcmask 72704   ;;  %vm3427_vm9 = vcmask 80896   ;;  %vm3436_vm10 = vcmask 89088   ;;  %s8965_s12 = smov (!%p199_p5, %s3705_s12), 1 }
  0x14   : > { %237 = vperm.xlu1 %3683, %v214_v3   ;;  %227 = vperm.xlu0 %3682, %v212_v4   ;;  %s3788_s9 = scalar_lea.vmem %s7988_s0, %s3650_s6  ;;  %8186 = vst [vmem:[#allocation4_spill] sm:$0xff] %v3794_v16  ;;  %8187 = vst [vmem:[#allocation5_spill] sm:$0xff] %v3799_v20  ;;  %vm208_vm11 = vcmask 523264   ;;  %s3651_s10 = sshll.u32 %s8965_s12, 4  ;;  %vm3445_vm12 = vcmask 97280   ;;  %vm3454_vm13 = vcmask 105472  }
  0x15   : > { %v219_v17 = vld [vmem:[%s3788_s9] sm:$0xf]  ;;  %v444_v18 = vld [vmem:[%s3788_s9 + $0x4] sm:$0xf]  ;;  %v3617_v19 = vld [vmem:[%s3788_s9 + $0x8] sm:$0xf]  ;;  %s7909_s17 = scalar_lea.vmem %s7991_s3, %s3651_s10 }
  0x16   : > { %v3618_v21 = vld [vmem:[%s3788_s9 + $0xc] sm:$0xf]  ;;  %v3619_v22 = vld [vmem:[%s3788_s9 + $0x10] sm:$0xf]  ;;  %8190 = vst [vmem:[#allocation8_spill] sm:$0xff] %v3807_v25  ;;  %v3810_v26 = vrot.slane %v219_v17, %v3794_v16  ;;  %8191 = vst [vmem:[#allocation9_spill] sm:$0xff] %v3812_v27  ;;  %v3815_v28 = vrot.slane %v444_v18, %v3794_v16  ;;  %v3818_v29 = vrot.slane %v3617_v19, %v3794_v16 }
  0x17   : > { %v3821_v30 = vrot.slane %v3618_v21, %v3794_v16  ;;  %v3824_v31 = vrot.slane %v3619_v22, %v3794_v16  ;;  %v3827_v32 = vrot.slane %v219_v17, %v3799_v20  ;;  %v3830_v33 = vrot.slane %v444_v18, %v3799_v20  ;;  %v3620_v36 = vld [vmem:[%s3788_s9 + $0x14] sm:$0xf]  ;;  %v3621_v43 = vld [vmem:[%s3788_s9 + $0x18] sm:$0xf]  ;;  %v3622_v44 = vld [vmem:[%s3788_s9 + $0x1c] sm:$0xf] }
  0x18   : > { %247 = vperm.xlu1 %3683, %v216_v5   ;;  %242 = vperm.xlu0 %3682, %v215_v6   ;;  %v3833_v34 = vrot.slane %v3617_v19, %v3799_v20  ;;  %v3836_v35 = vrot.slane %v3618_v21, %v3799_v20  ;;  %v3844_v39 = vrot.slane %v219_v17, %v3807_v25  ;;  %v3870_v49 = vld [vmem:[%s3788_s9 + $0x20] sm:$0xf]  ;;  %v3624_v58 = vld [vmem:[%s3788_s9 + $0x24] sm:$0xf]  ;;  %vm3463_vm14 = vcmask 113664  }
  0x19   : > { %v3847_v40 = vrot.slane %v444_v18, %v3807_v25  ;;  %v3850_v41 = vrot.slane %v3617_v19, %v3807_v25  ;;  %v3853_v42 = vrot.slane %v3619_v22, %v3799_v20  ;;  %v3858_v45 = vrot.slane %v219_v17, %v3812_v27 }
  0x1a   : > { %v3861_v46 = vrot.slane %v444_v18, %v3812_v27  ;;  %v3864_v47 = vrot.slane %v3618_v21, %v3807_v25  ;;  %v3867_v48 = vrot.slane %v3619_v22, %v3807_v25  ;;  %v3873_v50 = vrot.slane %v3617_v19, %v3812_v27 }
  0x1b   : > { %8194 = vst [vmem:[#allocation12_spill] sm:$0xff] %v3847_v40  ;;  %8195 = vst [vmem:[#allocation13_spill] sm:$0xff] %v3850_v41  ;;  %v3876_v51 = vrot.slane %v3618_v21, %v3812_v27  ;;  %v3879_v52 = vrot.slane %v3619_v22, %v3812_v27  ;;  %v3882_v53 = vrot.slane %v3620_v36, %v3794_v16  ;;  %vm3472_vm15 = vcmask 121856  }
  0x1c   : > { %257 = vperm.xlu1 %3683, %v218_v7   ;;  %252 = vperm.xlu0 %3682, %v217_v8   ;;  %8196 = vst [vmem:[#allocation14_spill] sm:$0xff] %v3853_v42  ;;  %8197 = vst [vmem:[#allocation15_spill] sm:$0xff] %v3858_v45  ;;  %v3885_v54 = vrot.slane %v3620_v36, %v3799_v20  ;;  %v3888_v55 = vrot.slane %v3621_v43, %v3794_v16 }
  0x1d   : > { %8198 = vst [vmem:[#allocation16_spill] sm:$0xff] %v3861_v46  ;;  %8199 = vst [vmem:[#allocation17_spill] sm:$0xff] %v3864_v47  ;;  %v3891_v56 = vrot.slane %v3621_v43, %v3799_v20  ;;  %v3894_v57 = vrot.slane %v3622_v44, %v3794_v16  ;;  %v3902_v61 = vrot.slane %v3620_v36, %v3807_v25 }
  0x1e   : > { %8200 = vst [vmem:[#allocation18_spill] sm:$0xff] %v3867_v48  ;;  %8201 = vst [vmem:[#allocation19_spill] sm:$0xff] %v3873_v50  ;;  %v3905_v62 = vrot.slane %v3620_v36, %v3812_v27  ;;  %v3908_v63 = vrot.slane %v3622_v44, %v3799_v20  ;;  %v3918_v2 = vrot.slane %v3621_v43, %v3812_v27 }
  0x1f   : > { %8202 = vst [vmem:[#allocation20_spill] sm:$0xff] %v3876_v51  ;;  %8203 = vst [vmem:[#allocation21_spill] sm:$0xff] %v3879_v52 }
  0x20   : > { %3685 = vset.pattern.permute.xlu1 %v3716_v9  ;;  %3684 = vset.pattern.permute.xlu0 %v3716_v9  ;;  %8204 = vst [vmem:[#allocation22_spill] sm:$0xff] %v3885_v54  ;;  %8205 = vst [vmem:[#allocation23_spill] sm:$0xff] %v3891_v56 }
  0x21   : > { %277 = vperm.xlu1 %3685, %v212_v4   ;;  %273 = vperm.xlu0 %3684, %v211_v1   ;;  %8208 = vst [vmem:[#allocation26_spill] sm:$0xff] %v3902_v61  ;;  %8209 = vst [vmem:[#allocation27_spill] sm:$0xff] %v3905_v62 }
  0x22   : > { %8210 = vst [vmem:[#allocation28_spill] sm:$0xff] %v3908_v63  ;;  %8213 = vst [vmem:[#allocation31_spill] sm:$0xff] %v3918_v2 }
  0x25   : > { %281 = vperm.xlu1 %3685, %v213_v0   ;;  %285 = vperm.xlu0 %3684, %v214_v3  }
  0x29   : > { %289 = vperm.xlu1 %3685, %v215_v6   ;;  %293 = vperm.xlu0 %3684, %v216_v5  }
  0x2d   : > { %297 = vperm.xlu1 %3685, %v217_v8   ;;  %301 = vperm.xlu0 %3684, %v218_v7  }
  0x31   : > { %3686 = vset.pattern.permute.xlu1 %v3717_v10  ;;  %3687 = vset.pattern.permute.xlu0 %v3717_v10 }
  0x32   : > { %325 = vperm.xlu1 %3686, %v211_v1   ;;  %329 = vperm.xlu0 %3687, %v212_v4  }
  0x36   : > { %333 = vperm.xlu1 %3686, %v213_v0   ;;  %341 = vperm.xlu0 %3687, %v215_v6  }
  0x3a   : > { %337 = vperm.xlu1 %3686, %v214_v3   ;;  %349 = vperm.xlu0 %3687, %v217_v8  }
  0x3e   : > { %345 = vperm.xlu1 %3686, %v216_v5   ;;  %3688 = vset.pattern.permute.xlu0 %v3718_v11 }
  0x3f   : > { %377 = vperm.xlu0 %3688, %v211_v1   ;;  %v3915_v1 = vrot.slane %v3621_v43, %v3807_v25 }
  0x41   : > { %8212 = vst [vmem:[#allocation30_spill] sm:$0xff] %v3915_v1 }
  0x42   : > { %353 = vperm.xlu1 %3686, %v218_v7  }
  0x43   : > { %389 = vperm.xlu0 %3688, %v214_v3   ;;  %v3921_v3 = vrot.slane %v3622_v44, %v3807_v25 }
  0x45   : > { %8214 = vst [vmem:[#allocation32_spill] sm:$0xff] %v3921_v3 }
  0x46   : > { %3689 = vset.pattern.permute.xlu1 %v3718_v11 }
  0x47   : > { %381 = vperm.xlu1 %3689, %v212_v4   ;;  %397 = vperm.xlu0 %3688, %v216_v5   ;;  %v3925_v4 = vrot.slane %v3870_v49, %v3799_v20 }
  0x49   : > { %8215 = vst [vmem:[#allocation33_spill] sm:$0xff] %v3925_v4 }
  0x4b   : > { %385 = vperm.xlu1 %3689, %v213_v0   ;;  %405 = vperm.xlu0 %3688, %v218_v7   ;;  %v3912_v0 = vrot.slane %v3870_v49, %v3794_v16 }
  0x4d   : > { %8211 = vst [vmem:[#allocation29_spill] sm:$0xff] %v3912_v0 }
  0x4f   : > { %393 = vperm.xlu1 %3689, %v215_v6  }
  0x53   : > { %401 = vperm.xlu1 %3689, %v217_v8   ;;  %v3940_v8 = vrot.slane %v3624_v58, %v3794_v16  ;;  %v3991_v16 = vrot.slane %v3622_v44, %v3812_v27 }
  0x55   : > { %8216 = vst [vmem:[#allocation34_spill] sm:$0xff] %v3940_v8  ;;  %8225 = vst [vmem:[#allocation43_spill] sm:$0xff] %v3991_v16 }
  0x8f   : > { %v3790_v14 = vpop.permute.xlu1 %232  ;;  %v3792_v15 = vpop.permute.xlu0 %222 }
  0x90   : > { %8184 = vst [vmem:[#allocation2_spill] sm:$0xff] %v3790_v14  ;;  %8185 = vst [vmem:[#allocation3_spill] sm:$0xff] %v3792_v15  ;;  %v3929_v5 = vmul.f32 %v3810_v26, %v3792_v15  ;;  %v3933_v6 = vmul.f32 %v3810_v26, %v3790_v14  ;;  %v3937_v7 = vmul.f32 %v3815_v28, %v3792_v15 }
  0x91   : > { %v3944_v9 = vmul.f32 %v3815_v28, %v3790_v14  ;;  %v3948_v10 = vmul.f32 %v3818_v29, %v3792_v15  ;;  %v3952_v11 = vmul.f32 %v3818_v29, %v3790_v14  ;;  %v3956_v12 = vmul.f32 %v3821_v30, %v3792_v15 }
  0x92   : > { %v3960_v13 = vmul.f32 %v3821_v30, %v3790_v14  ;;  %v3964_v17 = vmul.f32 %v3824_v31, %v3792_v15  ;;  %v3968_v18 = vmul.f32 %v3824_v31, %v3790_v14  ;;  %v3972_v19 = vmul.f32 %v3882_v53, %v3792_v15 }
  0x93   : > { %v3803_v23 = vpop.permute.xlu1 %237  ;;  %v3805_v24 = vpop.permute.xlu0 %227  ;;  %v3980_v36 = vmul.f32 %v3882_v53, %v3790_v14  ;;  %v3984_v43 = vmul.f32 %v3888_v55, %v3792_v15  ;;  %v3988_v58 = vmul.f32 %v3888_v55, %v3790_v14  ;;  %v4007_v3 = vmul.f32 %v3894_v57, %v3792_v15 }
  0x94   : > { %8188 = vst [vmem:[#allocation6_spill] sm:$0xff] %v3803_v23  ;;  %8189 = vst [vmem:[#allocation7_spill] sm:$0xff] %v3805_v24  ;;  %v3995_v8 = vmul.f32 %v3810_v26, %v3803_v23  ;;  %v3999_v20 = vmul.f32 %v3810_v26, %v3805_v24  ;;  %v4003_v4 = vmul.f32 %v3815_v28, %v3805_v24 }
  0x95   : > { %8217 = vst [vmem:[#allocation35_spill] sm:$0xff] %v3964_v17  ;;  %8218 = vst [vmem:[#allocation36_spill] sm:$0xff] %v3968_v18  ;;  %v4011_v44 = vmul.f32 %v3815_v28, %v3803_v23  ;;  %v4015_v16 = vmul.f32 %v3818_v29, %v3805_v24  ;;  %v4019_v63 = vmul.f32 %v3818_v29, %v3803_v23 }
  0x96   : > { %8219 = vst [vmem:[#allocation37_spill] sm:$0xff] %v3972_v19  ;;  %8222 = vst [vmem:[#allocation40_spill] sm:$0xff] %v3980_v36  ;;  %v4027_v15 = vmul.f32 %v3821_v30, %v3803_v23  ;;  %v4039_v2 = vmul.f32 %v3882_v53, %v3805_v24  ;;  %v4047_v36 = vmul.f32 %v3882_v53, %v3803_v23 }
  0x97   : > { %v3839_v37 = vpop.permute.xlu1 %247  ;;  %v3841_v38 = vpop.permute.xlu0 %242  ;;  %8223 = vst [vmem:[#allocation41_spill] sm:$0xff] %v3984_v43  ;;  %8224 = vst [vmem:[#allocation42_spill] sm:$0xff] %v3988_v58  ;;  %v4023_v58 = vmul.f32 %v3821_v30, %v3805_v24  ;;  %v4035_v43 = vmul.f32 %v3824_v31, %v3803_v23  ;;  %v4051_v19 = vmul.f32 %v3888_v55, %v3805_v24 }
  0x98   : > { %8192 = vst [vmem:[#allocation10_spill] sm:$0xff] %v3839_v37  ;;  %8193 = vst [vmem:[#allocation11_spill] sm:$0xff] %v3841_v38  ;;  %v4055_v62 = vmul.f32 %v3888_v55, %v3803_v23  ;;  %v4059_v61 = vmul.f32 %v3894_v57, %v3805_v24  ;;  %v4067_v18 = vmul.f32 %v3810_v26, %v3841_v38 }
  0x99   : > { %8226 = vst [vmem:[#allocation44_spill] sm:$0xff] %v4007_v3  ;;  %v4031_v3 = vmul.f32 %v3824_v31, %v3805_v24  ;;  %8228 = vst [vmem:[#allocation46_spill] sm:$0xff] %v4035_v43  ;;  %v4087_v54 = vmul.f32 %v3818_v29, %v3841_v38  ;;  %v4091_v17 = vmul.f32 %v3821_v30, %v3839_v37 }
  0x9a   : > { %8229 = vst [vmem:[#allocation47_spill] sm:$0xff] %v4039_v2  ;;  %8232 = vst [vmem:[#allocation50_spill] sm:$0xff] %v4047_v36  ;;  %v4063_v2 = vmul.f32 %v3810_v26, %v3839_v37  ;;  %v4071_v36 = vmul.f32 %v3815_v28, %v3839_v37  ;;  %v4103_v52 = vmul.f32 %v3824_v31, %v3841_v38 }
  0x9b   : > { %v3897_v59 = vpop.permute.xlu1 %257  ;;  %v3899_v60 = vpop.permute.xlu0 %252  ;;  %8227 = vst [vmem:[#allocation45_spill] sm:$0xff] %v4031_v3  ;;  %8233 = vst [vmem:[#allocation51_spill] sm:$0xff] %v4051_v19  ;;  %v4075_v19 = vmul.f32 %v3894_v57, %v3803_v23  ;;  %v4095_v23 = vmul.f32 %v3821_v30, %v3841_v38  ;;  %v4107_v43 = vmul.f32 %v3882_v53, %v3839_v37 }
  0x9c   : > { %8206 = vst [vmem:[#allocation24_spill] sm:$0xff] %v3897_v59  ;;  %8207 = vst [vmem:[#allocation25_spill] sm:$0xff] %v3899_v60  ;;  %v4115_v46 = vmul.f32 %v3882_v53, %v3841_v38  ;;  %v4119_v48 = vmul.f32 %v3888_v55, %v3839_v37  ;;  %v4135_v47 = vmul.f32 %v3810_v26, %v3899_v60 }
  0x9d   : > { %8234 = vst [vmem:[#allocation52_spill] sm:$0xff] %v4055_v62  ;;  %8235 = vst [vmem:[#allocation53_spill] sm:$0xff] %v4059_v61  ;;  %v4079_v62 = vmul.f32 %v3815_v28, %v3841_v38  ;;  %v4083_v61 = vmul.f32 %v3818_v29, %v3839_v37 }
  0x9e   : > { %8236 = vst [vmem:[#allocation54_spill] sm:$0xff] %v4075_v19  ;;  %v4099_v19 = vmul.f32 %v3824_v31, %v3839_v37  ;;  %8238 = vst [vmem:[#allocation56_spill] sm:$0xff] %v4103_v52  ;;  %v4127_v52 = vmul.f32 %v3894_v57, %v3839_v37  ;;  %v4147_v37 = vmul.f32 %v3815_v28, %v3899_v60 }
  0x9f   : > { %8239 = vst [vmem:[#allocation57_spill] sm:$0xff] %v4107_v43  ;;  %8242 = vst [vmem:[#allocation60_spill] sm:$0xff] %v4115_v46  ;;  %v4131_v43 = vmul.f32 %v3810_v26, %v3897_v59  ;;  %v4139_v46 = vmul.f32 %v3815_v28, %v3897_v59  ;;  %v4155_v26 = vmul.f32 %v3818_v29, %v3899_v60 }
  0xa0   : > { %v3974_v21 = vpop.permute.xlu1 %277  ;;  %v3976_v22 = vpop.permute.xlu0 %273  ;;  %8237 = vst [vmem:[#allocation55_spill] sm:$0xff] %v4099_v19  ;;  %8243 = vst [vmem:[#allocation61_spill] sm:$0xff] %v4119_v48  ;;  %v4123_v19 = vmul.f32 %v3888_v55, %v3841_v38  ;;  %v4143_v48 = vmul.f32 %v3894_v57, %v3790_v14  ;;  %v4163_v14 = vmul.f32 %v3821_v30, %v3899_v60 }
  0xa1   : > { %8220 = vst [vmem:[#allocation38_spill] sm:$0xff] %v3974_v21  ;;  %8221 = vst [vmem:[#allocation39_spill] sm:$0xff] %v3976_v22  ;;  %v4167_v28 = vmul.f32 %v3824_v31, %v3897_v59 }
  0xa2   : > { %8244 = vst [vmem:[#allocation62_spill] sm:$0xff] %v4123_v19  ;;  %8245 = vst [vmem:[#allocation63_spill] sm:$0xff] %v4127_v52  ;;  %v4151_v52 = vmul.f32 %v3818_v29, %v3897_v59  ;;  %v4159_v19 = vmul.f32 %v3821_v30, %v3897_v59  ;;  %v4175_v29 = vmul.f32 %v3882_v53, %v3897_v59 }
  0xa3   : > { %8246 = vst [vmem:[#allocation64_spill] sm:$0xff] %v4143_v48  ;;  %8248 = vst [vmem:[#allocation66_spill] sm:$0xff] %v4163_v14  ;;  %v4171_v48 = vmul.f32 %v3824_v31, %v3899_v60  ;;  %v308_v30 = vmul.f32 %v3827_v32, %v3976_v22  ;;  %v4185_v14 = vmul.f32 %v3882_v53, %v3899_v60 }
  0xa4   : > { %v4041_v1 = vpop.permute.xlu1 %281  ;;  %v4043_v56 = vpop.permute.xlu0 %285  ;;  %8247 = vst [vmem:[#allocation65_spill] sm:$0xff] %v4159_v19  ;;  %8249 = vst [vmem:[#allocation67_spill] sm:$0xff] %v4167_v28  ;;  %v4189_v28 = vmul.f32 %v3888_v55, %v3897_v59  ;;  %v4193_v31 = vmul.f32 %v3888_v55, %v3899_v60  ;;  %v4205_v53 = vmul.f32 %v3912_v0, %v3805_v24 }
  0xa5   : > { %8230 = vst [vmem:[#allocation48_spill] sm:$0xff] %v4041_v1  ;;  %8231 = vst [vmem:[#allocation49_spill] sm:$0xff] %v4043_v56  ;;  %v309_v55 = vmul.f32 %v3827_v32, %v3974_v21  ;;  %v560_v24 = vmul.f32 %v3833_v34, %v3974_v21  ;;  %v649_v0 = vmul.f32 %v3836_v35, %v3974_v21 }
  0xa6   : > { %8250 = vst [vmem:[#allocation68_spill] sm:$0xff] %v4171_v48  ;;  %8251 = vst [vmem:[#allocation69_spill] sm:$0xff] %v4175_v29  ;;  %v4197_v29 = vmul.f32 %v3894_v57, %v3897_v59  ;;  %v4201_v48 = vmul.f32 %v3894_v57, %v3841_v38  ;;  %v461_v59 = vmul.f32 %v3830_v33, %v3976_v22 }
  0xa7   : > { %8254 = vst [vmem:[#allocation72_spill] sm:$0xff] %v4185_v14  ;;  %8255 = vst [vmem:[#allocation73_spill] sm:$0xff] %v4189_v28  ;;  %v4209_v14 = vrot.slane %v3870_v49, %v3807_v25  ;;  %v4219_v38 = vrot.slane %v3870_v49, %v3812_v27  ;;  %v559_v25 = vmul.f32 %v3833_v34, %v3976_v22 }
  0xa8   : > { %v4109_v51 = vpop.permute.xlu1 %289  ;;  %v4111_v50 = vpop.permute.xlu0 %293  ;;  %8256 = vst [vmem:[#allocation74_spill] sm:$0xff] %v4193_v31  ;;  %8257 = vst [vmem:[#allocation75_spill] sm:$0xff] %v4197_v29  ;;  %v462_v31 = vmul.f32 %v3830_v33, %v3974_v21  ;;  %v311_v49 = vmul.f32 %v3827_v32, %v4043_v56  ;;  %v310_v27 = vmul.f32 %v3827_v32, %v4041_v1 }
  0xa9   : > { %8240 = vst [vmem:[#allocation58_spill] sm:$0xff] %v4109_v51  ;;  %8241 = vst [vmem:[#allocation59_spill] sm:$0xff] %v4111_v50  ;;  %v651_v45 = vmul.f32 %v3836_v35, %v4043_v56  ;;  %v4267_v19 = vadd.f32 %v559_v25, %v3948_v10  ;;  %v4270_v40 = vadd.f32 %v649_v0, %v4023_v58 }
  0xaa   : > { %8258 = vst [vmem:[#allocation76_spill] sm:$0xff] %v4201_v48  ;;  %8259 = vst [vmem:[#allocation77_spill] sm:$0xff] %v4205_v53  ;;  %v4229_v53 = vmul.f32 %v3894_v57, %v3899_v60  ;;  %v4232_v48 = vadd.f32 %v308_v30, %v3929_v5  ;;  %v464_v57 = vmul.f32 %v3830_v33, %v4043_v56 }
  0xab   : > { %8260 = vst [vmem:[#allocation78_spill] sm:$0xff] %v4209_v14  ;;  %8261 = vst [vmem:[#allocation79_spill] sm:$0xff] %v4219_v38  ;;  %v648_v38 = vmul.f32 %v3836_v35, %v3976_v22  ;;  %v463_v5 = vmul.f32 %v3830_v33, %v4041_v1  ;;  %v562_v30 = vmul.f32 %v3833_v34, %v4043_v56 }
  0xac   : > { %v4177_v3 = vpop.permute.xlu1 %297  ;;  %v4179_v41 = vpop.permute.xlu0 %301  ;;  %8262 = vst [vmem:[#allocation80_spill] sm:$0xff] %v4229_v53  ;;  %8263 = vst [vmem:[#allocation81_spill] sm:$0xff] %v4232_v48  ;;  %v561_v60 = vmul.f32 %v3833_v34, %v4041_v1  ;;  %v4253_v53 = vadd.f32 %v309_v55, %v3999_v20  ;;  %v4256_v28 = vadd.f32 %v462_v31, %v4003_v4 }
  0xad   : > { %8252 = vst [vmem:[#allocation70_spill] sm:$0xff] %v4177_v3  ;;  %8253 = vst [vmem:[#allocation71_spill] sm:$0xff] %v4179_v41  ;;  %v4259_v22 = vadd.f32 %v461_v59, %v3937_v7  ;;  %v4264_v48 = vadd.f32 %v560_v24, %v4015_v16  ;;  %v650_v20 = vmul.f32 %v3836_v35, %v4041_v1 }
  0xae   : > { %v4275_v4 = vadd.f32 %v311_v49, %v3995_v8  ;;  %v313_v59 = vmul.f32 %v3827_v32, %v4111_v50  ;;  %v4280_v7 = vadd.f32 %v310_v27, %v3933_v6  ;;  %v4283_v16 = vadd.f32 %v648_v38, %v3956_v12 }
  0xaf   : > { %v4290_v0 = vadd.f32 %v464_v57, %v4011_v44  ;;  %v4293_v10 = vadd.f32 %v463_v5, %v3944_v9  ;;  %v4296_v8 = vadd.f32 %v562_v30, %v4019_v63  ;;  %v4299_v58 = vadd.f32 %v561_v60, %v3952_v11 }
  0xb0   : > { %v312_v27 = vmul.f32 %v3827_v32, %v4109_v51  ;;  %v466_v38 = vmul.f32 %v3830_v33, %v4111_v50  ;;  %v465_v6 = vmul.f32 %v3830_v33, %v4109_v51  ;;  %v4308_v12 = vadd.f32 %v651_v45, %v4027_v15 }
  0xb1   : > { %v4240_v14 = vpop.permute.xlu1 %325  ;;  %v4242_v29 = vpop.permute.xlu0 %329  ;;  %v564_v9 = vmul.f32 %v3833_v34, %v4111_v50  ;;  %v563_v63 = vmul.f32 %v3833_v34, %v4109_v51  ;;  %v653_v60 = vmul.f32 %v3836_v35, %v4111_v50  ;;  %v4317_v11 = vadd.f32 %v650_v20, %v3960_v13 }
  0xb2   : > { %8264 = vst [vmem:[#allocation82_spill] sm:$0xff] %v4240_v14  ;;  %8265 = vst [vmem:[#allocation83_spill] sm:$0xff] %v4242_v29  ;;  %v4320_v44 = vadd.f32 %v313_v59, %v4063_v2  ;;  %v315_v31 = vmul.f32 %v3827_v32, %v4179_v41  ;;  %v314_v15 = vmul.f32 %v3827_v32, %v4177_v3 }
  0xb3   : > { %v652_v45 = vmul.f32 %v3836_v35, %v4109_v51  ;;  %v468_v13 = vmul.f32 %v3830_v33, %v4179_v41  ;;  %v467_v2 = vmul.f32 %v3830_v33, %v4177_v3  ;;  %v566_v57 = vmul.f32 %v3833_v34, %v4179_v41 }
  0xb4   : > { %v565_v5 = vmul.f32 %v3833_v34, %v4177_v3  ;;  %v4341_v32 = vadd.f32 %v312_v27, %v4067_v18  ;;  %v4344_v30 = vadd.f32 %v466_v38, %v4071_v36  ;;  %v4347_v20 = vadd.f32 %v465_v6, %v4079_v62 }
  0xb5   : > { %v4285_v24 = vpop.permute.xlu1 %333  ;;  %v4287_v25 = vpop.permute.xlu0 %341  ;;  %v655_v59 = vmul.f32 %v3836_v35, %v4179_v41  ;;  %v360_v33 = vmul.f32 %v3844_v39, %v4240_v14  ;;  %v4354_v51 = vadd.f32 %v564_v9, %v4083_v61  ;;  %v4357_v34 = vadd.f32 %v563_v63, %v4087_v54  ;;  %v8271_v9 = vld [vmem:[#allocation12_spill] sm:$0xff] }
  0xb6   : > { %8266 = vst [vmem:[#allocation84_spill] sm:$0xff] %v4285_v24  ;;  %8267 = vst [vmem:[#allocation85_spill] sm:$0xff] %v4287_v25  ;;  %v4360_v18 = vadd.f32 %v653_v60, %v4091_v17  ;;  %v4363_v36 = vadd.f32 %v315_v31, %v4131_v43  ;;  %v4366_v62 = vadd.f32 %v314_v15, %v4135_v47  ;;  %v8272_v60 = vld [vmem:[#allocation65_spill] sm:$0xff]  ;;  %v8274_v15 = vld [vmem:[#allocation15_spill] sm:$0xff] }
  0xb7   : > { %v4369_v27 = vadd.f32 %v652_v45, %v4095_v23  ;;  %v747_v38 = vmul.f32 %v3853_v42, %v3974_v21  ;;  %v4376_v54 = vadd.f32 %v468_v13, %v4139_v46  ;;  %v4379_v17 = vadd.f32 %v467_v2, %v4147_v37  ;;  %v8273_v31 = vld [vmem:[#allocation81_spill] sm:$0xff] }
  0xb8   : > { %v4382_v43 = vadd.f32 %v566_v57, %v4151_v52  ;;  %v4385_v47 = vadd.f32 %v565_v5, %v4155_v26  ;;  %v361_v23 = vmul.f32 %v3844_v39, %v4242_v29  ;;  %v482_v63 = vmul.f32 %v8271_v9, %v4242_v29  ;;  %v8275_v13 = vld [vmem:[#allocation13_spill] sm:$0xff] }
  0xb9   : > { %v4328_v55 = vpop.permute.xlu1 %337  ;;  %v4330_v49 = vpop.permute.xlu0 %349  ;;  %v481_v46 = vmul.f32 %v8271_v9, %v4240_v14  ;;  %v4396_v37 = vadd.f32 %v655_v59, %v8272_v60  ;;  %v368_v52 = vadd.f32 %v360_v33, %v8273_v31  ;;  %v580_v2 = vmul.f32 %v8275_v13, %v4242_v29  ;;  %v8276_v57 = vld [vmem:[#allocation45_spill] sm:$0xff]  ;;  %v8278_v33 = vld [vmem:[#allocation39_spill] sm:$0xff] }
  0xba   : > { %8268 = vst [vmem:[#allocation86_spill] sm:$0xff] %v4328_v55  ;;  %8269 = vst [vmem:[#allocation87_spill] sm:$0xff] %v4330_v49  ;;  %v363_v45 = vmul.f32 %v3844_v39, %v4328_v55  ;;  %v4406_v5 = vadd.f32 %v747_v38, %v8276_v57  ;;  %v4410_v21 = vmul.f32 %v3836_v35, %v4177_v3  ;;  %v8281_v38 = vld [vmem:[#allocation17_spill] sm:$0xff] }
  0xbb   : > { %v4414_v59 = vmul.f32 %v3853_v42, %v4043_v56  ;;  %v4418_v60 = vmul.f32 %v3853_v42, %v8278_v33  ;;  %v579_v1 = vmul.f32 %v8275_v13, %v4240_v14  ;;  %v669_v57 = vmul.f32 %v8281_v38, %v4242_v29 }
  0xbc   : > { %v668_v35 = vmul.f32 %v8281_v38, %v4240_v14  ;;  %v369_v56 = vadd.f32 %v361_v23, %v4253_v53  ;;  %v4435_v33 = vadd.f32 %v481_v46, %v4259_v22  ;;  %v4447_v53 = vadd.f32 %v580_v2, %v4264_v48 }
  0xbd   : > { %v4373_v61 = vpop.permute.xlu1 %345  ;;  %8277 = vst [vmem:[#allocation12_spill] sm:$0xff] %v4414_v59  ;;  %8279 = vst [vmem:[#allocation65_spill] sm:$0xff] %v4418_v60  ;;  %v4432_v59 = vadd.f32 %v482_v63, %v4256_v28  ;;  %v362_v22 = vmul.f32 %v3844_v39, %v4285_v24  ;;  %v364_v28 = vmul.f32 %v3844_v39, %v4287_v25 }
  0xbe   : > { %8270 = vst [vmem:[#allocation88_spill] sm:$0xff] %v4373_v61  ;;  %v4387_v6 = vpop.permute.xlu0 %377  ;;  %v365_v14 = vmul.f32 %v3844_v39, %v4373_v61  ;;  %8284 = vst [vmem:[#allocation45_spill] sm:$0xff] %v4447_v53  ;;  %v4458_v63 = vadd.f32 %v579_v1, %v4267_v19  ;;  %v4461_v46 = vadd.f32 %v669_v57, %v4270_v40 }
  0xbf   : > { %v412_v26 = vmul.f32 %v8274_v15, %v4387_v6  ;;  %v4464_v48 = vadd.f32 %v668_v35, %v4283_v16  ;;  %v670_v1 = vmul.f32 %v8281_v38, %v4285_v24  ;;  %v672_v40 = vmul.f32 %v8281_v38, %v4287_v25 }
  0xc0   : > { %8285 = vst [vmem:[#allocation17_spill] sm:$0xff] %v4461_v46  ;;  %v373_v16 = vadd.f32 %v365_v14, %v4320_v44  ;;  %v370_v35 = vadd.f32 %v362_v22, %v4280_v7  ;;  %v366_v14 = vmul.f32 %v3844_v39, %v4330_v49  ;;  %v484_v44 = vmul.f32 %v8271_v9, %v4328_v55 }
  0xc1   : > { %v4420_v31 = vpop.permute.xlu1 %353  ;;  %v420_v41 = vadd.f32 %v412_v26, %v368_v52  ;;  %v4439_v52 = vmul.f32 %v3853_v42, %v4111_v50  ;;  %v371_v26 = vadd.f32 %v363_v45, %v4275_v4  ;;  %v485_v4 = vmul.f32 %v8271_v9, %v4287_v25 }
  0xc2   : > { %8280 = vst [vmem:[#allocation81_spill] sm:$0xff] %v4420_v31  ;;  %v4428_v3 = vpop.permute.xlu0 %389  ;;  %v581_v50 = vmul.f32 %v8275_v13, %v4285_v24  ;;  %v583_v42 = vmul.f32 %v8275_v13, %v4287_v25  ;;  %v367_v57 = vmul.f32 %v3844_v39, %v4420_v31  ;;  %v487_v7 = vmul.f32 %v8271_v9, %v4330_v49 }
  0xc3   : > { %8282 = vst [vmem:[#allocation15_spill] sm:$0xff] %v4428_v3  ;;  %8283 = vst [vmem:[#allocation13_spill] sm:$0xff] %v4439_v52  ;;  %428 = vmax.xlane.f32.xlu1 %v420_v41  ;;  %v415_v60 = vmul.f32 %v8274_v15, %v4428_v3  ;;  %v483_v41 = vmul.f32 %v8271_v9, %v4285_v24 }
  0xc5   : > { %v423_v23 = vadd.f32 %v415_v60, %v371_v26  ;;  %v372_v26 = vadd.f32 %v364_v28, %v4341_v32  ;;  %v4488_v24 = vadd.f32 %v483_v41, %v4293_v10  ;;  %v582_v10 = vmul.f32 %v8275_v13, %v4328_v55 }
  0xc6   : > { %v4466_v45 = vpop.permute.xlu1 %381  ;;  %v4468_v2 = vpop.permute.xlu0 %397  ;;  %v671_v32 = vmul.f32 %v8281_v38, %v4328_v55  ;;  %v4515_v28 = vadd.f32 %v581_v50, %v4299_v58  ;;  %v4518_v41 = vadd.f32 %v583_v42, %v4357_v34  ;;  %v374_v50 = vadd.f32 %v366_v14, %v4366_v62 }
  0xc7   : > { %8286 = vst [vmem:[#allocation89_spill] sm:$0xff] %v4468_v2  ;;  %434 = vmax.xlane.f32.xlu1 %v423_v23  ;;  %v413_v19 = vmul.f32 %v8274_v15, %v4466_v45  ;;  %v417_v60 = vmul.f32 %v8274_v15, %v4468_v2  ;;  %v4491_v23 = vadd.f32 %v485_v4, %v4347_v20 }
  0xc8   : > { %v375_v20 = vadd.f32 %v367_v57, %v4363_v36  ;;  %v4521_v4 = vadd.f32 %v670_v1, %v4317_v11  ;;  %v4528_v57 = vadd.f32 %v672_v40, %v4369_v27  ;;  %v492_v42 = vadd.f32 %v484_v44, %v4290_v0 }
  0xc9   : > { %8287 = vst [vmem:[#allocation90_spill] sm:$0xff] %v4491_v23  ;;  %v421_v25 = vadd.f32 %v413_v19, %v369_v56  ;;  %v425_v52 = vadd.f32 %v417_v60, %v373_v16  ;;  %v585_v56 = vmul.f32 %v8275_v13, %v4330_v49  ;;  %v8291_v60 = vld [vmem:[#allocation16_spill] sm:$0xff]  ;;  %v4535_v58 = vadd.f32 %v487_v7, %v4379_v17  ;;  %v8294_v7 = vld [vmem:[#allocation19_spill] sm:$0xff] }
  0xca   : > { %v4497_v46 = vpop.permute.xlu1 %385  ;;  %v4499_v53 = vpop.permute.xlu0 %405  ;;  %v502_v36 = vmul.f32 %v8291_v60, %v4466_v45  ;;  %v590_v11 = vadd.f32 %v582_v10, %v4296_v8  ;;  %v679_v27 = vadd.f32 %v671_v32, %v4308_v12  ;;  %v486_v62 = vmul.f32 %v8271_v9, %v4373_v61 }
  0xcb   : > { %8288 = vst [vmem:[#allocation91_spill] sm:$0xff] %v4497_v46  ;;  %8289 = vst [vmem:[#allocation92_spill] sm:$0xff] %v4499_v53  ;;  %430 = vmax.xlane.f32.xlu0 %v421_v25  ;;  %438 = vmax.xlane.f32.xlu1 %v425_v52  ;;  %v414_v39 = vmul.f32 %v8274_v15, %v4497_v46  ;;  %v419_v22 = vmul.f32 %v8274_v15, %v4499_v53  ;;  %v8290_v25 = vld [vmem:[#allocation18_spill] sm:$0xff] }
  0xcc   : > { %v767_v52 = vmul.f32 %v8290_v25, %v4242_v29  ;;  %v4541_v1 = vadd.f32 %v585_v56, %v4385_v47  ;;  %v584_v0 = vmul.f32 %v8275_v13, %v4373_v61  ;;  %v673_v17 = vmul.f32 %v8281_v38, %v4373_v61 }
  0xcd   : > { %v422_v19 = vadd.f32 %v414_v39, %v370_v35  ;;  %v427_v16 = vadd.f32 %v419_v22, %v375_v20  ;;  %v510_v35 = vadd.f32 %v502_v36, %v4432_v59  ;;  %v504_v47 = vmul.f32 %v8291_v60, %v4428_v3 }
  0xce   : > { %v4530_v23 = vpop.permute.xlu1 %393  ;;  %v4551_v8 = vadd.f32 %v767_v52, %v4406_v5  ;;  %v501_v12 = vmul.f32 %v8291_v60, %v4387_v6  ;;  %v488_v44 = vmul.f32 %v8271_v9, %v4420_v31  ;;  %v599_v10 = vmul.f32 %v8294_v7, %v4387_v6 }
  0xcf   : > { %8292 = vst [vmem:[#allocation18_spill] sm:$0xff] %v4530_v23  ;;  %432 = vmax.xlane.f32.xlu0 %v422_v19  ;;  %442 = vmax.xlane.f32.xlu1 %v427_v16  ;;  %v416_v34 = vmul.f32 %v8274_v15, %v4530_v23  ;;  %v586_v5 = vmul.f32 %v8275_v13, %v4420_v31 }
  0xd0   : > { %v602_v32 = vmul.f32 %v8294_v7, %v4428_v3  ;;  %v675_v9 = vmul.f32 %v8281_v38, %v4420_v31  ;;  %v494_v39 = vadd.f32 %v486_v62, %v4344_v30  ;;  %v592_v20 = vadd.f32 %v584_v0, %v4354_v51 }
  0xd1   : > { %v424_v40 = vadd.f32 %v416_v34, %v372_v26  ;;  %v8295_v26 = vld [vmem:[#allocation20_spill] sm:$0xff]  ;;  %v681_v22 = vadd.f32 %v673_v17, %v4360_v18  ;;  %v512_v19 = vadd.f32 %v504_v47, %v492_v42  ;;  %v509_v16 = vadd.f32 %v501_v12, %v4435_v33  ;;  %v8299_v12 = vld [vmem:[#allocation45_spill] sm:$0xff] }
  0xd2   : > { %v4558_v14 = vpop.permute.xlu1 %401  ;;  %v688_v59 = vmul.f32 %v8295_v26, %v4387_v6  ;;  %v691_v13 = vmul.f32 %v8295_v26, %v4428_v3  ;;  %v496_v36 = vadd.f32 %v488_v44, %v4376_v54  ;;  %v4584_v34 = vadd.f32 %v599_v10, %v4458_v63 }
  0xd3   : > { %8293 = vst [vmem:[#allocation16_spill] sm:$0xff] %v4558_v14  ;;  %436 = vmax.xlane.f32.xlu0 %v424_v40  ;;  %519 = vmax.xlane.f32.xlu1 %v510_v35  ;;  %v418_v56 = vmul.f32 %v8274_v15, %v4558_v14  ;;  %v506_v15 = vmul.f32 %v8291_v60, %v4468_v2  ;;  %v8298_v35 = vld [vmem:[#allocation12_spill] sm:$0xff] }
  0xd4   : > { %v594_v30 = vadd.f32 %v586_v5, %v4382_v43  ;;  %v4588_v51 = vadd.f32 %v688_v59, %v4464_v48  ;;  %v600_v18 = vmul.f32 %v8294_v7, %v4466_v45  ;;  %v683_v33 = vadd.f32 %v675_v9, %v4396_v37  ;;  %v8296_v43 = vld [vmem:[#allocation66_spill] sm:$0xff] }
  0xd5   : > { %v426_v52 = vadd.f32 %v418_v56, %v374_v50  ;;  %v4592_v50 = vadd.f32 %v602_v32, %v590_v11  ;;  %v604_v54 = vmul.f32 %v8294_v7, %v4468_v2  ;;  %v689_v63 = vmul.f32 %v8295_v26, %v4466_v45 }
  0xd6   : > { %v4599_v42 = vadd.f32 %v691_v13, %v679_v27  ;;  %v662_v48 = vadd.f32 %v4410_v21, %v8296_v43  ;;  %v514_v62 = vadd.f32 %v506_v15, %v494_v39  ;;  %v503_v0 = vmul.f32 %v8291_v60, %v4497_v46  ;;  %v8297_v21 = vld [vmem:[#allocation46_spill] sm:$0xff]  ;;  %v8300_v13 = vld [vmem:[#allocation17_spill] sm:$0xff] }
  0xd7   : > { %440 = vmax.xlane.f32.xlu0 %v426_v52  ;;  %523 = vmax.xlane.f32.xlu1 %v512_v19  ;;  %v508_v11 = vmul.f32 %v8291_v60, %v4499_v53  ;;  %v693_v37 = vmul.f32 %v8295_v26, %v4468_v2  ;;  %v601_v17 = vmul.f32 %v8294_v7, %v4497_v46 }
  0xd8   : > { %v606_v27 = vmul.f32 %v8294_v7, %v4499_v53  ;;  %v674_v40 = vmul.f32 %v8281_v38, %v4330_v49  ;;  %v757_v47 = vadd.f32 %v8298_v35, %v8297_v21  ;;  %v608_v44 = vadd.f32 %v600_v18, %v8299_v12  ;;  %v8301_v18 = vld [vmem:[#allocation21_spill] sm:$0xff]  ;;  %v8309_v12 = vld [vmem:[#allocation48_spill] sm:$0xff] }
  0xd9   : > { %v690_v10 = vmul.f32 %v8295_v26, %v4497_v46  ;;  %v769_v5 = vmul.f32 %v8290_v25, %v4328_v55  ;;  %v505_v59 = vmul.f32 %v8291_v60, %v4530_v23  ;;  %v612_v56 = vadd.f32 %v604_v54, %v592_v20  ;;  %v8308_v35 = vld [vmem:[#allocation13_spill] sm:$0xff] }
  0xda   : > { %v603_v38 = vmul.f32 %v8294_v7, %v4530_v23  ;;  %v695_v32 = vmul.f32 %v8295_v26, %v4499_v53  ;;  %v511_v9 = vadd.f32 %v503_v0, %v4488_v24  ;;  %v516_v39 = vadd.f32 %v508_v11, %v496_v36 }
  0xdb   : > { %517 = vmax.xlane.f32.xlu0 %v509_v16  ;;  %527 = vmax.xlane.f32.xlu1 %v514_v62  ;;  %v4630_v52 = vadd.f32 %v689_v63, %v8300_v13  ;;  %v4632_v19 = vadd.f32 %v693_v37, %v681_v22  ;;  %v4635_v16 = vadd.f32 %v601_v17, %v4515_v28  ;;  %v8302_v22 = vld [vmem:[#allocation90_spill] sm:$0xff] }
  0xdc   : > { %v4637_v15 = vadd.f32 %v606_v27, %v594_v30  ;;  %v692_v20 = vmul.f32 %v8295_v26, %v4530_v23  ;;  %v787_v54 = vmul.f32 %v8301_v18, %v4466_v45  ;;  %v507_v24 = vmul.f32 %v8291_v60, %v4558_v14 }
  0xdd   : > { %v4646_v36 = vadd.f32 %v690_v10, %v4521_v4  ;;  %v789_v28 = vmul.f32 %v8301_v18, %v4428_v3  ;;  %v513_v30 = vadd.f32 %v505_v59, %v8302_v22  ;;  %v4652_v63 = vadd.f32 %v603_v38, %v4518_v41  ;;  %v8303_v4 = vld [vmem:[#allocation82_spill] sm:$0xff]  ;;  %v8304_v41 = vld [vmem:[#allocation35_spill] sm:$0xff] }
  0xde   : > { %v4654_v43 = vadd.f32 %v695_v32, %v683_v33  ;;  %v682_v62 = vadd.f32 %v674_v40, %v662_v48  ;;  %v605_v0 = vmul.f32 %v8294_v7, %v4558_v14  ;;  %v694_v60 = vmul.f32 %v8295_v26, %v4558_v14  ;;  %v8305_v33 = vld [vmem:[#allocation65_spill] sm:$0xff]  ;;  %v8310_v10 = vld [vmem:[#allocation14_spill] sm:$0xff]  ;;  %v8311_v59 = vld [vmem:[#allocation71_spill] sm:$0xff] }
  0xdf   : > { %521 = vmax.xlane.f32.xlu0 %v511_v9  ;;  %531 = vmax.xlane.f32.xlu1 %v516_v39  ;;  %v777_v11 = vadd.f32 %v769_v5, %v757_v47  ;;  %v766_v37 = vmul.f32 %v8290_v25, %v8303_v4  ;;  %v4663_v17 = vadd.f32 %v692_v20, %v4528_v57  ;;  %v8307_v57 = vld [vmem:[#allocation55_spill] sm:$0xff]  ;;  %v8312_v9 = vld [vmem:[#allocation58_spill] sm:$0xff]  ;;  %v8313_v20 = vld [vmem:[#allocation84_spill] sm:$0xff] }
  0xe0   : > { %v4666_v27 = vadd.f32 %v787_v54, %v4551_v8  ;;  %v754_v21 = vadd.f32 %v8305_v33, %v8304_v41  ;;  %v771_v48 = vmul.f32 %v8290_v25, %v4373_v61  ;;  %v515_v7 = vadd.f32 %v507_v24, %v4535_v58  ;;  %v8315_v22 = vld [vmem:[#allocation22_spill] sm:$0xff]  ;;  %v8320_v33 = vld [vmem:[#allocation67_spill] sm:$0xff] }
  0xe1   : > { %v4673_v26 = vadd.f32 %v789_v28, %v777_v11  ;;  %v786_v40 = vmul.f32 %v8301_v18, %v4387_v6  ;;  %v759_v47 = vadd.f32 %v8308_v35, %v8307_v57  ;;  %v791_v8 = vmul.f32 %v8301_v18, %v4468_v2  ;;  %v8314_v28 = vld [vmem:[#allocation38_spill] sm:$0xff] }
  0xe2   : > { %v748_v5 = vmul.f32 %v8310_v10, %v8309_v12  ;;  %v753_v38 = vmul.f32 %v8310_v10, %v8311_v59  ;;  %v4688_v58 = vadd.f32 %v694_v60, %v682_v62  ;;  %v774_v32 = vadd.f32 %v766_v37, %v754_v21  ;;  %v8319_v37 = vld [vmem:[#allocation36_spill] sm:$0xff] }
  0xe3   : > { %525 = vmax.xlane.f32.xlu0 %v513_v30  ;;  %617 = vmax.xlane.f32.xlu1 %v608_v44  ;;  %8306 = vst [vmem:[#allocation19_spill] sm:$0xff] %v4673_v26  ;;  %v4686_v44 = vadd.f32 %v605_v0, %v4541_v1  ;;  %v750_v39 = vmul.f32 %v8310_v10, %v8312_v9  ;;  %v8317_v0 = vld [vmem:[#allocation85_spill] sm:$0xff] }
  0xe4   : > { %v779_v13 = vadd.f32 %v771_v48, %v759_v47  ;;  %v768_v54 = vmul.f32 %v8290_v25, %v8313_v20  ;;  %v773_v24 = vmul.f32 %v8290_v25, %v4420_v31  ;;  %v836_v30 = vmul.f32 %v8315_v22, %v8314_v28  ;;  %v8323_v47 = vld [vmem:[#allocation70_spill] sm:$0xff] }
  0xe5   : > { %v4699_v1 = vadd.f32 %v786_v40, %v774_v32  ;;  %v788_v62 = vmul.f32 %v8301_v18, %v4497_v46  ;;  %v770_v60 = vmul.f32 %v8290_v25, %v8317_v0  ;;  %v756_v41 = vadd.f32 %v748_v5, %v8319_v37  ;;  %v8322_v40 = vld [vmem:[#allocation26_spill] sm:$0xff]  ;;  %v8325_v37 = vld [vmem:[#allocation49_spill] sm:$0xff] }
  0xe6   : > { %v4705_v11 = vadd.f32 %v791_v8, %v779_v13  ;;  %v761_v21 = vadd.f32 %v753_v38, %v8320_v33  ;;  %v793_v48 = vmul.f32 %v8301_v18, %v4499_v53  ;;  %v856_v35 = vmul.f32 %v8322_v40, %v4242_v29  ;;  %v8326_v33 = vld [vmem:[#allocation27_spill] sm:$0xff] }
  0xe7   : > { %529 = vmax.xlane.f32.xlu0 %v515_v7  ;;  %621 = vmax.xlane.f32.xlu1 %v4592_v50  ;;  %8316 = vst [vmem:[#allocation20_spill] sm:$0xff] %v4699_v1  ;;  %v8321_v7 = vld [vmem:[#allocation56_spill] sm:$0xff]  ;;  %v790_v50 = vmul.f32 %v8301_v18, %v4530_v23  ;;  %v752_v32 = vmul.f32 %v8310_v10, %v8323_v47 }
  0xe8   : > { %8318 = vst [vmem:[#allocation66_spill] sm:$0xff] %v4705_v11  ;;  %v758_v57 = vadd.f32 %v750_v39, %v8321_v7  ;;  %v776_v8 = vadd.f32 %v768_v54, %v756_v41  ;;  %v781_v13 = vadd.f32 %v773_v24, %v761_v21  ;;  %v8324_v11 = vld [vmem:[#allocation47_spill] sm:$0xff]  ;;  %v838_v38 = vmul.f32 %v8315_v22, %v8325_v37  ;;  %v8329_v21 = vld [vmem:[#allocation50_spill] sm:$0xff] }
  0xe9   : > { %v844_v5 = vadd.f32 %v836_v30, %v8324_v11  ;;  %v876_v7 = vmul.f32 %v8326_v33, %v4466_v45  ;;  %v772_v1 = vmul.f32 %v8290_v25, %v4330_v49  ;;  %v792_v10 = vmul.f32 %v8301_v18, %v4558_v14  ;;  %v8327_v24 = vld [vmem:[#allocation39_spill] sm:$0xff]  ;;  %v8328_v11 = vld [vmem:[#allocation68_spill] sm:$0xff] }
  0xea   : > { %v778_v39 = vadd.f32 %v770_v60, %v758_v57  ;;  %v4726_v26 = vadd.f32 %v788_v62, %v776_v8  ;;  %v858_v54 = vmul.f32 %v8322_v40, %v4328_v55  ;;  %v835_v30 = vmul.f32 %v8315_v22, %v8327_v24  ;;  %v8330_v57 = vld [vmem:[#allocation59_spill] sm:$0xff] }
  0xeb   : > { %615 = vmax.xlane.f32.xlu0 %v4584_v34  ;;  %625 = vmax.xlane.f32.xlu1 %v612_v56  ;;  %v4734_v34 = vadd.f32 %v793_v48, %v781_v13  ;;  %v864_v60 = vadd.f32 %v856_v35, %v844_v5  ;;  %v760_v41 = vadd.f32 %v752_v32, %v8328_v11  ;;  %v8332_v13 = vld [vmem:[#allocation37_spill] sm:$0xff] }
  0xec   : > { %v4736_v56 = vadd.f32 %v790_v50, %v778_v39  ;;  %v846_v25 = vadd.f32 %v838_v38, %v8329_v21  ;;  %v878_v62 = vmul.f32 %v8326_v33, %v4428_v3  ;;  %v855_v18 = vmul.f32 %v8322_v40, %v8303_v4 }
  0xed   : > { %v840_v8 = vmul.f32 %v8315_v22, %v8330_v57  ;;  %v4748_v48 = vadd.f32 %v876_v7, %v864_v60  ;;  %v780_v50 = vadd.f32 %v772_v1, %v760_v41  ;;  %v837_v35 = vmul.f32 %v8315_v22, %v8309_v12 }
  0xee   : > { %v866_v32 = vadd.f32 %v858_v54, %v846_v25  ;;  %v843_v5 = vadd.f32 %v835_v30, %v8332_v13  ;;  %v875_v38 = vmul.f32 %v8326_v33, %v4387_v6  ;;  %v860_v39 = vmul.f32 %v8322_v40, %v4373_v61  ;;  %v8335_v30 = vld [vmem:[#allocation57_spill] sm:$0xff] }
  0xef   : > { %619 = vmax.xlane.f32.xlu0 %v4635_v16  ;;  %629 = vmax.xlane.f32.xlu1 %v4637_v15  ;;  %8331 = vst [vmem:[#allocation46_spill] sm:$0xff] %v4748_v48  ;;  %v4757_v11 = vadd.f32 %v792_v10, %v780_v50  ;;  %v880_v16 = vmul.f32 %v8326_v33, %v4468_v2  ;;  %v8336_v10 = vld [vmem:[#allocation40_spill] sm:$0xff] }
  0xf0   : > { %v857_v15 = vmul.f32 %v8322_v40, %v8313_v20  ;;  %v842_v1 = vmul.f32 %v8315_v22, %v8311_v59  ;;  %v4765_v7 = vadd.f32 %v878_v62, %v866_v32  ;;  %v863_v54 = vadd.f32 %v855_v18, %v843_v5  ;;  %v8337_v32 = vld [vmem:[#allocation23_spill] sm:$0xff] }
  0xf1   : > { %8333 = vst [vmem:[#allocation12_spill] sm:$0xff] %v4757_v11  ;;  %v848_v60 = vadd.f32 %v840_v8, %v8335_v30  ;;  %v839_v41 = vmul.f32 %v8315_v22, %v8312_v9  ;;  %v845_v21 = vadd.f32 %v837_v35, %v8336_v10  ;;  %v877_v25 = vmul.f32 %v8326_v33, %v4497_v46  ;;  %v8338_v35 = vld [vmem:[#allocation69_spill] sm:$0xff]  ;;  %v8340_v11 = vld [vmem:[#allocation30_spill] sm:$0xff] }
  0xf2   : > { %8334 = vst [vmem:[#allocation45_spill] sm:$0xff] %v4765_v7  ;;  %v862_v50 = vmul.f32 %v8322_v40, %v4420_v31  ;;  %v882_v18 = vmul.f32 %v8326_v33, %v4499_v53  ;;  %v859_v8 = vmul.f32 %v8322_v40, %v8317_v0  ;;  %v4783_v13 = vadd.f32 %v875_v38, %v863_v54 }
  0xf3   : > { %623 = vmax.xlane.f32.xlu0 %v4652_v63  ;;  %706 = vmax.xlane.f32.xlu1 %v4630_v52  ;;  %v868_v62 = vadd.f32 %v860_v39, %v848_v60  ;;  %v934_v63 = vmul.f32 %v8337_v32, %v8314_v28  ;;  %v865_v52 = vadd.f32 %v857_v15, %v845_v21  ;;  %v8339_v39 = vld [vmem:[#allocation60_spill] sm:$0xff] }
  0xf4   : > { %v850_v5 = vadd.f32 %v842_v1, %v8338_v35  ;;  %v841_v30 = vmul.f32 %v8315_v22, %v8323_v47  ;;  %v847_v60 = vadd.f32 %v839_v41, %v8339_v39  ;;  %v879_v7 = vmul.f32 %v8326_v33, %v4530_v23  ;;  %v8341_v1 = vld [vmem:[#allocation51_spill] sm:$0xff] }
  0xf5   : > { %v4788_v10 = vadd.f32 %v880_v16, %v868_v62  ;;  %v954_v48 = vmul.f32 %v8340_v11, %v4242_v29  ;;  %v4797_v38 = vadd.f32 %v877_v25, %v865_v52  ;;  %v861_v22 = vmul.f32 %v8322_v40, %v4330_v49  ;;  %v8343_v25 = vld [vmem:[#allocation72_spill] sm:$0xff] }
  0xf6   : > { %v870_v15 = vadd.f32 %v862_v50, %v850_v5  ;;  %v867_v16 = vadd.f32 %v859_v8, %v847_v60  ;;  %v942_v54 = vadd.f32 %v934_v63, %v8341_v1  ;;  %v936_v41 = vmul.f32 %v8337_v32, %v8325_v37 }
  0xf7   : > { %627 = vmax.xlane.f32.xlu0 %v4686_v44  ;;  %710 = vmax.xlane.f32.xlu1 %v4599_v42  ;;  %v933_v21 = vmul.f32 %v8337_v32, %v8327_v24  ;;  %v8342_v44 = vld [vmem:[#allocation31_spill] sm:$0xff]  ;;  %v849_v52 = vadd.f32 %v841_v30, %v8343_v25  ;;  %v881_v50 = vmul.f32 %v8326_v33, %v4558_v14 }
  0xf8   : > { %v4806_v62 = vadd.f32 %v882_v18, %v870_v15  ;;  %v974_v42 = vmul.f32 %v8342_v44, %v4466_v45  ;;  %v4813_v40 = vadd.f32 %v879_v7, %v867_v16  ;;  %v962_v8 = vadd.f32 %v954_v48, %v942_v54  ;;  %v8344_v7 = vld [vmem:[#allocation52_spill] sm:$0xff]  ;;  %v8345_v48 = vld [vmem:[#allocation41_spill] sm:$0xff] }
  0xf9   : > { %v956_v63 = vmul.f32 %v8340_v11, %v4328_v55  ;;  %v953_v35 = vmul.f32 %v8340_v11, %v8303_v4  ;;  %v869_v18 = vadd.f32 %v861_v22, %v849_v52  ;;  %v976_v5 = vmul.f32 %v8342_v44, %v4428_v3 }
  0xfa   : > { %v938_v33 = vmul.f32 %v8337_v32, %v8330_v57  ;;  %v944_v30 = vadd.f32 %v936_v41, %v8344_v7  ;;  %v941_v39 = vadd.f32 %v933_v21, %v8345_v48  ;;  %v973_v60 = vmul.f32 %v8342_v44, %v4387_v6  ;;  %v8350_v48 = vld [vmem:[#allocation28_spill] sm:$0xff] }
  0xfb   : > { %704 = vmax.xlane.f32.xlu0 %v4588_v51  ;;  %714 = vmax.xlane.f32.xlu1 %v4632_v19  ;;  %v935_v15 = vmul.f32 %v8337_v32, %v8309_v12  ;;  %v4831_v51 = vadd.f32 %v974_v42, %v962_v8  ;;  %v4833_v19 = vadd.f32 %v881_v50, %v869_v18  ;;  %v8346_v42 = vld [vmem:[#allocation61_spill] sm:$0xff] }
  0xfc   : > { %v958_v22 = vmul.f32 %v8340_v11, %v4373_v61  ;;  %v940_v16 = vmul.f32 %v8337_v32, %v8311_v59  ;;  %v964_v1 = vadd.f32 %v956_v63, %v944_v30  ;;  %v961_v54 = vadd.f32 %v953_v35, %v941_v39  ;;  %v8348_v35 = vld [vmem:[#allocation42_spill] sm:$0xff] }
  0xfd   : > { %v978_v41 = vmul.f32 %v8342_v44, %v4468_v2  ;;  %v955_v21 = vmul.f32 %v8340_v11, %v8313_v20  ;;  %v946_v25 = vadd.f32 %v938_v33, %v8346_v42  ;;  %v960_v52 = vmul.f32 %v8340_v11, %v4420_v31 }
  0xfe   : > { %v937_v50 = vmul.f32 %v8337_v32, %v8312_v9  ;;  %v4850_v8 = vadd.f32 %v976_v5, %v964_v1  ;;  %v4852_v63 = vadd.f32 %v973_v60, %v961_v54  ;;  %v943_v18 = vadd.f32 %v935_v15, %v8348_v35  ;;  %v8351_v54 = vld [vmem:[#allocation62_spill] sm:$0xff]  ;;  %v8352_v35 = vld [vmem:[#allocation32_spill] sm:$0xff] }
  0xff   : > { %708 = vmax.xlane.f32.xlu0 %v4646_v36  ;;  %718 = vmax.xlane.f32.xlu1 %v4654_v43  ;;  %v975_v7 = vmul.f32 %v8342_v44, %v4497_v46  ;;  %v8349_v36 = vld [vmem:[#allocation73_spill] sm:$0xff]  ;;  %v980_v43 = vmul.f32 %v8342_v44, %v4499_v53  ;;  %v957_v33 = vmul.f32 %v8340_v11, %v8317_v0 }
 0x100   : > { %8347 = vst [vmem:[#allocation17_spill] sm:$0xff] %v4852_v63  ;;  %v948_v30 = vadd.f32 %v940_v16, %v8349_v36  ;;  %v1023_v39 = vmul.f32 %v8350_v48, %v8314_v28  ;;  %v966_v5 = vadd.f32 %v958_v22, %v946_v25  ;;  %v963_v1 = vadd.f32 %v955_v21, %v943_v18  ;;  %v8354_v22 = vld [vmem:[#allocation43_spill] sm:$0xff] }
 0x101   : > { %v977_v60 = vmul.f32 %v8342_v44, %v4530_v23  ;;  %v939_v15 = vmul.f32 %v8337_v32, %v8323_v47  ;;  %v945_v42 = vadd.f32 %v937_v50, %v8351_v54  ;;  %v1043_v36 = vmul.f32 %v8352_v35, %v4242_v29  ;;  %v8357_v50 = vld [vmem:[#allocation53_spill] sm:$0xff] }
 0x102   : > { %v968_v16 = vadd.f32 %v960_v52, %v948_v30  ;;  %v4873_v63 = vadd.f32 %v978_v41, %v966_v5  ;;  %v1063_v21 = vmul.f32 %v8354_v22, %v4466_v45  ;;  %v959_v25 = vmul.f32 %v8340_v11, %v4330_v49  ;;  %v8358_v30 = vld [vmem:[#allocation74_spill] sm:$0xff] }
 0x103   : > { %712 = vmax.xlane.f32.xlu0 %v4663_v17  ;;  %804 = vmax.xlane.f32.xlu1 %v4666_v27  ;;  %v1025_v32 = vmul.f32 %v8350_v48, %v8325_v37  ;;  %v4881_v17 = vadd.f32 %v975_v7, %v963_v1  ;;  %v965_v52 = vadd.f32 %v957_v33, %v945_v42  ;;  %v8359_v7 = vld [vmem:[#allocation19_spill] sm:$0xff] }
 0x104   : > { %8353 = vst [vmem:[#allocation21_spill] sm:$0xff] %v4873_v63  ;;  %v4883_v27 = vadd.f32 %v980_v43, %v968_v16  ;;  %v1031_v18 = vadd.f32 %v1023_v39, %v8357_v50  ;;  %v947_v54 = vadd.f32 %v939_v15, %v8358_v30  ;;  %v979_v41 = vmul.f32 %v8342_v44, %v4558_v14  ;;  %v8361_v15 = vld [vmem:[#allocation54_spill] sm:$0xff] }
 0x105   : > { %8355 = vst [vmem:[#allocation90_spill] sm:$0xff] %v4881_v17  ;;  %v1045_v5 = vmul.f32 %v8352_v35, %v4328_v55  ;;  %v1022_v11 = vmul.f32 %v8350_v48, %v8327_v24  ;;  %v4895_v43 = vadd.f32 %v977_v60, %v965_v52  ;;  %v1027_v39 = vmul.f32 %v8350_v48, %v8330_v57  ;;  %v8364_v52 = vld [vmem:[#allocation44_spill] sm:$0xff] }
 0x106   : > { %8356 = vst [vmem:[#allocation35_spill] sm:$0xff] %v4883_v27  ;;  %v1051_v33 = vadd.f32 %v1043_v36, %v1031_v18  ;;  %v967_v1 = vadd.f32 %v959_v25, %v947_v54  ;;  %v1033_v16 = vadd.f32 %v1025_v32, %v8361_v15  ;;  %v1065_v44 = vmul.f32 %v8354_v22, %v4428_v3  ;;  %v8365_v54 = vld [vmem:[#allocation20_spill] sm:$0xff] }
 0x107   : > { %716 = vmax.xlane.f32.xlu0 %v4688_v58  ;;  %808 = vmax.xlane.f32.xlu1 %v8359_v7  ;;  %8360 = vst [vmem:[#allocation65_spill] sm:$0xff] %v4895_v43  ;;  %v1042_v42 = vmul.f32 %v8352_v35, %v8303_v4  ;;  %v1062_v58 = vmul.f32 %v8354_v22, %v4387_v6  ;;  %v8367_v7 = vld [vmem:[#allocation63_spill] sm:$0xff] }
 0x108   : > { %v4904_v50 = vadd.f32 %v1063_v21, %v1051_v33  ;;  %v1047_v60 = vmul.f32 %v8352_v35, %v4373_v61  ;;  %v1024_v36 = vmul.f32 %v8350_v48, %v8309_v12  ;;  %v4912_v25 = vadd.f32 %v979_v41, %v967_v1  ;;  %v8366_v21 = vld [vmem:[#allocation66_spill] sm:$0xff] }
 0x109   : > { %v1053_v32 = vadd.f32 %v1045_v5, %v1033_v16  ;;  %v1030_v18 = vadd.f32 %v1022_v11, %v8364_v52  ;;  %v1029_v30 = vmul.f32 %v8350_v48, %v8311_v59  ;;  %v1035_v33 = vadd.f32 %v1027_v39, %v8367_v7  ;;  %v8369_v39 = vld [vmem:[#allocation64_spill] sm:$0xff] }
 0x10a   : > { %8362 = vst [vmem:[#allocation55_spill] sm:$0xff] %v4904_v50  ;;  %8363 = vst [vmem:[#allocation13_spill] sm:$0xff] %v4912_v25  ;;  %v1067_v15 = vmul.f32 %v8354_v22, %v4468_v2  ;;  %v1044_v50 = vmul.f32 %v8352_v35, %v8313_v20  ;;  %v1064_v5 = vmul.f32 %v8354_v22, %v4497_v46 }
 0x10b   : > { %802 = vmax.xlane.f32.xlu0 %v8365_v54  ;;  %812 = vmax.xlane.f32.xlu1 %v8366_v21  ;;  %v1050_v41 = vadd.f32 %v1042_v42, %v1030_v18  ;;  %v1049_v11 = vmul.f32 %v8352_v35, %v4420_v31  ;;  %v1026_v1 = vmul.f32 %v8350_v48, %v8312_v9  ;;  %v8370_v21 = vld [vmem:[#allocation33_spill] sm:$0xff]  ;;  %v8372_v42 = vld [vmem:[#allocation75_spill] sm:$0xff] }
 0x10c   : > { %v4930_v16 = vadd.f32 %v1065_v44, %v1053_v32  ;;  %v1055_v52 = vadd.f32 %v1047_v60, %v1035_v33  ;;  %v1032_v54 = vadd.f32 %v1024_v36, %v8369_v39  ;;  %v1121_v7 = vmul.f32 %v8370_v21, %v8314_v28  ;;  %v8374_v36 = vld [vmem:[#allocation78_spill] sm:$0xff]  ;;  %v8375_v33 = vld [vmem:[#allocation76_spill] sm:$0xff] }
 0x10d   : > { %v4935_v25 = vadd.f32 %v1062_v58, %v1050_v41  ;;  %v1037_v18 = vadd.f32 %v1029_v30, %v8372_v42  ;;  %v1069_v43 = vmul.f32 %v8354_v22, %v4499_v53  ;;  %v1046_v27 = vmul.f32 %v8352_v35, %v8317_v0 }
 0x10e   : > { %8368 = vst [vmem:[#allocation48_spill] sm:$0xff] %v4930_v16  ;;  %v4944_v44 = vadd.f32 %v1067_v15, %v1055_v52  ;;  %v1052_v60 = vadd.f32 %v1044_v50, %v1032_v54  ;;  %v1141_v32 = vmul.f32 %v8374_v36, %v4242_v29  ;;  %v1034_v41 = vadd.f32 %v1026_v1, %v8375_v33 }
 0x10f   : > { %8371 = vst [vmem:[#allocation14_spill] sm:$0xff] %v4935_v25  ;;  %806 = vmax.xlane.f32.xlu0 %v4726_v26  ;;  %816 = vmax.xlane.f32.xlu1 %v4734_v34  ;;  %v1057_v58 = vadd.f32 %v1049_v11, %v1037_v18  ;;  %v1066_v30 = vmul.f32 %v8354_v22, %v4530_v23  ;;  %v8377_v26 = vld [vmem:[#allocation77_spill] sm:$0xff]  ;;  %v8378_v34 = vld [vmem:[#allocation79_spill] sm:$0xff] }
 0x110   : > { %8373 = vst [vmem:[#allocation22_spill] sm:$0xff] %v4944_v44  ;;  %v1028_v39 = vmul.f32 %v8350_v48, %v8323_v47  ;;  %v4953_v42 = vadd.f32 %v1064_v5, %v1052_v60  ;;  %v1129_v25 = vadd.f32 %v1121_v7, %v8377_v26  ;;  %v1161_v15 = vmul.f32 %v8378_v34, %v4466_v45  ;;  %v8380_v48 = vld [vmem:[#allocation46_spill] sm:$0xff]  ;;  %v8382_v18 = vld [vmem:[#allocation29_spill] sm:$0xff] }
 0x111   : > { %v1123_v50 = vmul.f32 %v8370_v21, %v8325_v37  ;;  %v4960_v52 = vadd.f32 %v1069_v43, %v1057_v58  ;;  %v1054_v11 = vadd.f32 %v1046_v27, %v1034_v41  ;;  %v1048_v1 = vmul.f32 %v8352_v35, %v4330_v49  ;;  %v8381_v7 = vld [vmem:[#allocation6_spill] sm:$0xff]  ;;  %v8383_v43 = vld [vmem:[#allocation80_spill] sm:$0xff]  ;;  %v8384_v35 = vld [vmem:[#allocation3_spill] sm:$0xff] }
 0x112   : > { %8376 = vst [vmem:[#allocation36_spill] sm:$0xff] %v4953_v42  ;;  %v1120_v54 = vmul.f32 %v8370_v21, %v8327_v24  ;;  %v1149_v5 = vadd.f32 %v1141_v32, %v1129_v25  ;;  %v1111_v60 = vmul.f32 %v8382_v18, %v8381_v7  ;;  %v1143_v33 = vmul.f32 %v8374_v36, %v4328_v55  ;;  %v8388_v44 = vld [vmem:[#allocation45_spill] sm:$0xff] }
 0x113   : > { %8379 = vst [vmem:[#allocation67_spill] sm:$0xff] %v4960_v52  ;;  %810 = vmax.xlane.f32.xlu0 %v4736_v56  ;;  %893 = vmax.xlane.f32.xlu1 %v8380_v48  ;;  %v1036_v58 = vadd.f32 %v1028_v39, %v8383_v43  ;;  %v1068_v27 = vmul.f32 %v8354_v22, %v4558_v14  ;;  %v8387_v43 = vld [vmem:[#allocation12_spill] sm:$0xff] }
 0x114   : > { %v1108_v41 = vmul.f32 %v8382_v18, %v8384_v35  ;;  %v1140_v56 = vmul.f32 %v8374_v36, %v8303_v4  ;;  %v4979_v26 = vadd.f32 %v1066_v30, %v1054_v11  ;;  %v4981_v25 = vadd.f32 %v1161_v15, %v1149_v5 }
 0x115   : > { %v1131_v32 = vadd.f32 %v1123_v50, %v1111_v60  ;;  %v1163_v48 = vmul.f32 %v8378_v34, %v4428_v3  ;;  %v1056_v52 = vadd.f32 %v1048_v1, %v1036_v58  ;;  %v1125_v39 = vmul.f32 %v8370_v21, %v8330_v57  ;;  %v8389_v50 = vld [vmem:[#allocation10_spill] sm:$0xff] }
 0x116   : > { %8385 = vst [vmem:[#allocation56_spill] sm:$0xff] %v4979_v26  ;;  %8386 = vst [vmem:[#allocation26_spill] sm:$0xff] %v4981_v25  ;;  %v1128_v42 = vadd.f32 %v1120_v54, %v1108_v41  ;;  %v1122_v22 = vmul.f32 %v8370_v21, %v8309_v12  ;;  %v1160_v15 = vmul.f32 %v8378_v34, %v4387_v6  ;;  %v8391_v60 = vld [vmem:[#allocation2_spill] sm:$0xff]  ;;  %v8396_v26 = vld [vmem:[#allocation8_spill] sm:$0xff] }
 0x117   : > { %814 = vmax.xlane.f32.xlu0 %v8387_v43  ;;  %897 = vmax.xlane.f32.xlu1 %v8388_v44  ;;  %v1151_v30 = vadd.f32 %v1143_v33, %v1131_v32  ;;  %v1113_v11 = vmul.f32 %v8382_v18, %v8389_v50  ;;  %v4995_v1 = vadd.f32 %v1068_v27, %v1056_v52  ;;  %v8393_v43 = vld [vmem:[#allocation5_spill] sm:$0xff] }
 0x118   : > { %v1148_v54 = vadd.f32 %v1140_v56, %v1128_v42  ;;  %v1145_v5 = vmul.f32 %v8374_v36, %v4373_v61  ;;  %v1110_v58 = vmul.f32 %v8382_v18, %v8391_v60  ;;  %v1165_v44 = vmul.f32 %v8378_v34, %v4468_v2  ;;  %v3690_v56 = vld [vmem:[%s3788_s9 + $0x24] sm:$0xf] }
 0x119   : > { %8390 = vst [vmem:[#allocation47_spill] sm:$0xff] %v4995_v1  ;;  %v5001_v41 = vadd.f32 %v1163_v48, %v1151_v30  ;;  %v1142_v33 = vmul.f32 %v8374_v36, %v8313_v20  ;;  %v1127_v32 = vmul.f32 %v8370_v21, %v8311_v59  ;;  %v1133_v52 = vadd.f32 %v1125_v39, %v1113_v11  ;;  %v8394_v30 = vld [vmem:[#allocation24_spill] sm:$0xff]  ;;  %v8395_v11 = vld [vmem:[#allocation11_spill] sm:$0xff] }
 0x11a   : > { %v1130_v27 = vadd.f32 %v1122_v22, %v1110_v58  ;;  %v1124_v42 = vmul.f32 %v8370_v21, %v8312_v9  ;;  %v5013_v1 = vrot.slane %v3690_v56, %v8393_v43  ;;  %v1162_v48 = vmul.f32 %v8378_v34, %v4497_v46 }
 0x11b   : > { %8392 = vst [vmem:[#allocation27_spill] sm:$0xff] %v5001_v41  ;;  %891 = vmax.xlane.f32.xlu0 %v4783_v13  ;;  %901 = vmax.xlane.f32.xlu1 %v4788_v10  ;;  %v1115_v41 = vmul.f32 %v8382_v18, %v8394_v30  ;;  %v1147_v39 = vmul.f32 %v8374_v36, %v4420_v31 }
 0x11c   : > { %v1153_v22 = vadd.f32 %v1145_v5, %v1133_v52  ;;  %v1112_v58 = vmul.f32 %v8382_v18, %v8395_v11  ;;  %v1144_v25 = vmul.f32 %v8374_v36, %v8317_v0  ;;  %v5028_v13 = vrot.slane %v3690_v56, %v8396_v26 }
 0x11d   : > { %v5030_v10 = vadd.f32 %v1160_v15, %v1148_v54  ;;  %v1150_v16 = vadd.f32 %v1142_v33, %v1130_v27  ;;  %v1135_v17 = vadd.f32 %v1127_v32, %v1115_v41  ;;  %v1167_v30 = vmul.f32 %v8378_v34, %v4499_v53  ;;  %v8401_v32 = vld [vmem:[#allocation34_spill] sm:$0xff] }
 0x11e   : > { %v5034_v63 = vadd.f32 %v1165_v44, %v1153_v22  ;;  %v1132_v31 = vadd.f32 %v1124_v42, %v1112_v58  ;;  %v1164_v5 = vmul.f32 %v8378_v34, %v4530_v23  ;;  %v1210_v52 = vmul.f32 %v5013_v1, %v8314_v28  ;;  %v8400_v44 = vld [vmem:[#allocation7_spill] sm:$0xff]  ;;  %v8402_v22 = vld [vmem:[#allocation9_spill] sm:$0xff] }
 0x11f   : > { %8397 = vst [vmem:[#allocation68_spill] sm:$0xff] %v5030_v10  ;;  %895 = vmax.xlane.f32.xlu0 %v4797_v38  ;;  %905 = vmax.xlane.f32.xlu1 %v4806_v62  ;;  %v5042_v15 = vadd.f32 %v1162_v48, %v1150_v16  ;;  %v1155_v54 = vadd.f32 %v1147_v39, %v1135_v17  ;;  %v8404_v38 = vld [vmem:[#allocation25_spill] sm:$0xff]  ;;  %v8417_v10 = vld [vmem:[#allocation35_spill] sm:$0xff] }
 0x120   : > { %8398 = vst [vmem:[#allocation50_spill] sm:$0xff] %v5034_v63  ;;  %v1126_v41 = vmul.f32 %v8370_v21, %v8323_v47  ;;  %v1152_v33 = vadd.f32 %v1144_v25, %v1132_v31  ;;  %v1198_v27 = vmul.f32 %v8401_v32, %v8400_v44  ;;  %v1230_v42 = vmul.f32 %v5028_v13, %v4242_v29 }
 0x121   : > { %8399 = vst [vmem:[#allocation37_spill] sm:$0xff] %v5042_v15  ;;  %v5051_v58 = vrot.slane %v3690_v56, %v8402_v22  ;;  %v5053_v63 = vadd.f32 %v1167_v30, %v1155_v54  ;;  %v1114_v62 = vmul.f32 %v8382_v18, %v8404_v38  ;;  %v1146_v17 = vmul.f32 %v8374_v36, %v4330_v49  ;;  %v8416_v15 = vld [vmem:[#allocation90_spill] sm:$0xff] }
 0x122   : > { %v1212_v31 = vmul.f32 %v5013_v1, %v8325_v37  ;;  %v5061_v16 = vadd.f32 %v1164_v5, %v1152_v33  ;;  %v1218_v21 = vadd.f32 %v1210_v52, %v1198_v27  ;;  %v1209_v56 = vmul.f32 %v5013_v1, %v8327_v24 }
 0x123   : > { %8403 = vst [vmem:[#allocation57_spill] sm:$0xff] %v5053_v63  ;;  %v1250_v25 = vmul.f32 %v5051_v58, %v4466_v45  ;;  %899 = vmax.xlane.f32.xlu0 %v4813_v40  ;;  %991 = vmax.xlane.f32.xlu1 %v4831_v51  ;;  %v1134_v18 = vadd.f32 %v1126_v41, %v1114_v62 }
 0x124   : > { %8405 = vst [vmem:[#allocation40_spill] sm:$0xff] %v5061_v16  ;;  %v1200_v36 = vmul.f32 %v8401_v32, %v8381_v7  ;;  %v1232_v48 = vmul.f32 %v5028_v13, %v4328_v55  ;;  %v1238_v30 = vadd.f32 %v1230_v42, %v1218_v21  ;;  %v1166_v39 = vmul.f32 %v8378_v34, %v4558_v14 }
 0x125   : > { %v1197_v5 = vmul.f32 %v8401_v32, %v8384_v35  ;;  %v1229_v52 = vmul.f32 %v5028_v13, %v8303_v4  ;;  %v1154_v40 = vadd.f32 %v1146_v17, %v1134_v18  ;;  %v1252_v51 = vmul.f32 %v5051_v58, %v4428_v3 }
 0x126   : > { %v1220_v54 = vadd.f32 %v1212_v31, %v1200_v36  ;;  %v1214_v41 = vmul.f32 %v5013_v1, %v8330_v57  ;;  %v5083_v33 = vadd.f32 %v1250_v25, %v1238_v30  ;;  %v1249_v34 = vmul.f32 %v5051_v58, %v4387_v6  ;;  %v3625_v30 = vld [vmem:[%s3788_s9 + $0x28] sm:$0xf] }
 0x127   : > { %v1217_v27 = vadd.f32 %v1209_v56, %v1197_v5  ;;  %v1211_v42 = vmul.f32 %v5013_v1, %v8309_v12  ;;  %903 = vmax.xlane.f32.xlu0 %v4833_v19  ;;  %995 = vmax.xlane.f32.xlu1 %v4850_v8  ;;  %v1202_v17 = vmul.f32 %v8401_v32, %v8389_v50 }
 0x128   : > { %8406 = vst [vmem:[#allocation23_spill] sm:$0xff] %v5083_v33  ;;  %v1240_v62 = vadd.f32 %v1232_v48, %v1220_v54  ;;  %v1234_v31 = vmul.f32 %v5028_v13, %v4373_v61  ;;  %v5095_v21 = vadd.f32 %v1166_v39, %v1154_v40  ;;  %v1254_v56 = vmul.f32 %v5051_v58, %v4468_v2  ;;  %v8409_v54 = vld [vmem:[#allocation17_spill] sm:$0xff] }
 0x129   : > { %v1237_v25 = vadd.f32 %v1229_v52, %v1217_v27  ;;  %v1199_v18 = vmul.f32 %v8401_v32, %v8391_v60  ;;  %v1222_v19 = vadd.f32 %v1214_v41, %v1202_v17  ;;  %v1231_v8 = vmul.f32 %v5028_v13, %v8313_v20  ;;  %v8411_v27 = vld [vmem:[#allocation24_spill] sm:$0xff]  ;;  %v8412_v17 = vld [vmem:[#allocation81_spill] sm:$0xff] }
 0x12a   : > { %8407 = vst [vmem:[#allocation69_spill] sm:$0xff] %v5095_v21  ;;  %v5101_v36 = vadd.f32 %v1252_v51, %v1240_v62  ;;  %v1216_v48 = vmul.f32 %v5013_v1, %v8311_v59  ;;  %v1251_v39 = vmul.f32 %v5051_v58, %v4497_v46  ;;  %v1213_v52 = vmul.f32 %v5013_v1, %v8312_v9  ;;  %v8410_v51 = vld [vmem:[#allocation21_spill] sm:$0xff] }
 0x12b   : > { %v1219_v5 = vadd.f32 %v1211_v42, %v1199_v18  ;;  %v5113_v40 = vrot.slane %v3625_v30, %v8393_v43  ;;  %989 = vmax.xlane.f32.xlu0 %v8409_v54  ;;  %999 = vmax.xlane.f32.xlu1 %v8410_v51  ;;  %v1242_v41 = vadd.f32 %v1234_v31, %v1222_v19 }
 0x12c   : > { %8408 = vst [vmem:[#allocation60_spill] sm:$0xff] %v5101_v36  ;;  %v1204_v62 = vmul.f32 %v8401_v32, %v8411_v27  ;;  %v1236_v42 = vmul.f32 %v5028_v13, %v8412_v17  ;;  %v5121_v18 = vadd.f32 %v1249_v34, %v1237_v25  ;;  %v1201_v36 = vmul.f32 %v8401_v32, %v8395_v11  ;;  %v8415_v25 = vld [vmem:[#allocation4_spill] sm:$0xff] }
 0x12d   : > { %v1233_v21 = vmul.f32 %v5028_v13, %v8317_v0  ;;  %v5128_v33 = vrot.slane %v3625_v30, %v8396_v26  ;;  %v5130_v54 = vadd.f32 %v1254_v56, %v1242_v41  ;;  %v1239_v31 = vadd.f32 %v1231_v8, %v1219_v5 }
 0x12e   : > { %8413 = vst [vmem:[#allocation30_spill] sm:$0xff] %v5121_v18  ;;  %v1224_v19 = vadd.f32 %v1216_v48, %v1204_v62  ;;  %v1256_v51 = vmul.f32 %v5051_v58, %v4499_v53  ;;  %v1221_v16 = vadd.f32 %v1213_v52, %v1201_v36  ;;  %v1253_v34 = vmul.f32 %v5051_v58, %v4530_v23 }
 0x12f   : > { %8414 = vst [vmem:[#allocation51_spill] sm:$0xff] %v5130_v54  ;;  %v5137_v18 = vrot.slane %v3625_v30, %v8415_v25  ;;  %v1308_v63 = vmul.f32 %v5113_v40, %v8314_v28  ;;  %993 = vmax.xlane.f32.xlu0 %v8416_v15  ;;  %1003 = vmax.xlane.f32.xlu1 %v8417_v10  ;;  %v8433_v54 = vld [vmem:[#allocation67_spill] sm:$0xff] }
 0x130   : > { %v5143_v56 = vadd.f32 %v1251_v39, %v1239_v31  ;;  %v1244_v8 = vadd.f32 %v1236_v42, %v1224_v19  ;;  %v1215_v48 = vmul.f32 %v5013_v1, %v8323_v47  ;;  %v1241_v36 = vadd.f32 %v1233_v21, %v1221_v16  ;;  %v8421_v42 = vld [vmem:[#allocation65_spill] sm:$0xff]  ;;  %v8422_v31 = vld [vmem:[#allocation55_spill] sm:$0xff] }
 0x131   : > { %v1296_v5 = vmul.f32 %v5137_v18, %v8400_v44  ;;  %v1328_v52 = vmul.f32 %v5128_v33, %v4242_v29  ;;  %v5152_v41 = vrot.slane %v3625_v30, %v8402_v22  ;;  %v1203_v10 = vmul.f32 %v8401_v32, %v8404_v38 }
 0x132   : > { %8418 = vst [vmem:[#allocation31_spill] sm:$0xff] %v5143_v56  ;;  %v5154_v62 = vadd.f32 %v1256_v51, %v1244_v8  ;;  %v1235_v15 = vmul.f32 %v5028_v13, %v4330_v49  ;;  %v1310_v1 = vmul.f32 %v5113_v40, %v8325_v37  ;;  %v5162_v16 = vadd.f32 %v1253_v34, %v1241_v36  ;;  %v8432_v56 = vld [vmem:[#allocation36_spill] sm:$0xff] }
 0x133   : > { %v1316_v21 = vadd.f32 %v1308_v63, %v1296_v5  ;;  %v1348_v39 = vmul.f32 %v5152_v41, %v4466_v45  ;;  %v1307_v30 = vmul.f32 %v5113_v40, %v8327_v24  ;;  %997 = vmax.xlane.f32.xlu0 %v8421_v42  ;;  %1080 = vmax.xlane.f32.xlu1 %v8422_v31  ;;  %v8424_v31 = vld [vmem:[#allocation13_spill] sm:$0xff] }
 0x134   : > { %8419 = vst [vmem:[#allocation72_spill] sm:$0xff] %v5154_v62  ;;  %8420 = vst [vmem:[#allocation52_spill] sm:$0xff] %v5162_v16  ;;  %v1223_v32 = vadd.f32 %v1215_v48, %v1203_v10  ;;  %v1298_v13 = vmul.f32 %v5137_v18, %v8381_v7  ;;  %v1330_v19 = vmul.f32 %v5128_v33, %v4328_v55 }
 0x135   : > { %v1336_v51 = vadd.f32 %v1328_v52, %v1316_v21  ;;  %v1255_v63 = vmul.f32 %v5051_v58, %v4558_v14  ;;  %v1295_v34 = vmul.f32 %v5137_v18, %v8384_v35  ;;  %v1327_v8 = vmul.f32 %v5128_v33, %v8303_v4 }
 0x136   : > { %v1243_v36 = vadd.f32 %v1235_v15, %v1223_v32  ;;  %v1318_v5 = vadd.f32 %v1310_v1, %v1298_v13  ;;  %v1350_v48 = vmul.f32 %v5152_v41, %v4428_v3  ;;  %v1312_v10 = vmul.f32 %v5113_v40, %v8330_v57  ;;  %v8425_v15 = vld [vmem:[#allocation48_spill] sm:$0xff] }
 0x137   : > { %v5184_v42 = vadd.f32 %v1348_v39, %v1336_v51  ;;  %v1315_v52 = vadd.f32 %v1307_v30, %v1295_v34  ;;  %v1347_v58 = vmul.f32 %v5152_v41, %v4387_v6  ;;  %v1309_v21 = vmul.f32 %v5113_v40, %v8309_v12  ;;  %1001 = vmax.xlane.f32.xlu0 %v8424_v31 }
 0x138   : > { %1084 = vmax.xlane.f32.xlu1 %v8425_v15  ;;  %v1338_v1 = vadd.f32 %v1330_v19, %v1318_v5  ;;  %v1300_v32 = vmul.f32 %v5137_v18, %v8389_v50  ;;  %v1332_v39 = vmul.f32 %v5128_v33, %v4373_v61  ;;  %v5196_v13 = vadd.f32 %v1255_v63, %v1243_v36  ;;  %v3626_v15 = vld [vmem:[%s3788_s9 + $0x2c] sm:$0xf] }
 0x139   : > { %8423 = vst [vmem:[#allocation41_spill] sm:$0xff] %v5184_v42  ;;  %v1335_v30 = vadd.f32 %v1327_v8, %v1315_v52  ;;  %v1352_v51 = vmul.f32 %v5152_v41, %v4468_v2  ;;  %v1297_v34 = vmul.f32 %v5137_v18, %v8391_v60  ;;  %v1329_v19 = vmul.f32 %v5128_v33, %v8313_v20 }
 0x13a   : > { %8426 = vst [vmem:[#allocation61_spill] sm:$0xff] %v5196_v13  ;;  %v5202_v42 = vadd.f32 %v1350_v48, %v1338_v1  ;;  %v1320_v31 = vadd.f32 %v1312_v10, %v1300_v32  ;;  %v1314_v5 = vmul.f32 %v5113_v40, %v8311_v59  ;;  %v1349_v63 = vmul.f32 %v5152_v41, %v4497_v46  ;;  %v8428_v48 = vld [vmem:[#allocation14_spill] sm:$0xff] }
 0x13b   : > { %v1317_v16 = vadd.f32 %v1309_v21, %v1297_v34  ;;  %v1311_v8 = vmul.f32 %v5113_v40, %v8312_v9  ;;  %v5214_v36 = vrot.slane %v3626_v15, %v8393_v43  ;;  %1078 = vmax.xlane.f32.xlu0 %v8428_v48  ;;  %v8429_v10 = vld [vmem:[#allocation22_spill] sm:$0xff]  ;;  %v1302_v1 = vmul.f32 %v5137_v18, %v8411_v27 }
 0x13c   : > { %8427 = vst [vmem:[#allocation42_spill] sm:$0xff] %v5202_v42  ;;  %1088 = vmax.xlane.f32.xlu1 %v8429_v10  ;;  %v1340_v52 = vadd.f32 %v1332_v39, %v1320_v31  ;;  %v1334_v21 = vmul.f32 %v5128_v33, %v8412_v17  ;;  %v5222_v32 = vadd.f32 %v1347_v58, %v1335_v30 }
 0x13d   : > { %v1299_v34 = vmul.f32 %v5137_v18, %v8395_v11  ;;  %v1331_v42 = vmul.f32 %v5128_v33, %v8317_v0  ;;  %v5229_v13 = vrot.slane %v3626_v15, %v8396_v26  ;;  %v1337_v39 = vadd.f32 %v1329_v19, %v1317_v16 }
 0x13e   : > { %8430 = vst [vmem:[#allocation73_spill] sm:$0xff] %v5222_v32  ;;  %v5231_v48 = vadd.f32 %v1352_v51, %v1340_v52  ;;  %v1322_v31 = vadd.f32 %v1314_v5, %v1302_v1  ;;  %v1354_v10 = vmul.f32 %v5152_v41, %v4499_v53  ;;  %v1351_v58 = vmul.f32 %v5152_v41, %v4530_v23 }
 0x13f   : > { %v1319_v62 = vadd.f32 %v1311_v8, %v1299_v34  ;;  %v5238_v30 = vrot.slane %v3626_v15, %v8415_v25  ;;  %v1397_v32 = vmul.f32 %v5214_v36, %v8314_v28  ;;  %1082 = vmax.xlane.f32.xlu0 %v8432_v56  ;;  %v5244_v51 = vadd.f32 %v1349_v63, %v1337_v39  ;;  %v8438_v39 = vld [vmem:[#allocation26_spill] sm:$0xff] }
 0x140   : > { %8431 = vst [vmem:[#allocation28_spill] sm:$0xff] %v5231_v48  ;;  %1092 = vmax.xlane.f32.xlu1 %v8433_v54  ;;  %v1342_v16 = vadd.f32 %v1334_v21, %v1322_v31  ;;  %v1313_v19 = vmul.f32 %v5113_v40, %v8323_v47  ;;  %v1417_v52 = vmul.f32 %v5229_v13, %v4242_v29  ;;  %v8437_v21 = vld [vmem:[#allocation56_spill] sm:$0xff]  ;;  %v8449_v48 = vld [vmem:[#allocation57_spill] sm:$0xff] }
 0x141   : > { %8434 = vst [vmem:[#allocation62_spill] sm:$0xff] %v5244_v51  ;;  %v1339_v5 = vadd.f32 %v1331_v42, %v1319_v62  ;;  %v1385_v8 = vmul.f32 %v5238_v30, %v8400_v44  ;;  %v5253_v1 = vrot.slane %v3626_v15, %v8402_v22  ;;  %v1301_v54 = vmul.f32 %v5137_v18, %v8404_v38  ;;  %v8448_v51 = vld [vmem:[#allocation37_spill] sm:$0xff] }
 0x142   : > { %v5255_v34 = vadd.f32 %v1354_v10, %v1342_v16  ;;  %v1333_v56 = vmul.f32 %v5128_v33, %v4330_v49  ;;  %v1399_v40 = vmul.f32 %v5214_v36, %v8325_v37  ;;  %v1396_v15 = vmul.f32 %v5214_v36, %v8327_v24 }
 0x143   : > { %v5263_v62 = vadd.f32 %v1351_v58, %v1339_v5  ;;  %v1405_v42 = vadd.f32 %v1397_v32, %v1385_v8  ;;  %v1437_v63 = vmul.f32 %v5253_v1, %v4466_v45  ;;  %1086 = vmax.xlane.f32.xlu0 %v8437_v21  ;;  %v1321_v18 = vadd.f32 %v1313_v19, %v1301_v54 }
 0x144   : > { %8435 = vst [vmem:[#allocation32_spill] sm:$0xff] %v5255_v34  ;;  %1178 = vmax.xlane.f32.xlu1 %v8438_v39  ;;  %v1387_v33 = vmul.f32 %v5238_v30, %v8381_v7  ;;  %v1419_v31 = vmul.f32 %v5229_v13, %v4328_v55  ;;  %v1353_v32 = vmul.f32 %v5152_v41, %v4558_v14  ;;  %v8440_v39 = vld [vmem:[#allocation47_spill] sm:$0xff] }
 0x145   : > { %8436 = vst [vmem:[#allocation43_spill] sm:$0xff] %v5263_v62  ;;  %v1425_v10 = vadd.f32 %v1417_v52, %v1405_v42  ;;  %v1384_v58 = vmul.f32 %v5238_v30, %v8384_v35  ;;  %v1416_v16 = vmul.f32 %v5229_v13, %v8303_v4  ;;  %v1341_v5 = vadd.f32 %v1333_v56, %v1321_v18  ;;  %v8441_v56 = vld [vmem:[#allocation27_spill] sm:$0xff] }
 0x146   : > { %v1407_v8 = vadd.f32 %v1399_v40, %v1387_v33  ;;  %v1439_v19 = vmul.f32 %v5253_v1, %v4428_v3  ;;  %v1401_v54 = vmul.f32 %v5214_v36, %v8330_v57  ;;  %v1436_v41 = vmul.f32 %v5253_v1, %v4387_v6 }
 0x147   : > { %v5285_v21 = vadd.f32 %v1437_v63, %v1425_v10  ;;  %v1404_v52 = vadd.f32 %v1396_v15, %v1384_v58  ;;  %v1398_v42 = vmul.f32 %v5214_v36, %v8309_v12  ;;  %1090 = vmax.xlane.f32.xlu0 %v8440_v39  ;;  %v1389_v18 = vmul.f32 %v5238_v30, %v8389_v50 }
 0x148   : > { %1182 = vmax.xlane.f32.xlu1 %v8441_v56  ;;  %v1427_v40 = vadd.f32 %v1419_v31, %v1407_v8  ;;  %v1421_v63 = vmul.f32 %v5229_v13, %v4373_v61  ;;  %v5297_v33 = vadd.f32 %v1353_v32, %v1341_v5  ;;  %v1441_v10 = vmul.f32 %v5253_v1, %v4468_v2  ;;  %v3627_v56 = vld [vmem:[%s3788_s9 + $0x30] sm:$0xf] }
 0x149   : > { %8439 = vst [vmem:[#allocation53_spill] sm:$0xff] %v5285_v21  ;;  %v1424_v15 = vadd.f32 %v1416_v16, %v1404_v52  ;;  %v1386_v58 = vmul.f32 %v5238_v30, %v8391_v60  ;;  %v1409_v39 = vadd.f32 %v1401_v54, %v1389_v18  ;;  %v1418_v31 = vmul.f32 %v5229_v13, %v8313_v20  ;;  %v8445_v54 = vld [vmem:[#allocation50_spill] sm:$0xff] }
 0x14a   : > { %8442 = vst [vmem:[#allocation74_spill] sm:$0xff] %v5297_v33  ;;  %v5303_v21 = vadd.f32 %v1439_v19, %v1427_v40  ;;  %v1403_v8 = vmul.f32 %v5214_v36, %v8311_v59  ;;  %v1438_v32 = vmul.f32 %v5253_v1, %v4497_v46  ;;  %v1400_v16 = vmul.f32 %v5214_v36, %v8312_v9  ;;  %v8444_v19 = vld [vmem:[#allocation68_spill] sm:$0xff] }
 0x14b   : > { %v1406_v62 = vadd.f32 %v1398_v42, %v1386_v58  ;;  %v5315_v5 = vrot.slane %v3627_v56, %v8393_v43  ;;  %1176 = vmax.xlane.f32.xlu0 %v8444_v19  ;;  %v1429_v52 = vadd.f32 %v1421_v63, %v1409_v39  ;;  %v1391_v40 = vmul.f32 %v5238_v30, %v8411_v27 }
 0x14c   : > { %8443 = vst [vmem:[#allocation19_spill] sm:$0xff] %v5303_v21  ;;  %1186 = vmax.xlane.f32.xlu1 %v8445_v54  ;;  %v1423_v42 = vmul.f32 %v5229_v13, %v8412_v17  ;;  %v5323_v18 = vadd.f32 %v1436_v41, %v1424_v15  ;;  %v1388_v58 = vmul.f32 %v5238_v30, %v8395_v11 }
 0x14d   : > { %v1420_v21 = vmul.f32 %v5229_v13, %v8317_v0  ;;  %v5330_v33 = vrot.slane %v3627_v56, %v8396_v26  ;;  %v5332_v19 = vadd.f32 %v1441_v10, %v1429_v52  ;;  %v1426_v63 = vadd.f32 %v1418_v31, %v1406_v62 }
 0x14e   : > { %8446 = vst [vmem:[#allocation54_spill] sm:$0xff] %v5323_v18  ;;  %v1411_v39 = vadd.f32 %v1403_v8, %v1391_v40  ;;  %v1443_v54 = vmul.f32 %v5253_v1, %v4499_v53  ;;  %v1408_v34 = vadd.f32 %v1400_v16, %v1388_v58  ;;  %v1440_v41 = vmul.f32 %v5253_v1, %v4530_v23 }
 0x14f   : > { %8447 = vst [vmem:[#allocation44_spill] sm:$0xff] %v5332_v19  ;;  %v5339_v15 = vrot.slane %v3627_v56, %v8415_v25  ;;  %v1495_v18 = vmul.f32 %v5315_v5, %v8314_v28  ;;  %1180 = vmax.xlane.f32.xlu0 %v8448_v51  ;;  %v5345_v10 = vadd.f32 %v1438_v32, %v1426_v63  ;;  %v8454_v63 = vld [vmem:[#allocation40_spill] sm:$0xff] }
 0x150   : > { %1190 = vmax.xlane.f32.xlu1 %v8449_v48  ;;  %v1431_v62 = vadd.f32 %v1423_v42, %v1411_v39  ;;  %v1402_v31 = vmul.f32 %v5214_v36, %v8323_v47  ;;  %v5349_v8 = vpop.xlane.xlu1 %428  ;;  %v1428_v16 = vadd.f32 %v1420_v21, %v1408_v34  ;;  %v1515_v40 = vmul.f32 %v5330_v33, %v4242_v29  ;;  %v8455_v39 = vld [vmem:[#allocation23_spill] sm:$0xff]  ;;  %v3628_v19 = vld [vmem:[%s3788_s9 + $0x34] sm:$0xf] }
 0x151   : > { %8450 = vst [vmem:[#allocation20_spill] sm:$0xff] %v5345_v10  ;;  %8451 = vst [vmem:[#allocation66_spill] sm:$0xff] %v5349_v8  ;;  %v1483_v52 = vmul.f32 %v5339_v15, %v8400_v44  ;;  %v5356_v58 = vrot.slane %v3627_v56, %v8402_v22  ;;  %v1390_v48 = vmul.f32 %v5238_v30, %v8404_v38 }
 0x152   : > { %v5358_v51 = vadd.f32 %v1443_v54, %v1431_v62  ;;  %v1422_v36 = vmul.f32 %v5229_v13, %v4330_v49  ;;  %v1497_v34 = vmul.f32 %v5315_v5, %v8325_v37  ;;  %v5366_v21 = vadd.f32 %v1440_v41, %v1428_v16 }
 0x153   : > { %v1503_v32 = vadd.f32 %v1495_v18, %v1483_v52  ;;  %v1535_v42 = vmul.f32 %v5356_v58, %v4466_v45  ;;  %v1494_v56 = vmul.f32 %v5315_v5, %v8327_v24  ;;  %1184 = vmax.xlane.f32.xlu0 %v8454_v63  ;;  %v1410_v30 = vadd.f32 %v1402_v31, %v1390_v48 }
 0x154   : > { %8452 = vst [vmem:[#allocation63_spill] sm:$0xff] %v5358_v51  ;;  %8453 = vst [vmem:[#allocation64_spill] sm:$0xff] %v5366_v21  ;;  %1267 = vmax.xlane.f32.xlu1 %v8455_v39  ;;  %v1485_v13 = vmul.f32 %v5339_v15, %v8381_v7  ;;  %v1517_v54 = vmul.f32 %v5330_v33, %v4328_v55  ;;  %v5378_v41 = vpop.xlane.xlu1 %434  ;;  %v1442_v62 = vmul.f32 %v5253_v1, %v4558_v14  ;;  %v8458_v51 = vld [vmem:[#allocation69_spill] sm:$0xff] }
 0x155   : > { %8456 = vst [vmem:[#allocation33_spill] sm:$0xff] %v5378_v41  ;;  %v1523_v18 = vadd.f32 %v1515_v40, %v1503_v32  ;;  %v1482_v16 = vmul.f32 %v5339_v15, %v8384_v35  ;;  %v1514_v52 = vmul.f32 %v5330_v33, %v8303_v4  ;;  %v1430_v63 = vadd.f32 %v1422_v36, %v1410_v30  ;;  %v8459_v36 = vld [vmem:[#allocation60_spill] sm:$0xff]  ;;  %v8489_v41 = vld [vmem:[#allocation73_spill] sm:$0xff] }
 0x156   : > { %v1505_v31 = vadd.f32 %v1497_v34, %v1485_v13  ;;  %v1537_v48 = vmul.f32 %v5356_v58, %v4428_v3  ;;  %v1499_v39 = vmul.f32 %v5315_v5, %v8330_v57  ;;  %v1534_v1 = vmul.f32 %v5356_v58, %v4387_v6 }
 0x157   : > { %v5390_v21 = vadd.f32 %v1535_v42, %v1523_v18  ;;  %v1502_v40 = vadd.f32 %v1494_v56, %v1482_v16  ;;  %v1496_v32 = vmul.f32 %v5315_v5, %v8309_v12  ;;  %1188 = vmax.xlane.f32.xlu0 %v8458_v51  ;;  %v1487_v30 = vmul.f32 %v5339_v15, %v8389_v50 }
 0x158   : > { %1271 = vmax.xlane.f32.xlu1 %v8459_v36  ;;  %v1525_v34 = vadd.f32 %v1517_v54, %v1505_v31  ;;  %v1519_v42 = vmul.f32 %v5330_v33, %v4373_v61  ;;  %v5402_v13 = vpop.xlane.xlu0 %430  ;;  %v5404_v56 = vpop.xlane.xlu1 %438  ;;  %v5406_v18 = vadd.f32 %v1442_v62, %v1430_v63  ;;  %v1484_v51 = vmul.f32 %v5339_v15, %v8391_v60 }
 0x159   : > { %8457 = vst [vmem:[#allocation75_spill] sm:$0xff] %v5390_v21  ;;  %8460 = vst [vmem:[#allocation78_spill] sm:$0xff] %v5402_v13  ;;  %v1522_v16 = vadd.f32 %v1514_v52, %v1502_v40  ;;  %v1539_v21 = vmul.f32 %v5356_v58, %v4468_v2  ;;  %v1507_v31 = vadd.f32 %v1499_v39, %v1487_v30  ;;  %v8465_v39 = vld [vmem:[#allocation51_spill] sm:$0xff]  ;;  %v8498_v13 = vld [vmem:[#allocation62_spill] sm:$0xff] }
 0x15a   : > { %8461 = vst [vmem:[#allocation76_spill] sm:$0xff] %v5404_v56  ;;  %8462 = vst [vmem:[#allocation77_spill] sm:$0xff] %v5406_v18  ;;  %v5412_v54 = vadd.f32 %v1537_v48, %v1525_v34  ;;  %v1516_v36 = vmul.f32 %v5330_v33, %v8313_v20  ;;  %v1501_v10 = vmul.f32 %v5315_v5, %v8311_v59  ;;  %v8464_v48 = vld [vmem:[#allocation30_spill] sm:$0xff] }
 0x15b   : > { %v1504_v56 = vadd.f32 %v1496_v32, %v1484_v51  ;;  %v1536_v62 = vmul.f32 %v5356_v58, %v4497_v46  ;;  %v1498_v52 = vmul.f32 %v5315_v5, %v8312_v9  ;;  %v5424_v63 = vrot.slane %v3628_v19, %v8393_v43  ;;  %1265 = vmax.xlane.f32.xlu0 %v8464_v48 }
 0x15c   : > { %8463 = vst [vmem:[#allocation79_spill] sm:$0xff] %v5412_v54  ;;  %1275 = vmax.xlane.f32.xlu1 %v8465_v39  ;;  %v1527_v40 = vadd.f32 %v1519_v42, %v1507_v31  ;;  %v1489_v34 = vmul.f32 %v5339_v15, %v8411_v27  ;;  %v1521_v32 = vmul.f32 %v5330_v33, %v8412_v17  ;;  %v5432_v30 = vpop.xlane.xlu0 %432  ;;  %v5434_v51 = vpop.xlane.xlu1 %442 }
 0x15d   : > { %8466 = vst [vmem:[#allocation46_spill] sm:$0xff] %v5432_v30  ;;  %8467 = vst [vmem:[#allocation29_spill] sm:$0xff] %v5434_v51  ;;  %v5436_v54 = vadd.f32 %v1534_v1, %v1522_v16  ;;  %v1486_v18 = vmul.f32 %v5339_v15, %v8395_v11  ;;  %v1518_v48 = vmul.f32 %v5330_v33, %v8317_v0  ;;  %v8470_v0 = vld [vmem:[#allocation31_spill] sm:$0xff] }
 0x15e   : > { %v5443_v42 = vrot.slane %v3628_v19, %v8396_v26  ;;  %v5445_v31 = vadd.f32 %v1539_v21, %v1527_v40  ;;  %v1524_v39 = vadd.f32 %v1516_v36, %v1504_v56  ;;  %v1509_v9 = vadd.f32 %v1501_v10, %v1489_v34  ;;  %v8471_v26 = vld [vmem:[#allocation72_spill] sm:$0xff] }
 0x15f   : > { %8468 = vst [vmem:[#allocation80_spill] sm:$0xff] %v5436_v54  ;;  %v1541_v30 = vmul.f32 %v5356_v58, %v4499_v53  ;;  %v1506_v43 = vadd.f32 %v1498_v52, %v1486_v18  ;;  %v1538_v1 = vmul.f32 %v5356_v58, %v4530_v23  ;;  %v5452_v16 = vrot.slane %v3628_v19, %v8415_v25 }
 0x160   : > { %8469 = vst [vmem:[#allocation12_spill] sm:$0xff] %v5445_v31  ;;  %v1584_v54 = vmul.f32 %v5424_v63, %v8314_v28  ;;  %1269 = vmax.xlane.f32.xlu0 %v8470_v0  ;;  %1279 = vmax.xlane.f32.xlu1 %v8471_v26  ;;  %v5458_v21 = vadd.f32 %v1536_v62, %v1524_v39  ;;  %v5462_v18 = vpop.xlane.xlu0 %436  ;;  %v5464_v36 = vpop.xlane.xlu1 %519  ;;  %v8477_v39 = vld [vmem:[#allocation52_spill] sm:$0xff]  ;;  %v8483_v31 = vld [vmem:[#allocation42_spill] sm:$0xff] }
 0x161   : > { %v1529_v10 = vadd.f32 %v1521_v32, %v1509_v9  ;;  %v1500_v56 = vmul.f32 %v5315_v5, %v8323_v47  ;;  %8473 = vst [vmem:[#allocation2_spill] sm:$0xff] %v5462_v18  ;;  %8474 = vst [vmem:[#allocation34_spill] sm:$0xff] %v5464_v36  ;;  %v1526_v52 = vadd.f32 %v1518_v48, %v1506_v43  ;;  %v8478_v9 = vld [vmem:[#allocation41_spill] sm:$0xff]  ;;  %v8490_v36 = vld [vmem:[#allocation28_spill] sm:$0xff] }
 0x162   : > { %8472 = vst [vmem:[#allocation45_spill] sm:$0xff] %v5458_v21  ;;  %v1572_v40 = vmul.f32 %v5452_v16, %v8400_v44  ;;  %v1604_v34 = vmul.f32 %v5443_v42, %v4242_v29  ;;  %v5471_v0 = vrot.slane %v3628_v19, %v8402_v22  ;;  %v1488_v5 = vmul.f32 %v5339_v15, %v8404_v38  ;;  %v8482_v21 = vld [vmem:[#allocation61_spill] sm:$0xff] }
 0x163   : > { %v5475_v26 = vadd.f32 %v1541_v30, %v1529_v10  ;;  %v1520_v43 = vmul.f32 %v5330_v33, %v4330_v49  ;;  %v5481_v62 = vadd.f32 %v1538_v1, %v1526_v52  ;;  %v1586_v19 = vmul.f32 %v5424_v63, %v8325_v37 }
 0x164   : > { %v1592_v32 = vadd.f32 %v1584_v54, %v1572_v40  ;;  %v1624_v48 = vmul.f32 %v5471_v0, %v4466_v45  ;;  %1273 = vmax.xlane.f32.xlu0 %v8477_v39  ;;  %1365 = vmax.xlane.f32.xlu1 %v8478_v9  ;;  %v1508_v30 = vadd.f32 %v1500_v56, %v1488_v5  ;;  %v5493_v1 = vpop.xlane.xlu0 %440  ;;  %v5495_v54 = vpop.xlane.xlu1 %523 }
 0x165   : > { %8475 = vst [vmem:[#allocation9_spill] sm:$0xff] %v5475_v26  ;;  %8476 = vst [vmem:[#allocation17_spill] sm:$0xff] %v5481_v62  ;;  %v1540_v15 = vmul.f32 %v5356_v58, %v4558_v14  ;;  %v1583_v33 = vmul.f32 %v5424_v63, %v8327_v24  ;;  %v1574_v52 = vmul.f32 %v5452_v16, %v8381_v7 }
 0x166   : > { %8479 = vst [vmem:[#allocation21_spill] sm:$0xff] %v5493_v1  ;;  %8480 = vst [vmem:[#allocation90_spill] sm:$0xff] %v5495_v54  ;;  %v1612_v10 = vadd.f32 %v1604_v34, %v1592_v32  ;;  %v1606_v40 = vmul.f32 %v5443_v42, %v4328_v55  ;;  %v1626_v56 = vmul.f32 %v5471_v0, %v4428_v3 }
 0x167   : > { %v1528_v9 = vadd.f32 %v1520_v43, %v1508_v30  ;;  %v1571_v5 = vmul.f32 %v5452_v16, %v8384_v35  ;;  %v1603_v39 = vmul.f32 %v5443_v42, %v8303_v4  ;;  %v1594_v32 = vadd.f32 %v1586_v19, %v1574_v52 }
 0x168   : > { %v5509_v34 = vadd.f32 %v1624_v48, %v1612_v10  ;;  %v1623_v62 = vmul.f32 %v5471_v0, %v4387_v6  ;;  %v1588_v26 = vmul.f32 %v5424_v63, %v8330_v57  ;;  %1277 = vmax.xlane.f32.xlu0 %v8482_v21  ;;  %1369 = vmax.xlane.f32.xlu1 %v8483_v31  ;;  %v5521_v54 = vpop.xlane.xlu0 %517  ;;  %v5523_v48 = vpop.xlane.xlu1 %527 }
 0x169   : > { %v5517_v43 = vadd.f32 %v1540_v15, %v1528_v9  ;;  %v1591_v30 = vadd.f32 %v1583_v33, %v1571_v5  ;;  %v1585_v58 = vmul.f32 %v5424_v63, %v8309_v12  ;;  %8485 = vst [vmem:[#allocation55_spill] sm:$0xff] %v5521_v54  ;;  %8486 = vst [vmem:[#allocation13_spill] sm:$0xff] %v5523_v48  ;;  %v8497_v54 = vld [vmem:[#allocation8_spill] sm:$0xff] }
 0x16a   : > { %8481 = vst [vmem:[#allocation35_spill] sm:$0xff] %v5509_v34  ;;  %v1614_v19 = vadd.f32 %v1606_v40, %v1594_v32  ;;  %v1576_v10 = vmul.f32 %v5452_v16, %v8389_v50  ;;  %v1608_v21 = vmul.f32 %v5443_v42, %v4373_v61  ;;  %v1628_v31 = vmul.f32 %v5471_v0, %v4468_v2 }
 0x16b   : > { %8484 = vst [vmem:[#allocation65_spill] sm:$0xff] %v5517_v43  ;;  %v1611_v9 = vadd.f32 %v1603_v39, %v1591_v30  ;;  %v1573_v40 = vmul.f32 %v5452_v16, %v8391_v60  ;;  %v1605_v43 = vmul.f32 %v5443_v42, %v8313_v20  ;;  %v1590_v34 = vmul.f32 %v5424_v63, %v8311_v59  ;;  %v3629_v30 = vld [vmem:[%s3788_s9 + $0x38] sm:$0xf] }
 0x16c   : > { %v5537_v5 = vadd.f32 %v1626_v56, %v1614_v19  ;;  %v1596_v32 = vadd.f32 %v1588_v26, %v1576_v10  ;;  %1363 = vmax.xlane.f32.xlu0 %v8489_v41  ;;  %1373 = vmax.xlane.f32.xlu1 %v8490_v36  ;;  %v1625_v39 = vmul.f32 %v5471_v0, %v4497_v46  ;;  %v5550_v56 = vpop.xlane.xlu0 %521  ;;  %v5552_v26 = vpop.xlane.xlu1 %531 }
 0x16d   : > { %v5545_v15 = vadd.f32 %v1623_v62, %v1611_v9  ;;  %v1593_v52 = vadd.f32 %v1585_v58, %v1573_v40  ;;  %8492 = vst [vmem:[#allocation22_spill] sm:$0xff] %v5550_v56  ;;  %8493 = vst [vmem:[#allocation36_spill] sm:$0xff] %v5552_v26  ;;  %v1578_v10 = vmul.f32 %v5452_v16, %v8411_v27  ;;  %v8499_v58 = vld [vmem:[#allocation32_spill] sm:$0xff]  ;;  %v8501_v9 = vld [vmem:[#allocation85_spill] sm:$0xff] }
 0x16e   : > { %8488 = vst [vmem:[#allocation48_spill] sm:$0xff] %v5537_v5  ;;  %v1616_v19 = vadd.f32 %v1608_v21, %v1596_v32  ;;  %v1610_v41 = vmul.f32 %v5443_v42, %v8412_v17  ;;  %v8494_v5 = vld [vmem:[#allocation5_spill] sm:$0xff]  ;;  %v1630_v40 = vmul.f32 %v5471_v0, %v4499_v53  ;;  %v1575_v33 = vmul.f32 %v5452_v16, %v8395_v11 }
 0x16f   : > { %8491 = vst [vmem:[#allocation14_spill] sm:$0xff] %v5545_v15  ;;  %v5559_v36 = vrot.slane %v3629_v30, %v8494_v5  ;;  %v8496_v15 = vld [vmem:[#allocation58_spill] sm:$0xff]  ;;  %v1613_v32 = vadd.f32 %v1605_v43, %v1593_v52  ;;  %v1598_v48 = vadd.f32 %v1590_v34, %v1578_v10  ;;  %v5572_v8 = vrot.slane %v3629_v30, %v8497_v54 }
 0x170   : > { %v1587_v21 = vmul.f32 %v5424_v63, %v8496_v15  ;;  %1367 = vmax.xlane.f32.xlu0 %v8498_v13  ;;  %1377 = vmax.xlane.f32.xlu1 %v8499_v58  ;;  %v5576_v56 = vadd.f32 %v1628_v31, %v1616_v19  ;;  %v1607_v26 = vmul.f32 %v5443_v42, %v8501_v9  ;;  %v5583_v43 = vpop.xlane.xlu0 %525  ;;  %v5585_v34 = vpop.xlane.xlu1 %617  ;;  %v8507_v19 = vld [vmem:[#allocation53_spill] sm:$0xff] }
 0x171   : > { %v5581_v51 = vrot.slane %v3629_v30, %v8415_v25  ;;  %8502 = vst [vmem:[#allocation56_spill] sm:$0xff] %v5583_v43  ;;  %8503 = vst [vmem:[#allocation26_spill] sm:$0xff] %v5585_v34  ;;  %v1618_v52 = vadd.f32 %v1610_v41, %v1598_v48  ;;  %v1627_v10 = vmul.f32 %v5471_v0, %v4530_v23 }
 0x172   : > { %8500 = vst [vmem:[#allocation67_spill] sm:$0xff] %v5576_v56  ;;  %v1682_v13 = vmul.f32 %v5559_v36, %v8314_v28  ;;  %v1589_v31 = vmul.f32 %v5424_v63, %v8323_v47  ;;  %v5595_v58 = vadd.f32 %v1625_v39, %v1613_v32  ;;  %v1595_v56 = vadd.f32 %v1587_v21, %v1575_v33  ;;  %v8506_v47 = vld [vmem:[#allocation43_spill] sm:$0xff] }
 0x173   : > { %v1670_v62 = vmul.f32 %v5581_v51, %v8400_v44  ;;  %v5599_v34 = vadd.f32 %v1630_v40, %v1618_v52  ;;  %v1702_v48 = vmul.f32 %v5572_v8, %v4242_v29  ;;  %v5604_v41 = vrot.slane %v3629_v30, %v8402_v22 }
 0x174   : > { %8504 = vst [vmem:[#allocation47_spill] sm:$0xff] %v5595_v58  ;;  %v1577_v63 = vmul.f32 %v5452_v16, %v8404_v38  ;;  %1371 = vmax.xlane.f32.xlu0 %v8506_v47  ;;  %1454 = vmax.xlane.f32.xlu1 %v8507_v19  ;;  %v1615_v39 = vadd.f32 %v1607_v26, %v1595_v56  ;;  %v5614_v21 = vpop.xlane.xlu0 %529  ;;  %v5616_v32 = vpop.xlane.xlu1 %621  ;;  %v8511_v56 = vld [vmem:[#allocation19_spill] sm:$0xff] }
 0x175   : > { %8505 = vst [vmem:[#allocation27_spill] sm:$0xff] %v5599_v34  ;;  %v1609_v33 = vmul.f32 %v5443_v42, %v4330_v49  ;;  %v1684_v40 = vmul.f32 %v5559_v36, %v8325_v37  ;;  %8508 = vst [vmem:[#allocation68_spill] sm:$0xff] %v5614_v21  ;;  %v1690_v30 = vadd.f32 %v1682_v13, %v1670_v62 }
 0x176   : > { %v1722_v52 = vmul.f32 %v5604_v41, %v4466_v45  ;;  %v1597_v16 = vadd.f32 %v1589_v31, %v1577_v63  ;;  %v1629_v47 = vmul.f32 %v5471_v0, %v4558_v14  ;;  %v1672_v42 = vmul.f32 %v5581_v51, %v8381_v7  ;;  %v8510_v63 = vld [vmem:[#allocation74_spill] sm:$0xff] }
 0x177   : > { %v1704_v26 = vmul.f32 %v5572_v8, %v4328_v55  ;;  %v1681_v19 = vmul.f32 %v5559_v36, %v8327_v24  ;;  %v5630_v62 = vadd.f32 %v1627_v10, %v1615_v39  ;;  %v1710_v13 = vadd.f32 %v1702_v48, %v1690_v30 }
 0x178   : > { %v1724_v31 = vmul.f32 %v5604_v41, %v4428_v3  ;;  %v1669_v0 = vmul.f32 %v5581_v51, %v8384_v35  ;;  %1375 = vmax.xlane.f32.xlu0 %v8510_v63  ;;  %1458 = vmax.xlane.f32.xlu1 %v8511_v56  ;;  %v1617_v34 = vadd.f32 %v1609_v33, %v1597_v16  ;;  %v5640_v1 = vpop.xlane.xlu0 %615  ;;  %v5642_v10 = vpop.xlane.xlu1 %625 }
 0x179   : > { %8509 = vst [vmem:[#allocation50_spill] sm:$0xff] %v5630_v62  ;;  %v1692_v58 = vadd.f32 %v1684_v40, %v1672_v42  ;;  %v1701_v21 = vmul.f32 %v5572_v8, %v8303_v4  ;;  %v5644_v48 = vadd.f32 %v1722_v52, %v1710_v13  ;;  %v1721_v39 = vmul.f32 %v5604_v41, %v4387_v6 }
 0x17a   : > { %v1686_v30 = vmul.f32 %v5559_v36, %v8330_v57  ;;  %v1683_v56 = vmul.f32 %v5559_v36, %v8309_v12  ;;  %v5652_v33 = vadd.f32 %v1629_v47, %v1617_v34  ;;  %v1689_v16 = vadd.f32 %v1681_v19, %v1669_v0  ;;  %v8514_v34 = vld [vmem:[#allocation54_spill] sm:$0xff] }
 0x17b   : > { %8512 = vst [vmem:[#allocation37_spill] sm:$0xff] %v5644_v48  ;;  %v1712_v40 = vadd.f32 %v1704_v26, %v1692_v58  ;;  %v1674_v42 = vmul.f32 %v5581_v51, %v8389_v50  ;;  %v1706_v52 = vmul.f32 %v5572_v8, %v4373_v61  ;;  %v1726_v13 = vmul.f32 %v5604_v41, %v4468_v2  ;;  %v8515_v58 = vld [vmem:[#allocation44_spill] sm:$0xff] }
 0x17c   : > { %8513 = vst [vmem:[#allocation57_spill] sm:$0xff] %v5652_v33  ;;  %v1671_v63 = vmul.f32 %v5581_v51, %v8391_v60  ;;  %v1703_v48 = vmul.f32 %v5572_v8, %v8313_v20  ;;  %1452 = vmax.xlane.f32.xlu0 %v8514_v34  ;;  %1462 = vmax.xlane.f32.xlu1 %v8515_v58  ;;  %v5670_v0 = vpop.xlane.xlu0 %619  ;;  %v5672_v33 = vpop.xlane.xlu1 %629  ;;  %v3630_v20 = vld [vmem:[%s3788_s9 + $0x3c] sm:$0xf] }
 0x17d   : > { %v5666_v47 = vadd.f32 %v1724_v31, %v1712_v40  ;;  %v1709_v26 = vadd.f32 %v1701_v21, %v1689_v16  ;;  %v1688_v19 = vmul.f32 %v5559_v36, %v8311_v59  ;;  %v1694_v62 = vadd.f32 %v1686_v30, %v1674_v42 }
 0x17e   : > { %v1691_v43 = vadd.f32 %v1683_v56, %v1671_v63  ;;  %v1723_v18 = vmul.f32 %v5604_v41, %v4497_v46  ;;  %v1685_v34 = vmul.f32 %v5559_v36, %v8496_v15  ;;  %v1676_v21 = vmul.f32 %v5581_v51, %v8411_v27  ;;  %v8518_v63 = vld [vmem:[#allocation20_spill] sm:$0xff] }
 0x17f   : > { %8516 = vst [vmem:[#allocation40_spill] sm:$0xff] %v5666_v47  ;;  %v5679_v58 = vadd.f32 %v1721_v39, %v1709_v26  ;;  %v1708_v31 = vmul.f32 %v5572_v8, %v8412_v17  ;;  %v5686_v40 = vrot.slane %v3630_v20, %v8494_v5  ;;  %v1714_v30 = vadd.f32 %v1706_v52, %v1694_v62  ;;  %v8519_v39 = vld [vmem:[#allocation63_spill] sm:$0xff] }
 0x180   : > { %v1711_v56 = vadd.f32 %v1703_v48, %v1691_v43  ;;  %v1673_v16 = vmul.f32 %v5581_v51, %v8395_v11  ;;  %v1705_v42 = vmul.f32 %v5572_v8, %v8501_v9  ;;  %1456 = vmax.xlane.f32.xlu0 %v8518_v63  ;;  %1466 = vmax.xlane.f32.xlu1 %v8519_v39  ;;  %v5699_v62 = vpop.xlane.xlu0 %623  ;;  %v707_v43 = vpop.xlane.xlu1 %706  ;;  %v8521_v39 = vld [vmem:[#allocation26_spill] sm:$0xff] }
 0x181   : > { %8517 = vst [vmem:[#allocation23_spill] sm:$0xff] %v5679_v58  ;;  %v1696_v26 = vadd.f32 %v1688_v19, %v1676_v21  ;;  %v1728_v58 = vmul.f32 %v5604_v41, %v4499_v53  ;;  %v5697_v47 = vrot.slane %v3630_v20, %v8497_v54  ;;  %v5701_v48 = vadd.f32 %v1726_v13, %v1714_v30  ;;  %v8523_v30 = vld [vmem:[#allocation70_spill] sm:$0xff] }
 0x182   : > { %v1693_v52 = vadd.f32 %v1685_v34, %v1673_v16  ;;  %v1725_v9 = vmul.f32 %v5604_v41, %v4530_v23  ;;  %v5706_v63 = vrot.slane %v3630_v20, %v8415_v25  ;;  %v721_v19 = vmax.f32 %v8521_v39, %v707_v43  ;;  %v8525_v25 = vld [vmem:[#allocation34_spill] sm:$0xff] }
 0x183   : > { %8520 = vst [vmem:[#allocation69_spill] sm:$0xff] %v5701_v48  ;;  %v5709_v21 = vadd.f32 %v1723_v18, %v1711_v56  ;;  %v1716_v11 = vadd.f32 %v1708_v31, %v1696_v26  ;;  %v1771_v54 = vmul.f32 %v5686_v40, %v8314_v28  ;;  %v5716_v34 = vrot.slane %v3630_v20, %v8402_v22  ;;  %v8524_v48 = vld [vmem:[#allocation78_spill] sm:$0xff]  ;;  %v8528_v31 = vld [vmem:[#allocation64_spill] sm:$0xff]  ;;  %v8529_v56 = vld [vmem:[#allocation75_spill] sm:$0xff] }
 0x184   : > { %v1713_v5 = vadd.f32 %v1705_v42, %v1693_v52  ;;  %v1759_v13 = vmul.f32 %v5706_v63, %v8400_v44  ;;  %v1687_v16 = vmul.f32 %v5559_v36, %v8523_v30  ;;  %v8526_v23 = vmax.f32 %v8524_v48, %v8525_v25  ;;  %1460 = vmax.xlane.f32.xlu0 %v8528_v31  ;;  %v5732_v26 = vpop.xlane.xlu0 %627  ;;  %v711_v43 = vpop.xlane.xlu1 %710 }
 0x185   : > { %8522 = vst [vmem:[#allocation60_spill] sm:$0xff] %v5709_v21  ;;  %1552 = vmax.xlane.f32.xlu1 %v8529_v56  ;;  %v1791_v42 = vmul.f32 %v5697_v47, %v4242_v29  ;;  %v1675_v20 = vmul.f32 %v5581_v51, %v8404_v38  ;;  %v5734_v36 = vadd.f32 %v1728_v58, %v1716_v11  ;;  %v8533_v58 = vld [vmem:[#allocation90_spill] sm:$0xff] }
 0x186   : > { %v5724_v18 = vsel %vm3346_vm0, %v8526_v23, %v721_v19  ;;  %v5736_v52 = vadd.f32 %v1725_v9, %v1713_v5  ;;  %v1811_v23 = vmul.f32 %v5716_v34, %v4466_v45  ;;  %v1707_v25 = vmul.f32 %v5572_v8, %v4330_v49  ;;  %v8532_v8 = vld [vmem:[#allocation33_spill] sm:$0xff]  ;;  %v8540_v21 = vld [vmem:[#allocation66_spill] sm:$0xff] }
 0x187   : > { %8527 = vst [vmem:[#allocation30_spill] sm:$0xff] %v5724_v18  ;;  %8530 = vst [vmem:[#allocation51_spill] sm:$0xff] %v5734_v36  ;;  %v723_v48 = vmax.f32 %v5616_v32, %v711_v43  ;;  %v1779_v39 = vadd.f32 %v1771_v54, %v1759_v13  ;;  %v1727_v19 = vmul.f32 %v5604_v41, %v4558_v14  ;;  %v8536_v41 = vld [vmem:[#allocation77_spill] sm:$0xff]  ;;  %v8537_v13 = vld [vmem:[#allocation79_spill] sm:$0xff] }
 0x188   : > { %8531 = vst [vmem:[#allocation31_spill] sm:$0xff] %v5736_v52  ;;  %v1773_v51 = vmul.f32 %v5686_v40, %v8325_v37  ;;  %v1695_v31 = vadd.f32 %v1687_v16, %v1675_v20  ;;  %v1761_v11 = vmul.f32 %v5706_v63, %v8381_v7  ;;  %v1793_v5 = vmul.f32 %v5697_v47, %v4328_v55  ;;  %v705_v20 = vpop.xlane.xlu0 %704  ;;  %v715_v43 = vpop.xlane.xlu1 %714 }
 0x189   : > { %v1770_v9 = vmul.f32 %v5686_v40, %v8327_v24  ;;  %v8534_v32 = vmax.f32 %v8532_v8, %v8533_v58  ;;  %1464 = vmax.xlane.f32.xlu0 %v8536_v41  ;;  %1556 = vmax.xlane.f32.xlu1 %v8537_v13  ;;  %v1799_v16 = vadd.f32 %v1791_v42, %v1779_v39 }
 0x18a   : > { %v1813_v56 = vmul.f32 %v5716_v34, %v4428_v3  ;;  %v1715_v52 = vadd.f32 %v1707_v25, %v1695_v31  ;;  %v1758_v36 = vmul.f32 %v5706_v63, %v8384_v35  ;;  %v1790_v8 = vmul.f32 %v5697_v47, %v8303_v4 }
 0x18b   : > { %v5757_v54 = vsel %vm3346_vm0, %v8534_v32, %v723_v48  ;;  %v1775_v48 = vmul.f32 %v5686_v40, %v8330_v57  ;;  %v720_v58 = vmax.f32 %v5640_v1, %v705_v20  ;;  %v725_v32 = vmax.f32 %v5642_v10, %v715_v43  ;;  %v8544_v1 = vld [vmem:[#allocation76_spill] sm:$0xff]  ;;  %v8545_v10 = vld [vmem:[#allocation13_spill] sm:$0xff] }
 0x18c   : > { %8535 = vst [vmem:[#allocation72_spill] sm:$0xff] %v5757_v54  ;;  %v1781_v42 = vadd.f32 %v1773_v51, %v1761_v11  ;;  %v1810_v39 = vmul.f32 %v5716_v34, %v4387_v6  ;;  %v5773_v41 = vadd.f32 %v1811_v23, %v1799_v16  ;;  %v5775_v25 = vadd.f32 %v1727_v19, %v1715_v52  ;;  %v8541_v54 = vld [vmem:[#allocation55_spill] sm:$0xff]  ;;  %v8548_v23 = vld [vmem:[#allocation80_spill] sm:$0xff]  ;;  %v709_v19 = vpop.xlane.xlu0 %708 }
 0x18d   : > { %v1778_v31 = vadd.f32 %v1770_v9, %v1758_v36  ;;  %v1763_v13 = vmul.f32 %v5706_v63, %v8389_v50  ;;  %v8542_v18 = vmax.f32 %v8540_v21, %v8541_v54  ;;  %v8546_v51 = vmax.f32 %v8544_v1, %v8545_v10  ;;  %1550 = vmax.xlane.f32.xlu0 %v8548_v23  ;;  %v8549_v52 = vld [vmem:[#allocation12_spill] sm:$0xff]  ;;  %v719_v9 = vpop.xlane.xlu1 %718  ;;  %v8556_v10 = vld [vmem:[#allocation29_spill] sm:$0xff] }
 0x18e   : > { %8538 = vst [vmem:[#allocation52_spill] sm:$0xff] %v5773_v41  ;;  %8539 = vst [vmem:[#allocation41_spill] sm:$0xff] %v5775_v25  ;;  %1560 = vmax.xlane.f32.xlu1 %v8549_v52  ;;  %v1801_v36 = vadd.f32 %v1793_v5, %v1781_v42  ;;  %v1795_v21 = vmul.f32 %v5697_v47, %v4373_v61  ;;  %v722_v54 = vmax.f32 %v5670_v0, %v709_v19  ;;  %v8560_v52 = vld [vmem:[#allocation45_spill] sm:$0xff]  ;;  %v8567_v41 = vld [vmem:[#allocation2_spill] sm:$0xff] }
 0x18f   : > { %v5783_v57 = vsel %vm3346_vm0, %v8542_v18, %v720_v58  ;;  %v5789_v11 = vsel %vm3346_vm0, %v8546_v51, %v725_v32  ;;  %v1798_v16 = vadd.f32 %v1790_v8, %v1778_v31  ;;  %v1783_v20 = vadd.f32 %v1775_v48, %v1763_v13  ;;  %v8551_v8 = vld [vmem:[#allocation84_spill] sm:$0xff]  ;;  %v8552_v31 = vld [vmem:[#allocation46_spill] sm:$0xff] }
 0x190   : > { %8543 = vst [vmem:[#allocation61_spill] sm:$0xff] %v5783_v57  ;;  %8547 = vst [vmem:[#allocation42_spill] sm:$0xff] %v5789_v11  ;;  %v1815_v18 = vmul.f32 %v5716_v34, %v4468_v2  ;;  %v727_v43 = vmax.f32 %v5672_v33, %v719_v9  ;;  %v1760_v58 = vmul.f32 %v5706_v63, %v8391_v60  ;;  %v8553_v33 = vld [vmem:[#allocation22_spill] sm:$0xff]  ;;  %v8557_v51 = vld [vmem:[#allocation36_spill] sm:$0xff]  ;;  %v713_v9 = vpop.xlane.xlu0 %712 }
 0x191   : > { %v1772_v5 = vmul.f32 %v5686_v40, %v8309_v12  ;;  %v5803_v32 = vadd.f32 %v1813_v56, %v1801_v36  ;;  %v1792_v48 = vmul.f32 %v5697_v47, %v8551_v8  ;;  %v1812_v42 = vmul.f32 %v5716_v34, %v4497_v46  ;;  %1554 = vmax.xlane.f32.xlu0 %v8560_v52  ;;  %v8561_v36 = vld [vmem:[#allocation9_spill] sm:$0xff]  ;;  %v8574_v57 = vld [vmem:[#allocation18_spill] sm:$0xff] }
 0x192   : > { %v1777_v0 = vmul.f32 %v5686_v40, %v8311_v59  ;;  %v8554_v13 = vmax.f32 %v8552_v31, %v8553_v33  ;;  %v8558_v23 = vmax.f32 %v8556_v10, %v8557_v51  ;;  %1564 = vmax.xlane.f32.xlu1 %v8561_v36  ;;  %v5825_v19 = vadd.f32 %v1810_v39, %v1798_v16  ;;  %v3631_v33 = vld [vmem:[%s3788_s9 + $0x40] sm:$0xf]  ;;  %v8563_v16 = vld [vmem:[#allocation5_spill] sm:$0xff]  ;;  %v8566_v36 = vld [vmem:[#allocation8_spill] sm:$0xff] }
 0x193   : > { %8550 = vst [vmem:[#allocation73_spill] sm:$0xff] %v5803_v32  ;;  %v5827_v32 = vpop.xlane.xlu1 %804  ;;  %v1803_v25 = vadd.f32 %v1795_v21, %v1783_v20  ;;  %v1797_v31 = vmul.f32 %v5697_v47, %v8412_v17  ;;  %v1780_v10 = vadd.f32 %v1772_v5, %v1760_v58  ;;  %v1817_v39 = vmul.f32 %v5716_v34, %v4499_v53  ;;  %v8571_v58 = vld [vmem:[#allocation17_spill] sm:$0xff]  ;;  %v8572_v5 = vld [vmem:[#allocation35_spill] sm:$0xff] }
 0x194   : > { %v5815_v1 = vsel %vm3346_vm0, %v8554_v13, %v722_v54  ;;  %v5821_v56 = vsel %vm3346_vm0, %v8558_v23, %v727_v43  ;;  %8562 = vst [vmem:[#allocation32_spill] sm:$0xff] %v5825_v19  ;;  %v1765_v54 = vmul.f32 %v5706_v63, %v8411_v27  ;;  %v1774_v43 = vmul.f32 %v5686_v40, %v8496_v15  ;;  %v8565_v23 = vld [vmem:[#allocation11_spill] sm:$0xff] }
 0x195   : > { %8555 = vst [vmem:[#allocation28_spill] sm:$0xff] %v5815_v1  ;;  %8559 = vst [vmem:[#allocation62_spill] sm:$0xff] %v5821_v56  ;;  %v724_v13 = vmax.f32 %v5699_v62, %v713_v9  ;;  %v5840_v51 = vrot.slane %v3631_v33, %v8563_v16  ;;  %v5842_v20 = vadd.f32 %v1815_v18, %v1803_v25  ;;  %v8568_v56 = vld [vmem:[#allocation56_spill] sm:$0xff]  ;;  %1558 = vmax.xlane.f32.xlu0 %v8571_v58  ;;  %v8573_v25 = vld [vmem:[#allocation85_spill] sm:$0xff] }
 0x196   : > { %v1785_v21 = vadd.f32 %v1777_v0, %v1765_v54  ;;  %v1762_v52 = vmul.f32 %v5706_v63, %v8565_v23  ;;  %v5847_v19 = vrot.slane %v3631_v33, %v8566_v36  ;;  %v8569_v1 = vmax.f32 %v8567_v41, %v8568_v56  ;;  %1641 = vmax.xlane.f32.xlu1 %v8572_v5  ;;  %v717_v0 = vpop.xlane.xlu0 %716  ;;  %v8575_v41 = vld [vmem:[#allocation4_spill] sm:$0xff] }
 0x197   : > { %8564 = vst [vmem:[#allocation43_spill] sm:$0xff] %v5842_v20  ;;  %v1800_v9 = vadd.f32 %v1792_v48, %v1780_v10  ;;  %v1794_v18 = vmul.f32 %v5697_v47, %v8573_v25  ;;  %v5859_v54 = vpop.xlane.xlu1 %808  ;;  %v1814_v36 = vmul.f32 %v5716_v34, %v8574_v57  ;;  %v5864_v56 = vrot.slane %v3631_v33, %v8575_v41 }
 0x198   : > { %v5853_v62 = vsel %vm3346_vm0, %v8569_v1, %v724_v13  ;;  %v1805_v20 = vadd.f32 %v1797_v31, %v1785_v21  ;;  %v1782_v11 = vadd.f32 %v1774_v43, %v1762_v52  ;;  %v726_v1 = vmax.f32 %v5732_v26, %v717_v0  ;;  %v8578_v26 = vld [vmem:[#allocation21_spill] sm:$0xff] }
 0x199   : > { %8570 = vst [vmem:[#allocation53_spill] sm:$0xff] %v5853_v62  ;;  %v5867_v13 = vadd.f32 %v1812_v42, %v1800_v9  ;;  %v1869_v48 = vmul.f32 %v5840_v51, %v8314_v28  ;;  %v1776_v10 = vmul.f32 %v5686_v40, %v8523_v30  ;;  %v1857_v31 = vmul.f32 %v5864_v56, %v8400_v44  ;;  %v8579_v42 = vld [vmem:[#allocation68_spill] sm:$0xff]  ;;  %v8582_v9 = vld [vmem:[#allocation65_spill] sm:$0xff] }
 0x19a   : > { %v5873_v58 = vadd.f32 %v1817_v39, %v1805_v20  ;;  %v1889_v43 = vmul.f32 %v5847_v19, %v4242_v29  ;;  %v1871_v21 = vmul.f32 %v5840_v51, %v8325_v37  ;;  %v8580_v52 = vmax.f32 %v8578_v26, %v8579_v42  ;;  %1562 = vmax.xlane.f32.xlu0 %v8582_v9  ;;  %v8583_v40 = vld [vmem:[#allocation48_spill] sm:$0xff]  ;;  %v5894_v0 = vpop.xlane.xlu0 %802 }
 0x19b   : > { %8576 = vst [vmem:[#allocation74_spill] sm:$0xff] %v5867_v13  ;;  %1645 = vmax.xlane.f32.xlu1 %v8583_v40  ;;  %v5890_v39 = vrot.slane %v3631_v33, %v8402_v22  ;;  %v1764_v20 = vmul.f32 %v5706_v63, %v8404_v38  ;;  %v1796_v26 = vmul.f32 %v5697_v47, %v4330_v49 }
 0x19c   : > { %8577 = vst [vmem:[#allocation19_spill] sm:$0xff] %v5873_v58  ;;  %v5885_v5 = vsel %vm3346_vm0, %v8580_v52, %v726_v1  ;;  %v5896_v58 = vpop.xlane.xlu1 %812  ;;  %v1859_v1 = vmul.f32 %v5864_v56, %v8381_v7  ;;  %v1891_v42 = vmul.f32 %v5847_v19, %v4328_v55  ;;  %v1868_v33 = vmul.f32 %v5840_v51, %v8327_v24  ;;  %v8584_v55 = vld [vmem:[#allocation14_spill] sm:$0xff] }
 0x19d   : > { %8581 = vst [vmem:[#allocation54_spill] sm:$0xff] %v5885_v5  ;;  %v1877_v52 = vadd.f32 %v1869_v48, %v1857_v31  ;;  %v1909_v63 = vmul.f32 %v5890_v39, %v4466_v45  ;;  %v1784_v9 = vadd.f32 %v1776_v10, %v1764_v20  ;;  %v1816_v40 = vmul.f32 %v5716_v34, %v4558_v14  ;;  %v8585_v48 = vld [vmem:[#allocation67_spill] sm:$0xff] }
 0x19e   : > { %v1879_v13 = vadd.f32 %v1871_v21, %v1859_v1  ;;  %v1911_v47 = vmul.f32 %v5890_v39, %v4428_v3  ;;  %v1856_v5 = vmul.f32 %v5864_v56, %v8384_v35  ;;  %v1888_v62 = vmul.f32 %v5847_v19, %v8303_v4  ;;  %1639 = vmax.xlane.f32.xlu0 %v8584_v55  ;;  %v8586_v10 = vld [vmem:[#allocation59_spill] sm:$0xff]  ;;  %v5920_v34 = vpop.xlane.xlu0 %806 }
 0x19f   : > { %1649 = vmax.xlane.f32.xlu1 %v8585_v48  ;;  %v1802_v31 = vadd.f32 %v1794_v18, %v1782_v11  ;;  %v1897_v24 = vadd.f32 %v1889_v43, %v1877_v52  ;;  %v1873_v20 = vmul.f32 %v5840_v51, %v8586_v10  ;;  %v1804_v1 = vadd.f32 %v1796_v26, %v1784_v9 }
 0x1a0   : > { %v5922_v21 = vpop.xlane.xlu1 %816  ;;  %v1899_v3 = vadd.f32 %v1891_v42, %v1879_v13  ;;  %v1876_v7 = vadd.f32 %v1868_v33, %v1856_v5  ;;  %v1908_v35 = vmul.f32 %v5890_v39, %v4387_v6  ;;  %v1861_v11 = vmul.f32 %v5864_v56, %v8389_v50  ;;  %v8591_v5 = vld [vmem:[#allocation47_spill] sm:$0xff] }
 0x1a1   : > { %v5926_v4 = vadd.f32 %v1814_v36, %v1802_v31  ;;  %v5928_v55 = vadd.f32 %v1909_v63, %v1897_v24  ;;  %v1893_v18 = vmul.f32 %v5847_v19, %v4373_v61  ;;  %v5934_v43 = vadd.f32 %v1816_v40, %v1804_v1  ;;  %v8592_v36 = vld [vmem:[#allocation27_spill] sm:$0xff] }
 0x1a2   : > { %v5936_v52 = vadd.f32 %v1911_v47, %v1899_v3  ;;  %v1896_v26 = vadd.f32 %v1888_v62, %v1876_v7  ;;  %v1870_v13 = vmul.f32 %v5840_v51, %v8309_v12  ;;  %1643 = vmax.xlane.f32.xlu0 %v8591_v5  ;;  %v1881_v24 = vadd.f32 %v1873_v20, %v1861_v11  ;;  %v5946_v63 = vpop.xlane.xlu0 %810 }
 0x1a3   : > { %8587 = vst [vmem:[#allocation44_spill] sm:$0xff] %v5926_v4  ;;  %8588 = vst [vmem:[#allocation20_spill] sm:$0xff] %v5928_v55  ;;  %1653 = vmax.xlane.f32.xlu1 %v8592_v36  ;;  %v1913_v42 = vmul.f32 %v5890_v39, %v4468_v2  ;;  %v1858_v33 = vmul.f32 %v5864_v56, %v8391_v60  ;;  %v1890_v62 = vmul.f32 %v5847_v19, %v8551_v8  ;;  %v8594_v36 = vld [vmem:[#allocation30_spill] sm:$0xff] }
 0x1a4   : > { %8589 = vst [vmem:[#allocation63_spill] sm:$0xff] %v5934_v43  ;;  %8590 = vst [vmem:[#allocation26_spill] sm:$0xff] %v5936_v52  ;;  %v894_v3 = vpop.xlane.xlu1 %893  ;;  %v5948_v7 = vadd.f32 %v1908_v35, %v1896_v26  ;;  %v1910_v9 = vmul.f32 %v5890_v39, %v4497_v46  ;;  %v1875_v40 = vmul.f32 %v5840_v51, %v8311_v59  ;;  %v3632_v35 = vld [vmem:[%s3788_s9 + $0x44] sm:$0xf] }
 0x1a5   : > { %v908_v47 = vmax.f32 %v5827_v32, %v894_v3  ;;  %v1901_v48 = vadd.f32 %v1893_v18, %v1881_v24  ;;  %v1863_v31 = vmul.f32 %v5864_v56, %v8411_v27  ;;  %v1872_v20 = vmul.f32 %v5840_v51, %v8496_v15  ;;  %v8596_v18 = vld [vmem:[#allocation50_spill] sm:$0xff]  ;;  %v8597_v24 = vld [vmem:[#allocation37_spill] sm:$0xff] }
 0x1a6   : > { %8593 = vst [vmem:[#allocation78_spill] sm:$0xff] %v5948_v7  ;;  %v1878_v1 = vadd.f32 %v1870_v13, %v1858_v33  ;;  %v1895_v11 = vmul.f32 %v5847_v19, %v8412_v17  ;;  %v1915_v26 = vmul.f32 %v5890_v39, %v4499_v53  ;;  %v5967_v5 = vrot.slane %v3632_v35, %v8563_v16  ;;  %v5979_v3 = vpop.xlane.xlu0 %814 }
 0x1a7   : > { %v5971_v32 = vsel %vm3355_vm1, %v8594_v36, %v908_v47  ;;  %1647 = vmax.xlane.f32.xlu0 %v8596_v18  ;;  %1739 = vmax.xlane.f32.xlu1 %v8597_v24  ;;  %v1860_v13 = vmul.f32 %v5864_v56, %v8565_v23  ;;  %v1892_v33 = vmul.f32 %v5847_v19, %v8573_v25  ;;  %v8598_v47 = vld [vmem:[#allocation8_spill] sm:$0xff] }
 0x1a8   : > { %8595 = vst [vmem:[#allocation34_spill] sm:$0xff] %v5971_v32  ;;  %v898_v7 = vpop.xlane.xlu1 %897  ;;  %v1898_v52 = vadd.f32 %v1890_v62, %v1878_v1  ;;  %v1883_v43 = vadd.f32 %v1875_v40, %v1863_v31  ;;  %v5982_v55 = vrot.slane %v3632_v35, %v8575_v41  ;;  %v5985_v36 = vrot.slane %v3632_v35, %v8598_v47  ;;  %v8601_v31 = vld [vmem:[#allocation72_spill] sm:$0xff] }
 0x1a9   : > { %v910_v18 = vmax.f32 %v5859_v54, %v898_v7  ;;  %v5988_v24 = vadd.f32 %v1913_v42, %v1901_v48  ;;  %v1880_v4 = vadd.f32 %v1872_v20, %v1860_v13  ;;  %v1912_v32 = vmul.f32 %v5890_v39, %v8574_v57  ;;  %v8603_v54 = vld [vmem:[#allocation57_spill] sm:$0xff]  ;;  %v8604_v42 = vld [vmem:[#allocation40_spill] sm:$0xff] }
 0x1aa   : > { %v5992_v53 = vadd.f32 %v1910_v9, %v1898_v52  ;;  %v1903_v25 = vadd.f32 %v1895_v11, %v1883_v43  ;;  %v1946_v62 = vmul.f32 %v5982_v55, %v8400_v44  ;;  %v1958_v40 = vmul.f32 %v5967_v5, %v8314_v28  ;;  %v892_v9 = vpop.xlane.xlu0 %891 }
 0x1ab   : > { %8599 = vst [vmem:[#allocation64_spill] sm:$0xff] %v5988_v24  ;;  %v6000_v1 = vsel %vm3355_vm1, %v8601_v31, %v910_v18  ;;  %1651 = vmax.xlane.f32.xlu0 %v8603_v54  ;;  %1743 = vmax.xlane.f32.xlu1 %v8604_v42  ;;  %v1900_v7 = vadd.f32 %v1892_v33, %v1880_v4  ;;  %v8611_v54 = vld [vmem:[#allocation23_spill] sm:$0xff] }
 0x1ac   : > { %8600 = vst [vmem:[#allocation75_spill] sm:$0xff] %v5992_v53  ;;  %8602 = vst [vmem:[#allocation33_spill] sm:$0xff] %v6000_v1  ;;  %v1874_v52 = vmul.f32 %v5840_v51, %v8523_v30  ;;  %v902_v43 = vpop.xlane.xlu1 %901  ;;  %v6006_v48 = vadd.f32 %v1915_v26, %v1903_v25  ;;  %v1978_v20 = vmul.f32 %v5985_v36, %v4242_v29  ;;  %v8618_v53 = vld [vmem:[#allocation82_spill] sm:$0xff] }
 0x1ad   : > { %v6011_v11 = vrot.slane %v3632_v35, %v8402_v22  ;;  %v1862_v13 = vmul.f32 %v5864_v56, %v8404_v38  ;;  %v907_v18 = vmax.f32 %v5894_v0, %v892_v9  ;;  %v912_v4 = vmax.f32 %v5896_v58, %v902_v43  ;;  %v8607_v56 = vld [vmem:[#allocation61_spill] sm:$0xff]  ;;  %v8609_v58 = vld [vmem:[#allocation42_spill] sm:$0xff] }
 0x1ae   : > { %8605 = vst [vmem:[#allocation90_spill] sm:$0xff] %v6006_v48  ;;  %v6017_v33 = vadd.f32 %v1912_v32, %v1900_v7  ;;  %v1894_v51 = vmul.f32 %v5847_v19, %v4330_v49  ;;  %v1966_v25 = vadd.f32 %v1958_v40, %v1946_v62  ;;  %v1914_v35 = vmul.f32 %v5890_v39, %v4558_v14  ;;  %v8612_v19 = vld [vmem:[#allocation69_spill] sm:$0xff]  ;;  %v896_v40 = vpop.xlane.xlu0 %895  ;;  %v8613_v39 = vld [vmem:[#allocation6_spill] sm:$0xff] }
 0x1af   : > { %v1998_v26 = vmul.f32 %v6011_v11, %v4466_v45  ;;  %v1960_v31 = vmul.f32 %v5967_v5, %v8325_v37  ;;  %v6029_v0 = vsel %vm3355_vm1, %v8607_v56, %v907_v18  ;;  %v6033_v32 = vsel %vm3355_vm1, %v8609_v58, %v912_v4  ;;  %1737 = vmax.xlane.f32.xlu0 %v8611_v54  ;;  %v8614_v43 = vld [vmem:[#allocation86_spill] sm:$0xff]  ;;  %v8615_v18 = vld [vmem:[#allocation39_spill] sm:$0xff] }
 0x1b0   : > { %8606 = vst [vmem:[#allocation77_spill] sm:$0xff] %v6017_v33  ;;  %8608 = vst [vmem:[#allocation79_spill] sm:$0xff] %v6029_v0  ;;  %1747 = vmax.xlane.f32.xlu1 %v8612_v19  ;;  %v1882_v62 = vadd.f32 %v1874_v52, %v1862_v13  ;;  %v906_v42 = vpop.xlane.xlu1 %905  ;;  %v1986_v7 = vadd.f32 %v1978_v20, %v1966_v25  ;;  %v1948_v9 = vmul.f32 %v5982_v55, %v8613_v39  ;;  %v8616_v54 = vld [vmem:[#allocation15_spill] sm:$0xff] }
 0x1b1   : > { %8610 = vst [vmem:[#allocation66_spill] sm:$0xff] %v6033_v32  ;;  %v1980_v33 = vmul.f32 %v5985_v36, %v8614_v43  ;;  %v1957_v56 = vmul.f32 %v5967_v5, %v8615_v18  ;;  %v909_v4 = vmax.f32 %v5920_v34, %v896_v40  ;;  %v914_v58 = vmax.f32 %v5922_v21, %v906_v42  ;;  %v8617_v25 = vld [vmem:[#allocation3_spill] sm:$0xff]  ;;  %v8619_v32 = vld [vmem:[#allocation28_spill] sm:$0xff]  ;;  %v8621_v34 = vld [vmem:[#allocation62_spill] sm:$0xff] }
 0x1b2   : > { %v2000_v19 = vmul.f32 %v6011_v11, %v8616_v54  ;;  %v1962_v52 = vmul.f32 %v5967_v5, %v8586_v10  ;;  %v1902_v20 = vadd.f32 %v1894_v51, %v1882_v62  ;;  %v1968_v13 = vadd.f32 %v1960_v31, %v1948_v9  ;;  %v8623_v40 = vld [vmem:[#allocation60_spill] sm:$0xff]  ;;  %v8624_v42 = vld [vmem:[#allocation51_spill] sm:$0xff]  ;;  %v900_v31 = vpop.xlane.xlu0 %899 }
 0x1b3   : > { %v1945_v48 = vmul.f32 %v5982_v55, %v8617_v25  ;;  %v1977_v24 = vmul.f32 %v5985_v36, %v8618_v53  ;;  %v6055_v0 = vsel %vm3355_vm1, %v8619_v32, %v909_v4  ;;  %v6059_v21 = vsel %vm3355_vm1, %v8621_v34, %v914_v58  ;;  %1741 = vmax.xlane.f32.xlu0 %v8623_v40 }
 0x1b4   : > { %8620 = vst [vmem:[#allocation55_spill] sm:$0xff] %v6055_v0  ;;  %8622 = vst [vmem:[#allocation76_spill] sm:$0xff] %v6059_v21  ;;  %1751 = vmax.xlane.f32.xlu1 %v8624_v42  ;;  %v1950_v51 = vmul.f32 %v5982_v55, %v8389_v50  ;;  %v6065_v62 = vpop.xlane.xlu1 %991  ;;  %v6067_v9 = vadd.f32 %v1998_v26, %v1986_v7  ;;  %v1988_v1 = vadd.f32 %v1980_v33, %v1968_v13  ;;  %v3633_v33 = vld [vmem:[%s3788_s9 + $0x48] sm:$0xf]  ;;  %v8628_v7 = vld [vmem:[#allocation53_spill] sm:$0xff] }
 0x1b5   : > { %v1965_v32 = vadd.f32 %v1957_v56, %v1945_v48  ;;  %v1982_v4 = vmul.f32 %v5985_v36, %v4373_v61  ;;  %v911_v58 = vmax.f32 %v5946_v63, %v900_v31  ;;  %v6072_v34 = vadd.f32 %v1914_v35, %v1902_v20  ;;  %v8630_v63 = vld [vmem:[#allocation31_spill] sm:$0xff]  ;;  %v8631_v35 = vld [vmem:[#allocation52_spill] sm:$0xff] }
 0x1b6   : > { %8625 = vst [vmem:[#allocation13_spill] sm:$0xff] %v6067_v9  ;;  %v1997_v40 = vmul.f32 %v6011_v11, %v4387_v6  ;;  %v1970_v42 = vadd.f32 %v1962_v52, %v1950_v51  ;;  %v6076_v21 = vadd.f32 %v2000_v19, %v1988_v1  ;;  %v2002_v26 = vmul.f32 %v6011_v11, %v4468_v2  ;;  %v904_v19 = vpop.xlane.xlu0 %903  ;;  %v8636_v9 = vld [vmem:[#allocation41_spill] sm:$0xff] }
 0x1b7   : > { %8626 = vst [vmem:[#allocation80_spill] sm:$0xff] %v6072_v34  ;;  %v1985_v0 = vadd.f32 %v1977_v24, %v1965_v32  ;;  %v1947_v48 = vmul.f32 %v5982_v55, %v8391_v60  ;;  %v6085_v56 = vsel %vm3355_vm1, %v8628_v7, %v911_v58  ;;  %1745 = vmax.xlane.f32.xlu0 %v8630_v63 }
 0x1b8   : > { %8627 = vst [vmem:[#allocation12_spill] sm:$0xff] %v6076_v21  ;;  %8629 = vst [vmem:[#allocation84_spill] sm:$0xff] %v6085_v56  ;;  %1828 = vmax.xlane.f32.xlu1 %v8631_v35  ;;  %v1959_v1 = vmul.f32 %v5967_v5, %v8309_v12  ;;  %v6092_v24 = vrot.slane %v3633_v33, %v8563_v16  ;;  %v6094_v52 = vpop.xlane.xlu1 %995  ;;  %v1990_v20 = vadd.f32 %v1982_v4, %v1970_v42  ;;  %v8633_v21 = vld [vmem:[#allocation85_spill] sm:$0xff]  ;;  %v8638_v16 = vld [vmem:[#allocation92_spill] sm:$0xff] }
 0x1b9   : > { %v1979_v13 = vmul.f32 %v5985_v36, %v8551_v8  ;;  %v1964_v51 = vmul.f32 %v5967_v5, %v8311_v59  ;;  %v1961_v31 = vmul.f32 %v5967_v5, %v8496_v15  ;;  %v913_v32 = vmax.f32 %v5979_v3, %v904_v19  ;;  %v8634_v19 = vld [vmem:[#allocation54_spill] sm:$0xff]  ;;  %v8637_v56 = vld [vmem:[#allocation73_spill] sm:$0xff] }
 0x1ba   : > { %v1999_v58 = vmul.f32 %v6011_v11, %v4497_v46  ;;  %v1952_v7 = vmul.f32 %v5982_v55, %v8411_v27  ;;  %v6108_v63 = vrot.slane %v3633_v33, %v8598_v47  ;;  %v6110_v4 = vadd.f32 %v1997_v40, %v1985_v0 }
 0x1bb   : > { %v1984_v42 = vmul.f32 %v5985_v36, %v8412_v17  ;;  %v1949_v35 = vmul.f32 %v5982_v55, %v8565_v23  ;;  %v1981_v3 = vmul.f32 %v5985_v36, %v8633_v21  ;;  %v6120_v34 = vsel %vm3355_vm1, %v8634_v19, %v913_v32  ;;  %1749 = vmax.xlane.f32.xlu0 %v8636_v9 }
 0x1bc   : > { %8632 = vst [vmem:[#allocation46_spill] sm:$0xff] %v6110_v4  ;;  %8635 = vst [vmem:[#allocation22_spill] sm:$0xff] %v6120_v34  ;;  %1832 = vmax.xlane.f32.xlu1 %v8637_v56  ;;  %v6125_v0 = vrot.slane %v3633_v33, %v8575_v41  ;;  %v2056_v40 = vmul.f32 %v6092_v24, %v8314_v28  ;;  %v6129_v4 = vpop.xlane.xlu0 %989  ;;  %v6131_v47 = vpop.xlane.xlu1 %999  ;;  %v1967_v23 = vadd.f32 %v1959_v1, %v1947_v48 }
 0x1bd   : > { %v1972_v21 = vadd.f32 %v1964_v51, %v1952_v7  ;;  %v2004_v32 = vmul.f32 %v6011_v11, %v8638_v16  ;;  %v1969_v19 = vadd.f32 %v1961_v31, %v1949_v35  ;;  %v2001_v9 = vmul.f32 %v6011_v11, %v8574_v57  ;;  %v8639_v7 = vld [vmem:[#allocation32_spill] sm:$0xff]  ;;  %v8640_v31 = vld [vmem:[#allocation43_spill] sm:$0xff] }
 0x1be   : > { %v2044_v56 = vmul.f32 %v6125_v0, %v8400_v44  ;;  %v2076_v34 = vmul.f32 %v6108_v63, %v4242_v29  ;;  %v6142_v28 = vrot.slane %v3633_v33, %v8402_v22  ;;  %v6144_v41 = vadd.f32 %v2002_v26, %v1990_v20 }
 0x1bf   : > { %v1987_v48 = vadd.f32 %v1979_v13, %v1967_v23  ;;  %v1992_v1 = vadd.f32 %v1984_v42, %v1972_v21  ;;  %v1989_v51 = vadd.f32 %v1981_v3, %v1969_v19  ;;  %1826 = vmax.xlane.f32.xlu0 %v8639_v7  ;;  %v1963_v44 = vmul.f32 %v5967_v5, %v8523_v30  ;;  %v8644_v19 = vld [vmem:[#allocation74_spill] sm:$0xff] }
 0x1c0   : > { %1836 = vmax.xlane.f32.xlu1 %v8640_v31  ;;  %v2064_v35 = vadd.f32 %v2056_v40, %v2044_v56  ;;  %v2096_v57 = vmul.f32 %v6142_v28, %v4466_v45  ;;  %v6152_v29 = vpop.xlane.xlu0 %993  ;;  %v6154_v33 = vpop.xlane.xlu1 %1003  ;;  %v1951_v21 = vmul.f32 %v5982_v55, %v8404_v38  ;;  %v2058_v20 = vmul.f32 %v6092_v24, %v8325_v37 }
 0x1c1   : > { %v6156_v26 = vadd.f32 %v1999_v58, %v1987_v48  ;;  %v6158_v23 = vadd.f32 %v2004_v32, %v1992_v1  ;;  %v6164_v13 = vadd.f32 %v2001_v9, %v1989_v51  ;;  %v1983_v5 = vmul.f32 %v5985_v36, %v4330_v49 }
 0x1c2   : > { %v2084_v42 = vadd.f32 %v2076_v34, %v2064_v35  ;;  %v2003_v3 = vmul.f32 %v6011_v11, %v4558_v14  ;;  %v2046_v58 = vmul.f32 %v6125_v0, %v8613_v39  ;;  %v2078_v40 = vmul.f32 %v6108_v63, %v8614_v43  ;;  %v8645_v34 = vld [vmem:[#allocation19_spill] sm:$0xff] }
 0x1c3   : > { %8641 = vst [vmem:[#allocation29_spill] sm:$0xff] %v6156_v26  ;;  %8642 = vst [vmem:[#allocation36_spill] sm:$0xff] %v6158_v23  ;;  %v2055_v55 = vmul.f32 %v6092_v24, %v8615_v18  ;;  %v2060_v32 = vmul.f32 %v6092_v24, %v8586_v10  ;;  %1830 = vmax.xlane.f32.xlu0 %v8644_v19  ;;  %v1971_v11 = vadd.f32 %v1963_v44, %v1951_v21  ;;  %v8665_v23 = vld [vmem:[#allocation79_spill] sm:$0xff] }
 0x1c4   : > { %8643 = vst [vmem:[#allocation45_spill] sm:$0xff] %v6164_v13  ;;  %1840 = vmax.xlane.f32.xlu1 %v8645_v34  ;;  %v6180_v36 = vadd.f32 %v2096_v57, %v2084_v42  ;;  %v2098_v9 = vmul.f32 %v6142_v28, %v8616_v54  ;;  %v6184_v56 = vpop.xlane.xlu0 %997  ;;  %v1081_v48 = vpop.xlane.xlu1 %1080  ;;  %v2066_v1 = vadd.f32 %v2058_v20, %v2046_v58  ;;  %v8647_v34 = vld [vmem:[#allocation34_spill] sm:$0xff]  ;;  %v8649_v13 = vld [vmem:[#allocation44_spill] sm:$0xff] }
 0x1c5   : > { %v2043_v51 = vmul.f32 %v6125_v0, %v8617_v25  ;;  %v2075_v7 = vmul.f32 %v6108_v63, %v8618_v53  ;;  %v2048_v31 = vmul.f32 %v6125_v0, %v8389_v50  ;;  %v1095_v57 = vmax.f32 %v6065_v62, %v1081_v48  ;;  %v8650_v62 = vld [vmem:[#allocation20_spill] sm:$0xff] }
 0x1c6   : > { %8646 = vst [vmem:[#allocation9_spill] sm:$0xff] %v6180_v36  ;;  %v1991_v35 = vadd.f32 %v1983_v5, %v1971_v11  ;;  %v2095_v44 = vmul.f32 %v6142_v28, %v4387_v6  ;;  %v2080_v21 = vmul.f32 %v6108_v63, %v4373_v61  ;;  %v2086_v42 = vadd.f32 %v2078_v40, %v2066_v1 }
 0x1c7   : > { %v2063_v20 = vadd.f32 %v2055_v55, %v2043_v51  ;;  %v2068_v58 = vadd.f32 %v2060_v32, %v2048_v31  ;;  %v2057_v19 = vmul.f32 %v6092_v24, %v8309_v12  ;;  %v6201_v36 = vsel %vm3364_vm2, %v8647_v34, %v1095_v57  ;;  %1834 = vmax.xlane.f32.xlu0 %v8649_v13 }
 0x1c8   : > { %8648 = vst [vmem:[#allocation2_spill] sm:$0xff] %v6201_v36  ;;  %1926 = vmax.xlane.f32.xlu1 %v8650_v62  ;;  %v2100_v5 = vmul.f32 %v6142_v28, %v4468_v2  ;;  %v2062_v11 = vmul.f32 %v6092_v24, %v8311_v59  ;;  %v6209_v40 = vpop.xlane.xlu0 %1001  ;;  %v1085_v55 = vpop.xlane.xlu1 %1084  ;;  %v6211_v32 = vadd.f32 %v2003_v3, %v1991_v35 }
 0x1c9   : > { %v2083_v48 = vadd.f32 %v2075_v7, %v2063_v20  ;;  %v2045_v1 = vmul.f32 %v6125_v0, %v8391_v60  ;;  %v2077_v13 = vmul.f32 %v6108_v63, %v8551_v8  ;;  %v1097_v51 = vmax.f32 %v6094_v52, %v1085_v55  ;;  %v8654_v20 = vld [vmem:[#allocation33_spill] sm:$0xff]  ;;  %v8656_v52 = vld [vmem:[#allocation63_spill] sm:$0xff] }
 0x1ca   : > { %8651 = vst [vmem:[#allocation56_spill] sm:$0xff] %v6211_v32  ;;  %v6218_v31 = vadd.f32 %v2098_v9, %v2086_v42  ;;  %v2088_v57 = vadd.f32 %v2080_v21, %v2068_v58  ;;  %v2050_v34 = vmul.f32 %v6125_v0, %v8411_v27  ;;  %v2097_v7 = vmul.f32 %v6142_v28, %v4497_v46  ;;  %v8657_v9 = vld [vmem:[#allocation26_spill] sm:$0xff] }
 0x1cb   : > { %v6222_v62 = vadd.f32 %v2095_v44, %v2083_v48  ;;  %v2065_v3 = vadd.f32 %v2057_v19, %v2045_v1  ;;  %v2082_v35 = vmul.f32 %v6108_v63, %v8412_v17  ;;  %v6230_v32 = vsel %vm3364_vm2, %v8654_v20, %v1097_v51  ;;  %1838 = vmax.xlane.f32.xlu0 %v8656_v52  ;;  %v3634_v44 = vld [vmem:[%s3788_s9 + $0x4c] sm:$0xf] }
 0x1cc   : > { %8652 = vst [vmem:[#allocation17_spill] sm:$0xff] %v6218_v31  ;;  %8655 = vst [vmem:[#allocation21_spill] sm:$0xff] %v6230_v32  ;;  %1930 = vmax.xlane.f32.xlu1 %v8657_v9  ;;  %v6234_v21 = vadd.f32 %v2100_v5, %v2088_v57  ;;  %v2070_v42 = vadd.f32 %v2062_v11, %v2050_v34  ;;  %v1079_v58 = vpop.xlane.xlu0 %1078  ;;  %v1089_v19 = vpop.xlane.xlu1 %1088  ;;  %v2102_v48 = vmul.f32 %v6142_v28, %v8638_v16  ;;  %v8660_v5 = vld [vmem:[#allocation11_spill] sm:$0xff]  ;;  %v8661_v57 = vld [vmem:[#allocation85_spill] sm:$0xff] }
 0x1cd   : > { %8653 = vst [vmem:[#allocation35_spill] sm:$0xff] %v6222_v62  ;;  %v2085_v55 = vadd.f32 %v2077_v13, %v2065_v3  ;;  %v2059_v1 = vmul.f32 %v6092_v24, %v8496_v15  ;;  %v8659_v62 = vld [vmem:[#allocation5_spill] sm:$0xff]  ;;  %v1094_v20 = vmax.f32 %v6129_v4, %v1079_v58  ;;  %v1099_v52 = vmax.f32 %v6131_v47, %v1089_v19  ;;  %v8662_v3 = vld [vmem:[#allocation18_spill] sm:$0xff]  ;;  %v8664_v32 = vld [vmem:[#allocation8_spill] sm:$0xff] }
 0x1ce   : > { %8658 = vst [vmem:[#allocation68_spill] sm:$0xff] %v6234_v21  ;;  %v6242_v51 = vrot.slane %v3634_v44, %v8659_v62  ;;  %v2047_v11 = vmul.f32 %v6125_v0, %v8660_v5  ;;  %v2079_v34 = vmul.f32 %v6108_v63, %v8661_v57  ;;  %v2090_v13 = vadd.f32 %v2082_v35, %v2070_v42  ;;  %v8663_v21 = vld [vmem:[#allocation4_spill] sm:$0xff]  ;;  %v8666_v47 = vld [vmem:[#allocation66_spill] sm:$0xff] }
 0x1cf   : > { %v2099_v9 = vmul.f32 %v6142_v28, %v8662_v3  ;;  %v6253_v31 = vrot.slane %v3634_v44, %v8663_v21  ;;  %v6256_v36 = vrot.slane %v3634_v44, %v8664_v32  ;;  %v6260_v4 = vsel %vm3364_vm2, %v8665_v23, %v1094_v20  ;;  %v8667_v19 = vld [vmem:[#allocation78_spill] sm:$0xff]  ;;  %v8668_v35 = vld [vmem:[#allocation64_spill] sm:$0xff]  ;;  %v8671_v32 = vld [vmem:[#allocation7_spill] sm:$0xff] }
 0x1d0   : > { %v6264_v58 = vsel %vm3364_vm2, %v8666_v47, %v1099_v52  ;;  %1924 = vmax.xlane.f32.xlu0 %v8667_v19  ;;  %1934 = vmax.xlane.f32.xlu1 %v8668_v35  ;;  %v6268_v42 = vadd.f32 %v2097_v7, %v2085_v55  ;;  %v1083_v26 = vpop.xlane.xlu0 %1082  ;;  %v1093_v21 = vpop.xlane.xlu1 %1092  ;;  %v6270_v3 = vadd.f32 %v2102_v48, %v2090_v13  ;;  %v8672_v23 = vld [vmem:[#allocation38_spill] sm:$0xff]  ;;  %v8673_v48 = vld [vmem:[#allocation83_spill] sm:$0xff] }
 0x1d1   : > { %v2067_v16 = vadd.f32 %v2059_v1, %v2047_v11  ;;  %v2133_v57 = vmul.f32 %v6253_v31, %v8671_v32  ;;  %v2145_v20 = vmul.f32 %v6242_v51, %v8672_v23  ;;  %v1096_v52 = vmax.f32 %v6152_v29, %v1083_v26  ;;  %v8674_v35 = vld [vmem:[#allocation55_spill] sm:$0xff] }
 0x1d2   : > { %8669 = vst [vmem:[#allocation65_spill] sm:$0xff] %v6268_v42  ;;  %8670 = vst [vmem:[#allocation48_spill] sm:$0xff] %v6270_v3  ;;  %v1101_v47 = vmax.f32 %v6154_v33, %v1093_v21  ;;  %v6279_v19 = vrot.slane %v3634_v44, %v8402_v22  ;;  %v2061_v7 = vmul.f32 %v6092_v24, %v8523_v30  ;;  %v8676_v33 = vld [vmem:[#allocation76_spill] sm:$0xff]  ;;  %v8678_v21 = vld [vmem:[#allocation75_spill] sm:$0xff] }
 0x1d3   : > { %v2087_v55 = vadd.f32 %v2079_v34, %v2067_v16  ;;  %v2165_v1 = vmul.f32 %v6256_v36, %v8673_v48  ;;  %v2049_v11 = vmul.f32 %v6125_v0, %v8404_v38  ;;  %v2081_v13 = vmul.f32 %v6108_v63, %v4330_v49  ;;  %v8679_v16 = vld [vmem:[#allocation90_spill] sm:$0xff]  ;;  %v8681_v42 = vld [vmem:[#allocation84_spill] sm:$0xff] }
 0x1d4   : > { %v6291_v29 = vsel %vm3364_vm2, %v8674_v35, %v1096_v52  ;;  %v6295_v26 = vsel %vm3364_vm2, %v8676_v33, %v1101_v47  ;;  %1928 = vmax.xlane.f32.xlu0 %v8678_v21  ;;  %1938 = vmax.xlane.f32.xlu1 %v8679_v16  ;;  %v2147_v24 = vmul.f32 %v6242_v51, %v8325_v37  ;;  %v1087_v44 = vpop.xlane.xlu0 %1086  ;;  %v6301_v0 = vpop.xlane.xlu1 %1178 }
 0x1d5   : > { %8675 = vst [vmem:[#allocation14_spill] sm:$0xff] %v6291_v29  ;;  %8677 = vst [vmem:[#allocation67_spill] sm:$0xff] %v6295_v26  ;;  %v2153_v34 = vadd.f32 %v2145_v20, %v2133_v57  ;;  %v2185_v63 = vmul.f32 %v6279_v19, %v4466_v45  ;;  %v2101_v52 = vmul.f32 %v6142_v28, %v4558_v14 }
 0x1d6   : > { %v2144_v47 = vmul.f32 %v6242_v51, %v8615_v18  ;;  %v1098_v35 = vmax.f32 %v6184_v56, %v1087_v44  ;;  %v2069_v33 = vadd.f32 %v2061_v7, %v2049_v11  ;;  %v2135_v21 = vmul.f32 %v6253_v31, %v8613_v39  ;;  %v8683_v56 = vld [vmem:[#allocation77_spill] sm:$0xff] }
 0x1d7   : > { %v2167_v16 = vmul.f32 %v6256_v36, %v8614_v43  ;;  %v6314_v3 = vadd.f32 %v2099_v9, %v2087_v55  ;;  %v2173_v57 = vadd.f32 %v2165_v1, %v2153_v34  ;;  %v2132_v20 = vmul.f32 %v6253_v31, %v8617_v25  ;;  %v8684_v7 = vld [vmem:[#allocation13_spill] sm:$0xff] }
 0x1d8   : > { %v2164_v28 = vmul.f32 %v6256_v36, %v8618_v53  ;;  %v6322_v26 = vsel %vm3364_vm2, %v8681_v42, %v1098_v35  ;;  %1932 = vmax.xlane.f32.xlu0 %v8683_v56  ;;  %2015 = vmax.xlane.f32.xlu1 %v8684_v7  ;;  %v2089_v11 = vadd.f32 %v2081_v13, %v2069_v33  ;;  %v1091_v29 = vpop.xlane.xlu0 %1090  ;;  %v6326_v9 = vpop.xlane.xlu1 %1182 }
 0x1d9   : > { %8680 = vst [vmem:[#allocation47_spill] sm:$0xff] %v6314_v3  ;;  %8682 = vst [vmem:[#allocation27_spill] sm:$0xff] %v6322_v26  ;;  %v2155_v44 = vadd.f32 %v2147_v24, %v2135_v21  ;;  %v6328_v55 = vadd.f32 %v2185_v63, %v2173_v57  ;;  %v2187_v1 = vmul.f32 %v6279_v19, %v8616_v54  ;;  %v8687_v21 = vld [vmem:[#allocation22_spill] sm:$0xff] }
 0x1da   : > { %v2152_v34 = vadd.f32 %v2144_v47, %v2132_v20  ;;  %v2149_v3 = vmul.f32 %v6242_v51, %v8586_v10  ;;  %v1100_v42 = vmax.f32 %v6209_v40, %v1091_v29  ;;  %v6335_v35 = vadd.f32 %v2101_v52, %v2089_v11  ;;  %v8689_v29 = vld [vmem:[#allocation80_spill] sm:$0xff] }
 0x1db   : > { %8685 = vst [vmem:[#allocation30_spill] sm:$0xff] %v6328_v55  ;;  %v2175_v56 = vadd.f32 %v2167_v16, %v2155_v44  ;;  %v2184_v13 = vmul.f32 %v6279_v19, %v4387_v6  ;;  %v2137_v63 = vmul.f32 %v6253_v31, %v8389_v50  ;;  %v2169_v33 = vmul.f32 %v6256_v36, %v4373_v61  ;;  %v8690_v52 = vld [vmem:[#allocation12_spill] sm:$0xff] }
 0x1dc   : > { %8686 = vst [vmem:[#allocation50_spill] sm:$0xff] %v6335_v35  ;;  %v2172_v24 = vadd.f32 %v2164_v28, %v2152_v34  ;;  %v2146_v47 = vmul.f32 %v6242_v51, %v8309_v12  ;;  %v6347_v40 = vsel %vm3364_vm2, %v8687_v21, %v1100_v42  ;;  %1936 = vmax.xlane.f32.xlu0 %v8689_v29  ;;  %v6355_v20 = vpop.xlane.xlu0 %1176  ;;  %v6357_v28 = vpop.xlane.xlu1 %1186  ;;  %v3635_v42 = vld [vmem:[%s3788_s9 + $0x50] sm:$0xf] }
 0x1dd   : > { %8688 = vst [vmem:[#allocation37_spill] sm:$0xff] %v6347_v40  ;;  %2019 = vmax.xlane.f32.xlu1 %v8690_v52  ;;  %v2189_v16 = vmul.f32 %v6279_v19, %v4468_v2  ;;  %v2134_v57 = vmul.f32 %v6253_v31, %v8391_v60  ;;  %v6359_v7 = vadd.f32 %v2187_v1, %v2175_v56  ;;  %v8695_v40 = vld [vmem:[#allocation8_spill] sm:$0xff] }
 0x1de   : > { %v2157_v11 = vadd.f32 %v2149_v3, %v2137_v63  ;;  %v2166_v44 = vmul.f32 %v6256_v36, %v8551_v8  ;;  %v2151_v34 = vmul.f32 %v6242_v51, %v8311_v59  ;;  %v6366_v21 = vadd.f32 %v2184_v13, %v2172_v24  ;;  %v8694_v24 = vld [vmem:[#allocation85_spill] sm:$0xff] }
 0x1df   : > { %8691 = vst [vmem:[#allocation72_spill] sm:$0xff] %v6359_v7  ;;  %v2186_v29 = vmul.f32 %v6279_v19, %v4497_v46  ;;  %v2148_v52 = vmul.f32 %v6242_v51, %v8496_v15  ;;  %v6373_v35 = vrot.slane %v3635_v42, %v8659_v62  ;;  %v2154_v3 = vadd.f32 %v2146_v47, %v2134_v57  ;;  %v8693_v7 = vld [vmem:[#allocation46_spill] sm:$0xff]  ;;  %v8700_v62 = vld [vmem:[#allocation4_spill] sm:$0xff] }
 0x1e0   : > { %8692 = vst [vmem:[#allocation57_spill] sm:$0xff] %v6366_v21  ;;  %v2177_v1 = vadd.f32 %v2169_v33, %v2157_v11  ;;  %v2139_v56 = vmul.f32 %v6253_v31, %v8411_v27  ;;  %v2171_v63 = vmul.f32 %v6256_v36, %v8412_v17  ;;  %2013 = vmax.xlane.f32.xlu0 %v8693_v7  ;;  %v6388_v33 = vpop.xlane.xlu0 %1180  ;;  %v6390_v47 = vpop.xlane.xlu1 %1190  ;;  %v8698_v7 = vld [vmem:[#allocation92_spill] sm:$0xff]  ;;  %v8699_v17 = vld [vmem:[#allocation18_spill] sm:$0xff] }
 0x1e1   : > { %2023 = vmax.xlane.f32.xlu1 %v6144_v41  ;;  %v2136_v13 = vmul.f32 %v6253_v31, %v8660_v5  ;;  %v2168_v21 = vmul.f32 %v6256_v36, %v8694_v24  ;;  %v6386_v55 = vrot.slane %v3635_v42, %v8695_v40  ;;  %8696 = vst [vmem:[#allocation40_spill] sm:$0xff] %v6388_v33  ;;  %8697 = vst [vmem:[#allocation61_spill] sm:$0xff] %v6390_v47 }
 0x1e2   : > { %v6392_v57 = vadd.f32 %v2189_v16, %v2177_v1  ;;  %v2174_v11 = vadd.f32 %v2166_v44, %v2154_v3  ;;  %v2159_v26 = vadd.f32 %v2151_v34, %v2139_v56  ;;  %v2191_v41 = vmul.f32 %v6279_v19, %v8698_v7  ;;  %v8702_v34 = vld [vmem:[#allocation29_spill] sm:$0xff] }
 0x1e3   : > { %v2156_v15 = vadd.f32 %v2148_v52, %v2136_v13  ;;  %v2188_v5 = vmul.f32 %v6279_v19, %v8699_v17  ;;  %v6399_v24 = vrot.slane %v3635_v42, %v8700_v62  ;;  %v2243_v40 = vmul.f32 %v6373_v35, %v8672_v23  ;;  %v8703_v52 = vld [vmem:[#allocation36_spill] sm:$0xff] }
 0x1e4   : > { %v6403_v33 = vadd.f32 %v2186_v29, %v2174_v11  ;;  %v2179_v47 = vadd.f32 %v2171_v63, %v2159_v26  ;;  %v6406_v16 = vrot.slane %v3635_v42, %v8402_v22  ;;  %v2150_v44 = vmul.f32 %v6242_v51, %v8523_v30  ;;  %2017 = vmax.xlane.f32.xlu0 %v8702_v34  ;;  %v6416_v56 = vpop.xlane.xlu0 %1184  ;;  %v1268_v26 = vpop.xlane.xlu1 %1267 }
 0x1e5   : > { %2027 = vmax.xlane.f32.xlu1 %v8703_v52  ;;  %v2176_v1 = vadd.f32 %v2168_v21, %v2156_v15  ;;  %v2231_v3 = vmul.f32 %v6399_v24, %v8671_v32  ;;  %v2263_v29 = vmul.f32 %v6386_v55, %v8673_v48  ;;  %v2138_v51 = vmul.f32 %v6253_v31, %v8404_v38 }
 0x1e6   : > { %8701 = vst [vmem:[#allocation42_spill] sm:$0xff] %v6403_v33  ;;  %v6418_v42 = vadd.f32 %v2191_v41, %v2179_v47  ;;  %v2170_v63 = vmul.f32 %v6256_v36, %v4330_v49  ;;  %v2245_v15 = vmul.f32 %v6373_v35, %v8325_v37  ;;  %v1282_v21 = vmax.f32 %v6301_v0, %v1268_v26  ;;  %v8706_v41 = vld [vmem:[#allocation2_spill] sm:$0xff]  ;;  %v8709_v0 = vld [vmem:[#allocation9_spill] sm:$0xff] }
 0x1e7   : > { %v6427_v13 = vadd.f32 %v2188_v5, %v2176_v1  ;;  %v2251_v11 = vadd.f32 %v2243_v40, %v2231_v3  ;;  %v2283_v34 = vmul.f32 %v6406_v16, %v4466_v45  ;;  %v2158_v52 = vadd.f32 %v2150_v44, %v2138_v51  ;;  %v8708_v5 = vld [vmem:[#allocation45_spill] sm:$0xff] }
 0x1e8   : > { %8704 = vst [vmem:[#allocation23_spill] sm:$0xff] %v6418_v42  ;;  %v2190_v47 = vmul.f32 %v6279_v19, %v4558_v14  ;;  %v2233_v31 = vmul.f32 %v6399_v24, %v8613_v39  ;;  %v2265_v36 = vmul.f32 %v6386_v55, %v8614_v43  ;;  %v6439_v42 = vsel %vm3373_vm3, %v8706_v41, %v1282_v21  ;;  %v6445_v1 = vpop.xlane.xlu0 %1188  ;;  %v1272_v19 = vpop.xlane.xlu1 %1271 }
 0x1e9   : > { %8705 = vst [vmem:[#allocation69_spill] sm:$0xff] %v6427_v13  ;;  %8707 = vst [vmem:[#allocation28_spill] sm:$0xff] %v6439_v42  ;;  %2021 = vmax.xlane.f32.xlu0 %v8708_v5  ;;  %2113 = vmax.xlane.f32.xlu1 %v8709_v0  ;;  %v2271_v40 = vadd.f32 %v2263_v29, %v2251_v11  ;;  %v2242_v44 = vmul.f32 %v6373_v35, %v8615_v18 }
 0x1ea   : > { %v2178_v3 = vadd.f32 %v2170_v63, %v2158_v52  ;;  %v2253_v26 = vadd.f32 %v2245_v15, %v2233_v31  ;;  %v2285_v51 = vmul.f32 %v6406_v16, %v8616_v54  ;;  %v2230_v21 = vmul.f32 %v6399_v24, %v8617_v25  ;;  %v8712_v31 = vld [vmem:[#allocation21_spill] sm:$0xff] }
 0x1eb   : > { %v1284_v41 = vmax.f32 %v6326_v9, %v1272_v19  ;;  %v6452_v5 = vadd.f32 %v2283_v34, %v2271_v40  ;;  %v2262_v29 = vmul.f32 %v6386_v55, %v8618_v53  ;;  %v2282_v11 = vmul.f32 %v6406_v16, %v4387_v6  ;;  %v8714_v34 = vld [vmem:[#allocation56_spill] sm:$0xff]  ;;  %v8715_v40 = vld [vmem:[#allocation17_spill] sm:$0xff] }
 0x1ec   : > { %v6458_v0 = vadd.f32 %v2190_v47, %v2178_v3  ;;  %v2273_v63 = vadd.f32 %v2265_v36, %v2253_v26  ;;  %v2235_v15 = vmul.f32 %v6399_v24, %v8389_v50  ;;  %v2247_v52 = vmul.f32 %v6373_v35, %v8586_v10  ;;  %v1266_v36 = vpop.xlane.xlu0 %1265  ;;  %v1276_v3 = vpop.xlane.xlu1 %1275 }
 0x1ed   : > { %8710 = vst [vmem:[#allocation62_spill] sm:$0xff] %v6452_v5  ;;  %v6466_v9 = vsel %vm3373_vm3, %v8712_v31, %v1284_v41  ;;  %2025 = vmax.xlane.f32.xlu0 %v8714_v34  ;;  %2117 = vmax.xlane.f32.xlu1 %v8715_v40  ;;  %v2250_v19 = vadd.f32 %v2242_v44, %v2230_v21  ;;  %v3636_v5 = vld [vmem:[%s3788_s9 + $0x54] sm:$0xf] }
 0x1ee   : > { %8711 = vst [vmem:[#allocation60_spill] sm:$0xff] %v6458_v0  ;;  %8713 = vst [vmem:[#allocation51_spill] sm:$0xff] %v6466_v9  ;;  %v2267_v47 = vmul.f32 %v6386_v55, %v4373_v61  ;;  %v6472_v26 = vadd.f32 %v2285_v51, %v2273_v63  ;;  %v2287_v0 = vmul.f32 %v6406_v16, %v4468_v2 }
 0x1ef   : > { %v2232_v41 = vmul.f32 %v6399_v24, %v8391_v60  ;;  %v2244_v31 = vmul.f32 %v6373_v35, %v8309_v12  ;;  %v1281_v34 = vmax.f32 %v6355_v20, %v1266_v36  ;;  %v1286_v44 = vmax.f32 %v6357_v28, %v1276_v3 }
 0x1f0   : > { %8716 = vst [vmem:[#allocation53_spill] sm:$0xff] %v6472_v26  ;;  %v2270_v21 = vadd.f32 %v2262_v29, %v2250_v19  ;;  %v2264_v40 = vmul.f32 %v6386_v55, %v8551_v8  ;;  %v2255_v9 = vadd.f32 %v2247_v52, %v2235_v15  ;;  %v2284_v51 = vmul.f32 %v6406_v16, %v4497_v46  ;;  %v8719_v29 = vld [vmem:[#allocation35_spill] sm:$0xff]  ;;  %v8720_v15 = vld [vmem:[#allocation68_spill] sm:$0xff]  ;;  %v8721_v52 = vld [vmem:[#allocation5_spill] sm:$0xff]  ;;  %v1270_v36 = vpop.xlane.xlu0 %1269  ;;  %v1280_v3 = vpop.xlane.xlu1 %1279 }
 0x1f1   : > { %v2237_v63 = vmul.f32 %v6399_v24, %v8411_v27  ;;  %v2249_v26 = vmul.f32 %v6373_v35, %v8311_v59  ;;  %v6493_v20 = vsel %vm3373_vm3, %v6260_v4, %v1281_v34  ;;  %v6497_v28 = vsel %vm3373_vm3, %v6264_v58, %v1286_v44  ;;  %2111 = vmax.xlane.f32.xlu0 %v8719_v29  ;;  %v8723_v27 = vld [vmem:[#allocation81_spill] sm:$0xff]  ;;  %v8724_v34 = vld [vmem:[#allocation40_spill] sm:$0xff]  ;;  %v8727_v46 = vld [vmem:[#allocation11_spill] sm:$0xff] }
 0x1f2   : > { %8717 = vst [vmem:[#allocation31_spill] sm:$0xff] %v6493_v20  ;;  %8718 = vst [vmem:[#allocation52_spill] sm:$0xff] %v6497_v28  ;;  %2121 = vmax.xlane.f32.xlu1 %v8720_v15  ;;  %v6502_v19 = vrot.slane %v3636_v5, %v8721_v52  ;;  %v6504_v13 = vadd.f32 %v2282_v11, %v2270_v21  ;;  %v2275_v42 = vadd.f32 %v2267_v47, %v2255_v9  ;;  %v8725_v58 = vld [vmem:[#allocation61_spill] sm:$0xff]  ;;  %v8726_v15 = vld [vmem:[#allocation8_spill] sm:$0xff] }
 0x1f3   : > { %v2252_v33 = vadd.f32 %v2244_v31, %v2232_v41  ;;  %v2269_v4 = vmul.f32 %v6386_v55, %v8723_v27  ;;  %v1283_v20 = vmax.f32 %v8724_v34, %v1270_v36  ;;  %v1288_v44 = vmax.f32 %v8725_v58, %v1280_v3  ;;  %v8728_v21 = vld [vmem:[#allocation58_spill] sm:$0xff]  ;;  %v8731_v36 = vld [vmem:[#allocation67_spill] sm:$0xff]  ;;  %v8733_v34 = vld [vmem:[#allocation65_spill] sm:$0xff] }
 0x1f4   : > { %8722 = vst [vmem:[#allocation54_spill] sm:$0xff] %v6504_v13  ;;  %v2289_v29 = vmul.f32 %v6406_v16, %v8698_v7  ;;  %v6513_v28 = vrot.slane %v3636_v5, %v8726_v15  ;;  %v2257_v52 = vadd.f32 %v2249_v26, %v2237_v63  ;;  %v2234_v11 = vmul.f32 %v6399_v24, %v8727_v46  ;;  %v8729_v41 = vld [vmem:[#allocation14_spill] sm:$0xff]  ;;  %v8734_v26 = vld [vmem:[#allocation48_spill] sm:$0xff]  ;;  %v1274_v58 = vpop.xlane.xlu0 %1273  ;;  %v6534_v13 = vpop.xlane.xlu1 %1365  ;;  %v8735_v15 = vld [vmem:[#allocation85_spill] sm:$0xff] }
 0x1f5   : > { %v2246_v9 = vmul.f32 %v6373_v35, %v8728_v21  ;;  %v6520_v47 = vrot.slane %v3636_v5, %v8700_v62  ;;  %v6524_v31 = vsel %vm3373_vm3, %v8729_v41, %v1283_v20  ;;  %v6528_v3 = vsel %vm3373_vm3, %v8731_v36, %v1288_v44  ;;  %2115 = vmax.xlane.f32.xlu0 %v8733_v34 }
 0x1f6   : > { %8730 = vst [vmem:[#allocation41_spill] sm:$0xff] %v6524_v31  ;;  %8732 = vst [vmem:[#allocation73_spill] sm:$0xff] %v6528_v3  ;;  %2125 = vmax.xlane.f32.xlu1 %v8734_v26  ;;  %v2332_v63 = vmul.f32 %v6502_v19, %v8672_v23  ;;  %v6536_v62 = vadd.f32 %v2287_v0, %v2275_v42  ;;  %v2272_v46 = vadd.f32 %v2264_v40, %v2252_v33  ;;  %v8736_v40 = vld [vmem:[#allocation27_spill] sm:$0xff] }
 0x1f7   : > { %v2266_v20 = vmul.f32 %v6386_v55, %v8735_v15  ;;  %v2286_v44 = vmul.f32 %v6406_v16, %v8699_v17  ;;  %v1285_v41 = vmax.f32 %v6416_v56, %v1274_v58  ;;  %v2277_v36 = vadd.f32 %v2269_v4, %v2257_v52  ;;  %v8738_v56 = vld [vmem:[#allocation47_spill] sm:$0xff]  ;;  %v8739_v52 = vld [vmem:[#allocation30_spill] sm:$0xff] }
 0x1f8   : > { %v2320_v34 = vmul.f32 %v6520_v47, %v8671_v32  ;;  %v2352_v26 = vmul.f32 %v6513_v28, %v8673_v48  ;;  %v6547_v3 = vadd.f32 %v2284_v51, %v2272_v46  ;;  %v2254_v42 = vadd.f32 %v2246_v9, %v2234_v11  ;;  %v1278_v46 = vpop.xlane.xlu0 %1277  ;;  %v6562_v51 = vpop.xlane.xlu1 %1369 }
 0x1f9   : > { %v6550_v33 = vrot.slane %v3636_v5, %v8402_v22  ;;  %v2248_v0 = vmul.f32 %v6373_v35, %v8523_v30  ;;  %v6556_v31 = vsel %vm3373_vm3, %v8736_v40, %v1285_v41  ;;  %2119 = vmax.xlane.f32.xlu0 %v8738_v56  ;;  %v6560_v4 = vadd.f32 %v2289_v29, %v2277_v36 }
 0x1fa   : > { %8737 = vst [vmem:[#allocation32_spill] sm:$0xff] %v6556_v31  ;;  %2202 = vmax.xlane.f32.xlu1 %v8739_v52  ;;  %v2340_v58 = vadd.f32 %v2332_v63, %v2320_v34  ;;  %v2274_v11 = vadd.f32 %v2266_v20, %v2254_v42  ;;  %v2236_v5 = vmul.f32 %v6399_v24, %v8404_v38  ;;  %v8741_v34 = vld [vmem:[#allocation37_spill] sm:$0xff]  ;;  %v8744_v42 = vld [vmem:[#allocation72_spill] sm:$0xff] }
 0x1fb   : > { %8740 = vst [vmem:[#allocation43_spill] sm:$0xff] %v6560_v4  ;;  %v2268_v35 = vmul.f32 %v6386_v55, %v4330_v49  ;;  %v2334_v9 = vmul.f32 %v6502_v19, %v8325_v37  ;;  %v1287_v41 = vmax.f32 %v6445_v1, %v1278_v46  ;;  %v2372_v29 = vmul.f32 %v6550_v33, %v4466_v45 }
 0x1fc   : > { %v2360_v40 = vadd.f32 %v2352_v26, %v2340_v58  ;;  %v2331_v63 = vmul.f32 %v6502_v19, %v8615_v18  ;;  %v2256_v36 = vadd.f32 %v2248_v0, %v2236_v5  ;;  %v2288_v20 = vmul.f32 %v6406_v16, %v4558_v14  ;;  %v8743_v26 = vld [vmem:[#allocation50_spill] sm:$0xff]  ;;  %v6591_v56 = vpop.xlane.xlu0 %1363  ;;  %v6593_v52 = vpop.xlane.xlu1 %1373 }
 0x1fd   : > { %v2322_v24 = vmul.f32 %v6520_v47, %v8613_v39  ;;  %v2354_v55 = vmul.f32 %v6513_v28, %v8614_v43  ;;  %v6583_v1 = vsel %vm3373_vm3, %v8741_v34, %v1287_v41  ;;  %2123 = vmax.xlane.f32.xlu0 %v8743_v26  ;;  %v2319_v0 = vmul.f32 %v6520_v47, %v8617_v25 }
 0x1fe   : > { %8742 = vst [vmem:[#allocation74_spill] sm:$0xff] %v6583_v1  ;;  %2206 = vmax.xlane.f32.xlu1 %v8744_v42  ;;  %v2351_v16 = vmul.f32 %v6513_v28, %v8618_v53  ;;  %v2276_v58 = vadd.f32 %v2268_v35, %v2256_v36  ;;  %v2374_v5 = vmul.f32 %v6550_v33, %v8616_v54  ;;  %v8748_v36 = vld [vmem:[#allocation57_spill] sm:$0xff] }
 0x1ff   : > { %v2342_v46 = vadd.f32 %v2334_v9, %v2322_v24  ;;  %v2336_v41 = vmul.f32 %v6502_v19, %v8586_v10  ;;  %v6599_v34 = vadd.f32 %v2286_v44, %v2274_v11  ;;  %v6601_v26 = vadd.f32 %v2372_v29, %v2360_v40 }
 0x200   : > { %v2339_v42 = vadd.f32 %v2331_v63, %v2319_v0  ;;  %v2371_v1 = vmul.f32 %v6550_v33, %v4387_v6  ;;  %v6605_v31 = vadd.f32 %v2288_v20, %v2276_v58  ;;  %v2324_v35 = vmul.f32 %v6520_v47, %v8389_v50  ;;  %v6617_v29 = vpop.xlane.xlu0 %1367  ;;  %v6619_v63 = vpop.xlane.xlu1 %1377  ;;  %v3637_v0 = vld [vmem:[%s3788_s9 + $0x58] sm:$0xf] }
 0x201   : > { %8745 = vst [vmem:[#allocation19_spill] sm:$0xff] %v6599_v34  ;;  %8746 = vst [vmem:[#allocation34_spill] sm:$0xff] %v6601_v26  ;;  %v2362_v4 = vadd.f32 %v2354_v55, %v2342_v46  ;;  %v2356_v9 = vmul.f32 %v6513_v28, %v4373_v61  ;;  %2200 = vmax.xlane.f32.xlu0 %v8748_v36  ;;  %v2376_v11 = vmul.f32 %v6550_v33, %v4468_v2  ;;  %v8751_v46 = vld [vmem:[#allocation91_spill] sm:$0xff]  ;;  %v8752_v36 = vld [vmem:[#allocation5_spill] sm:$0xff] }
 0x202   : > { %8747 = vst [vmem:[#allocation44_spill] sm:$0xff] %v6605_v31  ;;  %2210 = vmax.xlane.f32.xlu1 %v6392_v57  ;;  %v2359_v44 = vadd.f32 %v2351_v16, %v2339_v42  ;;  %v2333_v40 = vmul.f32 %v6502_v19, %v8309_v12  ;;  %v2344_v24 = vadd.f32 %v2336_v41, %v2324_v35  ;;  %v8756_v34 = vld [vmem:[#allocation8_spill] sm:$0xff] }
 0x203   : > { %v6621_v20 = vadd.f32 %v2374_v5, %v2362_v4  ;;  %v2321_v55 = vmul.f32 %v6520_v47, %v8391_v60  ;;  %v2338_v57 = vmul.f32 %v6502_v19, %v8311_v59  ;;  %v2353_v58 = vmul.f32 %v6513_v28, %v8551_v8  ;;  %v8753_v5 = vld [vmem:[#allocation24_spill] sm:$0xff] }
 0x204   : > { %v6628_v16 = vadd.f32 %v2371_v1, %v2359_v44  ;;  %v2373_v42 = vmul.f32 %v6550_v33, %v8751_v46  ;;  %v6635_v31 = vrot.slane %v3637_v0, %v8752_v36  ;;  %v2364_v4 = vadd.f32 %v2356_v9, %v2344_v24  ;;  %v8754_v44 = vld [vmem:[#allocation42_spill] sm:$0xff]  ;;  %v6650_v24 = vpop.xlane.xlu0 %1371  ;;  %v1455_v36 = vpop.xlane.xlu1 %1454 }
 0x205   : > { %8749 = vst [vmem:[#allocation20_spill] sm:$0xff] %v6621_v20  ;;  %v2326_v41 = vmul.f32 %v6520_v47, %v8753_v5  ;;  %v2358_v35 = vmul.f32 %v6513_v28, %v8723_v27  ;;  %v2335_v1 = vmul.f32 %v6502_v19, %v8728_v21  ;;  %2204 = vmax.xlane.f32.xlu0 %v8754_v44  ;;  %8757 = vst [vmem:[#allocation63_spill] sm:$0xff] %v6650_v24  ;;  %v8758_v27 = vld [vmem:[#allocation11_spill] sm:$0xff]  ;;  %v8759_v21 = vld [vmem:[#allocation4_spill] sm:$0xff] }
 0x206   : > { %8750 = vst [vmem:[#allocation33_spill] sm:$0xff] %v6628_v16  ;;  %v8755_v16 = vld [vmem:[#allocation23_spill] sm:$0xff]  ;;  %v2341_v20 = vadd.f32 %v2333_v40, %v2321_v55  ;;  %v2378_v26 = vmul.f32 %v6550_v33, %v8698_v7  ;;  %v6648_v9 = vrot.slane %v3637_v0, %v8756_v34  ;;  %v2323_v59 = vmul.f32 %v6520_v47, %v8758_v27  ;;  %v8762_v27 = vld [vmem:[#allocation69_spill] sm:$0xff] }
 0x207   : > { %2214 = vmax.xlane.f32.xlu1 %v8755_v16  ;;  %v2346_v5 = vadd.f32 %v2338_v57, %v2326_v41  ;;  %v2355_v44 = vmul.f32 %v6513_v28, %v8735_v15  ;;  %v6657_v16 = vrot.slane %v3637_v0, %v8759_v21  ;;  %v1469_v40 = vmax.f32 %v6534_v13, %v1455_v36  ;;  %v8760_v15 = vld [vmem:[#allocation28_spill] sm:$0xff]  ;;  %v8763_v13 = vld [vmem:[#allocation62_spill] sm:$0xff] }
 0x208   : > { %v6660_v55 = vadd.f32 %v2376_v11, %v2364_v4  ;;  %v2361_v7 = vadd.f32 %v2353_v58, %v2341_v20  ;;  %v2430_v34 = vmul.f32 %v6635_v31, %v8672_v23  ;;  %v2343_v46 = vadd.f32 %v2335_v1, %v2323_v59  ;;  %v6679_v59 = vpop.xlane.xlu0 %1375  ;;  %v1459_v58 = vpop.xlane.xlu1 %1458 }
 0x209   : > { %v2366_v24 = vadd.f32 %v2358_v35, %v2346_v5  ;;  %v2375_v57 = vmul.f32 %v6550_v33, %v8699_v17  ;;  %v2418_v41 = vmul.f32 %v6657_v16, %v8671_v32  ;;  %v6670_v21 = vsel %vm3382_vm4, %v8760_v15, %v1469_v40  ;;  %2208 = vmax.xlane.f32.xlu0 %v8762_v27 }
 0x20a   : > { %8761 = vst [vmem:[#allocation26_spill] sm:$0xff] %v6670_v21  ;;  %v2450_v11 = vmul.f32 %v6648_v9, %v8673_v48  ;;  %v6677_v20 = vrot.slane %v3637_v0, %v8402_v22  ;;  %v6681_v36 = vadd.f32 %v2373_v42, %v2361_v7  ;;  %v2363_v5 = vadd.f32 %v2355_v44, %v2343_v46  ;;  %v8765_v46 = vld [vmem:[#allocation51_spill] sm:$0xff]  ;;  %v8768_v42 = vld [vmem:[#allocation53_spill] sm:$0xff] }
 0x20b   : > { %2300 = vmax.xlane.f32.xlu1 %v8763_v13  ;;  %v6683_v4 = vadd.f32 %v2378_v26, %v2366_v24  ;;  %v2337_v15 = vmul.f32 %v6502_v19, %v8523_v30  ;;  %v1471_v27 = vmax.f32 %v6562_v51, %v1459_v58  ;;  %v2438_v35 = vadd.f32 %v2430_v34, %v2418_v41  ;;  %v8767_v34 = vld [vmem:[#allocation60_spill] sm:$0xff] }
 0x20c   : > { %v2470_v1 = vmul.f32 %v6677_v20, %v4466_v45  ;;  %v2325_v0 = vmul.f32 %v6520_v47, %v8404_v38  ;;  %v6692_v40 = vadd.f32 %v2375_v57, %v2363_v5  ;;  %v2357_v7 = vmul.f32 %v6513_v28, %v4330_v49  ;;  %v1453_v44 = vpop.xlane.xlu0 %1452  ;;  %v1463_v28 = vpop.xlane.xlu1 %1462 }
 0x20d   : > { %v2377_v26 = vmul.f32 %v6550_v33, %v4558_v14  ;;  %v2432_v19 = vmul.f32 %v6635_v31, %v8325_v37  ;;  %v6702_v51 = vsel %vm3382_vm4, %v8765_v46, %v1471_v27  ;;  %2212 = vmax.xlane.f32.xlu0 %v8767_v34  ;;  %v2458_v47 = vadd.f32 %v2450_v11, %v2438_v35  ;;  %v8770_v34 = vld [vmem:[#allocation31_spill] sm:$0xff] }
 0x20e   : > { %8764 = vst [vmem:[#allocation79_spill] sm:$0xff] %v6692_v40  ;;  %8766 = vst [vmem:[#allocation66_spill] sm:$0xff] %v6702_v51  ;;  %v2429_v24 = vmul.f32 %v6635_v31, %v8615_v18  ;;  %v2345_v57 = vadd.f32 %v2337_v15, %v2325_v0  ;;  %v2420_v33 = vmul.f32 %v6657_v16, %v8613_v39  ;;  %v8789_v51 = vld [vmem:[#allocation85_spill] sm:$0xff] }
 0x20f   : > { %2304 = vmax.xlane.f32.xlu1 %v8768_v42  ;;  %v2452_v41 = vmul.f32 %v6648_v9, %v8614_v43  ;;  %v2472_v13 = vmul.f32 %v6677_v20, %v8616_v54  ;;  %v1468_v58 = vmax.f32 %v6591_v56, %v1453_v44  ;;  %v1473_v5 = vmax.f32 %v6593_v52, %v1463_v28  ;;  %v8772_v56 = vld [vmem:[#allocation52_spill] sm:$0xff]  ;;  %v8790_v40 = vld [vmem:[#allocation5_spill] sm:$0xff] }
 0x210   : > { %v6716_v11 = vadd.f32 %v2470_v1, %v2458_v47  ;;  %v2417_v27 = vmul.f32 %v6657_v16, %v8617_v25  ;;  %v2365_v35 = vadd.f32 %v2357_v7, %v2345_v57  ;;  %v2440_v15 = vadd.f32 %v2432_v19, %v2420_v33  ;;  %v8774_v1 = vld [vmem:[#allocation54_spill] sm:$0xff]  ;;  %v1457_v19 = vpop.xlane.xlu0 %1456  ;;  %v1467_v47 = vpop.xlane.xlu1 %1466 }
 0x211   : > { %v2449_v0 = vmul.f32 %v6648_v9, %v8618_v53  ;;  %v2434_v46 = vmul.f32 %v6635_v31, %v8586_v10  ;;  %v6726_v42 = vsel %vm3382_vm4, %v8770_v34, %v1468_v58  ;;  %v6730_v52 = vsel %vm3382_vm4, %v8772_v56, %v1473_v5  ;;  %2298 = vmax.xlane.f32.xlu0 %v8774_v1  ;;  %v8780_v56 = vld [vmem:[#allocation43_spill] sm:$0xff] }
 0x212   : > { %8769 = vst [vmem:[#allocation78_spill] sm:$0xff] %v6716_v11  ;;  %8771 = vst [vmem:[#allocation64_spill] sm:$0xff] %v6726_v42  ;;  %v2437_v7 = vadd.f32 %v2429_v24, %v2417_v27  ;;  %v6734_v44 = vadd.f32 %v2377_v26, %v2365_v35  ;;  %v2460_v28 = vadd.f32 %v2452_v41, %v2440_v15  ;;  %v8776_v35 = vld [vmem:[#allocation41_spill] sm:$0xff] }
 0x213   : > { %8773 = vst [vmem:[#allocation7_spill] sm:$0xff] %v6730_v52  ;;  %2308 = vmax.xlane.f32.xlu1 %v6536_v62  ;;  %v2469_v57 = vmul.f32 %v6677_v20, %v4387_v6  ;;  %v2422_v33 = vmul.f32 %v6657_v16, %v8389_v50  ;;  %v1470_v58 = vmax.f32 %v6617_v29, %v1457_v19  ;;  %v8782_v19 = vld [vmem:[#allocation91_spill] sm:$0xff]  ;;  %v3638_v42 = vld [vmem:[%s3788_s9 + $0x5c] sm:$0xf] }
 0x214   : > { %8775 = vst [vmem:[#allocation38_spill] sm:$0xff] %v6734_v44  ;;  %v1475_v5 = vmax.f32 %v6619_v63, %v1467_v47  ;;  %v2454_v34 = vmul.f32 %v6648_v9, %v4373_v61  ;;  %v2431_v62 = vmul.f32 %v6635_v31, %v8309_v12  ;;  %v2457_v24 = vadd.f32 %v2449_v0, %v2437_v7  ;;  %v8778_v63 = vld [vmem:[#allocation73_spill] sm:$0xff]  ;;  %v6762_v1 = vpop.xlane.xlu1 %1552 }
 0x215   : > { %v2442_v26 = vadd.f32 %v2434_v46, %v2422_v33  ;;  %v2474_v41 = vmul.f32 %v6677_v20, %v4468_v2  ;;  %v2419_v27 = vmul.f32 %v6657_v16, %v8391_v60  ;;  %v6752_v29 = vsel %vm3382_vm4, %v8776_v35, %v1470_v58  ;;  %2302 = vmax.xlane.f32.xlu0 %v6547_v3  ;;  %v1461_v46 = vpop.xlane.xlu0 %1460  ;;  %v8783_v33 = vld [vmem:[#allocation71_spill] sm:$0xff]  ;;  %v8787_v44 = vld [vmem:[#allocation81_spill] sm:$0xff] }
 0x216   : > { %8777 = vst [vmem:[#allocation83_spill] sm:$0xff] %v6752_v29  ;;  %v6756_v15 = vsel %vm3382_vm4, %v8778_v63, %v1475_v5  ;;  %v2451_v0 = vmul.f32 %v6648_v9, %v8551_v8  ;;  %v6764_v7 = vadd.f32 %v2472_v13, %v2460_v28  ;;  %v2471_v47 = vmul.f32 %v6677_v20, %v8782_v19  ;;  %v8784_v5 = vld [vmem:[#allocation58_spill] sm:$0xff]  ;;  %v8785_v3 = vld [vmem:[#allocation63_spill] sm:$0xff]  ;;  %v8786_v29 = vld [vmem:[#allocation24_spill] sm:$0xff] }
 0x217   : > { %8779 = vst [vmem:[#allocation55_spill] sm:$0xff] %v6756_v15  ;;  %2312 = vmax.xlane.f32.xlu1 %v8780_v56  ;;  %v2436_v58 = vmul.f32 %v6635_v31, %v8783_v33  ;;  %v2433_v35 = vmul.f32 %v6635_v31, %v8784_v5  ;;  %v1472_v63 = vmax.f32 %v8785_v3, %v1461_v46  ;;  %v8788_v28 = vld [vmem:[#allocation11_spill] sm:$0xff]  ;;  %v8791_v5 = vld [vmem:[#allocation32_spill] sm:$0xff] }
 0x218   : > { %8781 = vst [vmem:[#allocation76_spill] sm:$0xff] %v6764_v7  ;;  %v2462_v56 = vadd.f32 %v2454_v34, %v2442_v26  ;;  %v2439_v15 = vadd.f32 %v2431_v62, %v2419_v27  ;;  %v2424_v52 = vmul.f32 %v6657_v16, %v8786_v29  ;;  %v2456_v13 = vmul.f32 %v6648_v9, %v8787_v44  ;;  %v8793_v62 = vld [vmem:[#allocation19_spill] sm:$0xff]  ;;  %v8794_v26 = vld [vmem:[#allocation34_spill] sm:$0xff]  ;;  %v6793_v44 = vpop.xlane.xlu1 %1556  ;;  %v8795_v29 = vld [vmem:[#allocation92_spill] sm:$0xff] }
 0x219   : > { %v2421_v7 = vmul.f32 %v6657_v16, %v8788_v28  ;;  %v2453_v11 = vmul.f32 %v6648_v9, %v8789_v51  ;;  %v6783_v21 = vrot.slane %v3638_v42, %v8790_v40  ;;  %v6787_v34 = vsel %vm3382_vm4, %v8791_v5, %v1472_v63  ;;  %2306 = vmax.xlane.f32.xlu0 %v8793_v62  ;;  %v1465_v3 = vpop.xlane.xlu0 %1464 }
 0x21a   : > { %8792 = vst [vmem:[#allocation75_spill] sm:$0xff] %v6787_v34  ;;  %v6791_v27 = vadd.f32 %v2469_v57, %v2457_v24  ;;  %v2459_v46 = vadd.f32 %v2451_v0, %v2439_v15  ;;  %v6795_v28 = vadd.f32 %v2474_v41, %v2462_v56  ;;  %v2444_v51 = vadd.f32 %v2436_v58, %v2424_v52  ;;  %v8797_v57 = vld [vmem:[#allocation8_spill] sm:$0xff]  ;;  %v8799_v58 = vld [vmem:[#allocation74_spill] sm:$0xff] }
 0x21b   : > { %2389 = vmax.xlane.f32.xlu1 %v8794_v26  ;;  %v2476_v40 = vmul.f32 %v6677_v20, %v8795_v29  ;;  %v2441_v19 = vadd.f32 %v2433_v35, %v2421_v7  ;;  %v1474_v5 = vmax.f32 %v6679_v59, %v1465_v3  ;;  %v2473_v62 = vmul.f32 %v6677_v20, %v8699_v17  ;;  %v8798_v26 = vld [vmem:[#allocation4_spill] sm:$0xff] }
 0x21c   : > { %v6800_v63 = vadd.f32 %v2471_v47, %v2459_v46  ;;  %v6805_v24 = vrot.slane %v3638_v42, %v8797_v57  ;;  %v2464_v15 = vadd.f32 %v2456_v13, %v2444_v51  ;;  %v6808_v41 = vrot.slane %v3638_v42, %v8798_v26  ;;  %v8801_v59 = vld [vmem:[#allocation44_spill] sm:$0xff] }
 0x21d   : > { %v2461_v0 = vadd.f32 %v2453_v11, %v2441_v19  ;;  %v2519_v52 = vmul.f32 %v6783_v21, %v8672_v23  ;;  %v6814_v7 = vsel %vm3382_vm4, %v8799_v58, %v1474_v5  ;;  %2310 = vmax.xlane.f32.xlu0 %v8801_v59  ;;  %v8802_v47 = vld [vmem:[#allocation20_spill] sm:$0xff]  ;;  %v6819_v35 = vrot.slane %v3638_v42, %v8402_v22  ;;  %v6823_v11 = vpop.xlane.xlu0 %1550  ;;  %v6825_v19 = vpop.xlane.xlu1 %1560 }
 0x21e   : > { %8796 = vst [vmem:[#allocation90_spill] sm:$0xff] %v6800_v63  ;;  %8800 = vst [vmem:[#allocation84_spill] sm:$0xff] %v6814_v7  ;;  %v2435_v51 = vmul.f32 %v6635_v31, %v8523_v30  ;;  %v6827_v56 = vadd.f32 %v2476_v40, %v2464_v15  ;;  %v2507_v13 = vmul.f32 %v6808_v41, %v8671_v32 }
 0x21f   : > { %2393 = vmax.xlane.f32.xlu1 %v8802_v47  ;;  %v2423_v46 = vmul.f32 %v6657_v16, %v8404_v38  ;;  %v2521_v3 = vmul.f32 %v6783_v21, %v8325_v37  ;;  %v2539_v42 = vmul.f32 %v6805_v24, %v8673_v48  ;;  %v2559_v31 = vmul.f32 %v6819_v35, %v4466_v45  ;;  %v8804_v47 = vld [vmem:[#allocation33_spill] sm:$0xff] }
 0x220   : > { %8803 = vst [vmem:[#allocation77_spill] sm:$0xff] %v6827_v56  ;;  %v2455_v5 = vmul.f32 %v6648_v9, %v4330_v49  ;;  %v2518_v40 = vmul.f32 %v6783_v21, %v8615_v18  ;;  %v2527_v15 = vadd.f32 %v2519_v52, %v2507_v13  ;;  %v2475_v58 = vmul.f32 %v6677_v20, %v4558_v14 }
 0x221   : > { %v2509_v16 = vmul.f32 %v6808_v41, %v8613_v39  ;;  %v2541_v59 = vmul.f32 %v6805_v24, %v8614_v43  ;;  %2387 = vmax.xlane.f32.xlu0 %v8804_v47  ;;  %v2443_v7 = vadd.f32 %v2435_v51, %v2423_v46  ;;  %v2506_v9 = vmul.f32 %v6808_v41, %v8617_v25  ;;  %v6855_v13 = vpop.xlane.xlu0 %1554  ;;  %v6857_v20 = vpop.xlane.xlu1 %1564 }
 0x222   : > { %v2538_v52 = vmul.f32 %v6805_v24, %v8618_v53  ;;  %v6859_v34 = vadd.f32 %v2473_v62, %v2461_v0  ;;  %v2561_v63 = vmul.f32 %v6819_v35, %v8616_v54  ;;  %v2547_v51 = vadd.f32 %v2539_v42, %v2527_v15 }
 0x223   : > { %2397 = vmax.xlane.f32.xlu1 %v6660_v55  ;;  %v2529_v56 = vadd.f32 %v2521_v3, %v2509_v16  ;;  %v2523_v55 = vmul.f32 %v6783_v21, %v8586_v10  ;;  %v2463_v46 = vadd.f32 %v2455_v5, %v2443_v7  ;;  %v2526_v47 = vadd.f32 %v2518_v40, %v2506_v9 }
 0x224   : > { %v2558_v18 = vmul.f32 %v6819_v35, %v4387_v6  ;;  %v2511_v25 = vmul.f32 %v6808_v41, %v8389_v50  ;;  %v2543_v62 = vmul.f32 %v6805_v24, %v4373_v61  ;;  %v2520_v0 = vmul.f32 %v6783_v21, %v8309_v12 }
 0x225   : > { %v2549_v53 = vadd.f32 %v2541_v59, %v2529_v56  ;;  %2391 = vmax.xlane.f32.xlu0 %v6681_v36  ;;  %v6875_v7 = vadd.f32 %v2559_v31, %v2547_v51  ;;  %v6877_v3 = vadd.f32 %v2475_v58, %v2463_v46  ;;  %v2546_v42 = vadd.f32 %v2538_v52, %v2526_v47  ;;  %v6879_v56 = vpop.xlane.xlu0 %1558  ;;  %v1642_v5 = vpop.xlane.xlu1 %1641  ;;  %v8809_v52 = vld [vmem:[#allocation24_spill] sm:$0xff]  ;;  %v8810_v51 = vld [vmem:[#allocation26_spill] sm:$0xff]  ;;  %v8814_v47 = vld [vmem:[#allocation81_spill] sm:$0xff] }
 0x226   : > { %v2531_v15 = vadd.f32 %v2523_v55, %v2511_v25  ;;  %v2508_v16 = vmul.f32 %v6808_v41, %v8391_v60  ;;  %v2540_v36 = vmul.f32 %v6805_v24, %v8551_v8  ;;  %v2563_v58 = vmul.f32 %v6819_v35, %v4468_v2  ;;  %v8808_v25 = vld [vmem:[#allocation91_spill] sm:$0xff] }
 0x227   : > { %2401 = vmax.xlane.f32.xlu1 %v6683_v4  ;;  %8805 = vst [vmem:[#allocation13_spill] sm:$0xff] %v6877_v3  ;;  %v6881_v40 = vadd.f32 %v2561_v63, %v2549_v53  ;;  %v1656_v4 = vmax.f32 %v6762_v1, %v1642_v5  ;;  %v6888_v31 = vadd.f32 %v2558_v18, %v2546_v42  ;;  %v8812_v18 = vld [vmem:[#allocation79_spill] sm:$0xff]  ;;  %v8813_v1 = vld [vmem:[#allocation78_spill] sm:$0xff] }
 0x228   : > { %v2525_v59 = vmul.f32 %v6783_v21, %v8783_v33  ;;  %v2551_v53 = vadd.f32 %v2543_v62, %v2531_v15  ;;  %v2528_v63 = vadd.f32 %v2520_v0, %v2508_v16  ;;  %v2560_v9 = vmul.f32 %v6819_v35, %v8808_v25  ;;  %v3639_v0 = vld [vmem:[%s3788_s9 + $0x60] sm:$0xf] }
 0x229   : > { %8806 = vst [vmem:[#allocation22_spill] sm:$0xff] %v6881_v40  ;;  %8807 = vst [vmem:[#allocation80_spill] sm:$0xff] %v6888_v31  ;;  %v2513_v55 = vmul.f32 %v6808_v41, %v8809_v52  ;;  %v6900_v46 = vsel %vm3391_vm5, %v8810_v51, %v1656_v4  ;;  %2395 = vmax.xlane.f32.xlu0 %v8812_v18  ;;  %v2545_v42 = vmul.f32 %v6805_v24, %v8814_v47  ;;  %v6909_v5 = vpop.xlane.xlu0 %1562  ;;  %v1646_v15 = vpop.xlane.xlu1 %1645  ;;  %v8815_v31 = vld [vmem:[#allocation11_spill] sm:$0xff]  ;;  %v8816_v4 = vld [vmem:[#allocation58_spill] sm:$0xff] }
 0x22a   : > { %8811 = vst [vmem:[#allocation12_spill] sm:$0xff] %v6900_v46  ;;  %v2565_v62 = vmul.f32 %v6819_v35, %v8795_v29  ;;  %v2548_v16 = vadd.f32 %v2540_v36, %v2528_v63  ;;  %v2510_v40 = vmul.f32 %v6808_v41, %v8815_v31  ;;  %v2522_v51 = vmul.f32 %v6783_v21, %v8816_v4  ;;  %v8817_v18 = vld [vmem:[#allocation5_spill] sm:$0xff] }
 0x22b   : > { %2487 = vmax.xlane.f32.xlu1 %v8813_v1  ;;  %v6916_v46 = vrot.slane %v3639_v0, %v8817_v18  ;;  %v1658_v1 = vmax.f32 %v6793_v44, %v1646_v15  ;;  %v6919_v47 = vadd.f32 %v2563_v58, %v2551_v53  ;;  %v2533_v3 = vadd.f32 %v2525_v59, %v2513_v55  ;;  %v8819_v29 = vld [vmem:[#allocation85_spill] sm:$0xff]  ;;  %v8821_v18 = vld [vmem:[#allocation66_spill] sm:$0xff]  ;;  %v8824_v59 = vld [vmem:[#allocation76_spill] sm:$0xff] }
 0x22c   : > { %v2542_v52 = vmul.f32 %v6805_v24, %v8819_v29  ;;  %v6923_v33 = vadd.f32 %v2560_v9, %v2548_v16  ;;  %v2562_v36 = vmul.f32 %v6819_v35, %v8699_v17  ;;  %v6928_v63 = vrot.slane %v3639_v0, %v8798_v26  ;;  %v8823_v58 = vld [vmem:[#allocation38_spill] sm:$0xff] }
 0x22d   : > { %8818 = vst [vmem:[#allocation46_spill] sm:$0xff] %v6919_v47  ;;  %v6931_v31 = vrot.slane %v3639_v0, %v8797_v57  ;;  %v6935_v44 = vsel %vm3391_vm5, %v8821_v18, %v1658_v1  ;;  %2399 = vmax.xlane.f32.xlu0 %v8823_v58  ;;  %v2553_v53 = vadd.f32 %v2545_v42, %v2533_v3  ;;  %v1640_v55 = vpop.xlane.xlu0 %1639  ;;  %v1650_v15 = vpop.xlane.xlu1 %1649 }
 0x22e   : > { %8820 = vst [vmem:[#allocation29_spill] sm:$0xff] %v6923_v33  ;;  %8822 = vst [vmem:[#allocation36_spill] sm:$0xff] %v6935_v44  ;;  %v2524_v9 = vmul.f32 %v6783_v21, %v8523_v30  ;;  %v2530_v16 = vadd.f32 %v2522_v51, %v2510_v40  ;;  %v2605_v33 = vmul.f32 %v6928_v63, %v8671_v32  ;;  %v8836_v44 = vld [vmem:[#allocation82_spill] sm:$0xff] }
 0x22f   : > { %2491 = vmax.xlane.f32.xlu1 %v8824_v59  ;;  %v2617_v47 = vmul.f32 %v6916_v46, %v8672_v23  ;;  %v6946_v18 = vrot.slane %v3639_v0, %v8402_v22  ;;  %v1655_v1 = vmax.f32 %v6823_v11, %v1640_v55  ;;  %v1660_v58 = vmax.f32 %v6825_v19, %v1650_v15  ;;  %v8825_v59 = vld [vmem:[#allocation64_spill] sm:$0xff]  ;;  %v8827_v19 = vld [vmem:[#allocation7_spill] sm:$0xff] }
 0x230   : > { %v2512_v3 = vmul.f32 %v6808_v41, %v8404_v38  ;;  %v2544_v21 = vmul.f32 %v6805_v24, %v4330_v49  ;;  %v6954_v40 = vadd.f32 %v2565_v62, %v2553_v53  ;;  %v2550_v42 = vadd.f32 %v2542_v52, %v2530_v16 }
 0x231   : > { %v2637_v51 = vmul.f32 %v6931_v31, %v8673_v48  ;;  %v2657_v0 = vmul.f32 %v6946_v18, %v4466_v45  ;;  %v6962_v11 = vsel %vm3391_vm5, %v8825_v59, %v1655_v1  ;;  %v6966_v55 = vsel %vm3391_vm5, %v8827_v19, %v1660_v58  ;;  %2485 = vmax.xlane.f32.xlu0 %v6791_v27  ;;  %v1644_v41 = vpop.xlane.xlu0 %1643  ;;  %v1654_v52 = vpop.xlane.xlu1 %1653  ;;  %v8835_v19 = vld [vmem:[#allocation77_spill] sm:$0xff] }
 0x232   : > { %8826 = vst [vmem:[#allocation2_spill] sm:$0xff] %v6962_v11  ;;  %8828 = vst [vmem:[#allocation45_spill] sm:$0xff] %v6966_v55  ;;  %v2532_v24 = vadd.f32 %v2524_v9, %v2512_v3  ;;  %v6970_v62 = vadd.f32 %v2562_v36, %v2550_v42  ;;  %v2625_v53 = vadd.f32 %v2617_v47, %v2605_v33  ;;  %v8830_v47 = vld [vmem:[#allocation3_spill] sm:$0xff]  ;;  %v8834_v42 = vld [vmem:[#allocation90_spill] sm:$0xff] }
 0x233   : > { %2495 = vmax.xlane.f32.xlu1 %v6795_v28  ;;  %v2564_v15 = vmul.f32 %v6819_v35, %v4558_v14  ;;  %v2619_v16 = vmul.f32 %v6916_v46, %v8325_v37  ;;  %v1657_v1 = vmax.f32 %v6855_v13, %v1644_v41  ;;  %v1662_v58 = vmax.f32 %v6857_v20, %v1654_v52  ;;  %v8831_v36 = vld [vmem:[#allocation39_spill] sm:$0xff] }
 0x234   : > { %8829 = vst [vmem:[#allocation9_spill] sm:$0xff] %v6970_v62  ;;  %v2552_v59 = vadd.f32 %v2544_v21, %v2532_v24  ;;  %v2607_v28 = vmul.f32 %v6928_v63, %v8613_v39  ;;  %v2639_v27 = vmul.f32 %v6931_v31, %v8614_v43  ;;  %v2659_v33 = vmul.f32 %v6946_v18, %v8616_v54  ;;  %v8832_v3 = vld [vmem:[#allocation83_spill] sm:$0xff] }
 0x235   : > { %v2604_v35 = vmul.f32 %v6928_v63, %v8830_v47  ;;  %v2616_v9 = vmul.f32 %v6916_v46, %v8831_v36  ;;  %v6990_v13 = vsel %vm3391_vm5, %v8832_v3, %v1657_v1  ;;  %v8833_v20 = vld [vmem:[#allocation55_spill] sm:$0xff]  ;;  %2489 = vmax.xlane.f32.xlu0 %v8834_v42  ;;  %v2645_v24 = vadd.f32 %v2637_v51, %v2625_v53  ;;  %v1648_v41 = vpop.xlane.xlu0 %1647  ;;  %v6998_v52 = vpop.xlane.xlu1 %1739 }
 0x236   : > { %v6994_v21 = vsel %vm3391_vm5, %v8833_v20, %v1662_v58  ;;  %v7000_v55 = vadd.f32 %v2564_v15, %v2552_v59  ;;  %v2627_v11 = vadd.f32 %v2619_v16, %v2607_v28  ;;  %v2636_v62 = vmul.f32 %v6931_v31, %v8836_v44  ;;  %v8837_v20 = vld [vmem:[#allocation75_spill] sm:$0xff] }
 0x237   : > { %2499 = vmax.xlane.f32.xlu1 %v8835_v19  ;;  %v2621_v1 = vmul.f32 %v6916_v46, %v8586_v10  ;;  %v1659_v58 = vmax.f32 %v6879_v56, %v1648_v41  ;;  %v2656_v3 = vmul.f32 %v6946_v18, %v4387_v6  ;;  %v2609_v51 = vmul.f32 %v6928_v63, %v8389_v50  ;;  %v8839_v10 = vld [vmem:[#allocation24_spill] sm:$0xff] }
 0x238   : > { %v2618_v53 = vmul.f32 %v6916_v46, %v8309_v12  ;;  %v7013_v15 = vadd.f32 %v2657_v0, %v2645_v24  ;;  %v2647_v16 = vadd.f32 %v2639_v27, %v2627_v11  ;;  %v2624_v59 = vadd.f32 %v2616_v9, %v2604_v35 }
 0x239   : > { %v2641_v28 = vmul.f32 %v6931_v31, %v4373_v61  ;;  %v7019_v56 = vsel %vm3391_vm5, %v8837_v20, %v1659_v58  ;;  %2493 = vmax.xlane.f32.xlu0 %v6859_v34  ;;  %v2606_v42 = vmul.f32 %v6928_v63, %v8391_v60  ;;  %v2638_v0 = vmul.f32 %v6931_v31, %v8551_v8  ;;  %v1652_v11 = vpop.xlane.xlu0 %1651  ;;  %v7027_v27 = vpop.xlane.xlu1 %1743  ;;  %v8838_v58 = vld [vmem:[#allocation71_spill] sm:$0xff]  ;;  %v3640_v61 = vld [vmem:[%s3788_s9 + $0x64] sm:$0xf] }
 0x23a   : > { %v7029_v35 = vadd.f32 %v2659_v33, %v2647_v16  ;;  %v2644_v9 = vadd.f32 %v2636_v62, %v2624_v59  ;;  %v2629_v19 = vadd.f32 %v2621_v1, %v2609_v51  ;;  %v2661_v24 = vmul.f32 %v6946_v18, %v4468_v2  ;;  %v8840_v1 = vld [vmem:[#allocation5_spill] sm:$0xff]  ;;  %v8842_v16 = vld [vmem:[#allocation84_spill] sm:$0xff]  ;;  %v8845_v59 = vld [vmem:[#allocation22_spill] sm:$0xff] }
 0x23b   : > { %2576 = vmax.xlane.f32.xlu1 %v6875_v7  ;;  %v1661_v34 = vmax.f32 %v6909_v5, %v1652_v11  ;;  %v2626_v41 = vadd.f32 %v2618_v53, %v2606_v42  ;;  %v2658_v7 = vmul.f32 %v6946_v18, %v8808_v25  ;;  %v2623_v20 = vmul.f32 %v6916_v46, %v8838_v58  ;;  %v8844_v53 = vld [vmem:[#allocation13_spill] sm:$0xff]  ;;  %v8847_v2 = vld [vmem:[#allocation11_spill] sm:$0xff] }
 0x23c   : > { %v2649_v50 = vadd.f32 %v2641_v28, %v2629_v19  ;;  %v2611_v33 = vmul.f32 %v6928_v63, %v8839_v10  ;;  %v2620_v62 = vmul.f32 %v6916_v46, %v8816_v4  ;;  %v7044_v51 = vrot.slane %v3640_v61, %v8840_v1  ;;  %v8846_v11 = vld [vmem:[#allocation81_spill] sm:$0xff] }
 0x23d   : > { %v7048_v5 = vsel %vm3391_vm5, %v8842_v16, %v1661_v34  ;;  %2497 = vmax.xlane.f32.xlu0 %v8844_v53  ;;  %v2646_v42 = vadd.f32 %v2638_v0, %v2626_v41  ;;  %v2643_v28 = vmul.f32 %v6931_v31, %v8846_v11  ;;  %v7054_v19 = vpop.xlane.xlu0 %1737  ;;  %v7056_v10 = vpop.xlane.xlu1 %1747  ;;  %v7058_v58 = vadd.f32 %v2656_v3, %v2644_v9 }
 0x23e   : > { %8841 = vst [vmem:[#allocation21_spill] sm:$0xff] %v7044_v51  ;;  %8843 = vst [vmem:[#allocation56_spill] sm:$0xff] %v7048_v5  ;;  %v2608_v4 = vmul.f32 %v6928_v63, %v8847_v2  ;;  %v2640_v34 = vmul.f32 %v6931_v31, %v8819_v29  ;;  %v7065_v16 = vrot.slane %v3640_v61, %v8797_v57  ;;  %v8851_v2 = vld [vmem:[#allocation80_spill] sm:$0xff] }
 0x23f   : > { %2580 = vmax.xlane.f32.xlu1 %v8845_v59  ;;  %v7067_v53 = vadd.f32 %v2661_v24, %v2649_v50  ;;  %v7069_v0 = vadd.f32 %v2658_v7, %v2646_v42  ;;  %v2631_v41 = vadd.f32 %v2623_v20, %v2611_v33  ;;  %v8849_v59 = vld [vmem:[#allocation92_spill] sm:$0xff]  ;;  %v2660_v3 = vmul.f32 %v6946_v18, %v8699_v17  ;;  %v8852_v50 = vld [vmem:[#allocation46_spill] sm:$0xff] }
 0x240   : > { %8848 = vst [vmem:[#allocation17_spill] sm:$0xff] %v7065_v16  ;;  %v2663_v11 = vmul.f32 %v6946_v18, %v8849_v59  ;;  %v2628_v5 = vadd.f32 %v2620_v62, %v2608_v4  ;;  %v7076_v9 = vrot.slane %v3640_v61, %v8798_v26  ;;  %v2706_v29 = vmul.f32 %v7044_v51, %v8672_v23 }
 0x241   : > { %2574 = vmax.xlane.f32.xlu0 %v8851_v2  ;;  %v2651_v24 = vadd.f32 %v2643_v28, %v2631_v41  ;;  %v7083_v7 = vrot.slane %v3640_v61, %v8402_v22  ;;  %v2622_v4 = vmul.f32 %v6916_v46, %v8523_v30  ;;  %v7087_v20 = vpop.xlane.xlu0 %1741  ;;  %v7089_v33 = vpop.xlane.xlu1 %1751  ;;  %v2726_v2 = vmul.f32 %v7065_v16, %v8673_v48  ;;  %v8854_v30 = vld [vmem:[#allocation29_spill] sm:$0xff] }
 0x242   : > { %8850 = vst [vmem:[#allocation35_spill] sm:$0xff] %v7076_v9  ;;  %v2648_v62 = vadd.f32 %v2640_v34, %v2628_v5  ;;  %v2694_v42 = vmul.f32 %v7076_v9, %v8671_v32  ;;  %v2708_v28 = vmul.f32 %v7044_v51, %v8325_v37  ;;  %v2610_v46 = vmul.f32 %v6928_v63, %v8404_v38 }
 0x243   : > { %2584 = vmax.xlane.f32.xlu1 %v8852_v50  ;;  %8853 = vst [vmem:[#allocation68_spill] sm:$0xff] %v7083_v7  ;;  %v7097_v61 = vadd.f32 %v2663_v11, %v2651_v24  ;;  %v2746_v41 = vmul.f32 %v7083_v7, %v4466_v45  ;;  %v2642_v5 = vmul.f32 %v6931_v31, %v4330_v49  ;;  %v3642_v24 = vld [vmem:[%s3788_s9 + $0x6c] sm:$0xf] }
 0x244   : > { %v2714_v34 = vadd.f32 %v2706_v29, %v2694_v42  ;;  %v2696_v50 = vmul.f32 %v7076_v9, %v8613_v39  ;;  %v2728_v59 = vmul.f32 %v7065_v16, %v8614_v43  ;;  %v2705_v11 = vmul.f32 %v7044_v51, %v8831_v36 }
 0x245   : > { %2578 = vmax.xlane.f32.xlu0 %v8854_v30  ;;  %v2630_v63 = vadd.f32 %v2622_v4, %v2610_v46  ;;  %v2662_v31 = vmul.f32 %v6946_v18, %v4558_v14  ;;  %v7117_v29 = vrot.slane %v3642_v24, %v8840_v1  ;;  %v7119_v42 = vpop.xlane.xlu0 %1745  ;;  %v1829_v49 = vpop.xlane.xlu1 %1828  ;;  %v2693_v43 = vmul.f32 %v7076_v9, %v8830_v47 }
 0x246   : > { %v2734_v38 = vadd.f32 %v2726_v2, %v2714_v34  ;;  %v2716_v17 = vadd.f32 %v2708_v28, %v2696_v50  ;;  %v2725_v30 = vmul.f32 %v7065_v16, %v8836_v44  ;;  %v2748_v18 = vmul.f32 %v7083_v7, %v8616_v54  ;;  %v8855_v34 = vld [vmem:[#allocation12_spill] sm:$0xff] }
 0x247   : > { %2588 = vmax.xlane.f32.xlu1 %v6954_v40  ;;  %v1843_v40 = vmax.f32 %v6998_v52, %v1829_v49  ;;  %v2650_v4 = vadd.f32 %v2642_v5, %v2630_v63  ;;  %v2745_v46 = vmul.f32 %v7083_v7, %v4387_v6  ;;  %v2713_v39 = vadd.f32 %v2705_v11, %v2693_v43  ;;  %v8856_v49 = vld [vmem:[#allocation9_spill] sm:$0xff]  ;;  %v3644_v54 = vld [vmem:[%s3788_s9 + $0x74] sm:$0xf] }
 0x248   : > { %v2736_v14 = vadd.f32 %v2728_v59, %v2716_v17  ;;  %v7131_v2 = vrot.slane %v3642_v24, %v8798_v26  ;;  %v7134_v28 = vrot.slane %v3642_v24, %v8797_v57  ;;  %v2892_v52 = vmul.f32 %v7117_v29, %v8831_v36 }
 0x249   : > { %v7138_v50 = vsel %vm3400_vm6, %v8855_v34, %v1843_v40  ;;  %2582 = vmax.xlane.f32.xlu0 %v8856_v49  ;;  %v7145_v17 = vrot.slane %v3642_v24, %v8402_v22  ;;  %v7147_v43 = vpop.xlane.xlu0 %1749  ;;  %v1833_v59 = vpop.xlane.xlu1 %1832  ;;  %v7149_v5 = vadd.f32 %v2660_v3, %v2648_v62  ;;  %v7151_v11 = vadd.f32 %v2746_v41, %v2734_v38 }
 0x24a   : > { %v7153_v63 = vadd.f32 %v2662_v31, %v2650_v4  ;;  %v2733_v40 = vadd.f32 %v2725_v30, %v2713_v39  ;;  %v1845_v34 = vmax.f32 %v7027_v27, %v1833_v59  ;;  %v2880_v49 = vmul.f32 %v7131_v2, %v8830_v47  ;;  %v3641_v31 = vld [vmem:[%s3788_s9 + $0x68] sm:$0xf] }
 0x24b   : > { %2674 = vmax.xlane.f32.xlu1 %v7013_v15  ;;  %v7156_v15 = vadd.f32 %v2748_v18, %v2736_v14  ;;  %v2695_v24 = vmul.f32 %v7076_v9, %v8391_v60  ;;  %v2912_v38 = vmul.f32 %v7134_v28, %v8836_v44  ;;  %v2707_v3 = vmul.f32 %v7044_v51, %v8309_v12  ;;  %v8857_v14 = vld [vmem:[#allocation36_spill] sm:$0xff]  ;;  %v8861_v9 = vld [vmem:[#allocation2_spill] sm:$0xff] }
 0x24c   : > { %v7163_v37 = vadd.f32 %v2745_v46, %v2733_v40  ;;  %v7170_v39 = vrot.slane %v3644_v54, %v8840_v1  ;;  %v7174_v27 = vsel %vm3400_vm6, %v8857_v14, %v1845_v34  ;;  %v2900_v62 = vadd.f32 %v2892_v52, %v2880_v49 }
 0x24d   : > { %8858 = vst [vmem:[#allocation40_spill] sm:$0xff] %v7174_v27  ;;  %2586 = vmax.xlane.f32.xlu0 %v7000_v55  ;;  %v2932_v41 = vmul.f32 %v7145_v17, %v4387_v6  ;;  %v1827_v30 = vpop.xlane.xlu0 %1826  ;;  %v1837_v4 = vpop.xlane.xlu1 %1836  ;;  %v2727_v18 = vmul.f32 %v7065_v16, %v8551_v8  ;;  %v2747_v46 = vmul.f32 %v7083_v7, %v8808_v25 }
 0x24e   : > { %v7186_v59 = vrot.slane %v3644_v54, %v8798_v26  ;;  %v7189_v55 = vrot.slane %v3644_v54, %v8797_v57  ;;  %v1847_v52 = vmax.f32 %v7056_v10, %v1837_v4  ;;  %v7194_v40 = vrot.slane %v3644_v54, %v8402_v22 }
 0x24f   : > { %2678 = vmax.xlane.f32.xlu1 %v7029_v35  ;;  %v1842_v35 = vmax.f32 %v7054_v19, %v1827_v30  ;;  %v7197_v34 = vrot.slane %v3641_v31, %v8840_v1  ;;  %v2920_v49 = vadd.f32 %v2912_v38, %v2900_v62  ;;  %v2715_v14 = vadd.f32 %v2707_v3, %v2695_v24  ;;  %v8863_v19 = vld [vmem:[#allocation45_spill] sm:$0xff] }
 0x250   : > { %v3079_v7 = vmul.f32 %v7170_v39, %v8831_v36  ;;  %v7202_v16 = vrot.slane %v3641_v31, %v8798_v26  ;;  %v7210_v10 = vsel %vm3400_vm6, %v8863_v19, %v1847_v52  ;;  %v3067_v54 = vmul.f32 %v7186_v59, %v8830_v47 }
 0x251   : > { %8859 = vst [vmem:[#allocation61_spill] sm:$0xff] %v7197_v34  ;;  %v7206_v51 = vsel %vm3400_vm6, %v8861_v9, %v1842_v35  ;;  %8864 = vst [vmem:[#allocation65_spill] sm:$0xff] %v7210_v10  ;;  %2672 = vmax.xlane.f32.xlu0 %v7058_v58  ;;  %v1831_v24 = vpop.xlane.xlu0 %1830  ;;  %v1841_v38 = vpop.xlane.xlu1 %1840  ;;  %v7216_v3 = vadd.f32 %v2932_v41, %v2920_v49  ;;  %v2735_v62 = vadd.f32 %v2727_v18, %v2715_v14 }
 0x252   : > { %8860 = vst [vmem:[#allocation14_spill] sm:$0xff] %v7202_v16  ;;  %8862 = vst [vmem:[#allocation67_spill] sm:$0xff] %v7206_v51  ;;  %v3099_v9 = vmul.f32 %v7189_v55, %v8836_v44  ;;  %v7221_v30 = vrot.slane %v3641_v31, %v8797_v57  ;;  %v1844_v4 = vmax.f32 %v7087_v20, %v1831_v24 }
 0x253   : > { %2682 = vmax.xlane.f32.xlu1 %v7067_v53  ;;  %v1849_v58 = vmax.f32 %v7089_v33, %v1841_v38  ;;  %v2803_v53 = vmul.f32 %v7197_v34, %v8831_v36  ;;  %v7228_v35 = vrot.slane %v3641_v31, %v8402_v22  ;;  %v3087_v41 = vadd.f32 %v3079_v7, %v3067_v54  ;;  %v3643_v31 = vld [vmem:[%s3788_s9 + $0x70] sm:$0xf] }
 0x254   : > { %8865 = vst [vmem:[#allocation48_spill] sm:$0xff] %v7221_v30  ;;  %v3119_v18 = vmul.f32 %v7194_v40, %v4387_v6  ;;  %v2791_v52 = vmul.f32 %v7202_v16, %v8830_v47  ;;  %v2893_v49 = vmul.f32 %v7117_v29, %v8672_v23  ;;  %v7238_v20 = vsel %vm3400_vm6, %v6990_v13, %v1844_v4 }
 0x255   : > { %8866 = vst [vmem:[#allocation27_spill] sm:$0xff] %v7228_v35  ;;  %8867 = vst [vmem:[#allocation47_spill] sm:$0xff] %v7238_v20  ;;  %v7242_v33 = vsel %vm3400_vm6, %v6994_v21, %v1849_v58  ;;  %2676 = vmax.xlane.f32.xlu0 %v7069_v0  ;;  %v7246_v7 = vadd.f32 %v2747_v46, %v2735_v62  ;;  %v1835_v14 = vpop.xlane.xlu0 %1834  ;;  %v7249_v19 = vpop.xlane.xlu1 %1926  ;;  %v2823_v54 = vmul.f32 %v7221_v30, %v8836_v44  ;;  %v3646_v20 = vld [vmem:[%s3788_s9 + $0x7c] sm:$0xf] }
 0x256   : > { %8868 = vst [vmem:[#allocation30_spill] sm:$0xff] %v7242_v33  ;;  %v2881_v13 = vmul.f32 %v7131_v2, %v8671_v32  ;;  %v2913_v21 = vmul.f32 %v7134_v28, %v8673_v48  ;;  %v7258_v0 = vrot.slane %v3643_v31, %v8840_v1  ;;  %v3107_v46 = vadd.f32 %v3099_v9, %v3087_v41 }
 0x257   : > { %2686 = vmax.xlane.f32.xlu1 %v7097_v61  ;;  %v1846_v61 = vmax.f32 %v7119_v42, %v1835_v14  ;;  %v2811_v24 = vadd.f32 %v2803_v53, %v2791_v52  ;;  %v2843_v38 = vmul.f32 %v7228_v35, %v4387_v6  ;;  %v2933_v4 = vmul.f32 %v7145_v17, %v4466_v45 }
 0x258   : > { %v2901_v62 = vadd.f32 %v2893_v49, %v2881_v13  ;;  %v7266_v58 = vrot.slane %v3643_v31, %v8798_v26  ;;  %v7269_v33 = vrot.slane %v3643_v31, %v8797_v57  ;;  %v3127_v42 = vadd.f32 %v3119_v18, %v3107_v46 }
 0x259   : > { %v7274_v10 = vsel %vm3400_vm6, %v7019_v56, %v1846_v61  ;;  %2680 = vmax.xlane.f32.xlu0 %v7149_v5  ;;  %v7279_v9 = vrot.slane %v3646_v20, %v8840_v1  ;;  %v1839_v53 = vpop.xlane.xlu0 %1838  ;;  %v7281_v41 = vpop.xlane.xlu1 %1930  ;;  %v2831_v52 = vadd.f32 %v2823_v54, %v2811_v24  ;;  %v2990_v14 = vmul.f32 %v7258_v0, %v8831_v36  ;;  %v8874_v61 = vld [vmem:[#allocation56_spill] sm:$0xff] }
 0x25a   : > { %8869 = vst [vmem:[#allocation37_spill] sm:$0xff] %v7266_v58  ;;  %8870 = vst [vmem:[#allocation50_spill] sm:$0xff] %v7269_v33  ;;  %v2921_v49 = vadd.f32 %v2913_v21, %v2901_v62  ;;  %v7286_v56 = vrot.slane %v3643_v31, %v8402_v22  ;;  %v1848_v5 = vmax.f32 %v7147_v43, %v1839_v53  ;;  %v3645_v53 = vld [vmem:[%s3788_s9 + $0x78] sm:$0xf] }
 0x25b   : > { %8871 = vst [vmem:[#allocation72_spill] sm:$0xff] %v7274_v10  ;;  %2763 = vmax.xlane.f32.xlu1 %v7151_v11  ;;  %v2978_v11 = vmul.f32 %v7266_v58, %v8830_v47  ;;  %v7292_v18 = vrot.slane %v3646_v20, %v8797_v57  ;;  %v2804_v13 = vmul.f32 %v7197_v34, %v8672_v23 }
 0x25c   : > { %8872 = vst [vmem:[#allocation57_spill] sm:$0xff] %v7286_v56  ;;  %v3010_v54 = vmul.f32 %v7269_v33, %v8836_v44  ;;  %v7299_v21 = vrot.slane %v3646_v20, %v8798_v26  ;;  %v7302_v31 = vrot.slane %v3646_v20, %v8402_v22  ;;  %v2792_v43 = vmul.f32 %v7202_v16, %v8671_v32 }
 0x25d   : > { %8873 = vst [vmem:[#allocation42_spill] sm:$0xff] %v7292_v18  ;;  %v7308_v46 = vsel %vm3400_vm6, %v8874_v61, %v1848_v5  ;;  %2684 = vmax.xlane.f32.xlu0 %v7153_v63  ;;  %v3266_v24 = vmul.f32 %v7279_v9, %v8831_v36  ;;  %v2824_v62 = vmul.f32 %v7221_v30, %v8673_v48  ;;  %v7317_v20 = vpop.xlane.xlu0 %1924  ;;  %v7319_v10 = vpop.xlane.xlu1 %1934 }
 0x25e   : > { %8875 = vst [vmem:[#allocation23_spill] sm:$0xff] %v7308_v46  ;;  %8876 = vst [vmem:[#allocation28_spill] sm:$0xff] %v7317_v20  ;;  %v2851_v51 = vadd.f32 %v2843_v38, %v2831_v52  ;;  %v2998_v27 = vadd.f32 %v2990_v14, %v2978_v11  ;;  %v3030_v5 = vmul.f32 %v7286_v56, %v4387_v6 }
 0x25f   : > { %2767 = vmax.xlane.f32.xlu1 %v7156_v15  ;;  %8877 = vst [vmem:[#allocation69_spill] sm:$0xff] %v7319_v10  ;;  %v7324_v63 = vrot.slane %v3645_v53, %v8840_v1  ;;  %v3254_v15 = vmul.f32 %v7299_v21, %v8830_v47  ;;  %v3286_v61 = vmul.f32 %v7292_v18, %v8836_v44 }
 0x260   : > { %v2812_v46 = vadd.f32 %v2804_v13, %v2792_v43  ;;  %v2844_v20 = vmul.f32 %v7228_v35, %v4466_v45  ;;  %v2941_v30 = vadd.f32 %v2933_v4, %v2921_v49  ;;  %v3018_v10 = vadd.f32 %v3010_v54, %v2998_v27 }
 0x261   : > { %8878 = vst [vmem:[#allocation62_spill] sm:$0xff] %v7324_v63  ;;  %v3080_v38 = vmul.f32 %v7170_v39, %v8672_v23  ;;  %v7335_v52 = vrot.slane %v3645_v53, %v8797_v57  ;;  %2761 = vmax.xlane.f32.xlu0 %v7163_v37  ;;  %v3274_v1 = vadd.f32 %v3266_v24, %v3254_v15  ;;  %v7341_v13 = vpop.xlane.xlu0 %1928  ;;  %v7343_v43 = vpop.xlane.xlu1 %1938 }
 0x262   : > { %v3306_v14 = vmul.f32 %v7302_v31, %v4387_v6  ;;  %v2832_v11 = vadd.f32 %v2824_v62, %v2812_v46  ;;  %v3068_v27 = vmul.f32 %v7186_v59, %v8671_v32  ;;  %v3100_v57 = vmul.f32 %v7189_v55, %v8673_v48 }
 0x263   : > { %2948 = vmax.xlane.f32.xlu1 %v7216_v3  ;;  %v7350_v4 = vrot.slane %v3645_v53, %v8798_v26  ;;  %v3177_v37 = vmul.f32 %v7324_v63, %v8831_v36  ;;  %v3038_v3 = vadd.f32 %v3030_v5, %v3018_v10  ;;  %v3294_v49 = vadd.f32 %v3286_v61, %v3274_v1 }
 0x264   : > { %v7354_v54 = vadd.f32 %v2844_v20, %v2832_v11  ;;  %v7357_v46 = vrot.slane %v3645_v53, %v8402_v22  ;;  %v3088_v24 = vadd.f32 %v3080_v38, %v3068_v27  ;;  %v3197_v15 = vmul.f32 %v7335_v52, %v8836_v44 }
 0x265   : > { %v3165_v62 = vmul.f32 %v7350_v4, %v8830_v47  ;;  %v2894_v26 = vmul.f32 %v7117_v29, %v8309_v12  ;;  %2765 = vmax.xlane.f32.xlu0 %v7246_v7  ;;  %v3314_v36 = vadd.f32 %v3306_v14, %v3294_v49  ;;  %v3120_v10 = vmul.f32 %v7194_v40, %v4466_v45  ;;  %v7370_v53 = vpop.xlane.xlu0 %1932  ;;  %v2016_v47 = vpop.xlane.xlu1 %2015 }
 0x266   : > { %8879 = vst [vmem:[#allocation51_spill] sm:$0xff] %v7357_v46  ;;  %v2991_v22 = vmul.f32 %v7258_v0, %v8672_v23  ;;  %v3108_v20 = vadd.f32 %v3100_v57, %v3088_v24  ;;  %v2882_v44 = vmul.f32 %v7131_v2, %v8391_v60  ;;  %v2914_v7 = vmul.f32 %v7134_v28, %v8551_v8 }
 0x267   : > { %3135 = vmax.xlane.f32.xlu1 %v3127_v42  ;;  %v3185_v5 = vadd.f32 %v3177_v37, %v3165_v62  ;;  %v2030_v42 = vmax.f32 %v7249_v19, %v2016_v47  ;;  %v3217_v61 = vmul.f32 %v7357_v46, %v4387_v6  ;;  %v2979_v38 = vmul.f32 %v7266_v58, %v8671_v32 }
 0x268   : > { %v3011_v1 = vmul.f32 %v7269_v33, %v8673_v48  ;;  %v2902_v11 = vadd.f32 %v2894_v26, %v2882_v44  ;;  %v2934_v27 = vmul.f32 %v7145_v17, %v8808_v25  ;;  %v3267_v57 = vmul.f32 %v7279_v9, %v8672_v23 }
 0x269   : > { %v3205_v14 = vadd.f32 %v3197_v15, %v3185_v5  ;;  %v7389_v19 = vsel %vm3409_vm7, %v7138_v50, %v2030_v42  ;;  %2859 = vmax.xlane.f32.xlu0 %v2851_v51  ;;  %v2999_v6 = vadd.f32 %v2991_v22, %v2979_v38  ;;  %v3031_v37 = vmul.f32 %v7286_v56, %v4466_v45  ;;  %v7393_v49 = vpop.xlane.xlu0 %1936 }
 0x26a   : > { %v2020_v24 = vpop.xlane.xlu1 %2019  ;;  %v3128_v62 = vadd.f32 %v3120_v10, %v3108_v20  ;;  %v2922_v15 = vadd.f32 %v2914_v7, %v2902_v11  ;;  %v3255_v26 = vmul.f32 %v7299_v21, %v8671_v32  ;;  %v3287_v47 = vmul.f32 %v7292_v18, %v8673_v48  ;;  %v8880_v20 = vld [vmem:[#allocation40_spill] sm:$0xff] }
 0x26b   : > { %2950 = vmax.xlane.f32.xlu1 %v2941_v30  ;;  %v2032_v50 = vmax.f32 %v7281_v41, %v2020_v24  ;;  %v3225_v5 = vadd.f32 %v3217_v61, %v3205_v14  ;;  %v3019_v51 = vadd.f32 %v3011_v1, %v2999_v6  ;;  %v3307_v30 = vmul.f32 %v7302_v31, %v4466_v45  ;;  %v8882_v61 = vld [vmem:[#allocation48_spill] sm:$0xff] }
 0x26c   : > { %v2942_v22 = vadd.f32 %v2934_v27, %v2922_v15  ;;  %v3275_v44 = vadd.f32 %v3267_v57, %v3255_v26  ;;  %v2793_v42 = vmul.f32 %v7202_v16, %v8391_v60  ;;  %v2805_v10 = vmul.f32 %v7197_v34, %v8309_v12  ;;  %v8883_v24 = vld [vmem:[#allocation28_spill] sm:$0xff] }
 0x26d   : > { %v7408_v7 = vsel %vm3409_vm7, %v8880_v20, %v2032_v50  ;;  %3046 = vmax.xlane.f32.xlu0 %v3038_v3  ;;  %v3039_v41 = vadd.f32 %v3031_v37, %v3019_v51  ;;  %v2825_v38 = vmul.f32 %v8882_v61, %v8551_v8  ;;  %v2014_v1 = vpop.xlane.xlu0 %2013  ;;  %v2845_v27 = vmul.f32 %v7228_v35, %v8808_v25  ;;  %v8884_v3 = vld [vmem:[#allocation69_spill] sm:$0xff]  ;;  %v8885_v20 = vld [vmem:[#allocation67_spill] sm:$0xff] }
 0x26e   : > { %8881 = vst [vmem:[#allocation60_spill] sm:$0xff] %v7408_v7  ;;  %v2024_v14 = vpop.xlane.xlu1 %2023  ;;  %v3295_v11 = vadd.f32 %v3287_v47, %v3275_v44  ;;  %v3081_v57 = vmul.f32 %v7170_v39, %v8309_v12  ;;  %v3178_v6 = vmul.f32 %v7324_v63, %v8672_v23  ;;  %v2029_v15 = vmax.f32 %v8883_v24, %v2014_v1  ;;  %v8887_v1 = vld [vmem:[#allocation65_spill] sm:$0xff] }
 0x26f   : > { %3322 = vmax.xlane.f32.xlu1 %v3314_v36  ;;  %v2034_v36 = vmax.f32 %v8884_v3, %v2024_v14  ;;  %v3069_v37 = vmul.f32 %v7186_v59, %v8391_v60  ;;  %v3101_v26 = vmul.f32 %v7189_v55, %v8551_v8  ;;  %v2813_v50 = vadd.f32 %v2805_v10, %v2793_v42 }
 0x270   : > { %v3315_v47 = vadd.f32 %v3307_v30, %v3295_v11  ;;  %v3121_v51 = vmul.f32 %v7194_v40, %v8808_v25  ;;  %v3166_v44 = vmul.f32 %v7350_v4, %v8671_v32  ;;  %v7430_v23 = vsel %vm3409_vm7, %v8885_v20, %v2029_v15  ;;  %v8889_v32 = vld [vmem:[#allocation49_spill] sm:$0xff] }
 0x271   : > { %8886 = vst [vmem:[#allocation53_spill] sm:$0xff] %v7430_v23  ;;  %v7434_v14 = vsel %vm3409_vm7, %v8887_v1, %v2034_v36  ;;  %2861 = vmax.xlane.f32.xlu0 %v7354_v54  ;;  %v3198_v30 = vmul.f32 %v7335_v52, %v8673_v48  ;;  %v2018_v42 = vpop.xlane.xlu0 %2017  ;;  %v2833_v11 = vadd.f32 %v2825_v38, %v2813_v50  ;;  %v8890_v54 = vld [vmem:[#allocation6_spill] sm:$0xff]  ;;  %v8892_v38 = vld [vmem:[#allocation15_spill] sm:$0xff] }
 0x272   : > { %8888 = vst [vmem:[#allocation31_spill] sm:$0xff] %v7434_v14  ;;  %v2028_v10 = vpop.xlane.xlu1 %2027  ;;  %v3089_v24 = vadd.f32 %v3081_v57, %v3069_v37  ;;  %v3186_v3 = vadd.f32 %v3178_v6, %v3166_v44  ;;  %v2895_v7 = vmul.f32 %v7117_v29, %v8889_v32  ;;  %v2031_v15 = vmax.f32 %v7341_v13, %v2018_v42  ;;  %v8891_v48 = vld [vmem:[#allocation86_spill] sm:$0xff]  ;;  %v8893_v37 = vld [vmem:[#allocation47_spill] sm:$0xff] }
 0x273   : > { %3137 = vmax.xlane.f32.xlu1 %v3128_v62  ;;  %v2036_v20 = vmax.f32 %v7343_v43, %v2028_v10  ;;  %v3218_v36 = vmul.f32 %v7357_v46, %v4466_v45  ;;  %v2883_v62 = vmul.f32 %v7131_v2, %v8890_v54  ;;  %v2915_v14 = vmul.f32 %v7134_v28, %v8891_v48  ;;  %v8895_v43 = vld [vmem:[#allocation30_spill] sm:$0xff] }
 0x274   : > { %v3109_v1 = vadd.f32 %v3101_v26, %v3089_v24  ;;  %v2935_v57 = vmul.f32 %v7145_v17, %v8892_v38  ;;  %v2992_v6 = vmul.f32 %v7258_v0, %v8309_v12  ;;  %v7455_v13 = vsel %vm3409_vm7, %v8893_v37, %v2031_v15 }
 0x275   : > { %8894 = vst [vmem:[#allocation52_spill] sm:$0xff] %v7455_v13  ;;  %v7459_v45 = vsel %vm3409_vm7, %v8895_v43, %v2036_v20  ;;  %3233 = vmax.xlane.f32.xlu0 %v3225_v5  ;;  %v3206_v26 = vadd.f32 %v3198_v30, %v3186_v3  ;;  %v2853_v42 = vadd.f32 %v2845_v27, %v2833_v11  ;;  %v8897_v27 = vld [vmem:[#allocation72_spill] sm:$0xff] }
 0x276   : > { %8896 = vst [vmem:[#allocation54_spill] sm:$0xff] %v7459_v45  ;;  %v2022_v50 = vpop.xlane.xlu0 %2021  ;;  %v7461_v44 = vpop.xlane.xlu1 %2113  ;;  %v2903_v10 = vadd.f32 %v2895_v7, %v2883_v62  ;;  %v2980_v24 = vmul.f32 %v7266_v58, %v8391_v60  ;;  %v3012_v23 = vmul.f32 %v7269_v33, %v8551_v8  ;;  %v3129_v37 = vadd.f32 %v3121_v51, %v3109_v1 }
 0x277   : > { %2952 = vmax.xlane.f32.xlu1 %v2942_v22  ;;  %v2033_v15 = vmax.f32 %v7370_v53, %v2022_v50  ;;  %v3226_v13 = vadd.f32 %v3218_v36, %v3206_v26  ;;  %v3268_v5 = vmul.f32 %v7279_v9, %v8309_v12  ;;  %v3032_v3 = vmul.f32 %v7286_v56, %v8808_v25 }
 0x278   : > { %v2923_v22 = vadd.f32 %v2915_v14, %v2903_v10  ;;  %v3000_v30 = vadd.f32 %v2992_v6, %v2980_v24  ;;  %v2806_v7 = vmul.f32 %v7197_v34, %v8889_v32  ;;  %v3256_v53 = vmul.f32 %v7299_v21, %v8391_v60  ;;  %v8899_v24 = vld [vmem:[#allocation23_spill] sm:$0xff] }
 0x279   : > { %v7476_v11 = vsel %vm3409_vm7, %v8897_v27, %v2033_v15  ;;  %3048 = vmax.xlane.f32.xlu0 %v3039_v41  ;;  %v3288_v51 = vmul.f32 %v7292_v18, %v8551_v8  ;;  %v3308_v1 = vmul.f32 %v7302_v31, %v8808_v25  ;;  %v2794_v6 = vmul.f32 %v7202_v16, %v8890_v54  ;;  %v8901_v27 = vld [vmem:[#allocation58_spill] sm:$0xff] }
 0x27a   : > { %8898 = vst [vmem:[#allocation41_spill] sm:$0xff] %v7476_v11  ;;  %v2026_v14 = vpop.xlane.xlu0 %2025  ;;  %v7482_v20 = vpop.xlane.xlu1 %2117  ;;  %v2943_v36 = vadd.f32 %v2935_v57, %v2923_v22  ;;  %v3020_v62 = vadd.f32 %v3012_v23, %v3000_v30  ;;  %v2826_v43 = vmul.f32 %v8882_v61, %v8891_v48  ;;  %v2993_v26 = vmul.f32 %v7258_v0, %v8889_v32 }
 0x27b   : > { %3324 = vmax.xlane.f32.xlu1 %v3315_v47  ;;  %v2035_v41 = vmax.f32 %v7393_v49, %v2026_v14  ;;  %v3276_v47 = vadd.f32 %v3268_v5, %v3256_v53  ;;  %v2814_v10 = vadd.f32 %v2806_v7, %v2794_v6  ;;  %v2846_v23 = vmul.f32 %v7228_v35, %v8892_v38  ;;  %v8902_v14 = vld [vmem:[#allocation21_spill] sm:$0xff] }
 0x27c   : > { %v3040_v50 = vadd.f32 %v3032_v3, %v3020_v62  ;;  %v3179_v57 = vmul.f32 %v7324_v63, %v8309_v12  ;;  %v2981_v5 = vmul.f32 %v7266_v58, %v8890_v54  ;;  %v3013_v3 = vmul.f32 %v7269_v33, %v8891_v48 }
 0x27d   : > { %v7499_v15 = vsel %vm3409_vm7, %v8899_v24, %v2035_v41  ;;  %2863 = vmax.xlane.f32.xlu0 %v2853_v42  ;;  %v3296_v49 = vadd.f32 %v3288_v51, %v3276_v47  ;;  %v3167_v12 = vmul.f32 %v7350_v4, %v8391_v60  ;;  %v3199_v7 = vmul.f32 %v7335_v52, %v8551_v8  ;;  %v8903_v47 = vld [vmem:[#allocation11_spill] sm:$0xff]  ;;  %v8904_v24 = vld [vmem:[#allocation85_spill] sm:$0xff] }
 0x27e   : > { %8900 = vst [vmem:[#allocation73_spill] sm:$0xff] %v7499_v15  ;;  %v7503_v22 = vpop.xlane.xlu0 %2111  ;;  %v2807_v42 = vmul.f32 %v7197_v34, %v8901_v27  ;;  %v3001_v53 = vadd.f32 %v2993_v26, %v2981_v5  ;;  %v3033_v51 = vmul.f32 %v7286_v56, %v8892_v38  ;;  %v2709_v62 = vmul.f32 %v8902_v14, %v8901_v27  ;;  %v8905_v26 = vld [vmem:[#allocation35_spill] sm:$0xff]  ;;  %v8906_v5 = vld [vmem:[#allocation17_spill] sm:$0xff] }
 0x27f   : > { %3139 = vmax.xlane.f32.xlu1 %v3129_v37  ;;  %v7505_v30 = vpop.xlane.xlu1 %2121  ;;  %v2834_v37 = vadd.f32 %v2826_v43, %v2814_v10  ;;  %v3187_v6 = vadd.f32 %v3179_v57, %v3167_v12  ;;  %v3219_v41 = vmul.f32 %v7357_v46, %v8808_v25  ;;  %v2795_v60 = vmul.f32 %v7202_v16, %v8903_v47  ;;  %v8908_v16 = vld [vmem:[#allocation18_spill] sm:$0xff] }
 0x280   : > { %v2827_v8 = vmul.f32 %v8882_v61, %v8904_v24  ;;  %v3316_v43 = vadd.f32 %v3308_v1, %v3296_v49  ;;  %v2697_v10 = vmul.f32 %v8905_v26, %v8903_v47  ;;  %v2729_v15 = vmul.f32 %v8906_v5, %v8904_v24 }
 0x281   : > { %3235 = vmax.xlane.f32.xlu0 %v3226_v13  ;;  %v3021_v25 = vadd.f32 %v3013_v3, %v3001_v53  ;;  %v3207_v12 = vadd.f32 %v3199_v7, %v3187_v6  ;;  %v2815_v34 = vadd.f32 %v2807_v42, %v2795_v60  ;;  %v2847_v56 = vmul.f32 %v7228_v35, %v8908_v16 }
 0x282   : > { %v7529_v11 = vpop.xlane.xlu0 %2115  ;;  %v2854_v61 = vadd.f32 %v2846_v23, %v2834_v37  ;;  %v2717_v13 = vadd.f32 %v2709_v62, %v2697_v10  ;;  %v3180_v49 = vmul.f32 %v7324_v63, %v8889_v32  ;;  %v3168_v23 = vmul.f32 %v7350_v4, %v8890_v54 }
 0x283   : > { %2954 = vmax.xlane.f32.xlu1 %v2943_v36  ;;  %v7531_v57 = vpop.xlane.xlu1 %2125  ;;  %v8909_v36 = vld [vmem:[#allocation68_spill] sm:$0xff]  ;;  %v3041_v45 = vadd.f32 %v3033_v51, %v3021_v25  ;;  %v3227_v33 = vadd.f32 %v3219_v41, %v3207_v12  ;;  %v2835_v58 = vadd.f32 %v2827_v8, %v2815_v34  ;;  %v3200_v7 = vmul.f32 %v7335_v52, %v8891_v48  ;;  %v8910_v41 = vld [vmem:[#allocation59_spill] sm:$0xff] }
 0x284   : > { %8907 = vst [vmem:[#allocation43_spill] sm:$0xff] %v7531_v57  ;;  %v2749_v1 = vmul.f32 %v8909_v36, %v8908_v16  ;;  %v3082_v57 = vmul.f32 %v7170_v39, %v8889_v32  ;;  %v2737_v3 = vadd.f32 %v2729_v15, %v2717_v13  ;;  %v3220_v34 = vmul.f32 %v7357_v46, %v8892_v38  ;;  %v8913_v12 = vld [vmem:[#allocation88_spill] sm:$0xff] }
 0x285   : > { %3050 = vmax.xlane.f32.xlu0 %v3040_v50  ;;  %v2855_v53 = vadd.f32 %v2847_v56, %v2835_v58  ;;  %v3070_v51 = vmul.f32 %v7186_v59, %v8890_v54  ;;  %v3102_v50 = vmul.f32 %v7189_v55, %v8891_v48  ;;  %v3188_v6 = vadd.f32 %v3180_v49, %v3168_v23  ;;  %v8911_v56 = vld [vmem:[#allocation10_spill] sm:$0xff] }
 0x286   : > { %v7545_v42 = vpop.xlane.xlu0 %2119  ;;  %v2757_v62 = vadd.f32 %v2749_v1, %v2737_v3  ;;  %v2710_v60 = vmul.f32 %v8902_v14, %v8910_v41  ;;  %v3122_v58 = vmul.f32 %v7194_v40, %v8892_v38  ;;  %v2896_v10 = vmul.f32 %v7117_v29, %v8901_v27  ;;  %v8914_v3 = vld [vmem:[#allocation89_spill] sm:$0xff] }
 0x287   : > { %3326 = vmax.xlane.f32.xlu1 %v3316_v43  ;;  %v2203_v37 = vpop.xlane.xlu1 %2202  ;;  %v3090_v8 = vadd.f32 %v3082_v57, %v3070_v51  ;;  %v2698_v43 = vmul.f32 %v8905_v26, %v8911_v56  ;;  %v2730_v13 = vmul.f32 %v8906_v5, %v8913_v12  ;;  %v2750_v23 = vmul.f32 %v8909_v36, %v8914_v3 }
 0x288   : > { %v2217_v15 = vmax.f32 %v7461_v44, %v2203_v37  ;;  %v3208_v44 = vadd.f32 %v3200_v7, %v3188_v6  ;;  %v2884_v37 = vmul.f32 %v7131_v2, %v8903_v47  ;;  %v2936_v51 = vmul.f32 %v7145_v17, %v8908_v16 }
 0x289   : > { %2865 = vmax.xlane.f32.xlu0 %v2854_v61  ;;  %v3110_v49 = vadd.f32 %v3102_v50, %v3090_v8  ;;  %v2718_v7 = vadd.f32 %v2710_v60, %v2698_v43  ;;  %v3071_v50 = vmul.f32 %v7186_v59, %v8903_v47  ;;  %v3083_v8 = vmul.f32 %v7170_v39, %v8901_v27 }
 0x28a   : > { %v7564_v25 = vsel %vm3418_vm8, %v7389_v19, %v2217_v15  ;;  %v7568_v57 = vpop.xlane.xlu0 %2123  ;;  %v2916_v19 = vmul.f32 %v7134_v28, %v8904_v24  ;;  %v2904_v6 = vadd.f32 %v2896_v10, %v2884_v37  ;;  %v3103_v10 = vmul.f32 %v7189_v55, %v8904_v24 }
 0x28b   : > { %8912 = vst [vmem:[#allocation63_spill] sm:$0xff] %v7564_v25  ;;  %3052 = vmax.xlane.f32.xlu1 %v3041_v45  ;;  %v2207_v1 = vpop.xlane.xlu1 %2206  ;;  %v3228_v45 = vadd.f32 %v3220_v34, %v3208_v44  ;;  %v3130_v15 = vadd.f32 %v3122_v58, %v3110_v49  ;;  %v8915_v25 = vld [vmem:[#allocation60_spill] sm:$0xff]  ;;  %v3269_v34 = vmul.f32 %v7279_v9, %v8889_v32 }
 0x28c   : > { %v2219_v61 = vmax.f32 %v7482_v20, %v2207_v1  ;;  %v2738_v20 = vadd.f32 %v2730_v13, %v2718_v7  ;;  %v2924_v58 = vadd.f32 %v2916_v19, %v2904_v6  ;;  %v3123_v44 = vmul.f32 %v7194_v40, %v8908_v16 }
 0x28d   : > { %3237 = vmax.xlane.f32.xlu0 %v3227_v33  ;;  %v3257_v1 = vmul.f32 %v7299_v21, %v8890_v54  ;;  %v3289_v32 = vmul.f32 %v7292_v18, %v8891_v48  ;;  %v3091_v13 = vadd.f32 %v3083_v8, %v3071_v50  ;;  %v3309_v49 = vmul.f32 %v7302_v31, %v8892_v38 }
 0x28e   : > { %v7585_v36 = vsel %vm3418_vm8, %v8915_v25, %v2219_v61  ;;  %v2201_v60 = vpop.xlane.xlu0 %2200  ;;  %v2885_v37 = vmul.f32 %v7131_v2, %v8911_v56  ;;  %v2897_v19 = vmul.f32 %v7117_v29, %v8910_v41  ;;  %v8916_v61 = vld [vmem:[#allocation53_spill] sm:$0xff]  ;;  %v2917_v6 = vmul.f32 %v7134_v28, %v8913_v12 }
 0x28f   : > { %2867 = vmax.xlane.f32.xlu1 %v2855_v53  ;;  %v2211_v43 = vpop.xlane.xlu1 %2210  ;;  %v2216_v25 = vmax.f32 %v7503_v22, %v2201_v60  ;;  %v2758_v53 = vadd.f32 %v2750_v23, %v2738_v20  ;;  %v8918_v22 = vld [vmem:[#allocation31_spill] sm:$0xff]  ;;  %v3277_v48 = vadd.f32 %v3269_v34, %v3257_v1  ;;  %v3111_v38 = vadd.f32 %v3103_v10, %v3091_v13 }
 0x290   : > { %v2221_v33 = vmax.f32 %v7505_v30, %v2211_v43  ;;  %v2937_v50 = vmul.f32 %v7145_v17, %v8914_v3  ;;  %v2994_v8 = vmul.f32 %v7258_v0, %v8901_v27  ;;  %v8920_v60 = vld [vmem:[#allocation43_spill] sm:$0xff]  ;;  %v3270_v34 = vmul.f32 %v7279_v9, %v8901_v27 }
 0x291   : > { %v7607_v54 = vsel %vm3418_vm8, %v8916_v61, %v2216_v25  ;;  %2769 = vmax.xlane.f32.xlu0 %v2757_v62  ;;  %v8921_v62 = vld [vmem:[#allocation37_spill] sm:$0xff]  ;;  %v3297_v10 = vadd.f32 %v3289_v32, %v3277_v48  ;;  %v2905_v1 = vadd.f32 %v2897_v19, %v2885_v37  ;;  %v8922_v25 = vld [vmem:[#allocation50_spill] sm:$0xff]  ;;  %v3258_v13 = vmul.f32 %v7299_v21, %v8903_v47  ;;  %v8923_v61 = vld [vmem:[#allocation52_spill] sm:$0xff] }
 0x292   : > { %8917 = vst [vmem:[#allocation32_spill] sm:$0xff] %v7607_v54  ;;  %v7611_v30 = vsel %vm3418_vm8, %v8918_v22, %v2221_v33  ;;  %v2205_v23 = vpop.xlane.xlu0 %2204  ;;  %v3014_v33 = vmul.f32 %v8922_v25, %v8904_v24  ;;  %v3290_v32 = vmul.f32 %v7292_v18, %v8904_v24  ;;  %v2944_v48 = vadd.f32 %v2936_v51, %v2924_v58  ;;  %v8929_v18 = vld [vmem:[#allocation61_spill] sm:$0xff] }
 0x293   : > { %8919 = vst [vmem:[#allocation19_spill] sm:$0xff] %v7611_v30  ;;  %3239 = vmax.xlane.f32.xlu1 %v3228_v45  ;;  %v2218_v20 = vmax.f32 %v7529_v11, %v2205_v23  ;;  %v2982_v45 = vmul.f32 %v8921_v62, %v8903_v47  ;;  %v8925_v11 = vld [vmem:[#allocation54_spill] sm:$0xff]  ;;  %v8927_v30 = vld [vmem:[#allocation57_spill] sm:$0xff]  ;;  %v2808_v51 = vmul.f32 %v8929_v18, %v8910_v41 }
 0x294   : > { %v2215_v7 = vpop.xlane.xlu1 %2214  ;;  %v3034_v54 = vmul.f32 %v8927_v30, %v8908_v16  ;;  %v8930_v58 = vld [vmem:[#allocation41_spill] sm:$0xff] }
 0x295   : > { %v2223_v43 = vmax.f32 %v8920_v60, %v2215_v7  ;;  %v7631_v22 = vsel %vm3418_vm8, %v8923_v61, %v2218_v20  ;;  %3141 = vmax.xlane.f32.xlu0 %v3130_v15  ;;  %v3131_v7 = vadd.f32 %v3123_v44, %v3111_v38  ;;  %v3002_v60 = vadd.f32 %v2994_v8, %v2982_v45  ;;  %v8932_v45 = vld [vmem:[#allocation48_spill] sm:$0xff] }
 0x296   : > { %8924 = vst [vmem:[#allocation34_spill] sm:$0xff] %v7631_v22  ;;  %v2209_v37 = vpop.xlane.xlu0 %2208  ;;  %v3317_v61 = vadd.f32 %v3309_v49, %v3297_v10  ;;  %v2925_v22 = vadd.f32 %v2917_v6, %v2905_v1  ;;  %v3310_v15 = vmul.f32 %v7302_v31, %v8908_v16  ;;  %v2848_v10 = vmul.f32 %v7228_v35, %v8914_v3 }
 0x297   : > { %v7635_v23 = vsel %vm3418_vm8, %v8925_v11, %v2223_v43  ;;  %2771 = vmax.xlane.f32.xlu1 %v2758_v53  ;;  %v2220_v20 = vmax.f32 %v7545_v42, %v2209_v37  ;;  %v3278_v43 = vadd.f32 %v3270_v34, %v3258_v13  ;;  %v3022_v11 = vadd.f32 %v3014_v33, %v3002_v60  ;;  %v8928_v53 = vld [vmem:[#allocation14_spill] sm:$0xff] }
 0x298   : > { %8926 = vst [vmem:[#allocation8_spill] sm:$0xff] %v7635_v23  ;;  %v7639_v19 = vpop.xlane.xlu1 %2300  ;;  %v2796_v23 = vmul.f32 %v8928_v53, %v8911_v56  ;;  %v2945_v42 = vadd.f32 %v2937_v50, %v2925_v22  ;;  %v2828_v34 = vmul.f32 %v8932_v45, %v8913_v12  ;;  %v2983_v1 = vmul.f32 %v8921_v62, %v8911_v56  ;;  %v8933_v22 = vld [vmem:[#allocation70_spill] sm:$0xff] }
 0x299   : > { %v7652_v44 = vsel %vm3418_vm8, %v8930_v58, %v2220_v20  ;;  %2956 = vmax.xlane.f32.xlu0 %v2944_v48  ;;  %v3298_v49 = vadd.f32 %v3290_v32, %v3278_v43  ;;  %v3042_v8 = vadd.f32 %v3034_v54, %v3022_v11  ;;  %v2995_v13 = vmul.f32 %v7258_v0, %v8910_v41  ;;  %v8937_v43 = vld [vmem:[#allocation87_spill] sm:$0xff] }
 0x29a   : > { %8931 = vst [vmem:[#allocation4_spill] sm:$0xff] %v7652_v44  ;;  %v2213_v38 = vpop.xlane.xlu0 %2212  ;;  %v3181_v50 = vmul.f32 %v7324_v63, %v8901_v27  ;;  %v2809_v54 = vmul.f32 %v8929_v18, %v8933_v22  ;;  %v2816_v32 = vadd.f32 %v2808_v51, %v2796_v23  ;;  %v3015_v37 = vmul.f32 %v8922_v25, %v8913_v12  ;;  %v8936_v27 = vld [vmem:[#allocation25_spill] sm:$0xff] }
 0x29b   : > { %3143 = vmax.xlane.f32.xlu1 %v3131_v7  ;;  %v2222_v33 = vmax.f32 %v7568_v57, %v2213_v38  ;;  %v3169_v48 = vmul.f32 %v7350_v4, %v8903_v47  ;;  %v3201_v7 = vmul.f32 %v7335_v52, %v8904_v24  ;;  %v8934_v57 = vld [vmem:[#allocation73_spill] sm:$0xff]  ;;  %v2797_v20 = vmul.f32 %v8928_v53, %v8936_v27 }
 0x29c   : > { %v7654_v6 = vpop.xlane.xlu1 %2304  ;;  %v2829_v23 = vmul.f32 %v8932_v45, %v8937_v43  ;;  %v3318_v47 = vadd.f32 %v3310_v15, %v3298_v49  ;;  %v2836_v58 = vadd.f32 %v2828_v34, %v2816_v32  ;;  %v3035_v24 = vmul.f32 %v8927_v30, %v8914_v3  ;;  %v8939_v32 = vld [vmem:[#allocation68_spill] sm:$0xff] }
 0x29d   : > { %v7677_v60 = vsel %vm3418_vm8, %v8934_v57, %v2222_v33  ;;  %3328 = vmax.xlane.f32.xlu0 %v3317_v61  ;;  %v2711_v38 = vmul.f32 %v8902_v14, %v8933_v22  ;;  %v3003_v61 = vadd.f32 %v2995_v13, %v2983_v1  ;;  %v3221_v33 = vmul.f32 %v7357_v46, %v8908_v16 }
 0x29e   : > { %8935 = vst [vmem:[#allocation74_spill] sm:$0xff] %v7677_v60  ;;  %v7683_v11 = vpop.xlane.xlu0 %2298  ;;  %v2817_v57 = vadd.f32 %v2809_v54, %v2797_v20  ;;  %v8938_v60 = vld [vmem:[#allocation16_spill] sm:$0xff]  ;;  %v2699_v45 = vmul.f32 %v8905_v26, %v8936_v27  ;;  %v2731_v15 = vmul.f32 %v8906_v5, %v8937_v43  ;;  %v3182_v49 = vmul.f32 %v7324_v63, %v8910_v41 }
 0x29f   : > { %2958 = vmax.xlane.f32.xlu1 %v2945_v42  ;;  %v3189_v42 = vadd.f32 %v3181_v50, %v3169_v48  ;;  %v2849_v44 = vmul.f32 %v7228_v35, %v8938_v60  ;;  %v3023_v34 = vadd.f32 %v3015_v37, %v3003_v61  ;;  %v2751_v48 = vmul.f32 %v8939_v32, %v8938_v60 }
 0x2a0   : > { %v7685_v51 = vpop.xlane.xlu1 %2308  ;;  %v2837_v13 = vadd.f32 %v2829_v23, %v2817_v57  ;;  %v2719_v54 = vadd.f32 %v2711_v38, %v2699_v45  ;;  %v3170_v20 = vmul.f32 %v7350_v4, %v8911_v56  ;;  %v3202_v35 = vmul.f32 %v7335_v52, %v8913_v12 }
 0x2a1   : > { %3054 = vmax.xlane.f32.xlu0 %v3042_v8  ;;  %v3209_v1 = vadd.f32 %v3201_v7, %v3189_v42  ;;  %v2856_v63 = vadd.f32 %v2848_v10, %v2836_v58  ;;  %v3043_v8 = vadd.f32 %v3035_v24, %v3023_v34  ;;  %v3084_v61 = vmul.f32 %v7170_v39, %v8910_v41  ;;  %v8940_v42 = vld [vmem:[#allocation71_spill] sm:$0xff] }
 0x2a2   : > { %v7701_v50 = vpop.xlane.xlu0 %2302  ;;  %v2857_v37 = vadd.f32 %v2849_v44, %v2837_v13  ;;  %v2739_v7 = vadd.f32 %v2731_v15, %v2719_v54  ;;  %v3190_v23 = vadd.f32 %v3182_v49, %v3170_v20  ;;  %v3222_v45 = vmul.f32 %v7357_v46, %v8914_v3  ;;  %v8941_v49 = vld [vmem:[#allocation24_spill] sm:$0xff] }
 0x2a3   : > { %3330 = vmax.xlane.f32.xlu1 %v3318_v47  ;;  %v3229_v47 = vadd.f32 %v3221_v33, %v3209_v1  ;;  %v3072_v38 = vmul.f32 %v7186_v59, %v8911_v56  ;;  %v2712_v10 = vmul.f32 %v8902_v14, %v8940_v42  ;;  %v3104_v57 = vmul.f32 %v7189_v55, %v8913_v12  ;;  %v8942_v1 = vld [vmem:[#allocation81_spill] sm:$0xff] }
 0x2a4   : > { %v7703_v16 = vpop.xlane.xlu1 %2312  ;;  %v2759_v24 = vadd.f32 %v2751_v48, %v2739_v7  ;;  %v3210_v33 = vadd.f32 %v3202_v35, %v3190_v23  ;;  %v2700_v34 = vmul.f32 %v8905_v26, %v8941_v49  ;;  %v2732_v13 = vmul.f32 %v8906_v5, %v8942_v1  ;;  %v8943_v48 = vld [vmem:[#allocation92_spill] sm:$0xff] }
 0x2a5   : > { %2869 = vmax.xlane.f32.xlu0 %v2856_v63  ;;  %v3124_v63 = vmul.f32 %v7194_v40, %v8914_v3  ;;  %v2898_v14 = vmul.f32 %v7117_v29, %v8933_v22  ;;  %v3092_v54 = vadd.f32 %v3084_v61, %v3072_v38  ;;  %v2752_v35 = vmul.f32 %v8939_v32, %v8943_v48 }
 0x2a6   : > { %v7719_v58 = vpop.xlane.xlu0 %2306  ;;  %v2886_v20 = vmul.f32 %v7131_v2, %v8936_v27  ;;  %v2720_v26 = vadd.f32 %v2712_v10, %v2700_v34  ;;  %v2918_v5 = vmul.f32 %v7134_v28, %v8937_v43  ;;  %v3230_v32 = vadd.f32 %v3222_v45, %v3210_v33 }
 0x2a7   : > { %3056 = vmax.xlane.f32.xlu1 %v3043_v8  ;;  %v3085_v8 = vmul.f32 %v7170_v39, %v8933_v22  ;;  %v3112_v38 = vadd.f32 %v3104_v57, %v3092_v54  ;;  %v3105_v46 = vmul.f32 %v7189_v55, %v8937_v43  ;;  %v3271_v45 = vmul.f32 %v7279_v9, %v8910_v41 }
 0x2a8   : > { %v2390_v44 = vpop.xlane.xlu1 %2389  ;;  %v2899_v41 = vmul.f32 %v7117_v29, %v8940_v42 }
 0x2a9   : > { %v2404_v15 = vmax.f32 %v7639_v19, %v2390_v44  ;;  %v8944_v19 = vld [vmem:[#allocation63_spill] sm:$0xff]  ;;  %3241 = vmax.xlane.f32.xlu0 %v3229_v47  ;;  %v3073_v44 = vmul.f32 %v7186_v59, %v8936_v27  ;;  %v2906_v47 = vadd.f32 %v2898_v14, %v2886_v20  ;;  %v3132_v10 = vadd.f32 %v3124_v63, %v3112_v38  ;;  %v8946_v20 = vld [vmem:[#allocation42_spill] sm:$0xff] }
 0x2aa   : > { %v7744_v23 = vpop.xlane.xlu0 %2310  ;;  %v3259_v63 = vmul.f32 %v7299_v21, %v8911_v56  ;;  %v2919_v56 = vmul.f32 %v7134_v28, %v8942_v1  ;;  %v2984_v28 = vmul.f32 %v8921_v62, %v8936_v27 }
 0x2ab   : > { %v7740_v7 = vsel %vm3427_vm9, %v8944_v19, %v2404_v15  ;;  %2871 = vmax.xlane.f32.xlu1 %v2857_v37  ;;  %v2740_v19 = vadd.f32 %v2732_v13, %v2720_v26  ;;  %v2938_v37 = vmul.f32 %v7145_v17, %v8938_v60  ;;  %v3093_v34 = vadd.f32 %v3085_v8, %v3073_v44 }
 0x2ac   : > { %8945 = vst [vmem:[#allocation44_spill] sm:$0xff] %v7740_v7  ;;  %v2394_v61 = vpop.xlane.xlu1 %2393  ;;  %v3125_v7 = vmul.f32 %v7194_v40, %v8938_v60  ;;  %v2926_v57 = vadd.f32 %v2918_v5, %v2906_v47  ;;  %v3291_v8 = vmul.f32 %v8946_v20, %v8913_v12  ;;  %v3279_v5 = vadd.f32 %v3271_v45, %v3259_v63 }
 0x2ad   : > { %v2406_v15 = vmax.f32 %v7654_v6, %v2394_v61  ;;  %2773 = vmax.xlane.f32.xlu0 %v2759_v24  ;;  %v2760_v6 = vadd.f32 %v2752_v35, %v2740_v19  ;;  %v3113_v54 = vadd.f32 %v3105_v46, %v3093_v34  ;;  %v3311_v24 = vmul.f32 %v7302_v31, %v8914_v3  ;;  %v8947_v61 = vld [vmem:[#allocation32_spill] sm:$0xff] }
 0x2ae   : > { %v2388_v13 = vpop.xlane.xlu0 %2387  ;;  %v2887_v35 = vmul.f32 %v7131_v2, %v8941_v49  ;;  %v2946_v46 = vadd.f32 %v2938_v37, %v2926_v57  ;;  %v2939_v12 = vmul.f32 %v7145_v17, %v8943_v48  ;;  %v3299_v38 = vadd.f32 %v3291_v8, %v3279_v5 }
 0x2af   : > { %v7759_v33 = vsel %vm3427_vm9, %v7585_v36, %v2406_v15  ;;  %3243 = vmax.xlane.f32.xlu1 %v3230_v32  ;;  %v2403_v26 = vmax.f32 %v7683_v11, %v2388_v13  ;;  %v8948_v11 = vld [vmem:[#allocation19_spill] sm:$0xff]  ;;  %v3133_v3 = vadd.f32 %v3125_v7, %v3113_v54  ;;  %v2996_v17 = vmul.f32 %v7258_v0, %v8933_v22 }
 0x2b0   : > { %v2398_v14 = vpop.xlane.xlu1 %2397  ;;  %v2907_v44 = vadd.f32 %v2899_v41, %v2887_v35  ;;  %v3016_v47 = vmul.f32 %v8922_v25, %v8937_v43  ;;  %v3272_v7 = vmul.f32 %v7279_v9, %v8933_v22  ;;  %v3260_v34 = vmul.f32 %v7299_v21, %v8936_v27 }
 0x2b1   : > { %v2408_v36 = vmax.f32 %v7685_v51, %v2398_v14  ;;  %v7779_v29 = vsel %vm3427_vm9, %v8947_v61, %v2403_v26  ;;  %3145 = vmax.xlane.f32.xlu0 %v3132_v10  ;;  %v3036_v10 = vmul.f32 %v8927_v30, %v8938_v60  ;;  %v3292_v45 = vmul.f32 %v8946_v20, %v8937_v43 }
 0x2b2   : > { %v2392_v2 = vpop.xlane.xlu0 %2391  ;;  %v2927_v37 = vadd.f32 %v2919_v56, %v2907_v44  ;;  %v3319_v13 = vadd.f32 %v3311_v24, %v3299_v38  ;;  %v3004_v63 = vadd.f32 %v2996_v17, %v2984_v28  ;;  %v3312_v8 = vmul.f32 %v7302_v31, %v8938_v60  ;;  %v8951_v56 = vld [vmem:[#allocation48_spill] sm:$0xff]  ;;  %v8954_v17 = vld [vmem:[#allocation62_spill] sm:$0xff] }
 0x2b3   : > { %v7783_v51 = vsel %vm3427_vm9, %v8948_v11, %v2408_v36  ;;  %2775 = vmax.xlane.f32.xlu1 %v2760_v6  ;;  %v2405_v15 = vmax.f32 %v7701_v50, %v2392_v2  ;;  %v8949_v6 = vld [vmem:[#allocation34_spill] sm:$0xff]  ;;  %v2798_v41 = vmul.f32 %v8928_v53, %v8941_v49  ;;  %v2810_v26 = vmul.f32 %v8929_v18, %v8940_v42  ;;  %v8952_v11 = vld [vmem:[#allocation27_spill] sm:$0xff]  ;;  %v8953_v2 = vld [vmem:[#allocation4_spill] sm:$0xff] }
 0x2b4   : > { %v2402_v32 = vpop.xlane.xlu1 %2401  ;;  %v2947_v35 = vadd.f32 %v2939_v12, %v2927_v37  ;;  %v3280_v5 = vadd.f32 %v3272_v7, %v3260_v34  ;;  %v3086_v24 = vmul.f32 %v7170_v39, %v8940_v42  ;;  %v2830_v61 = vmul.f32 %v8951_v56, %v8942_v1  ;;  %v8955_v34 = vld [vmem:[#allocation74_spill] sm:$0xff] }
 0x2b5   : > { %v2410_v19 = vmax.f32 %v7703_v16, %v2402_v32  ;;  %v7803_v50 = vsel %vm3427_vm9, %v8949_v6, %v2405_v15  ;;  %v8950_v16 = vld [vmem:[#allocation8_spill] sm:$0xff]  ;;  %2960 = vmax.xlane.f32.xlu0 %v2946_v46  ;;  %v3024_v46 = vadd.f32 %v3016_v47, %v3004_v63  ;;  %v3074_v53 = vmul.f32 %v7186_v59, %v8941_v49 }
 0x2b6   : > { %v2396_v14 = vpop.xlane.xlu0 %2395  ;;  %v3106_v39 = vmul.f32 %v7189_v55, %v8942_v1  ;;  %v2818_v44 = vadd.f32 %v2810_v26, %v2798_v41  ;;  %v3126_v28 = vmul.f32 %v7194_v40, %v8943_v48  ;;  %v3183_v59 = vmul.f32 %v8954_v17, %v8933_v22 }
 0x2b7   : > { %v7807_v57 = vsel %vm3427_vm9, %v8950_v16, %v2410_v19  ;;  %3147 = vmax.xlane.f32.xlu1 %v3133_v3  ;;  %v2407_v36 = vmax.f32 %v7719_v58, %v2396_v14  ;;  %v2850_v3 = vmul.f32 %v8952_v11, %v8943_v48  ;;  %v3300_v58 = vadd.f32 %v3292_v45, %v3280_v5 }
 0x2b8   : > { %v7809_v54 = vpop.xlane.xlu1 %2487  ;;  %v3044_v38 = vadd.f32 %v3036_v10, %v3024_v46  ;;  %v3094_v47 = vadd.f32 %v3086_v24, %v3074_v53  ;;  %v3273_v7 = vmul.f32 %v7279_v9, %v8940_v42  ;;  %v2838_v37 = vadd.f32 %v2830_v61, %v2818_v44 }
 0x2b9   : > { %v7828_v18 = vsel %vm3427_vm9, %v8953_v2, %v2407_v36  ;;  %3332 = vmax.xlane.f32.xlu0 %v3319_v13  ;;  %v3320_v19 = vadd.f32 %v3312_v8, %v3300_v58  ;;  %v3171_v55 = vmul.f32 %v7350_v4, %v8936_v27  ;;  %v3203_v10 = vmul.f32 %v7335_v52, %v8937_v43  ;;  %v8956_v13 = vld [vmem:[#allocation51_spill] sm:$0xff] }
 0x2ba   : > { %v2400_v12 = vpop.xlane.xlu0 %2399  ;;  %v3261_v40 = vmul.f32 %v7299_v21, %v8941_v49  ;;  %v3293_v9 = vmul.f32 %v8946_v20, %v8942_v1  ;;  %v2858_v16 = vadd.f32 %v2850_v3, %v2838_v37  ;;  %v3223_v43 = vmul.f32 %v8956_v13, %v8938_v60 }
 0x2bb   : > { %2962 = vmax.xlane.f32.xlu1 %v2947_v35  ;;  %v2409_v15 = vmax.f32 %v7744_v23, %v2400_v12  ;;  %v3114_v23 = vadd.f32 %v3106_v39, %v3094_v47  ;;  %v3191_v27 = vadd.f32 %v3183_v59, %v3171_v55  ;;  %v3313_v21 = vmul.f32 %v7302_v31, %v8943_v48 }
 0x2bc   : > { %v2492_v32 = vpop.xlane.xlu1 %2491  ;;  %v3281_v63 = vadd.f32 %v3273_v7, %v3261_v40  ;;  %v2997_v8 = vmul.f32 %v7258_v0, %v8940_v42  ;;  %v2985_v41 = vmul.f32 %v8921_v62, %v8941_v49  ;;  %v3017_v36 = vmul.f32 %v8922_v25, %v8942_v1 }
 0x2bd   : > { %v7847_v22 = vsel %vm3427_vm9, %v8955_v34, %v2409_v15  ;;  %3058 = vmax.xlane.f32.xlu0 %v3044_v38  ;;  %v3134_v14 = vadd.f32 %v3126_v28, %v3114_v23  ;;  %v3211_v20 = vadd.f32 %v3203_v10, %v3191_v27  ;;  %v3037_v5 = vmul.f32 %v8927_v30, %v8943_v48 }
 0x2be   : > { %v2486_v45 = vpop.xlane.xlu0 %2485  ;;  %v3301_v26 = vadd.f32 %v3293_v9, %v3281_v63  ;;  %v3005_v46 = vadd.f32 %v2997_v8, %v2985_v41  ;;  %v3184_v0 = vmul.f32 %v8954_v17, %v8940_v42  ;;  %v3172_v56 = vmul.f32 %v7350_v4, %v8941_v49  ;;  %v8957_v42 = vld [vmem:[#allocation44_spill] sm:$0xff] }
 0x2bf   : > { %3334 = vmax.xlane.f32.xlu1 %v3320_v19  ;;  %v3231_v24 = vadd.f32 %v3223_v43, %v3211_v20  ;;  %v3204_v25 = vmul.f32 %v7335_v52, %v8942_v1  ;;  %v3224_v2 = vmul.f32 %v8956_v13, %v8943_v48 }
 0x2c0   : > { %v2496_v6 = vpop.xlane.xlu1 %2495  ;;  %v3321_v31 = vadd.f32 %v3313_v21, %v3301_v26  ;;  %v3025_v62 = vadd.f32 %v3017_v36, %v3005_v46  ;;  %v3192_v53 = vadd.f32 %v3184_v0, %v3172_v56 }
 0x2c1   : > { %2873 = vmax.xlane.f32.xlu0 %v2858_v16 }
 0x2c2   : > { %v2490_v35 = vpop.xlane.xlu0 %2489  ;;  %v3045_v3 = vadd.f32 %v3037_v5, %v3025_v62  ;;  %v3212_v39 = vadd.f32 %v3204_v25, %v3192_v53 }
 0x2c3   : > { %3149 = vmax.xlane.f32.xlu1 %v3134_v14 }
 0x2c4   : > { %v2500_v60 = vpop.xlane.xlu1 %2499  ;;  %v3232_v52 = vadd.f32 %v3224_v2, %v3212_v39 }
 0x2c5   : > { %3245 = vmax.xlane.f32.xlu0 %v3231_v24 }
 0x2c6   : > { %v2494_v61 = vpop.xlane.xlu0 %2493 }
 0x2c7   : > { %3336 = vmax.xlane.f32.xlu1 %v3321_v31 }
 0x2c8   : > { %v2577_v11 = vpop.xlane.xlu1 %2576 }
 0x2c9   : > { %v2591_v30 = vmax.f32 %v7809_v54, %v2577_v11  ;;  %3060 = vmax.xlane.f32.xlu0 %v3045_v3 }
 0x2ca   : > { %v2498_v4 = vpop.xlane.xlu0 %2497 }
 0x2cb   : > { %v7874_v58 = vsel %vm3436_vm10, %v8957_v42, %v2591_v30 }
 0x2cc   : > { %v2581_v49 = vpop.xlane.xlu1 %2580 }
 0x2cd   : > { %v2593_v12 = vmax.f32 %v2492_v32, %v2581_v49  ;;  %3247 = vmax.xlane.f32.xlu0 %v3232_v52 }
 0x2ce   : > { %v2575_v54 = vpop.xlane.xlu0 %2574 }
 0x2cf   : > { %v3440_v1 = vsel %vm3436_vm10, %v7759_v33, %v2593_v12  ;;  %v2590_v44 = vmax.f32 %v2486_v45, %v2575_v54 }
 0x2d0   : > { %v2585_v38 = vpop.xlane.xlu1 %2584 }
 0x2d1   : > { %v2595_v28 = vmax.f32 %v2496_v6, %v2585_v38  ;;  %v3437_v48 = vsel %vm3436_vm10, %v7779_v29, %v2590_v44 }
 0x2d2   : > { %v2579_v59 = vpop.xlane.xlu0 %2578 }
 0x2d3   : > { %v7882_v17 = vsel %vm3436_vm10, %v7783_v51, %v2595_v28  ;;  %v2592_v32 = vmax.f32 %v2490_v35, %v2579_v59 }
 0x2d4   : > { %v2589_v15 = vpop.xlane.xlu1 %2588 }
 0x2d5   : > { %v2597_v19 = vmax.f32 %v2500_v60, %v2589_v15  ;;  %v7886_v33 = vsel %vm3436_vm10, %v7803_v50, %v2592_v32 }
 0x2d6   : > { %v2583_v7 = vpop.xlane.xlu0 %2582 }
 0x2d7   : > { %v7890_v47 = vsel %vm3436_vm10, %v7807_v57, %v2597_v19  ;;  %v2594_v37 = vmax.f32 %v2494_v61, %v2583_v7 }
 0x2d8   : > { %v2675_v29 = vpop.xlane.xlu1 %2674 }
 0x2d9   : > { %v7894_v51 = vsel %vm3436_vm10, %v7828_v18, %v2594_v37  ;;  %v3719_v18 = vmov -inf  }
 0x2da   : > { %v2587_v55 = vpop.xlane.xlu0 %2586  ;;  %209 = vst.msk [vmem:[%s7909_s17] sm:$0xff] %vm208_vm11, %v3719_v18  ;;  %210 = vst.msk [vmem:[%s7909_s17 + $0x8] sm:$0xff] %vm208_vm11, %v3719_v18 }
 0x2db   : > { %v2596_v40 = vmax.f32 %v2498_v4, %v2587_v55 }
 0x2dc   : > { %v2679_v10 = vpop.xlane.xlu1 %2678 }
 0x2dd   : > { %v7898_v34 = vsel %vm3436_vm10, %v7847_v22, %v2596_v40 }
 0x2de   : > { %v2673_v50 = vpop.xlane.xlu0 %2672 }
 0x2e0   : > { %v7900_v23 = vpop.xlane.xlu1 %2682 }
 0x2e2   : > { %v2677_v57 = vpop.xlane.xlu0 %2676 }
 0x2e4   : > { %v7904_v9 = vpop.xlane.xlu1 %2686 }
 0x2e6   : > { %v7915_v22 = vpop.xlane.xlu0 %2680 }
 0x2e8   : > { %v2764_v45 = vpop.xlane.xlu1 %2763 }
 0x2e9   : > { %v2778_v3 = vmax.f32 %v2675_v29, %v2764_v45 }
 0x2ea   : > { %v7917_v6 = vpop.xlane.xlu0 %2684 }
 0x2eb   : > { %v3447_v4 = vsel %vm3445_vm12, %v7874_v58, %v2778_v3 }
 0x2ec   : > { %v2768_v16 = vpop.xlane.xlu1 %2767 }
 0x2ed   : > { %v2780_v27 = vmax.f32 %v2679_v10, %v2768_v16 }
 0x2ee   : > { %v2762_v43 = vpop.xlane.xlu0 %2761 }
 0x2ef   : > { %v7920_v13 = vsel %vm3445_vm12, %v3440_v1, %v2780_v27  ;;  %v2777_v36 = vmax.f32 %v2673_v50, %v2762_v43 }
 0x2f0   : > { %v2949_v14 = vpop.xlane.xlu1 %2948 }
 0x2f1   : > { %v3446_v31 = vsel %vm3445_vm12, %v3437_v48, %v2777_v36 }
 0x2f2   : > { %v2766_v63 = vpop.xlane.xlu0 %2765 }
 0x2f3   : > { %v2779_v48 = vmax.f32 %v2677_v57, %v2766_v63 }
 0x2f4   : > { %v3136_v21 = vpop.xlane.xlu1 %3135 }
 0x2f5   : > { %v3448_v58 = vsel %vm3445_vm12, %v7886_v33, %v2779_v48 }
 0x2f6   : > { %v2860_v8 = vpop.xlane.xlu0 %2859 }
 0x2f7   : > { %v2964_v5 = vmax.f32 %v2860_v8, %v2949_v14 }
 0x2f8   : > { %v2951_v41 = vpop.xlane.xlu1 %2950 }
 0x2f9   : > { %v3455_v62 = vsel %vm3454_vm13, %v3446_v31, %v2964_v5 }
 0x2fa   : > { %v3047_v20 = vpop.xlane.xlu0 %3046 }
 0x2fb   : > { %v3151_v24 = vmax.f32 %v3047_v20, %v3136_v21 }
 0x2fc   : > { %v3323_v26 = vpop.xlane.xlu1 %3322 }
 0x2fd   : > { %v3464_v25 = vsel %vm3463_vm14, %v3455_v62, %v3151_v24 }
 0x2fe   : > { %v2862_v35 = vpop.xlane.xlu0 %2861 }
 0x2ff   : > { %v2965_v42 = vmax.f32 %v2862_v35, %v2951_v41 }
 0x300   : > { %v3138_v60 = vpop.xlane.xlu1 %3137 }
 0x301   : > { %v3456_v52 = vsel %vm3454_vm13, %v3447_v4, %v2965_v42 }
 0x302   : > { %v3234_v46 = vpop.xlane.xlu0 %3233 }
 0x303   : > { %v3338_v56 = vmax.f32 %v3234_v46, %v3323_v26 }
 0x304   : > { %v2953_v0 = vpop.xlane.xlu1 %2952 }
 0x305   : > { %v3473_v61 = vsel %vm3472_vm15, %v3464_v25, %v3338_v56 }
 0x306   : > { %v3049_v11 = vpop.xlane.xlu0 %3048  ;;  %3481 = vxpose.xlu0.b32.start [1/8] (short) (narrow) %v3473_v61, 16 }
 0x307   : > { %v3152_v39 = vmax.f32 %v3049_v11, %v3138_v60 }
 0x308   : > { %v3325_v30 = vpop.xlane.xlu1 %3324 }
 0x309   : > { %v3465_v54 = vsel %vm3463_vm14, %v3456_v52, %v3152_v39 }
 0x30a   : > { %v2864_v53 = vpop.xlane.xlu0 %2863 }
 0x30b   : > { %v2966_v32 = vmax.f32 %v2864_v53, %v2953_v0 }
 0x30c   : > { %v3140_v2 = vpop.xlane.xlu1 %3139 }
 0x30d   : > { %v3457_v37 = vsel %vm3454_vm13, %v3448_v58, %v2966_v32 }
 0x30e   : > { %v3236_v49 = vpop.xlane.xlu0 %3235 }
 0x30f   : > { %v3339_v1 = vmax.f32 %v3236_v49, %v3325_v30 }
 0x310   : > { %v2955_v12 = vpop.xlane.xlu1 %2954 }
 0x311   : > { %v3474_v38 = vsel %vm3472_vm15, %v3465_v54, %v3339_v1 }
 0x312   : > { %v3051_v44 = vpop.xlane.xlu0 %3050  ;;  %3482 = vxpose.xlu0.b32.cont [2/8] (short) (narrow) %v3474_v38, 16 }
 0x313   : > { %v3153_v19 = vmax.f32 %v3051_v44, %v3140_v2 }
 0x314   : > { %v3327_v28 = vpop.xlane.xlu1 %3326 }
 0x315   : > { %v3466_v10 = vsel %vm3463_vm14, %v3457_v37, %v3153_v19 }
 0x316   : > { %v2866_v59 = vpop.xlane.xlu0 %2865 }
 0x317   : > { %v2967_v14 = vmax.f32 %v2866_v59, %v2955_v12 }
 0x318   : > { %v3053_v15 = vpop.xlane.xlu1 %3052 }
 0x319   : > { %v3458_v41 = vsel %vm3454_vm13, %v7920_v13, %v2967_v14  ;;  %v3514_v14 = vld [vmem:[%s7909_s17 + $0x8] sm:$0xff] }
 0x31a   : > { %v3238_v7 = vpop.xlane.xlu0 %3237 }
 0x31b   : > { %v3340_v55 = vmax.f32 %v3238_v7, %v3327_v28 }
 0x31c   : > { %v2868_v29 = vpop.xlane.xlu1 %2867 }
 0x31d   : > { %v3475_v40 = vsel %vm3472_vm15, %v3466_v10, %v3340_v55 }
 0x31e   : > { %v2770_v50 = vpop.xlane.xlu0 %2769  ;;  %3483 = vxpose.xlu0.b32.cont [3/8] (short) (narrow) %v3475_v40, 16 }
 0x31f   : > { %v2781_v57 = vmax.f32 %v7915_v22, %v2770_v50 }
 0x320   : > { %v3240_v18 = vpop.xlane.xlu1 %3239 }
 0x321   : > { %v3450_v45 = vsel %vm3445_vm12, %v7894_v51, %v2781_v57 }
 0x322   : > { %v3142_v16 = vpop.xlane.xlu0 %3141 }
 0x323   : > { %v3154_v63 = vmax.f32 %v3053_v15, %v3142_v16 }
 0x324   : > { %v2772_v27 = vpop.xlane.xlu1 %2771 }
 0x325   : > { %v3467_v26 = vsel %vm3463_vm14, %v3458_v41, %v3154_v63  ;;  %v2782_v3 = vmax.f32 %v7900_v23, %v2772_v27  ;;  %v3513_v27 = vld [vmem:[%s7909_s17] sm:$0xff] }
 0x326   : > { %v2957_v33 = vpop.xlane.xlu0 %2956 }
 0x327   : > { %v2968_v5 = vmax.f32 %v2868_v29, %v2957_v33  ;;  %v3451_v4 = vsel %vm3445_vm12, %v7882_v17, %v2782_v3 }
 0x328   : > { %v3144_v43 = vpop.xlane.xlu1 %3143 }
 0x329   : > { %v3459_v0 = vsel %vm3454_vm13, %v3450_v45, %v2968_v5 }
 0x32a   : > { %v3329_v21 = vpop.xlane.xlu0 %3328 }
 0x32b   : > { %v3341_v20 = vmax.f32 %v3240_v18, %v3329_v21  ;;  %v3647_v21 = vld [vmem:[%s7990_s2] ss:$0 sm:$0xff] }
 0x32c   : > { %v2959_v8 = vpop.xlane.xlu1 %2958 }
 0x32d   : > { %v3476_v36 = vsel %vm3472_vm15, %v3467_v26, %v3341_v20 }
 0x32e   : > { %v3055_v22 = vpop.xlane.xlu0 %3054  ;;  %3484 = vxpose.xlu0.b32.cont [4/8] (short) (narrow) %v3476_v36, 16 }
 0x32f   : > { %v3155_v24 = vmax.f32 %v3055_v22, %v3144_v43 }
 0x330   : > { %v3331_v35 = vpop.xlane.xlu1 %3330 }
 0x331   : > { %v3468_v56 = vsel %vm3463_vm14, %v3459_v0, %v3155_v24 }
 0x332   : > { %v2870_v51 = vpop.xlane.xlu0 %2869 }
 0x333   : > { %v2969_v42 = vmax.f32 %v2870_v51, %v2959_v8 }
 0x334   : > { %v3057_v60 = vpop.xlane.xlu1 %3056 }
 0x335   : > { %v3460_v12 = vsel %vm3454_vm13, %v3451_v4, %v2969_v42 }
 0x336   : > { %v3242_v31 = vpop.xlane.xlu0 %3241 }
 0x337   : > { %v3342_v62 = vmax.f32 %v3242_v31, %v3331_v35 }
 0x338   : > { %v2872_v46 = vpop.xlane.xlu1 %2871 }
 0x339   : > { %v3477_v13 = vsel %vm3472_vm15, %v3468_v56, %v3342_v62 }
 0x33a   : > { %v2774_v25 = vpop.xlane.xlu0 %2773  ;;  %3485 = vxpose.xlu0.b32.cont [5/8] (short) (narrow) %v3477_v13, 16 }
 0x33b   : > { %v2783_v23 = vmax.f32 %v7917_v6, %v2774_v25 }
 0x33c   : > { %v3244_v61 = vpop.xlane.xlu1 %3243 }
 0x33d   : > { %v3452_v17 = vsel %vm3445_vm12, %v7898_v34, %v2783_v23 }
 0x33e   : > { %v3146_v11 = vpop.xlane.xlu0 %3145 }
 0x33f   : > { %v3156_v39 = vmax.f32 %v3057_v60, %v3146_v11 }
 0x340   : > { %v2776_v30 = vpop.xlane.xlu1 %2775 }
 0x341   : > { %v3469_v1 = vsel %vm3463_vm14, %v3460_v12, %v3156_v39  ;;  %v2784_v55 = vmax.f32 %v7904_v9, %v2776_v30 }
 0x342   : > { %v2961_v53 = vpop.xlane.xlu0 %2960 }
 0x343   : > { %v2970_v59 = vmax.f32 %v2872_v46, %v2961_v53  ;;  %v3453_v34 = vsel %vm3445_vm12, %v7890_v47, %v2784_v55 }
 0x344   : > { %v3148_v2 = vpop.xlane.xlu1 %3147 }
 0x345   : > { %v3461_v19 = vsel %vm3454_vm13, %v3452_v17, %v2970_v59 }
 0x346   : > { %v3333_v49 = vpop.xlane.xlu0 %3332 }
 0x347   : > { %v3343_v52 = vmax.f32 %v3244_v61, %v3333_v49 }
 0x348   : > { %v2963_v54 = vpop.xlane.xlu1 %2962 }
 0x349   : > { %v3478_v38 = vsel %vm3472_vm15, %v3469_v1, %v3343_v52 }
 0x34a   : > { %v3059_v44 = vpop.xlane.xlu0 %3058  ;;  %3486 = vxpose.xlu0.b32.cont [6/8] (short) (narrow) %v3478_v38, 16 }
 0x34b   : > { %v3157_v15 = vmax.f32 %v3059_v44, %v3148_v2 }
 0x34c   : > { %v3335_v28 = vpop.xlane.xlu1 %3334 }
 0x34d   : > { %v3470_v7 = vsel %vm3463_vm14, %v3461_v19, %v3157_v15 }
 0x34e   : > { %v2874_v48 = vpop.xlane.xlu0 %2873 }
 0x34f   : > { %v2971_v10 = vmax.f32 %v2874_v48, %v2963_v54 }
 0x350   : > { %v3150_v29 = vpop.xlane.xlu1 %3149 }
 0x351   : > { %v3462_v57 = vsel %vm3454_vm13, %v3453_v34, %v2971_v10 }
 0x352   : > { %v3246_v32 = vpop.xlane.xlu0 %3245 }
 0x353   : > { %v3344_v58 = vmax.f32 %v3246_v32, %v3335_v28 }
 0x354   : > { %v3337_v50 = vpop.xlane.xlu1 %3336 }
 0x355   : > { %v3479_v37 = vsel %vm3472_vm15, %v3470_v7, %v3344_v58 }
 0x356   : > { %v3061_v6 = vpop.xlane.xlu0 %3060  ;;  %3487 = vxpose.xlu0.b32.cont [7/8] (short) (narrow) %v3479_v37, 16 }
 0x357   : > { %v3158_v40 = vmax.f32 %v3061_v6, %v3150_v29 }
 0x359   : > { %v3471_v16 = vsel %vm3463_vm14, %v3462_v57, %v3158_v40 }
 0x35a   : > { %v3248_v18 = vpop.xlane.xlu0 %3247 }
 0x35b   : > { %v3345_v45 = vmax.f32 %v3248_v18, %v3337_v50 }
 0x35d   : > { %v3480_v9 = vsel %vm3472_vm15, %v3471_v16, %v3345_v45 }
 0x35e   : > { %3488 = vxpose.xlu0.b32.end [8/8] (short) (narrow) %v3480_v9, 16 }
 0x3c2   : > { %v3497_v33 = vpop.trf.xlu0 }
 0x3c3   : > { %v3515_v43 = vmax.f32 %v3513_v27, %v3497_v33 }
 0x3c5   : > { %3518 = vst.msk [vmem:[%s7909_s17] sm:$0xff] %vm208_vm11, %v3515_v43 }
 0x3c6   : > { %v3498_v47 = vpop.trf.xlu0 }
 0x3c7   : > { %v3516_v63 = vmax.f32 %v3514_v14, %v3498_v47 }
 0x3c9   : > { %3519 = vst.msk [vmem:[%s7909_s17 + $0x8] sm:$0xff] %vm208_vm11, %v3516_v63 }
 0x3cc   : > { %v3523_v8 = vld [vmem:[%s7909_s17] sm:$0xff] }
 0x3cd   : > { %v3532_v41 = vadd.f32 %v3647_v21, %v3523_v8 }
 0x3cf   : > { %v3534_v20 = vmax.f32 %v3532_v41, 0.0 }
 0x3d0   : > { %v3524_v26 = vld [vmem:[%s7909_s17 + $0x8] sm:$0xff] }
 0x3d1   : > { %3536 = vst.msk [vmem:[%s7909_s17] sm:$0xff] %vm208_vm11, %v3534_v20  ;;  %v3533_v36 = vadd.f32 %v3647_v21, %v3524_v26 }
 0x3d3   : > { %v3535_v22 = vmax.f32 %v3533_v36, 0.0 }
 0x3d5   : > { %3537 = vst.msk [vmem:[%s7909_s17 + $0x8] sm:$0xff] %vm208_vm11, %v3535_v22 }
 0x3d6 PF: > { %s13_s14 = sadd.s32 1, %s3713_s14   ;;  %s8958_s12 = smov %s3709_s13 }
 0x3d7   : > { %p10_p6 = scmp.ge.s32.totalorder %s13_s14, 4   ;;  %s8959_s13 = smov %s8961_s15 }
 0x3d9   :  { %12 = sbr.rel (!%p10_p6) target bundleno = 2 (0x2), region = 85 }

// kernel: model_forward.5
= control target key start
LH: loop header
LB: loop body
LE: loop exit
PB: predicated region body
PF: predicated region fallthrough
CT: control target
= control target key end

     0   :  { %vm23_vm0 = vcmask 523264   ;;  %s258_s1 = inlined_call_operand.vmem [shape: f32[64,128], index: 1, kind: input, shape index: {}]   ;;  %s259_s0 = inlined_call_operand.vmem [shape: f32[32,64], index: 0, kind: input, shape index: {}]   ;;  %s260_s2 = inlined_call_operand.vmem [shape: f32[32,128], index: 2, kind: output, shape index: {}]  }
   0x1   :  { %v15_v0 = vld [vmem:[%s258_s1] sm:$0xff]  ;;  %v16_v1 = vld [vmem:[%s258_s1 + $0x8] sm:$0xff]  ;;  %v17_v2 = vld [vmem:[%s258_s1 + $0x10] sm:$0xff] }
   0x2   :  { %v167_v3 = vpack.c.bf16 %v16_v1, %v15_v0  ;;  %v18_v4 = vld [vmem:[%s258_s1 + $0x18] sm:$0xff]  ;;  %v19_v6 = vld [vmem:[%s258_s1 + $0x20] sm:$0xff]  ;;  %v20_v7 = vld [vmem:[%s258_s1 + $0x28] sm:$0xff] }
   0x3   :  { %v171_v5 = vpack.c.bf16 %v18_v4, %v17_v2  ;;  %v11_v8 = vld [vmem:[%s259_s0] sm:$0xff]  ;;  %v13_v9 = vld [vmem:[%s259_s0 + $0x10] sm:$0xff]  ;;  %v175_v10 = vpack.c.bf16 %v20_v7, %v19_v6  ;;  %v22_v12 = vld [vmem:[%s258_s1 + $0x38] sm:$0xff] }
   0x4   :  { %168 = vmatprep.subr.bf16.mxu0 %v167_v3  ;;  %183 = vmatprep.subr.bf16.mxu1 %v167_v3  ;;  %v21_v11 = vld [vmem:[%s258_s1 + $0x30] sm:$0xff]  ;;  %v12_v14 = vld [vmem:[%s259_s0 + $0x8] sm:$0xff]  ;;  %v14_v15 = vld [vmem:[%s259_s0 + $0x18] sm:$0xff] }
   0x5   :  { %170 = vmatpush3.bf16.msra.mxu0 %v167_v3  ;;  %187 = vmatpush3.bf16.msra.mxu1 %v167_v3  ;;  %v179_v13 = vpack.c.bf16 %v22_v12, %v21_v11 }
   0x6   :  { %172 = vmatprep.subr.bf16.mxu0 %v171_v5  ;;  %184 = vmatprep.subr.bf16.mxu1 %v171_v5 }
   0x7   :  { %161 = vmatprep.mubr.msk.f32.mxu0 %vm23_vm0, %v11_v8  ;;  %164 = vmatprep.mubr.msk.f32.mxu1 %vm23_vm0, %v13_v9 }
   0x9   :  { %174 = vmatpush3.bf16.msra.mxu0 %v171_v5  ;;  %188 = vmatpush3.bf16.msra.mxu1 %v171_v5 }
   0xa   :  { %176 = vmatprep.subr.bf16.mxu0 %v175_v10  ;;  %185 = vmatprep.subr.bf16.mxu1 %v175_v10 }
   0xd   :  { %178 = vmatpush3.bf16.msra.mxu0 %v175_v10  ;;  %189 = vmatpush3.bf16.msra.mxu1 %v175_v10 }
   0xe   :  { %180 = vmatprep.subr.bf16.mxu0 %v179_v13  ;;  %186 = vmatprep.subr.bf16.mxu1 %v179_v13 }
  0x11   :  { %182 = vmatpush3.bf16.msra.mxu0 %v179_v13  ;;  %190 = vmatpush3.bf16.msra.mxu1 %v179_v13 }
  0x14   :  { %162 = vmatmul.mubr.msk.f32.vlgmr.msra.gmra.mrb[0].mxu0 %vm23_vm0, %v12_v14  ;;  %165 = vmatmul.mubr.msk.f32.vlgmr.msra.gmra.mrb[0].mxu1 %vm23_vm0, %v14_v15 }
  0xe7   :  { %v163_v16 = vpop.f32.mrb[0].mxu0  ;;  %v166_v17 = vpop.f32.mrb[0].mxu1 }
  0xe8   :  { %122 = vst [vmem:[%s260_s2 + $0x8] sm:$0xff] %v163_v16  ;;  %124 = vst [vmem:[%s260_s2 + $0x18] sm:$0xff] %v166_v17  ;;  %v102_v18 = vpop.f32.mrb[1].mxu0  ;;  %v112_v19 = vpop.f32.mrb[1].mxu1 }
  0xe9   :  { %121 = vst [vmem:[%s260_s2] sm:$0xff] %v102_v18  ;;  %123 = vst [vmem:[%s260_s2 + $0x10] sm:$0xff] %v112_v19 }

</bundles_post_ra>
